<compile_context>
chip_gen: v6e
topology: v6e:2x2x1
jax: 0.10.0
libtpu: 0.0.40
codegen_flags: <defaults>
</compile_context>

<pallas_src>
import functools

import jax
import jax.numpy as jnp
from jax import lax
from jax.experimental import pallas as pl
from jax.experimental.pallas import tpu as pltpu

BN_EPS = 1e-3

# shift order s = 2*dy + dx; must match _build_shift_weights() and the pool
# corner phase mapping (phase = 3 - s).
_SHIFTS = ((0, 0), (0, 1), (1, 0), (1, 1))


# ----------------------------------------------------------------------------
# Pallas kernel: one (batch, row-tile) step of fused conv+pool+BN+ReLU.
# ----------------------------------------------------------------------------
def _downsampler_kernel(za_ref, zb_ref, w_ref, scale_ref, shift_ref, out_ref,
                        *, TH, Wo, Cin, Cconv):
    """
    za_ref:    (1, TH, Wo+1, 4*Cin)   bf16  z rows [t*TH, t*TH+TH)
    zb_ref:    (1, 1,  Wo+1, 4*Cin)   bf16  halo row t*TH+TH of z
    w_ref:     (4, 4*Cin, Cconv)      bf16  per-shift weights (BN scale folded)
    scale_ref: (1, Cconv+Cin)         f32   [ones | BN scale for pooled chans]
    shift_ref: (1, Cconv+Cin)         f32   [conv bias folded w/ BN shift | BN shift]
    out_ref:   (1, TH, Wo, Cconv+Cin) bf16  fused [conv | pool] output tile
    """
    K = 4 * Cin
    M = TH * Wo

    z_hi = za_ref[0]                                             # window rows 0..TH-1
    z_lo = jnp.concatenate([za_ref[0, 1:], zb_ref[0]], axis=0)   # window rows 1..TH

    acc = jnp.zeros((M, Cconv), jnp.float32)
    pooled = None
    for s, (dy, dx) in enumerate(_SHIFTS):
        win = (z_lo if dy else z_hi)[:, dx:dx + Wo, :]           # (TH, Wo, K)
        # conv half: K = 4*Cin matmul per shift, f32 accumulation on the MXU.
        acc = acc + jnp.dot(win.reshape(M, K), w_ref[s],
                            preferred_element_type=jnp.float32)
        # pool half: this shift's pool corner is channel phase 3-s of the window.
        p = 3 - s
        corner = win[:, :, p * Cin:(p + 1) * Cin]                # (TH, Wo, Cin)
        pooled = corner if pooled is None else jnp.maximum(pooled, corner)

    pooled = pooled.astype(jnp.float32).reshape(M, Cin)
    pre = jnp.concatenate([acc, pooled], axis=-1)                # (M, 128) f32
    y = jnp.maximum(pre * scale_ref[...] + shift_ref[...], 0.0)  # fused BN+bias+ReLU
    out_ref[...] = y.reshape(1, TH, Wo, Cconv + Cin).astype(out_ref.dtype)


# ----------------------------------------------------------------------------
# Host-side weight scatter: fold BN scale and rearrange the 3x3 stride-2 kernel
# into 4 per-shift [4*Cin, Cconv] matrices matching the space-to-depth layout.
# ----------------------------------------------------------------------------
def _build_shift_weights(conv_w, scale_c):
    """conv_w: [Cconv, Cin, 3, 3] (PyTorch OIHW), scale_c: [Cconv]."""
    Cconv, Cin = conv_w.shape[:2]
    w = conv_w * scale_c[:, None, None, None]                    # fold BN scale
    w = jnp.pad(w, ((0, 0), (0, 0), (0, 1), (0, 1)))             # [Cc, Ci, 4, 4]
    w = w.reshape(Cconv, Cin, 2, 2, 2, 2)                        # [o,ci,dy,a,dx,b]
    w = jnp.transpose(w, (2, 4, 3, 5, 1, 0))                     # [dy,dx,a,b,ci,o]
    return w.reshape(4, 4 * Cin, Cconv).astype(jnp.bfloat16)


# ----------------------------------------------------------------------------
# DownsamplerBlock forward (Pallas path). x_nchw: [N, Cin, H, W] float32.
# ----------------------------------------------------------------------------
def downsampler_forward(x_nchw, params):
    N, Cin, H, W = x_nchw.shape
    Cconv = params['conv_w'].shape[0]
    Cout = Cconv + Cin
    assert H % 2 == 0 and W % 2 == 0, (H, W)
    Ho, Wo = H // 2, W // 2
    assert Wo % 16 == 0, Wo   # keep in-kernel reshapes bf16 tile-aligned

    # Row-tile size: ~16 output rows per grid step.
    TH = 16 if Ho % 16 == 0 else (8 if Ho % 8 == 0 else Ho)
    nT = Ho // TH

    # Fold BatchNorm (inference mode) into weights / per-channel affine.
    bn = params['bn']
    scale = bn['gamma'] / jnp.sqrt(bn['var'] + BN_EPS)
    shift = bn['beta'] - bn['mean'] * scale
    sc_c, sc_p = scale[:Cconv], scale[Cconv:]
    sh_c, sh_p = shift[:Cconv], shift[Cconv:]

    w4 = _build_shift_weights(params['conv_w'], sc_c)
    bconv = params['conv_b'] * sc_c + sh_c
    scale128 = jnp.concatenate(
        [jnp.ones((Cconv,), jnp.float32), sc_p]).reshape(1, Cout).astype(jnp.float32)
    shift128 = jnp.concatenate([bconv, sh_p]).reshape(1, Cout).astype(jnp.float32)

    # Pad in NCHW and fold cast + NHWC + space-to-depth into ONE transpose:
    #   z[n, r, c, (2a+b)*Cin + ci] = xpad[n, ci, 2r+a, 2c+b]
    xpad = jnp.pad(x_nchw.astype(jnp.bfloat16),
                   ((0, 0), (0, 0), (1, 1), (1, 1)))
    z = xpad.reshape(N, Cin, Ho + 1, 2, Wo + 1, 2)
    z = jnp.transpose(z, (0, 2, 4, 3, 5, 1)).reshape(N, Ho + 1, Wo + 1, 4 * Cin)

    kernel = functools.partial(_downsampler_kernel, TH=TH, Wo=Wo,
                               Cin=Cin, Cconv=Cconv)

    # Scoped-VMEM sized to the tile (double-buffered blocks + weights + slack).
    za_bytes = TH * (Wo + 1) * 4 * Cin * 2
    zb_bytes = (Wo + 1) * 4 * Cin * 2
    out_bytes = TH * Wo * Cout * 2
    need = 2 * (za_bytes + zb_bytes + out_bytes) + w4.size * 2 + (2 << 20)
    vmem_limit = int(min(max(need, 32 << 20), 60 << 20))

    y = pl.pallas_call(
        kernel,
        out_shape=jax.ShapeDtypeStruct((N, Ho, Wo, Cout), jnp.bfloat16),
        grid=(N, nT),
        in_specs=[
            # main z row tile
            pl.BlockSpec((1, TH, Wo + 1, 4 * Cin), lambda n, t: (n, t, 0, 0)),
            # 1-row halo (same array, 1-row blocks -> element-granular row index)
            pl.BlockSpec((1, 1, Wo + 1, 4 * Cin),
                         lambda n, t: (n, (t + 1) * TH, 0, 0)),
            pl.BlockSpec((4, 4 * Cin, Cconv), lambda n, t: (0, 0, 0)),
            pl.BlockSpec((1, Cout), lambda n, t: (0, 0)),
            pl.BlockSpec((1, Cout), lambda n, t: (0, 0)),
        ],
        out_specs=pl.BlockSpec((1, TH, Wo, Cout), lambda n, t: (n, t, 0, 0)),
        compiler_params=pltpu.CompilerParams(
            dimension_semantics=("parallel", "parallel"),
            vmem_limit_bytes=vmem_limit),
    )(z, z, w4, scale128, shift128)

    # Consumers that accept NHWC bf16 can use `y` directly; restore the module's
    # NCHW float32 layout with a single fused transpose+cast.
    return jnp.transpose(y, (0, 3, 1, 2)).astype(jnp.float32)


# ----------------------------------------------------------------------------
# Deterministic synthetic parameters
# ----------------------------------------------------------------------------
def init_params(key, ninput, noutput):
    k = jax.random.split(key, 6)
    cconv = noutput - ninput
    fan_in = ninput * 9
    return dict(
        conv_w=jax.random.normal(k[0], (cconv, ninput, 3, 3), jnp.float32)
        / jnp.sqrt(fan_in),
        conv_b=0.1 * jax.random.normal(k[1], (cconv,), jnp.float32),
        bn=dict(
            gamma=1.0 + 0.1 * jax.random.normal(k[2], (noutput,), jnp.float32),
            beta=0.1 * jax.random.normal(k[3], (noutput,), jnp.float32),
            mean=0.1 * jax.random.normal(k[4], (noutput,), jnp.float32),
            var=1.0 + 0.1 * jax.random.uniform(k[5], (noutput,), jnp.float32),
        ))


# ----------------------------------------------------------------------------
# Pure-JAX reference (validation only)
# ----------------------------------------------------------------------------
def ref_downsampler(x_nchw, params):
    x = jnp.transpose(x_nchw, (0, 2, 3, 1))
    w_hwio = jnp.transpose(params['conv_w'], (2, 3, 1, 0))
    conv = lax.conv_general_dilated(
        x, w_hwio, window_strides=(2, 2), padding=((1, 1), (1, 1)),
        dimension_numbers=('NHWC', 'HWIO', 'NHWC'),
        precision=lax.Precision.HIGHEST) + params['conv_b']
    pool = lax.reduce_window(x, -jnp.inf, lax.max,
                             (1, 2, 2, 1), (1, 2, 2, 1), 'VALID')
    y = jnp.concatenate([conv, pool], axis=-1)
    bn = params['bn']
    y = (y - bn['mean']) / jnp.sqrt(bn['var'] + BN_EPS) * bn['gamma'] + bn['beta']
    y = jnp.maximum(y, 0.0)
    return jnp.transpose(y, (0, 3, 1, 2))


if __name__ == "__main__":
    # ERFNet's DownsamplerBlock(64, 128) at a small spatial size.
    N, CIN, NOUT, H, W = 2, 64, 128, 64, 64
    key = jax.random.PRNGKey(0)
    kp, kx = jax.random.split(key)
    params = init_params(kp, CIN, NOUT)
    x = jax.random.normal(kx, (N, CIN, H, W), jnp.float32)

    fwd = jax.jit(downsampler_forward)
    out = jax.block_until_ready(fwd(x, params))
    assert out.shape == (N, NOUT, H // 2, W // 2), out.shape

    ref = jax.block_until_ready(jax.jit(ref_downsampler)(x, params))
    max_err = float(jnp.max(jnp.abs(out - ref)))
    assert jnp.allclose(out, ref, atol=5e-2, rtol=5e-2), max_err

    print("KERNEL_OK")
</pallas_src>

<mosaic_0001>
module attributes {stable_mosaic.version = 11 : i64} {
  func.func @_downsampler_kernel(%arg0: i32, %arg1: i32, %arg2: memref<1x16x33x256xbf16, #tpu.memory_space<vmem>>, %arg3: memref<1x1x33x256xbf16, #tpu.memory_space<vmem>>, %arg4: memref<4x256x64xbf16, #tpu.memory_space<vmem>>, %arg5: memref<1x128xf32, #tpu.memory_space<vmem>>, %arg6: memref<1x128xf32, #tpu.memory_space<vmem>>, %arg7: memref<1x16x32x128xbf16, #tpu.memory_space<vmem>>) attributes {dimension_semantics = [#tpu.dimension_semantics<parallel>, #tpu.dimension_semantics<parallel>], iteration_bounds = array<i64: 2, 2>, scalar_prefetch = 0 : i64, scratch_operands = 0 : i64, tpu.core_type = #tpu.core_type<tc>, window_params = [{transform_indices = @transform_0, window_bounds = array<i64: 1, 16, 33, 256>}, {transform_indices = @transform_1, window_bounds = array<i64: 1, 1, 33, 256>}, {pipeline_mode = #tpu.pipeline_mode<synchronous>, transform_indices = @transform_2, window_bounds = array<i64: 4, 256, 64>}, {pipeline_mode = #tpu.pipeline_mode<synchronous>, transform_indices = @transform_3, window_bounds = array<i64: 1, 128>}, {pipeline_mode = #tpu.pipeline_mode<synchronous>, transform_indices = @transform_4, window_bounds = array<i64: 1, 128>}, {transform_indices = @transform_5, window_bounds = array<i64: 1, 16, 32, 128>}]} {
    %c0 = arith.constant 0 : index
    %c0_0 = arith.constant 0 : index
    %c0_1 = arith.constant 0 : index
    %c0_2 = arith.constant 0 : index
    %0 = vector.load %arg2[%c0, %c0_0, %c0_1, %c0_2] : memref<1x16x33x256xbf16, #tpu.memory_space<vmem>>, vector<1x16x33x256xbf16>
    %1 = vector.shape_cast %0 : vector<1x16x33x256xbf16> to vector<16x33x256xbf16>
    %c0_3 = arith.constant 0 : index
    %c1 = arith.constant 1 : index
    %c0_4 = arith.constant 0 : index
    %c0_5 = arith.constant 0 : index
    %2 = vector.load %arg2[%c0_3, %c1, %c0_4, %c0_5] : memref<1x16x33x256xbf16, #tpu.memory_space<vmem>>, vector<1x15x33x256xbf16>
    %3 = vector.shape_cast %2 : vector<1x15x33x256xbf16> to vector<15x33x256xbf16>
    %c0_6 = arith.constant 0 : index
    %c0_7 = arith.constant 0 : index
    %c0_8 = arith.constant 0 : index
    %c0_9 = arith.constant 0 : index
    %4 = vector.load %arg3[%c0_6, %c0_7, %c0_8, %c0_9] : memref<1x1x33x256xbf16, #tpu.memory_space<vmem>>, vector<1x1x33x256xbf16>
    %5 = vector.shape_cast %4 : vector<1x1x33x256xbf16> to vector<1x33x256xbf16>
    %6 = tpu.concatenate %3, %5 in 0 : vector<15x33x256xbf16>, vector<1x33x256xbf16> -> vector<16x33x256xbf16>
    %cst = arith.constant 0.000000e+00 : f32
    %7 = vector.broadcast %cst : f32 to vector<512x64xf32>
    %8 = vector.extract_strided_slice %1 {offsets = [0, 0, 0], sizes = [16, 32, 256], strides = [1, 1, 1]} : vector<16x33x256xbf16> to vector<16x32x256xbf16>
    %9 = vector.shape_cast %8 : vector<16x32x256xbf16> to vector<512x256xbf16>
    %c0_10 = arith.constant 0 : index
    %c0_11 = arith.constant 0 : index
    %c0_12 = arith.constant 0 : index
    %10 = vector.load %arg4[%c0_10, %c0_11, %c0_12] : memref<4x256x64xbf16, #tpu.memory_space<vmem>>, vector<1x256x64xbf16>
    %11 = vector.shape_cast %10 : vector<1x256x64xbf16> to vector<256x64xbf16>
    %cst_13 = arith.constant dense<0.000000e+00> : vector<512x64xf32>
    %12 = tpu.matmul %9, %11, %cst_13 {dimension_numbers = #tpu.dot_dimension_numbers<[1], [0], [0], [1], [0, 0, 1, 1], [], []>} : vector<512x256xbf16>, vector<256x64xbf16>, vector<512x64xf32> -> vector<512x64xf32>
    %13 = arith.addf %7, %12 : vector<512x64xf32>
    %14 = vector.extract_strided_slice %8 {offsets = [0, 0, 192], sizes = [16, 32, 64], strides = [1, 1, 1]} : vector<16x32x256xbf16> to vector<16x32x64xbf16>
    %15 = vector.extract_strided_slice %1 {offsets = [0, 1, 0], sizes = [16, 32, 256], strides = [1, 1, 1]} : vector<16x33x256xbf16> to vector<16x32x256xbf16>
    %16 = vector.shape_cast %15 : vector<16x32x256xbf16> to vector<512x256xbf16>
    %c1_14 = arith.constant 1 : index
    %c0_15 = arith.constant 0 : index
    %c0_16 = arith.constant 0 : index
    %17 = vector.load %arg4[%c1_14, %c0_15, %c0_16] : memref<4x256x64xbf16, #tpu.memory_space<vmem>>, vector<1x256x64xbf16>
    %18 = vector.shape_cast %17 : vector<1x256x64xbf16> to vector<256x64xbf16>
    %cst_17 = arith.constant dense<0.000000e+00> : vector<512x64xf32>
    %19 = tpu.matmul %16, %18, %cst_17 {dimension_numbers = #tpu.dot_dimension_numbers<[1], [0], [0], [1], [0, 0, 1, 1], [], []>} : vector<512x256xbf16>, vector<256x64xbf16>, vector<512x64xf32> -> vector<512x64xf32>
    %20 = arith.addf %13, %19 : vector<512x64xf32>
    %21 = vector.extract_strided_slice %15 {offsets = [0, 0, 128], sizes = [16, 32, 64], strides = [1, 1, 1]} : vector<16x32x256xbf16> to vector<16x32x64xbf16>
    %22 = arith.maximumf %14, %21 : vector<16x32x64xbf16>
    %23 = vector.extract_strided_slice %6 {offsets = [0, 0, 0], sizes = [16, 32, 256], strides = [1, 1, 1]} : vector<16x33x256xbf16> to vector<16x32x256xbf16>
    %24 = vector.shape_cast %23 : vector<16x32x256xbf16> to vector<512x256xbf16>
    %c2 = arith.constant 2 : index
    %c0_18 = arith.constant 0 : index
    %c0_19 = arith.constant 0 : index
    %25 = vector.load %arg4[%c2, %c0_18, %c0_19] : memref<4x256x64xbf16, #tpu.memory_space<vmem>>, vector<1x256x64xbf16>
    %26 = vector.shape_cast %25 : vector<1x256x64xbf16> to vector<256x64xbf16>
    %cst_20 = arith.constant dense<0.000000e+00> : vector<512x64xf32>
    %27 = tpu.matmul %24, %26, %cst_20 {dimension_numbers = #tpu.dot_dimension_numbers<[1], [0], [0], [1], [0, 0, 1, 1], [], []>} : vector<512x256xbf16>, vector<256x64xbf16>, vector<512x64xf32> -> vector<512x64xf32>
    %28 = arith.addf %20, %27 : vector<512x64xf32>
    %29 = vector.extract_strided_slice %23 {offsets = [0, 0, 64], sizes = [16, 32, 64], strides = [1, 1, 1]} : vector<16x32x256xbf16> to vector<16x32x64xbf16>
    %30 = arith.maximumf %22, %29 : vector<16x32x64xbf16>
    %31 = vector.extract_strided_slice %6 {offsets = [0, 1, 0], sizes = [16, 32, 256], strides = [1, 1, 1]} : vector<16x33x256xbf16> to vector<16x32x256xbf16>
    %32 = vector.shape_cast %31 : vector<16x32x256xbf16> to vector<512x256xbf16>
    %c3 = arith.constant 3 : index
    %c0_21 = arith.constant 0 : index
    %c0_22 = arith.constant 0 : index
    %33 = vector.load %arg4[%c3, %c0_21, %c0_22] : memref<4x256x64xbf16, #tpu.memory_space<vmem>>, vector<1x256x64xbf16>
    %34 = vector.shape_cast %33 : vector<1x256x64xbf16> to vector<256x64xbf16>
    %cst_23 = arith.constant dense<0.000000e+00> : vector<512x64xf32>
    %35 = tpu.matmul %32, %34, %cst_23 {dimension_numbers = #tpu.dot_dimension_numbers<[1], [0], [0], [1], [0, 0, 1, 1], [], []>} : vector<512x256xbf16>, vector<256x64xbf16>, vector<512x64xf32> -> vector<512x64xf32>
    %36 = arith.addf %28, %35 : vector<512x64xf32>
    %37 = vector.extract_strided_slice %31 {offsets = [0, 0, 0], sizes = [16, 32, 64], strides = [1, 1, 1]} : vector<16x32x256xbf16> to vector<16x32x64xbf16>
    %38 = arith.maximumf %30, %37 : vector<16x32x64xbf16>
    %39 = arith.extf %38 : vector<16x32x64xbf16> to vector<16x32x64xf32>
    %40 = vector.shape_cast %39 : vector<16x32x64xf32> to vector<512x64xf32>
    %41 = tpu.concatenate %36, %40 in 1 : vector<512x64xf32>, vector<512x64xf32> -> vector<512x128xf32>
    %c0_24 = arith.constant 0 : index
    %c0_25 = arith.constant 0 : index
    %42 = vector.load %arg5[%c0_24, %c0_25] : memref<1x128xf32, #tpu.memory_space<vmem>>, vector<1x128xf32>
    %43 = vector.broadcast %42 : vector<1x128xf32> to vector<512x128xf32>
    %44 = arith.mulf %41, %43 : vector<512x128xf32>
    %c0_26 = arith.constant 0 : index
    %c0_27 = arith.constant 0 : index
    %45 = vector.load %arg6[%c0_26, %c0_27] : memref<1x128xf32, #tpu.memory_space<vmem>>, vector<1x128xf32>
    %46 = vector.broadcast %45 : vector<1x128xf32> to vector<512x128xf32>
    %47 = arith.addf %44, %46 : vector<512x128xf32>
    %cst_28 = arith.constant 0.000000e+00 : f32
    %48 = vector.broadcast %cst_28 : f32 to vector<512x128xf32>
    %49 = arith.maximumf %47, %48 : vector<512x128xf32>
    %50 = vector.shape_cast %49 : vector<512x128xf32> to vector<1x16x32x128xf32>
    %51 = arith.truncf %50 : vector<1x16x32x128xf32> to vector<1x16x32x128xbf16>
    %c0_29 = arith.constant 0 : index
    %c0_30 = arith.constant 0 : index
    %c0_31 = arith.constant 0 : index
    %c0_32 = arith.constant 0 : index
    %52 = vector.load %arg7[%c0_29, %c0_30, %c0_31, %c0_32] : memref<1x16x32x128xbf16, #tpu.memory_space<vmem>>, vector<1x16x32x128xbf16>
    tpu.vector_store %arg7[%c0_29, %c0_30, %c0_31, %c0_32], %51 {strides = array<i32>} : memref<1x16x32x128xbf16, #tpu.memory_space<vmem>>, vector<1x16x32x128xbf16>,
    return
  }
  func.func @transform_0(%arg0: i32, %arg1: i32) -> (i32, i32, i32, i32) {
    %c0_i32 = arith.constant 0 : i32
    %c0_i32_0 = arith.constant 0 : i32
    %c0_i32_1 = arith.constant 0 : i32
    return %arg0, %arg1, %c0_i32, %c0_i32_0 : i32, i32, i32, i32
  }
  func.func @transform_1(%arg0: i32, %arg1: i32) -> (i32, i32, i32, i32) {
    %c1_i32 = arith.constant 1 : i32
    %0 = arith.addi %arg1, %c1_i32 : i32
    %c16_i32 = arith.constant 16 : i32
    %1 = arith.muli %0, %c16_i32 : i32
    %c0_i32 = arith.constant 0 : i32
    %c0_i32_0 = arith.constant 0 : i32
    %c0_i32_1 = arith.constant 0 : i32
    return %arg0, %1, %c0_i32, %c0_i32_0 : i32, i32, i32, i32
  }
  func.func @transform_2(%arg0: i32, %arg1: i32) -> (i32, i32, i32) {
    %c0_i32 = arith.constant 0 : i32
    %c0_i32_0 = arith.constant 0 : i32
    %c0_i32_1 = arith.constant 0 : i32
    %c0_i32_2 = arith.constant 0 : i32
    return %c0_i32, %c0_i32_0, %c0_i32_1 : i32, i32, i32
  }
  func.func @transform_3(%arg0: i32, %arg1: i32) -> (i32, i32) {
    %c0_i32 = arith.constant 0 : i32
    %c0_i32_0 = arith.constant 0 : i32
    %c0_i32_1 = arith.constant 0 : i32
    return %c0_i32, %c0_i32_0 : i32, i32
  }
  func.func @transform_4(%arg0: i32, %arg1: i32) -> (i32, i32) {
    %c0_i32 = arith.constant 0 : i32
    %c0_i32_0 = arith.constant 0 : i32
    %c0_i32_1 = arith.constant 0 : i32
    return %c0_i32, %c0_i32_0 : i32, i32
  }
  func.func @transform_5(%arg0: i32, %arg1: i32) -> (i32, i32, i32, i32) {
    %c0_i32 = arith.constant 0 : i32
    %c0_i32_0 = arith.constant 0 : i32
    %c0_i32_1 = arith.constant 0 : i32
    return %arg0, %arg1, %c0_i32, %c0_i32_0 : i32, i32, i32, i32
  }
}

</mosaic_0001>

<bundles_post_ra>
// kernel: downsampler_forward.1
= control target key start
LH: loop header
LB: loop body
LE: loop exit
PB: predicated region body
PF: predicated region fallthrough
CT: control target
= control target key end

     0   :  { %s8091_s18 = smov 0   ;;  %s8093_s19 = smov 0   ;;  %s12548_s0 = inlined_call_operand.vmem [shape: bf16[2,33,33,256], index: 0, kind: input, shape index: {}, may-alias: {0,1}]   ;;  %s12549_s1 = inlined_call_operand.vmem [shape: bf16[2,33,33,256], index: 1, kind: input, shape index: {}, may-alias: {0,1}]   ;;  %s12550_s2 = inlined_call_operand.vmem [shape: bf16[4,256,64], index: 2, kind: input, shape index: {}]   ;;  %s12551_s3 = inlined_call_operand.vmem [shape: f32[1,128], index: 3, kind: input, shape index: {}]   ;;  %s12552_s4 = inlined_call_operand.vmem [shape: f32[1,128], index: 4, kind: input, shape index: {}]   ;;  %s12553_s5 = inlined_call_operand.vmem [shape: bf16[2,32,32,128], index: 5, kind: output, shape index: {}]  }
   0x1   :  { %s8095_s20 = smov 0   ;;  %s8097_s21 = smov 0  }
   0x2   :  { %s8099_s22 = smov 0  }
   0x3 LB: > { %s24_s23 = sadd.s32 1, %s8049_s20  ;;  %s27_s24 = sadd.s32 1, %s8053_s21  ;;  %s8057_s22 = sphi %s8099_s22, %s15_s22   ;;  %s8053_s21 = sphi %s8097_s21, %s13883_s21   ;;  %s8049_s20 = sphi %s8095_s20, %s13882_s20   ;;  %s8045_s19 = sphi %s8093_s19, %s13881_s19   ;;  %s8041_s18 = sphi %s8091_s18, %s13880_s18  }
   0x4   : > { %p25_p0 = scmp.ge.s32.totalorder %s24_s23, 2  ;;  %p6740_p1 = scmp.ge.s32.totalorder %s8057_s22, 1 }
   0x5   : > { %p245_p2 = scmp.lt.s32.totalorder %s8057_s22, 5 }
   0x6   : > { %s13885_s23 = smov (%p25_p0, %s24_s23), 0  ;;  %s13887_s24 = smov (!%p25_p0, %s27_s24), %s8053_s21 }
   0x7   : > { %p246_p3 = pnand %p6740_p1, %p245_p2  ;;  %p29_p4 = scmp.ge.s32.totalorder %s13887_s24, 2 }
   0x9   : > { %s13889_s24 = smov (%p29_p4, %s13887_s24), 0  ;;  %249 = sbr.rel (%p246_p3) target bundleno = 831 (0x33f), region = 40 }
   0xe   : > { %v7774_v0 = vld [vmem:[%s12550_s2 + $0xb8] sm:$0xff]   ;;  %v12554_v1 = vmov 0   ;;  %v7776_v3 = vld [vmem:[%s12550_s2 + $0xb0] sm:$0xff]   ;;  %v7778_v5 = vld [vmem:[%s12550_s2 + $0xa8] sm:$0xff]   ;;  %s8150_s12 = sshll.u32 %s8041_s18, 4  ;;  %p307_p5 = scmp.lt.s32.totalorder %s8045_s19, 1 }
   0xf   : > { %1633 = vmatprep.subr.bf16.mxu0 %v12554_v1  ;;  %2338 = vmatprep.subr.bf16.mxu1 %v12554_v1  ;;  %v7775_v2 = vld [vmem:[%s12550_s2 + $0x38] sm:$0xff]   ;;  %v7777_v4 = vld [vmem:[%s12550_s2 + $0x30] sm:$0xff]   ;;  %v7779_v6 = vld [vmem:[%s12550_s2 + $0x28] sm:$0xff]   ;;  %p309_p6 = scmp.lt.s32.totalorder %s8150_s12, 32  ;;  %vm541_vm0 = vsmask.f32 3328 }
  0x10   : > { %1634 = vmatpush1.bf16.msra.mxu0 %v7774_v0  ;;  %2339 = vmatpush1.bf16.msra.mxu1 %v7775_v2  ;;  %v7780_v7 = vld [vmem:[%s12550_s2 + $0xa0] sm:$0xff]   ;;  %v7782_v9 = vld [vmem:[%s12550_s2 + $0x98] sm:$0xff]   ;;  %s13891_s19 = smov (!%p307_p5, %s8045_s19), 1  ;;  %v7784_v11 = vld [vmem:[%s12550_s2 + $0x90] sm:$0xff]   ;;  %vm542_vm1 = vsmask.f32 7440 }
  0x11   : > { %1635 = vmatprep.subr.bf16.mxu0 %v12554_v1  ;;  %2340 = vmatprep.subr.bf16.mxu1 %v12554_v1  ;;  %v7781_v8 = vld [vmem:[%s12550_s2 + $0x20] sm:$0xff]   ;;  %v7783_v10 = vld [vmem:[%s12550_s2 + $0x18] sm:$0xff]   ;;  %s310_s27 = scalar_select %p309_p6, %s8150_s12, 32  ;;  %v7785_v12 = vld [vmem:[%s12550_s2 + $0x10] sm:$0xff]   ;;  %vm6023_vm3 = vcmask 523264  }
  0x12   : > { %s7570_s30 = smul.u32 330, %s13891_s19  ;;  %v7786_v13 = vld [vmem:[%s12550_s2 + $0x88] sm:$0xff]   ;;  %v7788_v15 = vld [vmem:[%s12550_s2 + $0x80] sm:$0xff]   ;;  %v7790_v17 = vld [vmem:[%s12550_s2 + $0xf8] sm:$0xff]   ;;  %s8060_s11 = smov 64  }
  0x13   : > { %s7569_s8 = smul.u32 10, %s310_s27  ;;  %v7787_v14 = vld [vmem:[%s12550_s2 + $0x8] sm:$0xff]   ;;  %v7789_v16 = vld [vmem:[%s12550_s2] sm:$0xff]   ;;  %v7791_v18 = vld [vmem:[%s12550_s2 + $0x78] sm:$0xff]   ;;  %s7313_s13 = sadd.s32 16, %s8150_s12 }
  0x14   : > { %1636 = vmatpush1.bf16.msra.mxu0 %v7776_v3  ;;  %2341 = vmatpush1.bf16.msra.mxu1 %v7777_v4  ;;  %v7792_v22 = vld [vmem:[%s12550_s2 + $0xf0] sm:$0xff]   ;;  %v7794_v42 = vld [vmem:[%s12550_s2 + $0xe8] sm:$0xff]   ;;  %vm8258_vm2 = vmor %vm541_vm0, %vm542_vm1  ;;  %p10450_p7 = scmp.lt.s32.totalorder %s7313_s13, 32  ;;  %p339_p8 = scmp.lt.s32.totalorder %s8150_s12, 31 }
  0x15   : > { %1637 = vmatprep.subr.bf16.mxu0 %v12554_v1  ;;  %2342 = vmatprep.subr.bf16.mxu1 %v12554_v1  ;;  %s313_s14 = sadd.s32 %s7570_s30, %s7569_s8  ;;  %v7793_v26 = vld [vmem:[%s12550_s2 + $0x70] sm:$0xff]   ;;  %v7795_v45 = vld [vmem:[%s12550_s2 + $0x68] sm:$0xff]   ;;  %v7796_v56 = vld [vmem:[%s12550_s2 + $0xe0] sm:$0xff]   ;;  %s6747_s29 = sshll.u32 %s13891_s19, 7 }
  0x16   : > { %s6742_s17 = sshll.u32 %s313_s14, 2  ;;  %v7797_v61 = vld [vmem:[%s12550_s2 + $0x60] sm:$0xff]   ;;  %v7798_v0 = vld [vmem:[%s12550_s2 + $0xd8] sm:$0xff]   ;;  %s13893_s13 = smov (!%p10450_p7, %s7313_s13), 32 }
  0x17   : > { %s8204_s28 = scalar_lea.vmem %s12548_s0, %s6742_s17  ;;  %s7571_s15 = smul.u32 10, %s13893_s13 }
  0x18   : > { %1638 = vmatpush1.bf16.msra.mxu0 %v7778_v5  ;;  %2343 = vmatpush1.bf16.msra.mxu1 %v7779_v6  ;;  %v8215_v19 = vld [vmem:[%s8204_s28] sm:$0xff]  ;;  %v8218_v20 = vld [vmem:[%s8204_s28 + $0x8] sm:$0xff]  ;;  %v8221_v21 = vld [vmem:[%s8204_s28 + $0x10] sm:$0xff]  ;;  %s13895_s12 = smov (!%p339_p8, %s8150_s12), 31 }
  0x19   : > { %1639 = vmatprep.subr.bf16.mxu0 %v12554_v1  ;;  %2344 = vmatprep.subr.bf16.mxu1 %v12554_v1  ;;  %v545_v23 = vshrl.u32 %v8215_v19, 16  ;;  %v548_v24 = vshll.u32 %v8215_v19, 16  ;;  %v554_v25 = vshll.u32 %v8218_v20, 16  ;;  %v558_v27 = vshrl.u32 %v8218_v20, 16  ;;  %v8243_v34 = vld [vmem:[%s8204_s28 + $0x18] sm:$0xff]  ;;  %v8249_v41 = vld [vmem:[%s8204_s28 + $0x28] sm:$0xff]  ;;  %s10577_s16 = sadd.s32 %s7571_s15, %s7570_s30 }
  0x1a   : > { %2627 = vrot.lane.b32.xlu0 %v8215_v19, %s8060_s11  ;;  %2631 = vrot.lane.b32.xlu1 %v8221_v21, %s8060_s11  ;;  %v564_v28 = vshll.u32 %v8221_v21, 16  ;;  %v568_v29 = vshrl.u32 %v8221_v21, 16  ;;  %v6937_v30 = vcombine.high %v8215_v19, %v8218_v20  ;;  %v574_v37 = vshll.u32 %v8243_v34, 16  ;;  %v8269_v48 = vld [vmem:[%s8204_s28 + $0x30] sm:$0xff]  ;;  %v352_v50 = vld [vmem:[%s8204_s28 + $0x20] sm:$0x11] }
  0x1b   : > { %v547_v31 = vrot.slane %v545_v23, 4  ;;  %v550_v32 = vrot.slane %v548_v24, 5  ;;  %v556_v33 = vrot.slane %v554_v25, 5  ;;  %v560_v35 = vrot.slane %v558_v27, 4  ;;  %v8291_v58 = vld [vmem:[%s8204_s28 + $0x38] sm:$0xff]  ;;  %v8295_v60 = vld [vmem:[%s8204_s28 + $0x40] sm:$0xff] }
  0x1c   : > { %1640 = vmatpush1.bf16.msra.mxu0 %v7780_v7  ;;  %2345 = vmatpush1.bf16.msra.mxu1 %v7781_v8  ;;  %v570_v36 = vrot.slane %v568_v29, 4  ;;  %v566_v39 = vrot.slane %v564_v28, 5  ;;  %v578_v40 = vshrl.u32 %v8243_v34, 16  ;;  %v8273_v51 = vrot.slane %v574_v37, 5  ;;  %v7800_v28 = vld [vmem:[%s12550_s2 + $0xd0] sm:$0xff]   ;;  %s6744_s30 = sshll.u32 %s10577_s16, 2 }
  0x1d   : > { %1641 = vmatprep.subr.bf16.mxu0 %v12554_v1  ;;  %2346 = vmatprep.subr.bf16.mxu1 %v12554_v1  ;;  %v551_v38 = vor.u32 %v550_v32, %v547_v31  ;;  %v561_v44 = vor.u32 %v560_v35, %v556_v33  ;;  %v589_v53 = vshrl.u32 %v8249_v41, 16  ;;  %v592_v55 = vshll.u32 %v8249_v41, 16  ;;  %v7801_v32 = vld [vmem:[%s12550_s2 + $0x50] sm:$0xff]   ;;  %s10638_s25 = scalar_lea.vmem %s12549_s1, %s6744_s30  ;;  %s6746_s27 = sshll.u32 %s13895_s12, 2 }
  0x1e   : > { %2370 = vmatprep.mubr.bf16.mxu1 %v6937_v30  ;;  %2629 = vrot.lane.b32.xlu0 %v8218_v20, %s8060_s11  ;;  %v571_v47 = vor.u32 %v570_v36, %v566_v39  ;;  %v580_v52 = vrot.slane %v578_v40, 4  ;;  %v598_v59 = vshll.u32 %v8269_v48, 16  ;;  %v602_v63 = vshrl.u32 %v8269_v48, 16  ;;  %v8361_v40 = vld [vmem:[%s8204_s28 + $0x60] sm:$0xff]  ;;  %s343_s8 = sadd.s32 %s6747_s29, %s6746_s27 }
  0x1f   : > { %2633 = vrot.lane.b32.xlu1 %v8243_v34, %s8060_s11  ;;  %v552_v46 = vrot.slane %v551_v38, 4  ;;  %v562_v49 = vrot.slane %v561_v44, 4  ;;  %v584_v4 = vshll.u32 %v352_v50, 16  ;;  %v591_v5 = vrot.slane %v589_v53, 4  ;;  %s6748_s19 = sshll.u32 %s343_s8, 2 }
  0x20   : > { %1642 = vmatpush1.bf16.msra.mxu0 %v7782_v9  ;;  %2347 = vmatpush1.bf16.msra.mxu1 %v7783_v10  ;;  %v572_v2 = vrot.slane %v571_v47, 4  ;;  %v581_v3 = vor.u32 %v580_v52, %v8273_v51  ;;  %v594_v6 = vrot.slane %v592_v55, 5  ;;  %v608_v7 = vshll.u32 %v8291_v58, 16  ;;  %v7802_v52 = vld [vmem:[%s12550_s2 + $0xc8] sm:$0xff]   ;;  %s12199_s10 = scalar_lea.vmem %s12553_s5, %s6748_s19 }
  0x21   : > { %1643 = vmatprep.subr.bf16.mxu0 %v12554_v1  ;;  %2348 = vmatprep.subr.bf16.mxu1 %v12554_v1  ;;  %v8278_v54 = vsel %vm8258_vm2, %v552_v46, %v556_v33  ;;  %v8288_v57 = vsel %vm8258_vm2, %v562_v49, %v566_v39  ;;  %v612_v8 = vshrl.u32 %v8291_v58, 16  ;;  %v618_v9 = vshll.u32 %v8295_v60, 16 }
  0x22   : > { %12939 = vst [vmem:[#allocation2_spill] sm:$0xff] %v8278_v54  ;;  %2635 = vrot.lane.b32.xlu0 %v8249_v41, %s8060_s11  ;;  %12940 = vst [vmem:[#allocation3_spill] sm:$0xff] %v8288_v57  ;;  %v6857_v62 = vcombine.high %v8278_v54, %v8288_v57  ;;  %v8316_v10 = vrot.slane %v598_v59, 5  ;;  %v586_v23 = vrot.slane %v584_v4, 5  ;;  %v8335_v24 = vrot.slane %v608_v7, 5  ;;  %v7803_v59 = vld [vmem:[%s12550_s2 + $0x48] sm:$0xff]  }
  0x23   : > { %2637 = vrot.lane.b32.xlu1 %v8269_v48, %s8060_s11  ;;  %v595_v29 = vor.u32 %v594_v6, %v591_v5  ;;  %v6936_v38 = vcombine.low %v8215_v19, %v8218_v20  ;;  %v6939_v39 = vcombine.high %v8221_v21, %v8243_v34  ;;  %v8369_v46 = vsel %vm8258_vm2, %v572_v2, %v8273_v51  ;;  %v8402_v6 = vld [vmem:[%s8204_s28 + $0x78] sm:$0xff]  ;;  %v7804_v7 = vld [vmem:[%s12550_s2 + $0xc0] sm:$0xff]  }
  0x24   : > { %1644 = vmatpush1.bf16.msra.mxu0 %v7784_v11  ;;  %2349 = vmatpush1.bf16.msra.mxu1 %v7785_v12  ;;  %v357_v11 = vld [vmem:[%s8204_s28 + $0x48] sm:$0x11]  ;;  %v8320_v12 = vld [vmem:[%s8204_s28 + $0x50] sm:$0xff]  ;;  %12941 = vst [vmem:[#allocation4_spill] sm:$0xff] %v8369_v46  ;;  %v6856_v53 = vcombine.low %v8278_v54, %v8288_v57  ;;  %v6938_v51 = vcombine.low %v8221_v21, %v8243_v34  ;;  %v652_v4 = vshll.u32 %v8361_v40, 16  ;;  %v656_v5 = vshrl.u32 %v8361_v40, 16 }
  0x25   : > { %1645 = vmatprep.subr.bf16.mxu0 %v12554_v1  ;;  %2350 = vmatprep.subr.bf16.mxu1 %v12554_v1  ;;  %v636_v27 = vshll.u32 %v8320_v12, 16  ;;  %v628_v37 = vshll.u32 %v357_v11, 16  ;;  %v596_v55 = vrot.slane %v595_v29, 4  ;;  %v367_v20 = vld [vmem:[%s8204_s28 + $0x98] sm:$0x11]  ;;  %v9088_v54 = vld [vmem:[%s8204_s28 + $0x190] sm:$0xff] }
  0x26   : > { %1665 = vmatprep.mubr.bf16.mxu0 %v6857_v62  ;;  %2639 = vrot.lane.b32.xlu0 %v8291_v58, %s8060_s11  ;;  %v654_v29 = vrot.slane %v652_v4, 5  ;;  %13000 = vst [vmem:[#allocation41_spill] sm:$0xff] %v9088_v54 }
  0x27   : > { %2641 = vrot.lane.b32.xlu1 %v8295_v60, %s8060_s11  ;;  %v638_v44 = vrot.slane %v636_v27, 5  ;;  %v362_v27 = vld [vmem:[%s8204_s28 + $0x70] sm:$0x11] }
  0x28   : > { %1646 = vmatpush1.bf16.msra.mxu0 %v7786_v13  ;;  %2351 = vmatpush1.bf16.msra.mxu1 %v7787_v14  ;;  %v7799_v13 = vld [vmem:[%s12550_s2 + $0x58] sm:$0xff]   ;;  %v604_v14 = vrot.slane %v602_v63, 4 }
  0x29   : > { %1647 = vmatprep.subr.bf16.mxu0 %v12554_v1  ;;  %2352 = vmatprep.subr.bf16.mxu1 %v12554_v1 }
  0x2a   : > { %2643 = vrot.lane.b32.xlu0 %v8320_v12, %s8060_s11  ;;  %v605_v33 = vor.u32 %v604_v14, %v8316_v10  ;;  %v7805_v14 = vld [vmem:[%s12550_s2 + $0x40] sm:$0xff]  }
  0x2c   : > { %1648 = vmatpush1.bf16.msra.mxu0 %v7788_v15  ;;  %2353 = vmatpush1.bf16.msra.mxu1 %v7789_v16  ;;  %v614_v15 = vrot.slane %v612_v8, 4  ;;  %v8328_v16 = vrot.slane %v618_v9, 5 }
  0x2d   : > { %1649 = vmatprep.subr.bf16.mxu0 %v12554_v1  ;;  %2354 = vmatprep.subr.bf16.mxu1 %v12554_v1 }
  0x2e   : > { %v615_v35 = vor.u32 %v614_v15, %v8335_v24  ;;  %2647 = vrot.lane.b32.xlu0 %v8361_v40, %s8060_s11 }
  0x30   : > { %1650 = vmatpush2.bf16.msra.mxu0 %v7790_v17  ;;  %2355 = vmatpush2.bf16.msra.mxu1 %v7791_v18  ;;  %v622_v17 = vshrl.u32 %v8295_v60, 16  ;;  %v8332_v18 = vld [vmem:[%s8204_s28 + $0x58] sm:$0xff]  ;;  %v616_v62 = vrot.slane %v615_v35, 4 }
  0x31   : > { %1651 = vmatprep.subr.bf16.mxu0 %v12554_v1  ;;  %2356 = vmatprep.subr.bf16.mxu1 %v12554_v1  ;;  %v642_v30 = vshll.u32 %v8332_v18, 16  ;;  %v646_v31 = vshrl.u32 %v8332_v18, 16 }
  0x32   : > { %v624_v25 = vrot.slane %v622_v17, 4  ;;  %2645 = vrot.lane.b32.xlu1 %v8332_v18, %s8060_s11  ;;  %2651 = vrot.lane.b32.xlu0 %v8402_v6, %s8060_s11  ;;  %v8420_v17 = vsel %vm8258_vm2, %v596_v55, %v8316_v10  ;;  %v672_v55 = vshll.u32 %v362_v27, 16 }
  0x33   : > { %v8375_v49 = vrot.slane %v642_v30, 5  ;;  %v648_v50 = vrot.slane %v646_v31, 4  ;;  %12943 = vst [vmem:[#allocation6_spill] sm:$0xff] %v8420_v17  ;;  %v658_v30 = vrot.slane %v656_v5, 4  ;;  %v8447_v31 = vld [vmem:[%s8204_s28 + $0x88] sm:$0xff] }
  0x34   : > { %1652 = vmatpush2.bf16.msra.mxu0 %v7792_v22  ;;  %2357 = vmatpush2.bf16.msra.mxu1 %v7793_v26  ;;  %v582_v22 = vrot.slane %v581_v3, 4  ;;  %v633_v26 = vshrl.u32 %v8320_v12, 16  ;;  %v625_v36 = vor.u32 %v624_v25, %v8328_v16  ;;  %v6940_v3 = vcombine.low %v8249_v41, %v8269_v48 }
  0x35   : > { %1653 = vmatprep.subr.bf16.mxu0 %v12554_v1  ;;  %2358 = vmatprep.subr.bf16.mxu1 %v12554_v1  ;;  %v649_v9 = vor.u32 %v648_v50, %v8375_v49  ;;  %v659_v5 = vor.u32 %v658_v30, %v654_v29 }
  0x36   : > { %v8373_v47 = vsel %vm8258_vm2, %v582_v22, %v586_v23  ;;  %v626_v63 = vrot.slane %v625_v36, 4  ;;  %2655 = vrot.lane.b32.xlu0 %v8447_v31, %s8060_s11  ;;  %v8561_v22 = vld [vmem:[%s8204_s28 + $0xc8] sm:$0xff] }
  0x37   : > { %12942 = vst [vmem:[#allocation5_spill] sm:$0xff] %v8373_v47  ;;  %v6859_v2 = vcombine.high %v8369_v46, %v8373_v47  ;;  %v6858_v15 = vcombine.low %v8369_v46, %v8373_v47  ;;  %v650_v35 = vrot.slane %v649_v9, 4  ;;  %v8483_v9 = vld [vmem:[%s8204_s28 + $0xa0] sm:$0xff] }
  0x38   : > { %1654 = vmatpush2.bf16.msra.mxu0 %v7794_v42  ;;  %2359 = vmatpush2.bf16.msra.mxu1 %v7795_v45  ;;  %v635_v42 = vrot.slane %v633_v26, 4  ;;  %v8364_v45 = vld [vmem:[%s8204_s28 + $0x68] sm:$0xff]  ;;  %v8435_v26 = vsel %vm8258_vm2, %v616_v62, %v8328_v16  ;;  %v7808_v16 = vld [vmem:[%s12550_s2 + $0x138] sm:$0xff]  }
  0x39   : > { %1655 = vmatprep.subr.bf16.mxu0 %v12554_v1  ;;  %2360 = vmatprep.subr.bf16.mxu1 %v12554_v1  ;;  %v662_v11 = vshll.u32 %v8364_v45, 16  ;;  %12945 = vst [vmem:[#allocation8_spill] sm:$0xff] %v8435_v26  ;;  %v8503_v27 = vsel %vm8258_vm2, %v650_v35, %v654_v29  ;;  %v8521_v35 = vld [vmem:[%s8204_s28 + $0xb0] sm:$0xff] }
  0x3a   : > { %2649 = vrot.lane.b32.xlu1 %v8364_v45, %s8060_s11  ;;  %v639_v8 = vor.u32 %v638_v44, %v635_v42  ;;  %v7809_v42 = vld [vmem:[%s12550_s2 + $0x1b8] sm:$0xff]   ;;  %12948 = vst [vmem:[#allocation11_spill] sm:$0xff] %v8503_v27  ;;  %2659 = vrot.lane.b32.xlu0 %v8483_v9, %s8060_s11 }
  0x3b   : > { %v8456_v36 = vrot.slane %v662_v11, 5  ;;  %v7814_v11 = vld [vmem:[%s12550_s2 + $0x130] sm:$0xff]  }
  0x3c   : > { %1656 = vmatpush2.bf16.msra.mxu0 %v7796_v56  ;;  %2361 = vmatpush2.bf16.msra.mxu1 %v7797_v61  ;;  %v6941_v56 = vcombine.high %v8249_v41, %v8269_v48  ;;  %v606_v61 = vrot.slane %v605_v33, 4  ;;  %v640_v33 = vrot.slane %v639_v8, 4  ;;  %v12954_v41 = vcombine.high %v8291_v58, %v8295_v60 }
  0x3d   : > { %1657 = vmatprep.subr.bf16.mxu0 %v12554_v1  ;;  %2362 = vmatprep.subr.bf16.mxu1 %v12554_v1 }
  0x3e   : > { %v8430_v25 = vsel %vm8258_vm2, %v606_v61, %v8335_v24  ;;  %v677_v24 = vshrl.u32 %v8402_v6, 16  ;;  %2663 = vrot.lane.b32.xlu0 %v8521_v35, %s8060_s11 }
  0x3f   : > { %12944 = vst [vmem:[#allocation7_spill] sm:$0xff] %v8430_v25  ;;  %v6861_v44 = vcombine.high %v8420_v17, %v8430_v25  ;;  %v6860_v50 = vcombine.low %v8420_v17, %v8430_v25  ;;  %v8808_v25 = vld [vmem:[%s8204_s28 + $0x120] sm:$0xff] }
  0x40   : > { %1658 = vmatpush2.bf16.msra.mxu0 %v7798_v0  ;;  %2363 = vmatpush2.bf16.msra.mxu1 %v7799_v13  ;;  %v630_v0 = vrot.slane %v628_v37, 5  ;;  %v666_v13 = vshrl.u32 %v8364_v45, 16 }
  0x41   : > { %1659 = vmatprep.subr.bf16.mxu0 %v12554_v1  ;;  %2364 = vmatprep.subr.bf16.mxu1 %v12554_v1 }
  0x42   : > { %v8439_v10 = vsel %vm8258_vm2, %v626_v63, %v630_v0  ;;  %v668_v37 = vrot.slane %v666_v13, 4  ;;  %v7815_v13 = vld [vmem:[%s12550_s2 + $0x1b0] sm:$0xff]   ;;  %2667 = vrot.lane.b32.xlu0 %v8561_v22, %s8060_s11 }
  0x43   : > { %12946 = vst [vmem:[#allocation9_spill] sm:$0xff] %v8439_v10 }
  0x44   : > { %1660 = vmatpush2.bf16.msra.mxu0 %v7800_v28  ;;  %2365 = vmatpush2.bf16.msra.mxu1 %v7801_v32  ;;  %v8443_v28 = vld [vmem:[%s8204_s28 + $0x80] sm:$0xff]  ;;  %v680_v32 = vshll.u32 %v8402_v6, 16  ;;  %v669_v30 = vor.u32 %v668_v37, %v8456_v36  ;;  %v8552_v37 = vld [vmem:[%s8204_s28 + $0xb8] sm:$0xff] }
  0x45   : > { %1661 = vmatprep.subr.bf16.mxu0 %v12554_v1  ;;  %2366 = vmatprep.subr.bf16.mxu1 %v12554_v1  ;;  %v686_v63 = vshll.u32 %v8443_v28, 16  ;;  %v690_v0 = vshrl.u32 %v8443_v28, 16 }
  0x46   : > { %2653 = vrot.lane.b32.xlu1 %v8443_v28, %s8060_s11  ;;  %v682_v8 = vrot.slane %v680_v32, 5 }
  0x48   : > { %1662 = vmatpush2.bf16.msra.mxu0 %v7802_v52  ;;  %2367 = vmatpush2.bf16.msra.mxu1 %v7803_v59  ;;  %v8470_v59 = vld [vmem:[%s8204_s28 + $0x90] sm:$0xff] }
  0x49   : > { %1663 = vmatprep.subr.bf16.mxu0 %v12554_v1  ;;  %2368 = vmatprep.subr.bf16.mxu1 %v12554_v1  ;;  %v706_v32 = vshll.u32 %v8470_v59, 16  ;;  %v710_v29 = vshrl.u32 %v8470_v59, 16 }
  0x4a   : > { %2657 = vrot.lane.b32.xlu1 %v8470_v59, %s8060_s11 }
  0x4b   : > { %v712_v52 = vrot.slane %v710_v29, 4  ;;  %v716_v29 = vshll.u32 %v367_v20, 16 }
  0x4c   : > { %1664 = vmatpush2.bf16.msra.mxu0 %v7804_v7  ;;  %2369 = vmatpush2.bf16.msra.mxu1 %v7805_v14  ;;  %v679_v7 = vrot.slane %v677_v24, 4  ;;  %v8499_v14 = vsel %vm8258_vm2, %v640_v33, %v8375_v49  ;;  %v8512_v24 = vrot.slane %v672_v55, 5  ;;  %v696_v49 = vshll.u32 %v8447_v31, 16  ;;  %v8518_v33 = vld [vmem:[%s8204_s28 + $0xa8] sm:$0xff] }
  0x4d   : > { %3524 = vmatprep.subr.bf16.mxu0 %v12554_v1  ;;  %5222 = vmatprep.subr.bf16.mxu1 %v12554_v1  ;;  %12947 = vst [vmem:[#allocation10_spill] sm:$0xff] %v8499_v14  ;;  %v730_v62 = vshll.u32 %v8518_v33, 16  ;;  %v734_v4 = vshrl.u32 %v8518_v33, 16 }
  0x4e   : > { %v683_v55 = vor.u32 %v682_v8, %v679_v7  ;;  %v698_v7 = vrot.slane %v696_v49, 5  ;;  %v8549_v8 = vrot.slane %v706_v32, 5  ;;  %2661 = vrot.lane.b32.xlu1 %v8518_v33, %s8060_s11 }
  0x4f   : > { %1666 = vmatmul.mubr.bf16.vlgmr.msra.gmra.mxu0 %v6856_v53  ;;  %v700_v53 = vshrl.u32 %v8447_v31, 16  ;;  %2371 = vmatmul.mubr.bf16.vlgmr.msra.gmra.mxu1 %v6936_v38  ;;  %v688_v38 = vrot.slane %v686_v63, 5  ;;  %v7820_v63 = vld [vmem:[%s12550_s2 + $0x128] sm:$0xff]  }
  0x50   : > { %3525 = vmatpush1.bf16.msra.mxu0 %v7808_v16  ;;  %5223 = vmatpush1.bf16.msra.mxu1 %v7809_v42  ;;  %v692_v16 = vrot.slane %v690_v0, 4  ;;  %v660_v42 = vrot.slane %v659_v5, 4  ;;  %v670_v0 = vrot.slane %v669_v30, 4  ;;  %v7821_v5 = vld [vmem:[%s12550_s2 + $0x1a8] sm:$0xff]   ;;  %v684_v32 = vrot.slane %v683_v55, 4 }
  0x51   : > { %1673 = vmatprep.mubr.bf16.mxu0 %v6859_v2  ;;  %2378 = vmatprep.mubr.bf16.mxu1 %v6939_v39  ;;  %v721_v2 = vshrl.u32 %v8483_v9, 16  ;;  %v702_v19 = vrot.slane %v700_v53, 4  ;;  %v724_v39 = vshll.u32 %v8483_v9, 16  ;;  %v713_v21 = vor.u32 %v712_v52, %v8549_v8 }
  0x52   : > { %3526 = vmatprep.subr.bf16.mxu0 %v12554_v1  ;;  %5224 = vmatprep.subr.bf16.mxu1 %v12554_v1  ;;  %v693_v53 = vor.u32 %v692_v16, %v688_v38  ;;  %v736_v16 = vrot.slane %v734_v4, 4  ;;  %v7826_v4 = vld [vmem:[%s12550_s2 + $0x120] sm:$0xff]   ;;  %v754_v55 = vshrl.u32 %v8552_v37, 16  ;;  %v8610_v52 = vsel %vm8258_vm2, %v684_v32, %v688_v38 }
  0x53   : > { %v723_v30 = vrot.slane %v721_v2, 4  ;;  %v726_v23 = vrot.slane %v724_v39, 5  ;;  %v740_v2 = vshll.u32 %v8521_v35, 16  ;;  %v744_v39 = vshrl.u32 %v8521_v35, 16  ;;  %12951 = vst [vmem:[#allocation14_spill] sm:$0xff] %v8610_v52  ;;  %2665 = vrot.lane.b32.xlu1 %v8552_v37, %s8060_s11 }
  0x54   : > { %3527 = vmatpush1.bf16.msra.mxu0 %v7814_v11  ;;  %5225 = vmatpush1.bf16.msra.mxu1 %v7815_v13  ;;  %v8557_v11 = vrot.slane %v730_v62, 5  ;;  %v703_v62 = vor.u32 %v702_v19, %v698_v7  ;;  %v7827_v19 = vld [vmem:[%s12550_s2 + $0x1a0] sm:$0xff]   ;;  %v8601_v13 = vld [vmem:[%s8204_s28 + $0xd0] sm:$0xff]  ;;  %v756_v38 = vrot.slane %v754_v55, 4  ;;  %v714_v32 = vrot.slane %v713_v21, 4 }
  0x55   : > { %3528 = vmatprep.subr.bf16.mxu0 %v12554_v1  ;;  %5226 = vmatprep.subr.bf16.mxu1 %v12554_v1  ;;  %v727_v34 = vor.u32 %v726_v23, %v723_v30  ;;  %v8606_v23 = vsel %vm8258_vm2, %v670_v0, %v8512_v24  ;;  %v8616_v30 = vld [vmem:[%s8204_s28 + $0xd8] sm:$0xff]  ;;  %v774_v49 = vshll.u32 %v8601_v13, 16  ;;  %v778_v61 = vshrl.u32 %v8601_v13, 16 }
  0x56   : > { %v737_v20 = vor.u32 %v736_v16, %v8557_v11  ;;  %12950 = vst [vmem:[#allocation13_spill] sm:$0xff] %v8606_v23  ;;  %v7832_v24 = vld [vmem:[%s12550_s2 + $0x118] sm:$0xff]   ;;  %2671 = vrot.lane.b32.xlu0 %v8616_v30, %s8060_s11 }
  0x57   : > { %1674 = vmatmul.mubr.bf16.gmra.mxu0 %v6858_v15  ;;  %2379 = vmatmul.mubr.bf16.gmra.mxu1 %v6938_v51  ;;  %v8584_v15 = vsel %vm8258_vm2, %v660_v42, %v8456_v36  ;;  %v372_v51 = vld [vmem:[%s8204_s28 + $0xc0] sm:$0x11]  ;;  %v694_v36 = vrot.slane %v693_v53, 4  ;;  %v746_v42 = vrot.slane %v744_v39, 4  ;;  %v742_v53 = vrot.slane %v740_v2, 5 }
  0x58   : > { %1681 = vmatprep.mubr.bf16.mxu0 %v6861_v44  ;;  %12949 = vst [vmem:[#allocation12_spill] sm:$0xff] %v8584_v15  ;;  %v750_v44 = vshll.u32 %v8552_v37, 16  ;;  %2386 = vmatprep.mubr.bf16.mxu1 %v6941_v56  ;;  %v728_v16 = vrot.slane %v727_v34, 4  ;;  %v765_v39 = vshrl.u32 %v8561_v22, 16  ;;  %v760_v21 = vshll.u32 %v372_v51, 16 }
  0x59   : > { %3529 = vmatpush1.bf16.msra.mxu0 %v7820_v63  ;;  %5227 = vmatpush1.bf16.msra.mxu1 %v7821_v5  ;;  %v718_v63 = vrot.slane %v716_v29, 5  ;;  %v704_v5 = vrot.slane %v703_v62, 4  ;;  %v7833_v29 = vld [vmem:[%s12550_s2 + $0x198] sm:$0xff]   ;;  %v768_v62 = vshll.u32 %v8561_v22, 16  ;;  %v8635_v2 = vsel %vm8258_vm2, %v694_v36, %v698_v7  ;;  %v7838_v36 = vld [vmem:[%s12550_s2 + $0x110] sm:$0xff]  }
  0x5a   : > { %3530 = vmatprep.subr.bf16.mxu0 %v12554_v1  ;;  %5228 = vmatprep.subr.bf16.mxu1 %v12554_v1  ;;  %v8622_v0 = vrot.slane %v750_v44, 5  ;;  %12952 = vst [vmem:[#allocation15_spill] sm:$0xff] %v8635_v2  ;;  %v738_v44 = vrot.slane %v737_v20, 4  ;;  %v747_v55 = vor.u32 %v746_v42, %v742_v53  ;;  %v767_v51 = vrot.slane %v765_v39, 4  ;;  %v7839_v39 = vld [vmem:[%s12550_s2 + $0x190] sm:$0xff]  }
  0x5b   : > { %v8678_v48 = vsel %vm8258_vm2, %v704_v5, %v8549_v8  ;;  %v8687_v7 = vsel %vm8258_vm2, %v728_v16, %v8557_v11  ;;  %v8693_v8 = vrot.slane %v774_v49, 5  ;;  %v780_v5 = vrot.slane %v778_v61, 4  ;;  %v8700_v16 = vld [vmem:[%s8204_s28 + $0xf0] sm:$0xff]  ;;  %2669 = vrot.lane.b32.xlu1 %v8601_v13, %s8060_s11  ;;  %v7844_v61 = vld [vmem:[%s12550_s2 + $0x108] sm:$0xff]  }
  0x5c   : > { %12955 = vst [vmem:[#allocation16_spill] sm:$0xff] %v8678_v48  ;;  %12957 = vst [vmem:[#allocation18_spill] sm:$0xff] %v8687_v7  ;;  %v788_v11 = vshrl.u32 %v8616_v30, 16  ;;  %2675 = vrot.lane.b32.xlu0 %v8700_v16, %s8060_s11  ;;  %v12962_v42 = vcombine.low %v8291_v58, %v8295_v60  ;;  %v12964_v20 = vcombine.high %v8320_v12, %v8332_v18  ;;  %v7851_v58 = vld [vmem:[%s12550_s2 + $0x180] sm:$0xff]  }
  0x5d   : > { %3531 = vmatpush1.bf16.msra.mxu0 %v7826_v4  ;;  %5229 = vmatpush1.bf16.msra.mxu1 %v7827_v19  ;;  %v757_v4 = vor.u32 %v756_v38, %v8622_v0  ;;  %v770_v19 = vrot.slane %v768_v62, 5  ;;  %v8670_v62 = vld [vmem:[%s8204_s28 + $0xe0] sm:$0xff]  ;;  %v762_v38 = vrot.slane %v760_v21, 5 }
  0x5e   : > { %3532 = vmatprep.subr.bf16.mxu0 %v12554_v1  ;;  %5230 = vmatprep.subr.bf16.mxu1 %v12554_v1 }
  0x5f   : > { %1682 = vmatmul.mubr.bf16.gmra.mxu0 %v6860_v50  ;;  %2387 = vmatmul.mubr.bf16.gmra.mxu1 %v6940_v3  ;;  %v12953_v50 = vcombine.high %v8435_v26, %v8439_v10  ;;  %v8682_v3 = vsel %vm8258_vm2, %v714_v32, %v718_v63  ;;  %v758_v63 = vrot.slane %v757_v4, 4  ;;  %v784_v32 = vshll.u32 %v8616_v30, 16 }
  0x60   : > { %2394 = vmatprep.mubr.bf16.mxu1 %v12954_v41  ;;  %12956 = vst [vmem:[#allocation17_spill] sm:$0xff] %v8682_v3  ;;  %v8691_v41 = vsel %vm8258_vm2, %v738_v44, %v742_v53  ;;  %v794_v53 = vshll.u32 %v8670_v62, 16  ;;  %v8711_v44 = vld [vmem:[%s8204_s28 + $0xf8] sm:$0xff]  ;;  %v781_v4 = vor.u32 %v780_v5, %v8693_v8  ;;  %v7850_v5 = vld [vmem:[%s12550_s2 + $0x100] sm:$0xff]   ;;  %2673 = vrot.lane.b32.xlu1 %v8670_v62, %s8060_s11 }
  0x61   : > { %1689 = vmatprep.mubr.bf16.mxu0 %v12953_v50  ;;  %3533 = vmatpush1.bf16.msra.mxu0 %v7832_v24  ;;  %v748_v50 = vrot.slane %v747_v55, 4  ;;  %12958 = vst [vmem:[#allocation19_spill] sm:$0xff] %v8691_v41  ;;  %v771_v24 = vor.u32 %v770_v19, %v767_v51  ;;  %v377_v19 = vld [vmem:[%s8204_s28 + $0xe8] sm:$0x11]  ;;  %v12960_v51 = vcombine.low %v8435_v26, %v8439_v10  ;;  %v818_v60 = vshll.u32 %v8711_v44, 16 }
  0x62   : > { %5231 = vmatpush1.bf16.msra.mxu1 %v7833_v29  ;;  %3534 = vmatprep.subr.bf16.mxu0 %v12554_v1  ;;  %v798_v29 = vshrl.u32 %v8670_v62, 16  ;;  %v8744_v49 = vsel %vm8258_vm2, %v758_v63, %v762_v38  ;;  %v12963_v38 = vcombine.high %v8499_v14, %v8503_v27  ;;  %v786_v63 = vrot.slane %v784_v32, 5 }
  0x63   : > { %5232 = vmatprep.subr.bf16.mxu1 %v12554_v1  ;;  %v8732_v21 = vsel %vm8258_vm2, %v748_v50, %v8622_v0  ;;  %12961 = vst [vmem:[#allocation21_spill] sm:$0xff] %v8744_v49  ;;  %v772_v55 = vrot.slane %v771_v24, 4  ;;  %v790_v0 = vrot.slane %v788_v11, 4  ;;  %v809_v50 = vshrl.u32 %v8700_v16, 16 }
  0x64   : > { %12959 = vst [vmem:[#allocation20_spill] sm:$0xff] %v8732_v21  ;;  %v8760_v24 = vrot.slane %v794_v53, 5  ;;  %v800_v11 = vrot.slane %v798_v29, 4  ;;  %v782_v53 = vrot.slane %v781_v4, 4  ;;  %v8789_v29 = vld [vmem:[%s8204_s28 + $0x118] sm:$0xff]  ;;  %v8804_v34 = vrot.slane %v818_v60, 5  ;;  %2677 = vrot.lane.b32.xlu1 %v8711_v44, %s8060_s11 }
  0x65   : > { %3535 = vmatpush1.bf16.msra.mxu0 %v7838_v36  ;;  %v7845_v36 = vld [vmem:[%s12550_s2 + $0x188] sm:$0xff]   ;;  %v791_v56 = vor.u32 %v790_v0, %v786_v63  ;;  %v8785_v32 = vrot.slane %v809_v50, 4  ;;  %v12968_v26 = vcombine.low %v8499_v14, %v8503_v27  ;;  %v12970_v60 = vcombine.high %v8584_v15, %v8606_v23 }
  0x66   : > { %5233 = vmatpush1.bf16.msra.mxu1 %v7839_v39  ;;  %3536 = vmatprep.subr.bf16.mxu0 %v12554_v1  ;;  %v8749_v39 = vld [vmem:[%s8204_s28 + $0x108] sm:$0xff]  ;;  %v12971_v27 = vcombine.high %v8361_v40, %v8364_v45 }
  0x67   : > { %1690 = vmatmul.mubr.bf16.gmra.mxu0 %v12960_v51  ;;  %5234 = vmatprep.subr.bf16.mxu1 %v12554_v1  ;;  %v812_v51 = vshll.u32 %v8700_v16, 16  ;;  %v838_v0 = vshll.u32 %v8749_v39, 16  ;;  %v842_v50 = vshrl.u32 %v8749_v39, 16 }
  0x68   : > { %2395 = vmatmul.mubr.bf16.gmra.mxu1 %v12962_v42  ;;  %1697 = vmatprep.mubr.bf16.mxu0 %v12963_v38  ;;  %v822_v42 = vshrl.u32 %v8711_v44, 16  ;;  %v8777_v38 = vld [vmem:[%s8204_s28 + $0x100] sm:$0xff] }
  0x69   : > { %2402 = vmatprep.mubr.bf16.mxu1 %v12964_v20  ;;  %3537 = vmatpush1.bf16.msra.mxu0 %v7844_v61  ;;  %v804_v20 = vshll.u32 %v377_v19, 16  ;;  %v832_v4 = vshrl.u32 %v8777_v38, 16  ;;  %v8797_v19 = vsel %vm8258_vm2, %v772_v55, %v8693_v8  ;;  %v814_v61 = vrot.slane %v812_v51, 5  ;;  %v7856_v8 = vld [vmem:[%s12550_s2 + $0x178] sm:$0xff]  }
  0x6a   : > { %5235 = vmatpush1.bf16.msra.mxu1 %v7845_v36  ;;  %3538 = vmatprep.subr.bf16.mxu0 %v12554_v1  ;;  %12965 = vst [vmem:[#allocation22_spill] sm:$0xff] %v8797_v19  ;;  %v801_v36 = vor.u32 %v800_v11, %v8760_v24  ;;  %v828_v10 = vshll.u32 %v8777_v38, 16  ;;  %v8815_v55 = vsel %vm8258_vm2, %v782_v53, %v786_v63  ;;  %v792_v63 = vrot.slane %v791_v56, 4 }
  0x6b   : > { %5236 = vmatprep.subr.bf16.mxu1 %v12554_v1  ;;  %2679 = vrot.lane.b32.xlu0 %v8777_v38, %s8060_s11  ;;  %v824_v1 = vrot.slane %v822_v42, 4  ;;  %12966 = vst [vmem:[#allocation23_spill] sm:$0xff] %v8815_v55  ;;  %v806_v11 = vrot.slane %v804_v20, 5  ;;  %v12967_v42 = vmov 0   ;;  %v834_v53 = vrot.slane %v832_v4, 4 }
  0x6c   : > { %v853_v20 = vshrl.u32 %v8789_v29, 16  ;;  %v856_v51 = vshll.u32 %v8789_v29, 16  ;;  %v8837_v17 = vrot.slane %v838_v0, 5  ;;  %v862_v56 = vshll.u32 %v8808_v25, 16  ;;  %v7862_v0 = vld [vmem:[%s12550_s2 + $0x170] sm:$0xff]   ;;  %2681 = vrot.lane.b32.xlu1 %v8749_v39, %s8060_s11 }
  0x6d   : > { %3539 = vmatpush1.bf16.msra.mxu0 %v7850_v5  ;;  %v7857_v5 = vld [vmem:[%s12550_s2 + $0x1f8] sm:$0xff]   ;;  %v866_v4 = vshrl.u32 %v8808_v25, 16  ;;  %v802_v14 = vrot.slane %v801_v36, 4  ;;  %v815_v47 = vor.u32 %v814_v61, %v8785_v32  ;;  %v8864_v61 = vld [vmem:[%s8204_s28 + $0x128] sm:$0xff]  ;;  %v8872_v36 = vsel %vm8258_vm2, %v792_v63, %v8760_v24 }
  0x6e   : > { %5237 = vmatpush1.bf16.msra.mxu1 %v7851_v58  ;;  %3540 = vmatprep.subr.bf16.mxu0 %v12967_v42  ;;  %v12969_v58 = vcombine.low %v8320_v12, %v8332_v18  ;;  %v825_v12 = vor.u32 %v824_v1, %v8804_v34  ;;  %v830_v18 = vrot.slane %v828_v10, 5  ;;  %v8850_v46 = vrot.slane %v862_v56, 5  ;;  %v7863_v1 = vld [vmem:[%s12550_s2 + $0x1f0] sm:$0xff]   ;;  %12972 = vst [vmem:[#allocation24_spill] sm:$0xff] %v8872_v36 }
  0x6f   : > { %1698 = vmatmul.mubr.bf16.gmra.mxu0 %v12968_v26  ;;  %5238 = vmatprep.subr.bf16.mxu1 %v12967_v42  ;;  %v844_v26 = vrot.slane %v842_v50, 4  ;;  %v855_v50 = vrot.slane %v853_v20, 4  ;;  %v868_v57 = vrot.slane %v866_v4, 4  ;;  %v8876_v20 = vld [vmem:[%s8204_s28 + $0x130] sm:$0xff]  ;;  %v8881_v56 = vsel %vm8258_vm2, %v802_v14, %v806_v11 }
  0x70   : > { %2403 = vmatmul.mubr.bf16.gmra.mxu1 %v12969_v58  ;;  %1705 = vmatprep.mubr.bf16.mxu0 %v12970_v60  ;;  %v382_v58 = vld [vmem:[%s8204_s28 + $0x110] sm:$0x11]  ;;  %v858_v60 = vrot.slane %v856_v51, 5  ;;  %12973 = vst [vmem:[#allocation25_spill] sm:$0xff] %v8881_v56  ;;  %v816_v4 = vrot.slane %v815_v47, 4  ;;  %v826_v32 = vrot.slane %v825_v12, 4  ;;  %v12974_v47 = vcombine.low %v8584_v15, %v8606_v23 }
  0x71   : > { %2410 = vmatprep.mubr.bf16.mxu1 %v12971_v27  ;;  %3541 = vmatpush2.bf16.msra.mxu0 %v7856_v8  ;;  %v835_v8 = vor.u32 %v834_v53, %v830_v18  ;;  %v845_v51 = vor.u32 %v844_v26, %v8837_v17  ;;  %v869_v63 = vor.u32 %v868_v57, %v8850_v46  ;;  %v872_v53 = vshll.u32 %v8864_v61, 16 }
  0x72   : > { %5239 = vmatpush2.bf16.msra.mxu1 %v7857_v5  ;;  %2683 = vrot.lane.b32.xlu0 %v8789_v29, %s8060_s11  ;;  %v848_v5 = vshll.u32 %v382_v58, 16  ;;  %v859_v24 = vor.u32 %v858_v60, %v855_v50  ;;  %v876_v14 = vshrl.u32 %v8864_v61, 16  ;;  %v882_v11 = vshll.u32 %v8876_v20, 16  ;;  %v7868_v58 = vld [vmem:[%s12550_s2 + $0x168] sm:$0xff]  }
  0x73   : > { %3542 = vmatprep.subr.bf16.mxu0 %v12967_v42  ;;  %5240 = vmatprep.subr.bf16.mxu1 %v12967_v42  ;;  %v886_v57 = vshrl.u32 %v8876_v20, 16  ;;  %v12976_v50 = vcombine.high %v8610_v52, %v8635_v2  ;;  %v12977_v26 = vcombine.high %v8402_v6, %v8443_v28  ;;  %v870_v27 = vrot.slane %v869_v63, 4  ;;  %v8993_v63 = vld [vmem:[%s8204_s28 + $0x158] sm:$0xff] }
  0x74   : > { %v850_v12 = vrot.slane %v848_v5, 5  ;;  %v7869_v5 = vld [vmem:[%s12550_s2 + $0x1e8] sm:$0xff]   ;;  %v874_v60 = vrot.slane %v872_v53, 5  ;;  %2685 = vrot.lane.b32.xlu1 %v8808_v25, %s8060_s11  ;;  %12987 = vst [vmem:[#allocation34_spill] sm:$0xff] %v8993_v63  ;;  %v9034_v53 = vld [vmem:[%s8204_s28 + $0x178] sm:$0xff] }
  0x75   : > { %3543 = vmatpush2.bf16.msra.mxu0 %v7862_v0  ;;  %v12975_v0 = vcombine.low %v8361_v40, %v8364_v45  ;;  %v8935_v45 = vld [vmem:[%s8204_s28 + $0x140] sm:$0xff]  ;;  %v8938_v40 = vld [vmem:[%s8204_s28 + $0x148] sm:$0xff]  ;;  %12993 = vst [vmem:[#allocation37_spill] sm:$0xff] %v9034_v53 }
  0x76   : > { %5241 = vmatpush2.bf16.msra.mxu1 %v7863_v1  ;;  %2687 = vrot.lane.b32.xlu0 %v8864_v61, %s8060_s11  ;;  %v836_v1 = vrot.slane %v835_v8, 4  ;;  %12980 = vst [vmem:[#allocation28_spill] sm:$0xff] %v8938_v40  ;;  %v888_v8 = vrot.slane %v886_v57, 4 }
  0x77   : > { %1706 = vmatmul.mubr.bf16.gmra.mxu0 %v12974_v47  ;;  %v846_v47 = vrot.slane %v845_v51, 4  ;;  %v387_v51 = vld [vmem:[%s8204_s28 + $0x138] sm:$0x11]  ;;  %3544 = vmatprep.subr.bf16.mxu0 %v12967_v42 }
  0x78   : > { %2411 = vmatmul.mubr.bf16.gmra.mxu1 %v12975_v0  ;;  %1713 = vmatprep.mubr.bf16.mxu0 %v12976_v50  ;;  %v8922_v0 = vsel %vm8258_vm2, %v816_v4, %v8804_v34  ;;  %v860_v50 = vrot.slane %v859_v24, 4  ;;  %v878_v34 = vrot.slane %v876_v14, 4  ;;  %v8943_v4 = vrot.slane %v882_v11, 5 }
  0x79   : > { %2418 = vmatprep.mubr.bf16.mxu1 %v12977_v26  ;;  %12978 = vst [vmem:[#allocation26_spill] sm:$0xff] %v8922_v0  ;;  %v8932_v26 = vsel %vm8258_vm2, %v826_v32, %v830_v18  ;;  %3545 = vmatpush2.bf16.msra.mxu0 %v7868_v58  ;;  %v8952_v32 = vsel %vm8258_vm2, %v836_v1, %v8837_v17  ;;  %v892_v11 = vshll.u32 %v387_v51, 16  ;;  %v8980_v1 = vld [vmem:[%s8204_s28 + $0x150] sm:$0xff]  ;;  %v8996_v18 = vld [vmem:[%s8204_s28 + $0x168] sm:$0xff]  ;;  %v7874_v17 = vld [vmem:[%s12550_s2 + $0x160] sm:$0xff]  }
  0x7a   : > { %12979 = vst [vmem:[#allocation27_spill] sm:$0xff] %v8932_v26  ;;  %2691 = vrot.lane.b32.xlu0 %v8935_v45, %s8060_s11  ;;  %12981 = vst [vmem:[#allocation29_spill] sm:$0xff] %v8952_v32  ;;  %v8956_v24 = vsel %vm8258_vm2, %v846_v47, %v850_v12  ;;  %5242 = vmatprep.subr.bf16.mxu1 %v12967_v42  ;;  %v8971_v57 = vsel %vm8258_vm2, %v860_v50, %v8850_v46  ;;  %v897_v47 = vshrl.u32 %v8935_v45, 16 }
  0x7b   : > { %12982 = vst [vmem:[#allocation30_spill] sm:$0xff] %v8956_v24  ;;  %3546 = vmatprep.subr.bf16.mxu0 %v12967_v42  ;;  %5243 = vmatpush2.bf16.msra.mxu1 %v7869_v5  ;;  %12983 = vst [vmem:[#allocation31_spill] sm:$0xff] %v8971_v57  ;;  %v8975_v12 = vsel %vm8258_vm2, %v870_v27, %v874_v60  ;;  %v12986_v51 = vcombine.low %v8610_v52, %v8635_v2  ;;  %v900_v50 = vshll.u32 %v8935_v45, 16 }
  0x7c   : > { %12984 = vst [vmem:[#allocation32_spill] sm:$0xff] %v8975_v12  ;;  %12985 = vst [vmem:[#allocation33_spill] sm:$0xff] %v8980_v1  ;;  %2689 = vrot.lane.b32.xlu1 %v8876_v20, %s8060_s11  ;;  %v879_v5 = vor.u32 %v878_v34, %v874_v60  ;;  %v889_v27 = vor.u32 %v888_v8, %v8943_v4  ;;  %v12989_v58 = vcombine.low %v8402_v6, %v8443_v28  ;;  %v7875_v6 = vld [vmem:[%s12550_s2 + $0x1e0] sm:$0xff]   ;;  %v9026_v60 = vld [vmem:[%s8204_s28 + $0x170] sm:$0xff] }
  0x7d   : > { %12988 = vst [vmem:[#allocation35_spill] sm:$0xff] %v8996_v18  ;;  %v12991_v28 = vcombine.high %v8447_v31, %v8470_v59  ;;  %v906_v8 = vshll.u32 %v8938_v40, 16  ;;  %v910_v34 = vshrl.u32 %v8938_v40, 16  ;;  %12992 = vst [vmem:[#allocation36_spill] sm:$0xff] %v9026_v60  ;;  %5244 = vmatprep.subr.bf16.mxu1 %v12967_v42  ;;  %v9031_v14 = vrot.slane %v897_v47, 4  ;;  %3547 = vmatpush2.bf16.msra.mxu0 %v7874_v17 }
  0x7e   : > { %2695 = vrot.lane.b32.xlu0 %v8980_v1, %s8060_s11  ;;  %v890_v10 = vrot.slane %v889_v27, 4  ;;  %v9040_v2 = vrot.slane %v900_v50, 5  ;;  %v916_v23 = vshll.u32 %v8980_v1, 16  ;;  %v950_v52 = vshll.u32 %v9026_v60, 16  ;;  %3548 = vmatprep.subr.bf16.mxu0 %v12967_v42 }
  0x7f   : > { %1714 = vmatmul.mubr.bf16.gmra.mxu0 %v12986_v51  ;;  %v12990_v51 = vcombine.high %v8678_v48, %v8682_v3  ;;  %5245 = vmatpush2.bf16.msra.mxu1 %v7875_v6  ;;  %v954_v15 = vshrl.u32 %v9026_v60, 16  ;;  %v9049_v17 = vrot.slane %v906_v8, 5  ;;  %v960_v27 = vshll.u32 %v9034_v53, 16 }
  0x80   : > { %2419 = vmatmul.mubr.bf16.gmra.mxu1 %v12989_v58  ;;  %v944_v58 = vshll.u32 %v8996_v18, 16  ;;  %2693 = vrot.lane.b32.xlu1 %v8938_v40, %s8060_s11  ;;  %v9059_v40 = vld [vmem:[%s8204_s28 + $0x180] sm:$0xff]  ;;  %v12995_v8 = vcombine.low %v8678_v48, %v8682_v3  ;;  %v13001_v50 = vcombine.high %v8483_v9, %v8518_v33  ;;  %v926_v3 = vshll.u32 %v8993_v63, 16 }
  0x81   : > { %1721 = vmatprep.mubr.bf16.mxu0 %v12990_v51  ;;  %2426 = vmatprep.mubr.bf16.mxu1 %v12991_v28  ;;  %v894_v51 = vrot.slane %v892_v11, 5  ;;  %v941_v28 = vshrl.u32 %v8996_v18, 16  ;;  %v880_v11 = vrot.slane %v879_v5, 4  ;;  %v9051_v5 = vrot.slane %v910_v34, 4  ;;  %12994 = vst [vmem:[#allocation38_spill] sm:$0xff] %v9059_v40 }
  0x82   : > { %2699 = vrot.lane.b32.xlu0 %v8996_v18, %s8060_s11  ;;  %v946_v46 = vrot.slane %v944_v58, 5  ;;  %5246 = vmatprep.subr.bf16.mxu1 %v12967_v42  ;;  %v956_v58 = vrot.slane %v954_v15, 4  ;;  %v985_v18 = vshrl.u32 %v9088_v54, 16 }
  0x83   : > { %v943_v47 = vrot.slane %v941_v28, 4  ;;  %v952_v28 = vrot.slane %v950_v52, 5  ;;  %v9069_v34 = vsel %vm8258_vm2, %v880_v11, %v8943_v4  ;;  %v9073_v15 = vsel %vm8258_vm2, %v890_v10, %v894_v51 }
  0x84   : > { %2697 = vrot.lane.b32.xlu1 %v8993_v63, %s8060_s11  ;;  %12996 = vst [vmem:[#allocation39_spill] sm:$0xff] %v9069_v34  ;;  %12997 = vst [vmem:[#allocation40_spill] sm:$0xff] %v9073_v15  ;;  %v920_v52 = vshrl.u32 %v8980_v1, 16  ;;  %v12999_v4 = vcombine.high %v8687_v7, %v8691_v41  ;;  %v9085_v11 = vrot.slane %v916_v23, 5  ;;  %v13006_v1 = vcombine.low %v8687_v7, %v8691_v41 }
  0x85   : > { %v947_v6 = vor.u32 %v946_v46, %v943_v47  ;;  %v964_v46 = vshrl.u32 %v9034_v53, 16  ;;  %v12998_v47 = vcombine.low %v8447_v31, %v8470_v59  ;;  %v957_v51 = vor.u32 %v956_v58, %v952_v28 }
  0x86   : > { %2703 = vrot.lane.b32.xlu0 %v9034_v53, %s8060_s11  ;;  %v930_v31 = vshrl.u32 %v8993_v63, 16  ;;  %v903_v58 = vor.u32 %v9040_v2, %v9031_v14  ;;  %v9124_v2 = vrot.slane %v926_v3, 5  ;;  %v392_v53 = vld [vmem:[%s8204_s28 + $0x160] sm:$0x11]  ;;  %v913_v3 = vor.u32 %v9051_v5, %v9049_v17 }
  0x87   : > { %1722 = vmatmul.mubr.bf16.gmra.mxu0 %v12995_v8  ;;  %v948_v10 = vrot.slane %v947_v6, 4  ;;  %v962_v8 = vrot.slane %v960_v27, 5  ;;  %v966_v59 = vrot.slane %v964_v46, 4  ;;  %v958_v27 = vrot.slane %v957_v51, 4 }
  0x88   : > { %2427 = vmatmul.mubr.bf16.gmra.mxu1 %v12998_v47  ;;  %1729 = vmatprep.mubr.bf16.mxu0 %v12999_v4  ;;  %v970_v47 = vshll.u32 %v9059_v40, 16  ;;  %v9097_v4 = vld [vmem:[%s8204_s28 + $0x198] sm:$0xff]  ;;  %v922_v46 = vrot.slane %v920_v52, 4  ;;  %v988_v51 = vshll.u32 %v9088_v54, 16  ;;  %v932_v14 = vrot.slane %v930_v31, 4 }
  0x89   : > { %2434 = vmatprep.mubr.bf16.mxu1 %v13001_v50  ;;  %13002 = vst [vmem:[#allocation42_spill] sm:$0xff] %v9097_v4  ;;  %v9101_v23 = vsel %vm8258_vm2, %v948_v10, %v952_v28  ;;  %2701 = vrot.lane.b32.xlu1 %v9026_v60, %s8060_s11  ;;  %v967_v48 = vor.u32 %v966_v59, %v962_v8  ;;  %v9119_v10 = vld [vmem:[%s8204_s28 + $0x1a0] sm:$0xff]  ;;  %v994_v50 = vshll.u32 %v9097_v4, 16  ;;  %v998_v6 = vshrl.u32 %v9097_v4, 16 }
  0x8a   : > { %13003 = vst [vmem:[#allocation43_spill] sm:$0xff] %v9101_v23  ;;  %2707 = vrot.lane.b32.xlu0 %v9088_v54, %s8060_s11  ;;  %v9116_v28 = vsel %vm8258_vm2, %v958_v27, %v962_v8  ;;  %13005 = vst [vmem:[#allocation45_spill] sm:$0xff] %v9119_v10  ;;  %v9126_v59 = vrot.slane %v970_v47, 5  ;;  %v987_v60 = vrot.slane %v985_v18, 4  ;;  %v990_v63 = vrot.slane %v988_v51, 5  ;;  %v9155_v51 = vld [vmem:[%s8204_s28 + $0x1a8] sm:$0xff] }
  0x8b   : > { %13004 = vst [vmem:[#allocation44_spill] sm:$0xff] %v9116_v28  ;;  %v968_v52 = vrot.slane %v967_v48, 4  ;;  %v996_v8 = vrot.slane %v994_v50, 5  ;;  %v1000_v27 = vrot.slane %v998_v6, 4  ;;  %v1004_v18 = vshll.u32 %v9119_v10, 16  ;;  %13010 = vst [vmem:[#allocation47_spill] sm:$0xff] %v9155_v51 }
  0x8c   : > { %v13009_v5 = vcombine.high %v8732_v21, %v8744_v49  ;;  %v991_v47 = vor.u32 %v990_v63, %v987_v60  ;;  %v13011_v31 = vcombine.high %v8521_v35, %v8552_v37  ;;  %v7880_v63 = vld [vmem:[%s12550_s2 + $0x158] sm:$0xff]   ;;  %v1014_v7 = vshll.u32 %v9155_v51, 16 }
  0x8d   : > { %2705 = vrot.lane.b32.xlu1 %v9059_v40, %s8060_s11  ;;  %v9139_v48 = vsel %vm8258_vm2, %v968_v52, %v9126_v59  ;;  %v1001_v6 = vor.u32 %v1000_v27, %v996_v8  ;;  %v1008_v52 = vshrl.u32 %v9119_v10, 16  ;;  %v1006_v41 = vrot.slane %v1004_v18, 5  ;;  %3549 = vmatpush2.bf16.msra.mxu0 %v7880_v63 }
  0x8e   : > { %13007 = vst [vmem:[#allocation46_spill] sm:$0xff] %v9139_v48  ;;  %2711 = vrot.lane.b32.xlu0 %v9119_v10, %s8060_s11  ;;  %v974_v27 = vshrl.u32 %v9059_v40, 16  ;;  %v992_v50 = vrot.slane %v991_v47, 4  ;;  %3550 = vmatprep.subr.bf16.mxu0 %v12967_v42 }
  0x8f   : > { %1730 = vmatmul.mubr.bf16.gmra.mxu0 %v13006_v1  ;;  %v13008_v1 = vcombine.low %v8483_v9, %v8518_v33  ;;  %v923_v9 = vor.u32 %v922_v46, %v9085_v11  ;;  %v933_v33 = vor.u32 %v932_v14, %v9124_v2  ;;  %v904_v46 = vrot.slane %v903_v58, 4 }
  0x90   : > { %1737 = vmatprep.mubr.bf16.mxu0 %v13009_v5  ;;  %v9164_v5 = vld [vmem:[%s8204_s28 + $0x1b8] sm:$0xff]  ;;  %v914_v14 = vrot.slane %v913_v3, 4  ;;  %v1010_v18 = vrot.slane %v1008_v52, 4  ;;  %v9182_v47 = vsel %vm8258_vm2, %v992_v50, %v996_v8  ;;  %v9192_v52 = vld [vmem:[%s8204_s28 + $0x1c0] sm:$0xff]  ;;  %v9196_v50 = vld [vmem:[%s8204_s28 + $0x1c8] sm:$0xff] }
  0x91   : > { %2435 = vmatmul.mubr.bf16.gmra.mxu1 %v13008_v1  ;;  %v936_v1 = vshll.u32 %v392_v53, 16  ;;  %13012 = vst [vmem:[#allocation48_spill] sm:$0xff] %v9164_v5  ;;  %2709 = vrot.lane.b32.xlu1 %v9097_v4, %s8060_s11  ;;  %v7881_v53 = vld [vmem:[%s12550_s2 + $0x1d8] sm:$0xff]   ;;  %13013 = vst [vmem:[#allocation49_spill] sm:$0xff] %v9182_v47  ;;  %v1029_v3 = vshrl.u32 %v9164_v5, 16  ;;  %v924_v63 = vrot.slane %v923_v9, 4  ;;  %v13017_v9 = vcombine.low %v8732_v21, %v8744_v49 }
  0x92   : > { %2442 = vmatprep.mubr.bf16.mxu1 %v13011_v31  ;;  %v1002_v31 = vrot.slane %v1001_v6, 4  ;;  %2715 = vrot.lane.b32.xlu0 %v9164_v5, %s8060_s11  ;;  %13015 = vst [vmem:[#allocation51_spill] sm:$0xff] %v9192_v52  ;;  %v934_v60 = vrot.slane %v933_v33, 4  ;;  %v1011_v8 = vor.u32 %v1010_v18, %v1006_v41  ;;  %13016 = vst [vmem:[#allocation52_spill] sm:$0xff] %v9196_v50  ;;  %v1032_v58 = vshll.u32 %v9164_v5, 16  ;;  %v9225_v49 = vld [vmem:[%s8204_s28 + $0x1e0] sm:$0xff] }
  0x93   : > { %5247 = vmatpush2.bf16.msra.mxu1 %v7881_v53  ;;  %v938_v4 = vrot.slane %v936_v1, 5  ;;  %v1031_v54 = vrot.slane %v1029_v3, 4  ;;  %v9208_v1 = vrot.slane %v1014_v7, 5  ;;  %v1042_v53 = vshrl.u32 %v9192_v52, 16  ;;  %13020 = vst [vmem:[#allocation53_spill] sm:$0xff] %v9225_v49 }
  0x94   : > { %v9186_v6 = vsel %vm8258_vm2, %v1002_v31, %v1006_v41  ;;  %5248 = vmatprep.subr.bf16.mxu1 %v12967_v42  ;;  %v976_v31 = vrot.slane %v974_v27, 4  ;;  %v397_v41 = vld [vmem:[%s8204_s28 + $0x188] sm:$0x11]  ;;  %v1012_v33 = vrot.slane %v1011_v8, 4  ;;  %v1052_v27 = vshrl.u32 %v9196_v50, 16 }
  0x95   : > { %13014 = vst [vmem:[#allocation50_spill] sm:$0xff] %v9186_v6  ;;  %2713 = vrot.lane.b32.xlu1 %v9155_v51, %s8060_s11  ;;  %v13018_v18 = vcombine.low %v8521_v35, %v8552_v37  ;;  %v13019_v3 = vcombine.high %v8797_v19, %v8815_v55  ;;  %v1038_v8 = vshll.u32 %v9192_v52, 16  ;;  %v1048_v7 = vshll.u32 %v9196_v50, 16 }
  0x96   : > { %2719 = vrot.lane.b32.xlu0 %v9196_v50, %s8060_s11  ;;  %v13021_v21 = vcombine.high %v8561_v22, %v8601_v13  ;;  %v9233_v35 = vsel %vm8258_vm2, %v1012_v33, %v9208_v1  ;;  %v1018_v37 = vshrl.u32 %v9155_v51, 16  ;;  %v980_v40 = vshll.u32 %v397_v41, 16  ;;  %v402_v41 = vld [vmem:[%s8204_s28 + $0x1b0] sm:$0x11] }
  0x97   : > { %1738 = vmatmul.mubr.bf16.gmra.mxu0 %v13017_v9  ;;  %v1034_v9 = vrot.slane %v1032_v58, 5  ;;  %13022 = vst [vmem:[#allocation54_spill] sm:$0xff] %v9233_v35  ;;  %v1054_v58 = vrot.slane %v1052_v27, 4  ;;  %v1040_v10 = vrot.slane %v1038_v8, 5  ;;  %v9246_v33 = vsel %vm8258_vm2, %v914_v14, %v9085_v11  ;;  %v9260_v14 = vld [vmem:[%s8204_s28 + $0x1f0] sm:$0xff] }
  0x98   : > { %1745 = vmatprep.mubr.bf16.mxu0 %v13019_v3  ;;  %v9239_v3 = vsel %vm8258_vm2, %v904_v46, %v9049_v17  ;;  %13024 = vst [vmem:[#allocation56_spill] sm:$0xff] %v9246_v33  ;;  %v977_v27 = vor.u32 %v976_v31, %v9126_v59  ;;  %v9254_v46 = vld [vmem:[%s8204_s28 + $0x1d0] sm:$0xff]  ;;  %v1073_v8 = vshrl.u32 %v9225_v49, 16  ;;  %v1076_v11 = vshll.u32 %v9225_v49, 16  ;;  %13026 = vst [vmem:[#allocation58_spill] sm:$0xff] %v9260_v14 }
  0x99   : > { %2443 = vmatmul.mubr.bf16.gmra.mxu1 %v13018_v18  ;;  %v1044_v18 = vrot.slane %v1042_v53, 4  ;;  %13023 = vst [vmem:[#allocation55_spill] sm:$0xff] %v9239_v3  ;;  %2717 = vrot.lane.b32.xlu1 %v9192_v52, %s8060_s11  ;;  %v1050_v53 = vrot.slane %v1048_v7, 5  ;;  %13025 = vst [vmem:[#allocation57_spill] sm:$0xff] %v9254_v46  ;;  %v9265_v59 = vsel %vm8258_vm2, %v924_v63, %v9124_v2  ;;  %v1020_v7 = vrot.slane %v1018_v37, 4  ;;  %v9279_v2 = vld [vmem:[%s8204_s28 + $0x1e8] sm:$0xff] }
  0x9a   : > { %2450 = vmatprep.mubr.bf16.mxu1 %v13021_v21  ;;  %v1035_v21 = vor.u32 %v1034_v9, %v1031_v54  ;;  %2723 = vrot.lane.b32.xlu0 %v9225_v49, %s8060_s11  ;;  %13027 = vst [vmem:[#allocation59_spill] sm:$0xff] %v9265_v59  ;;  %v9269_v31 = vsel %vm8258_vm2, %v934_v60, %v938_v4  ;;  %v982_v52 = vrot.slane %v980_v40, 5  ;;  %v1062_v5 = vshrl.u32 %v9254_v46, 16 }
  0x9b   : > { %v1045_v9 = vor.u32 %v1044_v18, %v1040_v10  ;;  %13028 = vst [vmem:[#allocation60_spill] sm:$0xff] %v9269_v31  ;;  %v1055_v17 = vor.u32 %v1054_v58, %v1050_v53  ;;  %13030 = vst [vmem:[#allocation62_spill] sm:$0xff] %v9279_v2  ;;  %v13031_v4 = vcombine.low %v8797_v19, %v8815_v55  ;;  %v978_v60 = vrot.slane %v977_v27, 4  ;;  %v9347_v19 = vld [vmem:[%s8204_s28 + $0x218] sm:$0xff] }
  0x9c   : > { %v1036_v54 = vrot.slane %v1035_v21, 4  ;;  %v1024_v63 = vshll.u32 %v402_v41, 16  ;;  %v13032_v37 = vcombine.low %v8561_v22, %v8601_v13  ;;  %v13033_v58 = vcombine.high %v8872_v36, %v8881_v56  ;;  %13042 = vst [vmem:[#allocation70_spill] sm:$0xff] %v9347_v19 }
  0x9d   : > { %v1046_v21 = vrot.slane %v1045_v9, 4  ;;  %2721 = vrot.lane.b32.xlu1 %v9254_v46, %s8060_s11  ;;  %v1056_v40 = vrot.slane %v1055_v17, 4  ;;  %v1075_v27 = vrot.slane %v1073_v8, 4  ;;  %v1078_v41 = vrot.slane %v1076_v11, 5  ;;  %v9300_v17 = vld [vmem:[%s8204_s28 + $0x208] sm:$0xff]  ;;  %v9309_v8 = vpop.permute.xlu0 %2627  ;;  %v9311_v11 = vpop.permute.xlu1 %2631 }
  0x9e   : > { %v9273_v18 = vsel %vm8258_vm2, %v1036_v54, %v1040_v10  ;;  %2727 = vrot.lane.b32.xlu0 %v9260_v14, %s8060_s11  ;;  %v1058_v10 = vshll.u32 %v9254_v46, 16  ;;  %13035 = vst [vmem:[#allocation64_spill] sm:$0xff] %v9300_v17  ;;  %v1021_v13 = vor.u32 %v1020_v7, %v9208_v1  ;;  %13037 = vst [vmem:[#allocation65_spill] sm:$0xff] %v9309_v8  ;;  %v1064_v1 = vrot.slane %v1062_v5, 4  ;;  %v9340_v7 = vld [vmem:[%s8204_s28 + $0x1f8] sm:$0xff] }
  0x9f   : > { %13029 = vst [vmem:[#allocation61_spill] sm:$0xff] %v9273_v18  ;;  %1746 = vmatmul.mubr.bf16.gmra.mxu0 %v13031_v4  ;;  %v9295_v54 = vsel %vm8258_vm2, %v1046_v21, %v1050_v53  ;;  %v13036_v4 = vcombine.high %v8616_v30, %v8670_v62  ;;  %v1086_v53 = vshrl.u32 %v9279_v2, 16  ;;  %13038 = vst [vmem:[#allocation66_spill] sm:$0xff] %v9311_v11  ;;  %v1096_v22 = vshrl.u32 %v9260_v14, 16  ;;  %v417_v8 = vld [vmem:[%s8204_s28 + $0x228] sm:$0x11] }
  0xa0   : > { %1753 = vmatprep.mubr.bf16.mxu0 %v13033_v58  ;;  %13034 = vst [vmem:[#allocation63_spill] sm:$0xff] %v9295_v54  ;;  %v1060_v21 = vrot.slane %v1058_v10, 5  ;;  %v7887_v10 = vld [vmem:[%s12550_s2 + $0x1d0] sm:$0xff]   ;;  %13040 = vst [vmem:[#allocation68_spill] sm:$0xff] %v9340_v7  ;;  %v9344_v55 = vsel %vm8258_vm2, %v978_v60, %v982_v52  ;;  %v1026_v9 = vrot.slane %v1024_v63, 5  ;;  %v1079_v58 = vor.u32 %v1078_v41, %v1075_v27  ;;  %v9503_v54 = vld [vmem:[%s8204_s28 + $0x248] sm:$0xff] }
  0xa1   : > { %2451 = vmatmul.mubr.bf16.gmra.mxu1 %v13032_v37  ;;  %v7886_v37 = vld [vmem:[%s12550_s2 + $0x150] sm:$0xff]   ;;  %2725 = vrot.lane.b32.xlu1 %v9279_v2, %s8060_s11  ;;  %13041 = vst [vmem:[#allocation69_spill] sm:$0xff] %v9344_v55  ;;  %v1082_v46 = vshll.u32 %v9279_v2, 16  ;;  %v1088_v50 = vrot.slane %v1086_v53, 4  ;;  %v1092_v51 = vshll.u32 %v9260_v14, 16  ;;  %v9354_v31 = vpop.permute.xlu0 %2629  ;;  %v9359_v41 = vpop.permute.xlu1 %2633  ;;  %v1117_v53 = vshrl.u32 %v9300_v17, 16 }
  0xa2   : > { %2458 = vmatprep.mubr.bf16.mxu1 %v13036_v4  ;;  %v407_v4 = vld [vmem:[%s8204_s28 + $0x1d8] sm:$0x11]  ;;  %v9335_v5 = vsel %vm8258_vm2, %v1056_v40, %v1060_v21  ;;  %2731 = vrot.lane.b32.xlu0 %v9300_v17, %s8060_s11  ;;  %v1022_v40 = vrot.slane %v1021_v13, 4  ;;  %13043 = vst [vmem:[#allocation71_spill] sm:$0xff] %v9354_v31  ;;  %v1065_v52 = vor.u32 %v1064_v1, %v1060_v21  ;;  %v1080_v63 = vrot.slane %v1079_v58, 4  ;;  %v9546_v31 = vld [vmem:[%s8204_s28 + $0x28] sm:$0xff] }
  0xa3   : > { %13039 = vst [vmem:[#allocation67_spill] sm:$0xff] %v9335_v5  ;;  %3551 = vmatpush2.bf16.msra.mxu0 %v7886_v37  ;;  %5249 = vmatpush2.bf16.msra.mxu1 %v7887_v10  ;;  %v1068_v60 = vshll.u32 %v407_v4, 16  ;;  %v1084_v27 = vrot.slane %v1082_v46, 5  ;;  %13044 = vst [vmem:[#allocation72_spill] sm:$0xff] %v9359_v41  ;;  %v13045_v13 = vcombine.low %v8872_v36, %v8881_v56  ;;  %v1098_v21 = vrot.slane %v1096_v22, 4  ;;  %v9371_v4 = vld [vmem:[%s8204_s28 + $0x210] sm:$0xff] }
  0xa4   : > { %3552 = vmatprep.subr.bf16.mxu0 %v12967_v42  ;;  %5250 = vmatprep.subr.bf16.mxu1 %v12967_v42  ;;  %13046 = vst [vmem:[#allocation73_spill] sm:$0xff] %v9371_v4  ;;  %v13047_v58 = vcombine.low %v8616_v30, %v8670_v62  ;;  %v13048_v1 = vcombine.high %v8922_v0, %v8932_v26  ;;  %v9390_v10 = vld [vmem:[%s8204_s28 + $0x230] sm:$0xff]  ;;  %v1094_v46 = vrot.slane %v1092_v51, 5  ;;  %v1120_v56 = vshll.u32 %v9300_v17, 16  ;;  %v9414_v51 = vld [vmem:[%s8204_s28 + $0x220] sm:$0xff] }
  0xa5   : > { %2729 = vrot.lane.b32.xlu1 %v9340_v7, %s8060_s11  ;;  %v9387_v37 = vsel %vm8258_vm2, %v1080_v63, %v1084_v27  ;;  %13050 = vst [vmem:[#allocation75_spill] sm:$0xff] %v9390_v10  ;;  %v13051_v30 = vcombine.high %v8700_v16, %v8711_v44  ;;  %v9401_v22 = vpop.permute.xlu0 %2635  ;;  %v1066_v63 = vrot.slane %v1065_v52, 4  ;;  %13055 = vst [vmem:[#allocation79_spill] sm:$0xff] %v9414_v51  ;;  %v1102_v52 = vshll.u32 %v9340_v7, 16  ;;  %v9422_v36 = vld [vmem:[%s8204_s28 + $0x240] sm:$0xff] }
  0xa6   : > { %2735 = vrot.lane.b32.xlu0 %v9347_v19, %s8060_s11  ;;  %13049 = vst [vmem:[#allocation74_spill] sm:$0xff] %v9387_v37  ;;  %13053 = vst [vmem:[#allocation77_spill] sm:$0xff] %v9401_v22  ;;  %v1140_v62 = vshrl.u32 %v9347_v19, 16  ;;  %v1119_v47 = vrot.slane %v1117_v53, 4  ;;  %v1122_v55 = vrot.slane %v1120_v56, 5  ;;  %v9452_v56 = vld [vmem:[%s8204_s28 + $0x238] sm:$0xff] }
  0xa7   : > { %1754 = vmatmul.mubr.bf16.gmra.mxu0 %v13045_v13  ;;  %v1070_v13 = vrot.slane %v1068_v60, 5  ;;  %13056 = vst [vmem:[#allocation80_spill] sm:$0xff] %v9422_v36  ;;  %v9431_v49 = vrot.slane %v1102_v52, 5  ;;  %13062 = vst [vmem:[#allocation85_spill] sm:$0xff] %v9452_v56  ;;  %v13065_v52 = vcombine.high %v8952_v32, %v8956_v24  ;;  %v7900_v22 = vld [vmem:[%s12550_s2 + $0x1c0] sm:$0xff]  }
  0xa8   : > { %1761 = vmatprep.mubr.bf16.mxu0 %v13048_v1  ;;  %v1089_v1 = vor.u32 %v1088_v50, %v1084_v27  ;;  %v1099_v50 = vor.u32 %v1098_v21, %v1094_v46  ;;  %v1106_v27 = vshrl.u32 %v9340_v7, 16  ;;  %v1184_v7 = vshrl.u32 %v9422_v36, 16  ;;  %13069 = vst [vmem:[#allocation89_spill] sm:$0xff] %v9503_v54  ;;  %13076 = vst [vmem:[#allocation95_spill] sm:$0xff] %v9546_v31 }
  0xa9   : > { %2459 = vmatmul.mubr.bf16.gmra.mxu1 %v13047_v58  ;;  %v9399_v58 = vsel %vm8258_vm2, %v1022_v40, %v1026_v9  ;;  %2733 = vrot.lane.b32.xlu1 %v9371_v4, %s8060_s11  ;;  %v1130_v9 = vshrl.u32 %v9371_v4, 16  ;;  %v9433_v60 = vpop.permute.xlu0 %2639  ;;  %v9437_v6 = vsel %vm8258_vm2, %v1066_v63, %v1070_v13  ;;  %v13064_v63 = vcombine.low %v8700_v16, %v8711_v44  ;;  %v7894_v44 = vld [vmem:[%s12550_s2 + $0x1c8] sm:$0xff]  }
  0xaa   : > { %2466 = vmatprep.mubr.bf16.mxu1 %v13051_v30  ;;  %13052 = vst [vmem:[#allocation76_spill] sm:$0xff] %v9399_v58  ;;  %v9407_v30 = vpop.permute.xlu1 %2637  ;;  %v1090_v40 = vrot.slane %v1089_v1, 4  ;;  %2739 = vrot.lane.b32.xlu0 %v9390_v10, %s8060_s11  ;;  %v1100_v2 = vrot.slane %v1099_v50, 4  ;;  %13058 = vst [vmem:[#allocation82_spill] sm:$0xff] %v9433_v60  ;;  %v1161_v1 = vshrl.u32 %v9390_v10, 16  ;;  %v9474_v58 = vld [vmem:[%s8204_s28 + $0x258] sm:$0xff]  ;;  %v13067_v16 = vcombine.high %v8777_v38, %v8749_v39 }
  0xab   : > { %13054 = vst [vmem:[#allocation78_spill] sm:$0xff] %v9407_v30  ;;  %13059 = vst [vmem:[#allocation83_spill] sm:$0xff] %v9437_v6  ;;  %v1150_v13 = vshrl.u32 %v9414_v51, 16  ;;  %v9512_v6 = vld [vmem:[%s8204_s28 + $0x268] sm:$0xff]  ;;  %5251 = vmatpush2.bf16.msra.mxu1 %v7894_v44  ;;  %v9539_v48 = vrot.slane %v1184_v7, 4  ;;  %v13079_v7 = vcombine.high %v8971_v57, %v8975_v12  ;;  %v1170_v30 = vshll.u32 %v9452_v56, 16 }
  0xac   : > { %v9429_v21 = vsel %vm8258_vm2, %v1090_v40, %v1094_v46  ;;  %v13061_v40 = vcombine.low %v8922_v0, %v8932_v26  ;;  %v9457_v53 = vsel %vm8258_vm2, %v1100_v2, %v9431_v49  ;;  %v1108_v26 = vrot.slane %v1106_v27, 4  ;;  %v412_v0 = vld [vmem:[%s8204_s28 + $0x200] sm:$0x11]  ;;  %13066 = vst [vmem:[#allocation87_spill] sm:$0xff] %v9474_v58  ;;  %v7893_v27 = vld [vmem:[%s12550_s2 + $0x148] sm:$0xff]   ;;  %13070 = vst [vmem:[#allocation90_spill] sm:$0xff] %v9512_v6 }
  0xad   : > { %13057 = vst [vmem:[#allocation81_spill] sm:$0xff] %v9429_v21  ;;  %2737 = vrot.lane.b32.xlu1 %v9414_v51, %s8060_s11  ;;  %13063 = vst [vmem:[#allocation86_spill] sm:$0xff] %v9457_v53  ;;  %v1164_v2 = vshll.u32 %v9390_v10, 16  ;;  %v9484_v50 = vpop.permute.xlu0 %2643  ;;  %v1112_v14 = vshll.u32 %v412_v0, 16  ;;  %3553 = vmatpush2.bf16.msra.mxu0 %v7893_v27  ;;  %v9517_v35 = vrot.slane %v1150_v13, 4  ;;  %v1174_v27 = vshrl.u32 %v9452_v56, 16 }
  0xae   : > { %v9442_v46 = vpop.permute.xlu1 %2641  ;;  %2743 = vrot.lane.b32.xlu0 %v9422_v36, %s8060_s11  ;;  %13068 = vst [vmem:[#allocation88_spill] sm:$0xff] %v9484_v50  ;;  %3554 = vmatprep.subr.bf16.mxu0 %v12967_v42  ;;  %v9530_v13 = vld [vmem:[%s8204_s28 + $0x260] sm:$0xff]  ;;  %v1172_v60 = vrot.slane %v1170_v30, 5 }
  0xaf   : > { %13060 = vst [vmem:[#allocation84_spill] sm:$0xff] %v9442_v46  ;;  %1762 = vmatmul.mubr.bf16.gmra.mxu0 %v13061_v40  ;;  %5252 = vmatprep.subr.bf16.mxu1 %v12967_v42  ;;  %13073 = vst [vmem:[#allocation93_spill] sm:$0xff] %v9530_v13  ;;  %v1205_v40 = vshrl.u32 %v9474_v58, 16  ;;  %v13080_v42 = vcombine.high %v8789_v29, %v8808_v25 }
  0xb0   : > { %1769 = vmatprep.mubr.bf16.mxu0 %v13065_v52  ;;  %v1132_v52 = vrot.slane %v1130_v9, 4  ;;  %v1126_v9 = vshll.u32 %v9371_v4, 16  ;;  %5253 = vmatpush2.bf16.msra.mxu1 %v7900_v22  ;;  %v13100_v22 = vcombine.low %v9069_v34, %v9073_v15 }
  0xb1   : > { %2467 = vmatmul.mubr.bf16.gmra.mxu1 %v13064_v63  ;;  %v9481_v63 = vrot.slane %v1140_v62, 4  ;;  %2741 = vrot.lane.b32.xlu1 %v9452_v56, %s8060_s11  ;;  %v1123_v62 = vor.u32 %v1122_v55, %v1119_v47  ;;  %v9508_v55 = vrot.slane %v1164_v2, 5  ;;  %v1109_v47 = vor.u32 %v1108_v26, %v9431_v49  ;;  %v9523_v49 = vpop.permute.xlu0 %2647 }
  0xb2   : > { %2474 = vmatprep.mubr.bf16.mxu1 %v13067_v16  ;;  %v9491_v16 = vrot.slane %v1161_v1, 4  ;;  %2747 = vrot.lane.b32.xlu0 %v9474_v58, %s8060_s11  ;;  %v1136_v1 = vshll.u32 %v9347_v19, 16  ;;  %v1128_v0 = vrot.slane %v1126_v9, 5  ;;  %v9514_v18 = vpop.permute.xlu1 %2645  ;;  %13072 = vst [vmem:[#allocation92_spill] sm:$0xff] %v9523_v49  ;;  %v13075_v2 = vcombine.low %v8952_v32, %v8956_v24  ;;  %v9589_v32 = vld [vmem:[%s8204_s28 + $0x270] sm:$0xff] }
  0xb3   : > { %v1124_v5 = vrot.slane %v1123_v62, 4  ;;  %13071 = vst [vmem:[#allocation91_spill] sm:$0xff] %v9514_v18  ;;  %v1114_v26 = vrot.slane %v1112_v14, 5  ;;  %v1208_v14 = vshll.u32 %v9474_v58, 16  ;;  %v9584_v24 = vrot.slane %v1205_v40, 4  ;;  %13084 = vst [vmem:[#allocation100_spill] sm:$0xff] %v9589_v32 }
  0xb4   : > { %v1133_v62 = vor.u32 %v1132_v52, %v1128_v0  ;;  %v1138_v9 = vrot.slane %v1136_v1, 5  ;;  %v13078_v52 = vcombine.low %v8777_v38, %v8749_v39  ;;  %v1110_v1 = vrot.slane %v1109_v47, 4  ;;  %v9773_v18 = vld [vmem:[%s8204_s28 + $0x88] sm:$0xff] }
  0xb5   : > { %2745 = vrot.lane.b32.xlu1 %v9503_v54, %s8060_s11  ;;  %v9534_v44 = vsel %vm8258_vm2, %v1124_v5, %v1128_v0  ;;  %v9549_v5 = vld [vmem:[%s8204_s28 + $0x30] sm:$0xff]  ;;  %v9565_v38 = vrot.slane %v1174_v27, 4  ;;  %v1146_v27 = vshll.u32 %v9414_v51, 16  ;;  %13112 = vst [vmem:[#allocation118_spill] sm:$0xff] %v9773_v18  ;;  %v13115_v56 = vcombine.low %v9239_v3, %v9246_v33 }
  0xb6   : > { %13074 = vst [vmem:[#allocation94_spill] sm:$0xff] %v9534_v44  ;;  %2751 = vrot.lane.b32.xlu0 %v9512_v6, %s8060_s11  ;;  %13077 = vst [vmem:[#allocation96_spill] sm:$0xff] %v9549_v5  ;;  %v1134_v0 = vrot.slane %v1133_v62, 4  ;;  %v1143_v47 = vor.u32 %v9481_v63, %v1138_v9  ;;  %v1228_v62 = vshrl.u32 %v9512_v6, 16  ;;  %v9580_v39 = vpop.permute.xlu1 %2649  ;;  %v9601_v63 = vld [vmem:[%s8204_s28 + $0x38] sm:$0xff] }
  0xb7   : > { %1770 = vmatmul.mubr.bf16.gmra.mxu0 %v13075_v2  ;;  %v1218_v2 = vshrl.u32 %v9530_v13, 16  ;;  %13083 = vst [vmem:[#allocation99_spill] sm:$0xff] %v9580_v39  ;;  %13086 = vst [vmem:[#allocation102_spill] sm:$0xff] %v9601_v63  ;;  %v1148_v40 = vrot.slane %v1146_v27, 5  ;;  %v13089_v27 = vcombine.low %v8971_v57, %v8975_v12  ;;  %v1167_v57 = vor.u32 %v9508_v55, %v9491_v16  ;;  %v7899_v16 = vld [vmem:[%s12550_s2 + $0x140] sm:$0xff]  }
  0xb8   : > { %1777 = vmatprep.mubr.bf16.mxu0 %v13079_v7  ;;  %v9569_v7 = vpop.permute.xlu0 %2651  ;;  %v1144_v11 = vrot.slane %v1143_v47, 4  ;;  %v4134_v47 = vshrl.u32 %v9546_v31, 16  ;;  %3555 = vmatpush2.bf16.msra.mxu0 %v7899_v16  ;;  %v13103_v16 = vcombine.low %v8864_v61, %v8876_v20 }
  0xb9   : > { %2475 = vmatmul.mubr.bf16.gmra.mxu1 %v13078_v52  ;;  %v1194_v52 = vshrl.u32 %v9503_v54, 16  ;;  %13081 = vst [vmem:[#allocation97_spill] sm:$0xff] %v9569_v7  ;;  %2749 = vrot.lane.b32.xlu1 %v9530_v13, %s8060_s11  ;;  %v1153_v55 = vor.u32 %v9517_v35, %v1148_v40  ;;  %v1168_v50 = vrot.slane %v1167_v57, 4  ;;  %v9682_v57 = vld [vmem:[%s8204_s28 + $0x60] sm:$0xff] }
  0xba   : > { %2482 = vmatprep.mubr.bf16.mxu1 %v13080_v42  ;;  %v9577_v42 = vsel %vm8258_vm2, %v1134_v0, %v1138_v9  ;;  %3877 = vrot.lane.b32.xlu0 %v9546_v31, %s8060_s11  ;;  %v9595_v9 = vsel %vm8258_vm2, %v1110_v1, %v1114_v26  ;;  %v9597_v0 = vrot.slane %v1208_v14, 5  ;;  %v9611_v26 = vrot.slane %v1228_v62, 4  ;;  %v9643_v62 = vld [vmem:[%s8204_s28 + $0x50] sm:$0xff]  ;;  %v9645_v12 = vpop.permute.xlu1 %2653  ;;  %13097 = vst [vmem:[#allocation109_spill] sm:$0xff] %v9682_v57 }
  0xbb   : > { %13082 = vst [vmem:[#allocation98_spill] sm:$0xff] %v9577_v42  ;;  %13085 = vst [vmem:[#allocation101_spill] sm:$0xff] %v9595_v9  ;;  %v9603_v17 = vrot.slane %v1194_v52, 4  ;;  %v9613_v1 = vrot.slane %v1218_v2, 4  ;;  %v9620_v52 = vsel %vm8258_vm2, %v1144_v11, %v1148_v40  ;;  %v4137_v2 = vshll.u32 %v9546_v31, 16  ;;  %v9679_v9 = vld [vmem:[%s8204_s28 + $0x40] sm:$0xff] }
  0xbc   : > { %v9609_v37 = vpop.permute.xlu0 %2655  ;;  %13088 = vst [vmem:[#allocation104_spill] sm:$0xff] %v9620_v52  ;;  %v1238_v14 = vshrl.u32 %v9589_v32, 16  ;;  %v13090_v11 = vcombine.low %v8789_v29, %v8808_v25  ;;  %13092 = vst [vmem:[#allocation105_spill] sm:$0xff] %v9643_v62  ;;  %v13094_v25 = vcombine.high %v8864_v61, %v8876_v20  ;;  %v4157_v29 = vshrl.u32 %v9601_v63, 16  ;;  %v13107_v61 = vld [vmem:[#allocation28_spill] sm:$0xff] }
  0xbd   : > { %13087 = vst [vmem:[#allocation103_spill] sm:$0xff] %v9609_v37  ;;  %2753 = vrot.lane.b32.xlu1 %v9589_v32, %s8060_s11  ;;  %13093 = vst [vmem:[#allocation106_spill] sm:$0xff] %v9645_v12  ;;  %v9669_v21 = vrot.slane %v4134_v47, 4  ;;  %v9671_v41 = vrot.slane %v4137_v2, 5  ;;  %v9686_v35 = vsel %vm8258_vm2, %v1168_v50, %v1172_v60  ;;  %v1154_v19 = vrot.slane %v1153_v55, 4  ;;  %v9732_v50 = vld [vmem:[%s8204_s28 + $0x78] sm:$0xff] }
  0xbe   : > { %3881 = vrot.lane.b32.xlu0 %v9601_v63, %s8060_s11  ;;  %v9673_v51 = vrot.slane %v1238_v14, 4  ;;  %13096 = vst [vmem:[#allocation108_spill] sm:$0xff] %v9679_v9  ;;  %13098 = vst [vmem:[#allocation110_spill] sm:$0xff] %v9686_v35  ;;  %v9691_v47 = vrot.slane %v4157_v29, 4  ;;  %v4181_v2 = vshll.u32 %v9643_v62, 16  ;;  %v4167_v40 = vshrl.u32 %v9679_v9, 16 }
  0xbf   : > { %1778 = vmatmul.mubr.bf16.gmra.mxu0 %v13089_v27  ;;  %v13091_v27 = vcombine.high %v9069_v34, %v9073_v15  ;;  %13106 = vst [vmem:[#allocation115_spill] sm:$0xff] %v9732_v50  ;;  %v13108_v20 = vcombine.high %v8935_v45, %v13107_v61  ;;  %v13117_v37 = vcombine.low %v8935_v45, %v13107_v61  ;;  %v9846_v61 = vld [vmem:[%s8204_s28 + $0x90] sm:$0xff] }
  0xc0   : > { %v9658_v4 = vpop.permute.xlu0 %2659  ;;  %13126 = vst [vmem:[#allocation123_spill] sm:$0xff] %v9846_v61  ;;  %v4140_v35 = vor.u32 %v9671_v41, %v9669_v21  ;;  %v4153_v41 = vshll.u32 %v9601_v63, 16  ;;  %v6753_v21 = vld [vmem:[%s8204_s28 + $0x48] sm:$0x11] }
  0xc1   : > { %2483 = vmatmul.mubr.bf16.gmra.mxu1 %v13090_v11  ;;  %1785 = vmatprep.mubr.bf16.mxu0 %v13091_v27  ;;  %v4147_v11 = vshrl.u32 %v9549_v5, 16  ;;  %v1180_v27 = vshll.u32 %v9422_v36, 16  ;;  %13095 = vst [vmem:[#allocation107_spill] sm:$0xff] %v9658_v4  ;;  %v13121_v36 = vld [vmem:[#allocation33_spill] sm:$0xff] }
  0xc2   : > { %2490 = vmatprep.mubr.bf16.mxu1 %v13094_v25  ;;  %3879 = vrot.lane.b32.xlu1 %v9549_v5, %s8060_s11  ;;  %v1156_v25 = vshll.u32 %v417_v8, 16  ;;  %v1177_v8 = vor.u32 %v9565_v38, %v1172_v60  ;;  %v9701_v38 = vpop.permute.xlu1 %2657  ;;  %v4141_v31 = vrot.slane %v4140_v35, 4 }
  0xc3   : > { %3885 = vrot.lane.b32.xlu0 %v9643_v62, %s8060_s11  ;;  %v1182_v30 = vrot.slane %v1180_v27, 5  ;;  %v9693_v14 = vrot.slane %v4147_v11, 4  ;;  %13099 = vst [vmem:[#allocation111_spill] sm:$0xff] %v9701_v38  ;;  %v4178_v11 = vshrl.u32 %v9643_v62, 16  ;;  %v9712_v27 = vld [vmem:[%s8204_s28 + $0x58] sm:$0xff]  ;;  %v9853_v38 = vld [vmem:[%s8204_s28 + $0xb0] sm:$0xff] }
  0xc4   : > { %v1158_v46 = vrot.slane %v1156_v25, 5  ;;  %v1178_v60 = vrot.slane %v1177_v8, 4  ;;  %13101 = vst [vmem:[#allocation112_spill] sm:$0xff] %v9712_v27  ;;  %v9714_v55 = vpop.permute.xlu0 %2663  ;;  %v1190_v8 = vshll.u32 %v9503_v54, 16  ;;  %v13118_v54 = vld [vmem:[#allocation60_spill] sm:$0xff]  ;;  %13128 = vst [vmem:[#allocation125_spill] sm:$0xff] %v9853_v38 }
  0xc5   : > { %13102 = vst [vmem:[#allocation113_spill] sm:$0xff] %v9714_v55  ;;  %v1187_v25 = vor.u32 %v9539_v48, %v1182_v30  ;;  %v9751_v7 = vrot.slane %v4178_v11, 4 }
  0xc6   : > { %3883 = vrot.lane.b32.xlu1 %v9679_v9, %s8060_s11  ;;  %v9729_v48 = vsel %vm8258_vm2, %v1178_v60, %v1182_v30  ;;  %v9739_v34 = vrot.slane %v1190_v8, 5  ;;  %v9743_v29 = vsel %vm8258_vm2, %v1154_v19, %v1158_v46  ;;  %v4222_v60 = vshrl.u32 %v9732_v50, 16  ;;  %v9757_v19 = vld [vmem:[%s8204_s28 + $0x68] sm:$0xff]  ;;  %v9775_v49 = vpop.permute.xlu1 %2661 }
  0xc7   : > { %1786 = vmatmul.mubr.bf16.gmra.mxu0 %v13100_v22  ;;  %3889 = vrot.lane.b32.xlu0 %v9682_v57, %s8060_s11  ;;  %v13104_v22 = vcombine.high %v9239_v3, %v9246_v33  ;;  %13105 = vst [vmem:[#allocation114_spill] sm:$0xff] %v9729_v48  ;;  %v1188_v15 = vrot.slane %v1187_v25, 4  ;;  %13109 = vst [vmem:[#allocation28_spill] sm:$0xff] %v9743_v29  ;;  %v4225_v25 = vshll.u32 %v9732_v50, 16  ;;  %v9766_v30 = vrot.slane %v4181_v2, 5  ;;  %v13122_v29 = vld [vmem:[#allocation34_spill] sm:$0xff] }
  0xc8   : > { %13110 = vst [vmem:[#allocation116_spill] sm:$0xff] %v9757_v19  ;;  %13113 = vst [vmem:[#allocation119_spill] sm:$0xff] %v9775_v49  ;;  %v422_v2 = vld [vmem:[%s8204_s28 + $0x250] sm:$0x11]  ;;  %v9784_v8 = vpop.permute.xlu0 %2667  ;;  %v9790_v11 = vrot.slane %v4222_v60, 4  ;;  %v9806_v60 = vld [vmem:[%s8204_s28 + $0x80] sm:$0xff]  ;;  %v13119_v33 = vcombine.high %v9265_v59, %v13118_v54  ;;  %v13123_v52 = vcombine.high %v13121_v36, %v13122_v29  ;;  %v1197_v45 = vor.u32 %v9603_v17, %v9739_v34 }
  0xc9   : > { %2491 = vmatmul.mubr.bf16.gmra.mxu1 %v13103_v16  ;;  %1793 = vmatprep.mubr.bf16.mxu0 %v13104_v22  ;;  %v4201_v16 = vshrl.u32 %v9682_v57, 16  ;;  %v4191_v22 = vshrl.u32 %v9712_v27, 16  ;;  %v9762_v46 = vsel %vm8258_vm2, %v1188_v15, %v9739_v34  ;;  %13114 = vst [vmem:[#allocation120_spill] sm:$0xff] %v9784_v8  ;;  %v9799_v12 = vrot.slane %v4225_v25, 5  ;;  %13116 = vst [vmem:[#allocation121_spill] sm:$0xff] %v9806_v60 }
  0xca   : > { %2498 = vmatprep.mubr.bf16.mxu1 %v13108_v20  ;;  %3887 = vrot.lane.b32.xlu1 %v9712_v27, %s8060_s11  ;;  %13111 = vst [vmem:[#allocation117_spill] sm:$0xff] %v9762_v46  ;;  %v9768_v20 = vrot.slane %v4167_v40, 4  ;;  %v1211_v40 = vor.u32 %v9597_v0, %v9584_v24  ;;  %v4211_v24 = vshrl.u32 %v9757_v19, 16  ;;  %v4245_v25 = vshrl.u32 %v9773_v18, 16  ;;  %v9817_v0 = vld [vmem:[%s8204_s28 + $0xa0] sm:$0xff] }
  0xcb   : > { %3893 = vrot.lane.b32.xlu0 %v9732_v50, %s8060_s11  ;;  %v9779_v15 = vrot.slane %v4201_v16, 4  ;;  %v9781_v10 = vrot.slane %v4191_v22, 4  ;;  %v1214_v16 = vshll.u32 %v9530_v13, 16  ;;  %v1224_v22 = vshll.u32 %v9512_v6, 16  ;;  %13120 = vst [vmem:[#allocation122_spill] sm:$0xff] %v9817_v0 }
  0xcc   : > { %v1212_v39 = vrot.slane %v1211_v40, 4  ;;  %v1200_v3 = vshll.u32 %v422_v2, 16  ;;  %v4235_v2 = vshrl.u32 %v9806_v60, 16  ;;  %v9848_v40 = vpop.permute.xlu0 %2671  ;;  %v9859_v58 = vrot.slane %v4245_v25, 4  ;;  %v9899_v25 = vld [vmem:[%s8204_s28 + $0xc8] sm:$0xff] }
  0xcd   : > { %v1216_v4 = vrot.slane %v1214_v16, 5  ;;  %v9832_v16 = vpop.permute.xlu1 %2665  ;;  %13127 = vst [vmem:[#allocation124_spill] sm:$0xff] %v9848_v40  ;;  %13135 = vst [vmem:[#allocation129_spill] sm:$0xff] %v9899_v25  ;;  %v4143_v6 = vshll.u32 %v9549_v5, 16 }
  0xce   : > { %3891 = vrot.lane.b32.xlu1 %v9757_v19, %s8060_s11  ;;  %13124 = vst [vmem:[#allocation33_spill] sm:$0xff] %v9832_v16  ;;  %v1202_v55 = vrot.slane %v1200_v3, 5  ;;  %v9861_v42 = vrot.slane %v4235_v2, 4 }
  0xcf   : > { %1794 = vmatmul.mubr.bf16.gmra.mxu0 %v13115_v56  ;;  %3897 = vrot.lane.b32.xlu0 %v9773_v18, %s8060_s11  ;;  %v9836_v34 = vsel %vm8258_vm2, %v1212_v39, %v1216_v4  ;;  %v1221_v17 = vor.u32 %v9613_v1, %v1216_v4  ;;  %v4266_v56 = vshrl.u32 %v9817_v0, 16  ;;  %v4269_v39 = vshll.u32 %v9817_v0, 16 }
  0xd0   : > { %1801 = vmatprep.mubr.bf16.mxu0 %v13119_v33  ;;  %13125 = vst [vmem:[#allocation34_spill] sm:$0xff] %v9836_v34  ;;  %v1234_v1 = vshll.u32 %v9589_v32, 16  ;;  %v9919_v8 = vpop.permute.xlu0 %2675  ;;  %v9942_v32 = vld [vmem:[%s8204_s28 + $0xd0] sm:$0xff]  ;;  %v4145_v16 = vrot.slane %v4143_v6, 5 }
  0xd1   : > { %2499 = vmatmul.mubr.bf16.gmra.mxu1 %v13117_v37  ;;  %v1226_v37 = vrot.slane %v1224_v22, 5  ;;  %v1222_v4 = vrot.slane %v1221_v17, 4  ;;  %v4255_v22 = vshrl.u32 %v9846_v61, 16  ;;  %v9878_v2 = vrot.slane %v4266_v56, 4  ;;  %13142 = vst [vmem:[#allocation131_spill] sm:$0xff] %v9919_v8  ;;  %13145 = vst [vmem:[#allocation134_spill] sm:$0xff] %v9942_v32 }
  0xd2   : > { %2506 = vmatprep.mubr.bf16.mxu1 %v13123_v52  ;;  %3895 = vrot.lane.b32.xlu1 %v9806_v60, %s8060_s11  ;;  %v9839_v52 = vrot.slane %v4211_v24, 4  ;;  %v1198_v24 = vrot.slane %v1197_v45, 4  ;;  %v13130_v45 = vcombine.low %v9265_v59, %v13118_v54  ;;  %v4289_v17 = vshrl.u32 %v9853_v38, 16  ;;  %v9917_v59 = vld [vmem:[%s8204_s28 + $0xb8] sm:$0xff] }
  0xd3   : > { %3901 = vrot.lane.b32.xlu0 %v9817_v0, %s8060_s11  ;;  %v1231_v33 = vor.u32 %v9611_v26, %v1226_v37  ;;  %v9867_v3 = vsel %vm8258_vm2, %v1222_v4, %v1226_v37  ;;  %v9869_v26 = vrot.slane %v1234_v1, 5  ;;  %v9884_v37 = vld [vmem:[%s8204_s28 + $0xa8] sm:$0xff]  ;;  %v13132_v4 = vcombine.low %v13121_v36, %v13122_v29  ;;  %v10419_v0 = vld [vmem:[%s8204_s28 + $0x1e0] sm:$0xff] }
  0xd4   : > { %13129 = vst [vmem:[#allocation126_spill] sm:$0xff] %v9867_v3  ;;  %13131 = vst [vmem:[#allocation127_spill] sm:$0xff] %v9884_v37  ;;  %v13133_v1 = vcombine.high %v9101_v23, %v9116_v28  ;;  %v4279_v13 = vshrl.u32 %v9884_v37, 16  ;;  %v13137_v29 = vld [vmem:[#allocation35_spill] sm:$0xff]  ;;  %v9913_v56 = vrot.slane %v4255_v22, 4  ;;  %v4310_v54 = vshrl.u32 %v9899_v25, 16 }
  0xd5   : > { %v1232_v49 = vrot.slane %v1231_v33, 4  ;;  %v9896_v33 = vpop.permute.xlu1 %2669  ;;  %v427_v22 = vld [vmem:[%s8204_s28 + $0x278] sm:$0x11]  ;;  %v9936_v53 = vrot.slane %v4289_v17, 4  ;;  %v4323_v48 = vshrl.u32 %v9942_v32, 16  ;;  %v13147_v17 = vcombine.low %v9101_v23, %v9116_v28  ;;  %v13152_v28 = vld [vmem:[#allocation46_spill] sm:$0xff] }
  0xd6   : > { %3899 = vrot.lane.b32.xlu1 %v9846_v61, %s8060_s11  ;;  %13134 = vst [vmem:[#allocation128_spill] sm:$0xff] %v9896_v33  ;;  %v1244_v5 = vshll.u32 %v427_v22, 16  ;;  %v10021_v3 = vld [vmem:[%s8204_s28 + $0x100] sm:$0xff]  ;;  %13262 = vst [vmem:[#allocation188_spill] sm:$0xff] %v10419_v0 }
  0xd7   : > { %1802 = vmatmul.mubr.bf16.gmra.mxu0 %v13130_v45  ;;  %3905 = vrot.lane.b32.xlu0 %v9853_v38, %s8060_s11  ;;  %v9892_v45 = vrot.slane %v4269_v39, 5  ;;  %v9904_v36 = vsel %vm8258_vm2, %v1232_v49, %v9869_v26  ;;  %v9911_v39 = vsel %vm8258_vm2, %v1198_v24, %v1202_v55  ;;  %v4299_v55 = vshrl.u32 %v9917_v59, 16  ;;  %v9928_v24 = vld [vmem:[%s8204_s28 + $0xd8] sm:$0xff]  ;;  %13144 = vst [vmem:[#allocation133_spill] sm:$0xff] %v9936_v53 }
  0xd8   : > { %1809 = vmatprep.mubr.bf16.mxu0 %v13133_v1  ;;  %13136 = vst [vmem:[#allocation130_spill] sm:$0xff] %v9904_v36  ;;  %13140 = vst [vmem:[#allocation35_spill] sm:$0xff] %v9911_v39  ;;  %v4333_v49 = vshrl.u32 %v9928_v24, 16  ;;  %v9945_v38 = vrot.slane %v4279_v13, 4  ;;  %v9986_v40 = vrot.slane %v4323_v48, 4  ;;  %v9991_v39 = vld [vmem:[%s8204_s28 + $0xf0] sm:$0xff] }
  0xd9   : > { %2507 = vmatmul.mubr.bf16.gmra.mxu1 %v13132_v4  ;;  %v13138_v4 = vld [vmem:[#allocation36_spill] sm:$0xff]  ;;  %13143 = vst [vmem:[#allocation132_spill] sm:$0xff] %v9928_v24  ;;  %v9958_v13 = vrot.slane %v4299_v55, 4  ;;  %v9962_v35 = vpop.permute.xlu1 %2673  ;;  %v4155_v55 = vrot.slane %v4153_v41, 5  ;;  %13155 = vst [vmem:[#allocation139_spill] sm:$0xff] %v9991_v39  ;;  %v4173_v48 = vshll.u32 %v6753_v21, 16 }
  0xda   : > { %v13139_v1 = vcombine.high %v13137_v29, %v13138_v4  ;;  %13141 = vst [vmem:[#allocation36_spill] sm:$0xff] %v9917_v59  ;;  %3903 = vrot.lane.b32.xlu1 %v9884_v37, %s8060_s11  ;;  %13146 = vst [vmem:[#allocation135_spill] sm:$0xff] %v9962_v35  ;;  %v9968_v44 = vrot.slane %v4333_v49, 4  ;;  %v13151_v22 = vcombine.low %v13137_v29, %v13138_v4  ;;  %v13157_v29 = vld [vmem:[#allocation38_spill] sm:$0xff]  ;;  %v4377_v46 = vshrl.u32 %v10021_v3, 16 }
  0xdb   : > { %3909 = vrot.lane.b32.xlu0 %v9899_v25, %s8060_s11  ;;  %13162 = vst [vmem:[#allocation141_spill] sm:$0xff] %v10021_v3  ;;  %v4207_v35 = vshll.u32 %v9757_v19, 16 }
  0xdc   : > { %2514 = vmatprep.mubr.bf16.mxu1 %v13139_v1  ;;  %v4313_v1 = vshll.u32 %v9899_v25, 16  ;;  %v9954_v25 = vrot.slane %v4310_v54, 4  ;;  %13148 = vst [vmem:[#allocation136_spill] sm:$0xff] %v9968_v44  ;;  %v9976_v54 = vsel %vm8258_vm2, %v4141_v31, %v4145_v16  ;;  %v1241_v31 = vor.u32 %v9673_v51, %v9869_v26  ;;  %v10030_v44 = vld [vmem:[%s8204_s28 + $0xf8] sm:$0xff] }
  0xdd   : > { %v9972_v6 = vpop.permute.xlu0 %2679  ;;  %13150 = vst [vmem:[#allocation138_spill] sm:$0xff] %v9976_v54  ;;  %v1246_v26 = vrot.slane %v1244_v5, 5  ;;  %v10017_v23 = vpop.permute.xlu1 %2677  ;;  %13164 = vst [vmem:[#allocation143_spill] sm:$0xff] %v10030_v44 }
  0xde   : > { %v9956_v53 = vrot.slane %v4313_v1, 5  ;;  %3907 = vrot.lane.b32.xlu1 %v9917_v59, %s8060_s11  ;;  %13149 = vst [vmem:[#allocation137_spill] sm:$0xff] %v9972_v6  ;;  %v4150_v1 = vor.u32 %v9693_v14, %v4145_v16  ;;  %v13156_v16 = vld [vmem:[#allocation37_spill] sm:$0xff]  ;;  %13161 = vst [vmem:[#allocation140_spill] sm:$0xff] %v10017_v23  ;;  %v1242_v33 = vrot.slane %v1241_v31, 4 }
  0xdf   : > { %1810 = vmatmul.mubr.bf16.gmra.mxu0 %v13147_v17  ;;  %3913 = vrot.lane.b32.xlu0 %v9928_v24, %s8060_s11  ;;  %v13153_v17 = vld [vmem:[#allocation69_spill] sm:$0xff]  ;;  %v13158_v4 = vcombine.high %v13156_v16, %v13157_v29 }
  0xe0   : > { %v13154_v49 = vcombine.high %v13152_v28, %v13153_v17  ;;  %v4151_v41 = vrot.slane %v4150_v1, 4  ;;  %v4357_v1 = vshll.u32 %v9991_v39, 16 }
  0xe1   : > { %2515 = vmatmul.mubr.bf16.gmra.mxu1 %v13151_v22  ;;  %v4160_v22 = vor.u32 %v9691_v47, %v4155_v55  ;;  %v10011_v47 = vld [vmem:[%s8204_s28 + $0xe0] sm:$0xff] }
  0xe2   : > { %1817 = vmatprep.mubr.bf16.mxu0 %v13154_v49  ;;  %2522 = vmatprep.mubr.bf16.mxu1 %v13158_v4  ;;  %v4163_v49 = vshll.u32 %v9679_v9, 16  ;;  %v4354_v4 = vshrl.u32 %v9991_v39, 16  ;;  %13159 = vst [vmem:[#allocation37_spill] sm:$0xff] %v10011_v47  ;;  %v10015_v21 = vsel %vm8258_vm2, %v4151_v41, %v4155_v55  ;;  %v4343_v5 = vshrl.u32 %v10011_v47, 16  ;;  %v13170_v9 = vld [vmem:[#allocation50_spill] sm:$0xff] }
  0xe3   : > { %3911 = vrot.lane.b32.xlu1 %v9942_v32, %s8060_s11  ;;  %3917 = vrot.lane.b32.xlu0 %v9991_v39, %s8060_s11  ;;  %13160 = vst [vmem:[#allocation38_spill] sm:$0xff] %v10015_v21  ;;  %v4161_v14 = vrot.slane %v4160_v22, 4  ;;  %v4175_v41 = vrot.slane %v4173_v48, 5  ;;  %v4367_v21 = vshrl.u32 %v10030_v44, 16  ;;  %v13168_v22 = vcombine.low %v13156_v16, %v13157_v29  ;;  %v13175_v16 = vld [vmem:[#allocation41_spill] sm:$0xff]  ;;  %v13176_v29 = vld [vmem:[#allocation42_spill] sm:$0xff] }
  0xe4   : > { %v4165_v51 = vrot.slane %v4163_v49, 5  ;;  %v10027_v39 = vpop.permute.xlu0 %2683  ;;  %v10040_v34 = vrot.slane %v4354_v4, 4  ;;  %v4187_v4 = vshll.u32 %v9712_v27, 16  ;;  %v13169_v49 = vld [vmem:[#allocation49_spill] sm:$0xff]  ;;  %v10068_v48 = vrot.slane %v4343_v5, 4 }
  0xe5   : > { %13163 = vst [vmem:[#allocation142_spill] sm:$0xff] %v10027_v39  ;;  %v10083_v5 = vrot.slane %v4377_v46, 4 }
  0xe6   : > { %v10034_v55 = vsel %vm8258_vm2, %v4161_v14, %v4165_v51  ;;  %v4170_v31 = vor.u32 %v9768_v20, %v4165_v51  ;;  %13166 = vst [vmem:[#allocation145_spill] sm:$0xff] %v10040_v34  ;;  %v13167_v14 = vcombine.low %v13152_v28, %v13153_v17  ;;  %v4184_v51 = vor.u32 %v9766_v30, %v9751_v7  ;;  %v10070_v28 = vpop.permute.xlu1 %2681  ;;  %v6779_v7 = vld [vmem:[%s8204_s28 + $0x118] sm:$0xff] }
  0xe7   : > { %13165 = vst [vmem:[#allocation144_spill] sm:$0xff] %v10034_v55  ;;  %3915 = vrot.lane.b32.xlu1 %v10011_v47, %s8060_s11  ;;  %3921 = vrot.lane.b32.xlu0 %v10021_v3, %s8060_s11  ;;  %v13171_v17 = vcombine.high %v13169_v49, %v13170_v9  ;;  %13174 = vst [vmem:[#allocation148_spill] sm:$0xff] %v10070_v28  ;;  %v4197_v30 = vshll.u32 %v9682_v57, 16  ;;  %v4401_v8 = vshll.u32 %v6779_v7, 16  ;;  %v6758_v55 = vld [vmem:[%s8204_s28 + $0x70] sm:$0x11] }
  0xe8   : > { %1818 = vmatmul.mubr.bf16.gmra.mxu0 %v13167_v14  ;;  %v4171_v20 = vrot.slane %v4170_v31, 4  ;;  %v10064_v14 = vsel %vm8258_vm2, %v1242_v33, %v1246_v26  ;;  %v10066_v31 = vrot.slane %v4357_v1, 5  ;;  %v10077_v63 = vpop.permute.xlu0 %2687  ;;  %v4185_v26 = vrot.slane %v4184_v51, 4  ;;  %13180 = vst [vmem:[#allocation149_spill] sm:$0xff] %v10083_v5 }
  0xe9   : > { %2523 = vmatmul.mubr.bf16.gmra.mxu1 %v13168_v22  ;;  %1825 = vmatprep.mubr.bf16.mxu0 %v13171_v17  ;;  %13172 = vst [vmem:[#allocation146_spill] sm:$0xff] %v10064_v14  ;;  %v13177_v22 = vcombine.high %v13175_v16, %v13176_v29  ;;  %13178 = vst [vmem:[#allocation41_spill] sm:$0xff] %v10077_v63  ;;  %v4398_v17 = vshrl.u32 %v6779_v7, 16  ;;  %v4189_v1 = vrot.slane %v4187_v4, 5  ;;  %v4199_v51 = vrot.slane %v4197_v30, 5  ;;  %v6784_v4 = vld [vmem:[%s8204_s28 + $0x140] sm:$0xff] }
  0xea   : > { %13173 = vst [vmem:[#allocation147_spill] sm:$0xff] %v10066_v31  ;;  %v10081_v33 = vsel %vm8258_vm2, %v4171_v20, %v4175_v41  ;;  %v10091_v31 = vrot.slane %v4367_v21, 4  ;;  %v10095_v41 = vld [vmem:[%s8204_s28 + $0x108] sm:$0xff]  ;;  %v10105_v54 = vpop.permute.xlu1 %2685  ;;  %v4442_v34 = vshrl.u32 %v6784_v4, 16  ;;  %v4217_v27 = vshll.u32 %v6758_v55, 16 }
  0xeb   : > { %2530 = vmatprep.mubr.bf16.mxu1 %v13177_v22  ;;  %13179 = vst [vmem:[#allocation42_spill] sm:$0xff] %v10081_v33  ;;  %3919 = vrot.lane.b32.xlu1 %v10030_v44, %s8060_s11  ;;  %13182 = vst [vmem:[#allocation151_spill] sm:$0xff] %v10095_v41  ;;  %v10099_v46 = vsel %vm8258_vm2, %v4185_v26, %v4189_v1  ;;  %v4194_v20 = vor.u32 %v9781_v10, %v4189_v1  ;;  %v4387_v21 = vshrl.u32 %v10095_v41, 16  ;;  %v10112_v33 = vld [vmem:[%s8204_s28 + $0x120] sm:$0xff] }
  0xec   : > { %13181 = vst [vmem:[#allocation150_spill] sm:$0xff] %v10091_v31  ;;  %3925 = vrot.lane.b32.xlu0 %v6779_v7, %s8060_s11  ;;  %13183 = vst [vmem:[#allocation152_spill] sm:$0xff] %v10099_v46  ;;  %v10109_v7 = vld [vmem:[%s8204_s28 + $0x128] sm:$0xff]  ;;  %v10117_v5 = vrot.slane %v4398_v17, 4  ;;  %v10119_v10 = vpop.permute.xlu0 %2691  ;;  %v4411_v1 = vshrl.u32 %v10112_v33, 16  ;;  %v10125_v31 = vrot.slane %v4401_v8, 5  ;;  %v13189_v26 = vcombine.low %v13169_v49, %v13170_v9 }
  0xed   : > { %13184 = vst [vmem:[#allocation153_spill] sm:$0xff] %v10105_v54  ;;  %13185 = vst [vmem:[#allocation154_spill] sm:$0xff] %v10109_v7  ;;  %v4421_v30 = vshrl.u32 %v10109_v7, 16  ;;  %v4195_v22 = vrot.slane %v4194_v20, 4  ;;  %v4204_v8 = vor.u32 %v9779_v15, %v4199_v51  ;;  %v13191_v17 = vcombine.low %v13175_v16, %v13176_v29  ;;  %v13192_v9 = vld [vmem:[#allocation54_spill] sm:$0xff] }
  0xee   : > { %13186 = vst [vmem:[#allocation155_spill] sm:$0xff] %v10117_v5  ;;  %13187 = vst [vmem:[#allocation156_spill] sm:$0xff] %v10119_v10  ;;  %v10148_v62 = vrot.slane %v4387_v21, 4  ;;  %v10150_v6 = vpop.permute.xlu1 %2689  ;;  %v10166_v21 = vld [vmem:[%s8204_s28 + $0x130] sm:$0xff]  ;;  %v10171_v15 = vrot.slane %v4442_v34, 4  ;;  %v4219_v34 = vrot.slane %v4217_v27, 5 }
  0xef   : > { %13188 = vst [vmem:[#allocation157_spill] sm:$0xff] %v10125_v31  ;;  %3923 = vrot.lane.b32.xlu1 %v10095_v41, %s8060_s11  ;;  %v10138_v20 = vsel %vm8258_vm2, %v4195_v22, %v4199_v51  ;;  %13196 = vst [vmem:[#allocation160_spill] sm:$0xff] %v10150_v6  ;;  %v4445_v22 = vshll.u32 %v6784_v4, 16  ;;  %v13197_v51 = vld [vmem:[#allocation45_spill] sm:$0xff]  ;;  %v10159_v29 = vrot.slane %v4421_v30, 4  ;;  %v6786_v31 = vld [vmem:[%s8204_s28 + $0x150] sm:$0xff]  ;;  %v4228_v30 = vor.u32 %v9799_v12, %v9790_v11 }
  0xf0   : > { %1826 = vmatmul.mubr.bf16.gmra.mxu0 %v13189_v26  ;;  %3929 = vrot.lane.b32.xlu0 %v10109_v7, %s8060_s11  ;;  %13190 = vst [vmem:[#allocation158_spill] sm:$0xff] %v10138_v20  ;;  %v13193_v26 = vld [vmem:[#allocation76_spill] sm:$0xff]  ;;  %13195 = vst [vmem:[#allocation159_spill] sm:$0xff] %v10148_v62  ;;  %v13198_v7 = vld [vmem:[#allocation47_spill] sm:$0xff]  ;;  %v4205_v5 = vrot.slane %v4204_v8, 4  ;;  %v4209_v62 = vrot.slane %v4207_v35, 5 }
  0xf1   : > { %2531 = vmatmul.mubr.bf16.gmra.mxu1 %v13191_v17  ;;  %v13194_v49 = vcombine.high %v13192_v9, %v13193_v26  ;;  %v13199_v16 = vcombine.high %v13197_v51, %v13198_v7  ;;  %13200 = vst [vmem:[#allocation45_spill] sm:$0xff] %v10159_v29  ;;  %v10161_v17 = vrot.slane %v4411_v1, 4  ;;  %13202 = vst [vmem:[#allocation161_spill] sm:$0xff] %v10171_v15  ;;  %v4431_v55 = vshrl.u32 %v10166_v21, 16 }
  0xf2   : > { %v4465_v20 = vshrl.u32 %v6786_v31, 16  ;;  %v10183_v35 = vsel %vm8258_vm2, %v4205_v5, %v4209_v62  ;;  %v4214_v8 = vor.u32 %v9839_v52, %v4209_v62  ;;  %v10186_v15 = vpop.permute.xlu1 %2693  ;;  %v10188_v46 = vrot.slane %v4445_v22, 5 }
  0xf3   : > { %1833 = vmatprep.mubr.bf16.mxu0 %v13194_v49  ;;  %2538 = vmatprep.mubr.bf16.mxu1 %v13199_v16  ;;  %v10163_v49 = vpop.permute.xlu0 %2695  ;;  %v10175_v16 = vld [vmem:[%s8204_s28 + $0x148] sm:$0xff]  ;;  %13203 = vst [vmem:[#allocation162_spill] sm:$0xff] %v10183_v35  ;;  %13204 = vst [vmem:[#allocation163_spill] sm:$0xff] %v10186_v15  ;;  %v4241_v27 = vshll.u32 %v9773_v18, 16  ;;  %v10200_v52 = vrot.slane %v4431_v55, 4  ;;  %v4229_v12 = vrot.slane %v4228_v30, 4  ;;  %v13208_v29 = vcombine.low %v13192_v9, %v13193_v26 }
  0xf4   : > { %13201 = vst [vmem:[#allocation47_spill] sm:$0xff] %v10163_v49  ;;  %3927 = vrot.lane.b32.xlu1 %v10112_v33, %s8060_s11  ;;  %3933 = vrot.lane.b32.xlu0 %v6784_v4, %s8060_s11  ;;  %v4455_v1 = vshrl.u32 %v10175_v16, 16  ;;  %13205 = vst [vmem:[#allocation164_spill] sm:$0xff] %v10188_v46  ;;  %v4231_v4 = vshll.u32 %v9806_v60, 16  ;;  %v4215_v62 = vrot.slane %v4214_v8, 4  ;;  %v10204_v22 = vrot.slane %v4465_v20, 4 }
  0xf5   : > { %v13211_v30 = vcombine.low %v13197_v51, %v13198_v7  ;;  %v4243_v7 = vrot.slane %v4241_v27, 5  ;;  %v6763_v51 = vld [vmem:[%s8204_s28 + $0x98] sm:$0x11]  ;;  %v13217_v20 = vld [vmem:[#allocation51_spill] sm:$0xff]  ;;  %v6790_v27 = vld [vmem:[%s8204_s28 + $0x170] sm:$0xff]  ;;  %v4251_v26 = vshll.u32 %v9846_v61, 16 }
  0xf6   : > { %13207 = vst [vmem:[#allocation166_spill] sm:$0xff] %v10204_v22  ;;  %v4233_v11 = vrot.slane %v4231_v4, 5  ;;  %v10211_v8 = vrot.slane %v4455_v1, 4  ;;  %v10215_v55 = vsel %vm8258_vm2, %v4215_v62, %v4219_v34  ;;  %v13212_v4 = vld [vmem:[#allocation61_spill] sm:$0xff]  ;;  %v10225_v5 = vpop.permute.xlu1 %2697  ;;  %v4499_v23 = vshrl.u32 %v6790_v27, 16  ;;  %v6792_v22 = vld [vmem:[%s8204_s28 + $0x180] sm:$0xff] }
  0xf7   : > { %v10197_v57 = vpop.permute.xlu0 %2699  ;;  %13210 = vst [vmem:[#allocation168_spill] sm:$0xff] %v10215_v55  ;;  %13215 = vst [vmem:[#allocation169_spill] sm:$0xff] %v10225_v5  ;;  %v6787_v1 = vld [vmem:[%s8204_s28 + $0x158] sm:$0xff]  ;;  %v4253_v35 = vrot.slane %v4251_v26, 5  ;;  %v13231_v26 = vld [vmem:[#allocation83_spill] sm:$0xff] }
  0xf8   : > { %13206 = vst [vmem:[#allocation165_spill] sm:$0xff] %v10197_v57  ;;  %3931 = vrot.lane.b32.xlu1 %v10166_v21, %s8060_s11  ;;  %1834 = vmatmul.mubr.bf16.gmra.mxu0 %v13208_v29  ;;  %13209 = vst [vmem:[#allocation167_spill] sm:$0xff] %v10211_v8  ;;  %v13213_v29 = vld [vmem:[#allocation63_spill] sm:$0xff]  ;;  %v10234_v62 = vsel %vm8258_vm2, %v4229_v12, %v4233_v11  ;;  %v4238_v28 = vor.u32 %v9861_v42, %v4233_v11  ;;  %v4475_v12 = vshrl.u32 %v6787_v1, 16  ;;  %v10248_v34 = vld [vmem:[%s8204_s28 + $0x178] sm:$0xff] }
  0xf9   : > { %3937 = vrot.lane.b32.xlu0 %v6786_v31, %s8060_s11  ;;  %2539 = vmatmul.mubr.bf16.gmra.mxu1 %v13211_v30  ;;  %v13214_v19 = vcombine.high %v13212_v4, %v13213_v29  ;;  %v6789_v31 = vld [vmem:[%s8204_s28 + $0x168] sm:$0xff]  ;;  %v13216_v30 = vld [vmem:[#allocation48_spill] sm:$0xff]  ;;  %13220 = vst [vmem:[#allocation51_spill] sm:$0xff] %v10248_v34  ;;  %v4261_v11 = vshll.u32 %v6763_v51, 16  ;;  %v10323_v18 = vld [vmem:[%s8204_s28 + $0x1a0] sm:$0xff] }
  0xfa   : > { %v4486_v60 = vshrl.u32 %v6789_v31, 16  ;;  %v4489_v50 = vshll.u32 %v6789_v31, 16  ;;  %v4239_v42 = vrot.slane %v4238_v28, 4  ;;  %v10273_v51 = vrot.slane %v4475_v12, 4  ;;  %v13245_v49 = vld [vmem:[#allocation133_spill] sm:$0xff]  ;;  %v10435_v5 = vld [vmem:[%s8204_s28 + $0x1f0] sm:$0xff] }
  0xfb   : > { %1841 = vmatprep.mubr.bf16.mxu0 %v13214_v19  ;;  %v13218_v19 = vcombine.high %v13216_v30, %v13217_v20  ;;  %v10241_v9 = vpop.permute.xlu0 %2703  ;;  %v10258_v55 = vpop.permute.xlu1 %2701  ;;  %v4258_v12 = vor.u32 %v9913_v56, %v4253_v35  ;;  %v4272_v56 = vor.u32 %v9892_v45, %v9878_v2  ;;  %v6768_v45 = vld [vmem:[%s8204_s28 + $0xc0] sm:$0x11]  ;;  %13266 = vst [vmem:[#allocation192_spill] sm:$0xff] %v10435_v5 }
  0xfc   : > { %13219 = vst [vmem:[#allocation48_spill] sm:$0xff] %v10241_v9  ;;  %3935 = vrot.lane.b32.xlu1 %v10175_v16, %s8060_s11  ;;  %13221 = vst [vmem:[#allocation170_spill] sm:$0xff] %v10258_v55  ;;  %v10263_v46 = vrot.slane %v4486_v60, 4  ;;  %v10271_v28 = vsel %vm8258_vm2, %v4239_v42, %v4243_v7  ;;  %v4263_v42 = vrot.slane %v4261_v11, 5  ;;  %v13230_v60 = vld [vmem:[#allocation67_spill] sm:$0xff]  ;;  %v13234_v11 = vld [vmem:[#allocation125_spill] sm:$0xff] }
  0xfd   : > { %2546 = vmatprep.mubr.bf16.mxu1 %v13218_v19  ;;  %v4248_v19 = vor.u32 %v9859_v58, %v4243_v7  ;;  %3941 = vrot.lane.b32.xlu0 %v6789_v31, %s8060_s11  ;;  %v10265_v31 = vrot.slane %v4489_v50, 5  ;;  %13225 = vst [vmem:[#allocation174_spill] sm:$0xff] %v10273_v51  ;;  %v10289_v7 = vrot.slane %v4499_v23, 4  ;;  %v4285_v39 = vshll.u32 %v13234_v11, 16 }
  0xfe   : > { %13222 = vst [vmem:[#allocation171_spill] sm:$0xff] %v10263_v46  ;;  %v4259_v23 = vrot.slane %v4258_v12, 4 }
  0xff   : > { %v4249_v8 = vrot.slane %v4248_v19, 4  ;;  %13223 = vst [vmem:[#allocation172_spill] sm:$0xff] %v10265_v31  ;;  %v10267_v63 = vpop.permute.xlu0 %2707  ;;  %v13226_v19 = vcombine.low %v13212_v4, %v13213_v29  ;;  %13227 = vst [vmem:[#allocation175_spill] sm:$0xff] %v10289_v7  ;;  %v10303_v58 = vpop.permute.xlu1 %2705  ;;  %v13235_v29 = vld [vmem:[#allocation52_spill] sm:$0xff]  ;;  %v4519_v4 = vshrl.u32 %v6792_v22, 16  ;;  %v4287_v2 = vrot.slane %v4285_v39, 5 }
 0x100   : > { %13224 = vst [vmem:[#allocation173_spill] sm:$0xff] %v10267_v63  ;;  %3939 = vrot.lane.b32.xlu1 %v6787_v1, %s8060_s11  ;;  %v10292_v1 = vld [vmem:[%s8204_s28 + $0x190] sm:$0xff]  ;;  %13233 = vst [vmem:[#allocation177_spill] sm:$0xff] %v10303_v58  ;;  %v10331_v61 = vsel %vm8258_vm2, %v4259_v23, %v4263_v42  ;;  %v13322_v7 = vld [vmem:[#allocation66_spill] sm:$0xff] }
 0x101   : > { %v10282_v50 = vsel %vm8258_vm2, %v4249_v8, %v4253_v35  ;;  %1842 = vmatmul.mubr.bf16.gmra.mxu0 %v13226_v19  ;;  %3945 = vrot.lane.b32.xlu0 %v10248_v34, %s8060_s11  ;;  %13228 = vst [vmem:[#allocation176_spill] sm:$0xff] %v10292_v1  ;;  %v13229_v8 = vcombine.low %v13216_v30, %v13217_v20  ;;  %v4275_v35 = vshll.u32 %v9884_v37, 16  ;;  %v13236_v20 = vld [vmem:[#allocation57_spill] sm:$0xff]  ;;  %v10348_v23 = vrot.slane %v4519_v4, 4 }
 0x102   : > { %v13232_v19 = vcombine.high %v13230_v60, %v13231_v26  ;;  %v13237_v30 = vcombine.high %v13235_v29, %v13236_v20  ;;  %13239 = vst [vmem:[#allocation57_spill] sm:$0xff] %v10323_v18  ;;  %v4305_v4 = vshll.u32 %v6768_v45, 16  ;;  %v13249_v45 = vld [vmem:[#allocation74_spill] sm:$0xff] }
 0x103   : > { %2547 = vmatmul.mubr.bf16.gmra.mxu1 %v13229_v8  ;;  %v10314_v8 = vpop.permute.xlu0 %2711  ;;  %v4277_v10 = vrot.slane %v4275_v35, 5  ;;  %v10334_v37 = vpop.permute.xlu1 %2709  ;;  %13243 = vst [vmem:[#allocation181_spill] sm:$0xff] %v10348_v23  ;;  %v13247_v35 = vcombine.low %v13230_v60, %v13231_v26  ;;  %v10381_v26 = vld [vmem:[%s8204_s28 + $0x1a8] sm:$0xff] }
 0x104   : > { %1849 = vmatprep.mubr.bf16.mxu0 %v13232_v19  ;;  %2554 = vmatprep.mubr.bf16.mxu1 %v13237_v30  ;;  %13238 = vst [vmem:[#allocation52_spill] sm:$0xff] %v10314_v8  ;;  %v4273_v30 = vrot.slane %v4272_v56, 4  ;;  %13240 = vst [vmem:[#allocation178_spill] sm:$0xff] %v10334_v37  ;;  %v4292_v56 = vor.u32 %v13245_v49, %v4287_v2  ;;  %v10384_v49 = vld [vmem:[%s8204_s28 + $0x1c8] sm:$0xff]  ;;  %v10541_v8 = vld [vmem:[%s8204_s28 + $0x220] sm:$0xff] }
 0x105   : > { %3943 = vrot.lane.b32.xlu1 %v6790_v27, %s8060_s11  ;;  %3949 = vrot.lane.b32.xlu0 %v10292_v1, %s8060_s11  ;;  %v10337_v27 = vld [vmem:[%s8204_s28 + $0x198] sm:$0xff]  ;;  %v4282_v42 = vor.u32 %v9945_v38, %v4277_v10  ;;  %13253 = vst [vmem:[#allocation184_spill] sm:$0xff] %v10381_v26  ;;  %13254 = vst [vmem:[#allocation185_spill] sm:$0xff] %v10384_v49 }
 0x106   : > { %13241 = vst [vmem:[#allocation179_spill] sm:$0xff] %v10337_v27  ;;  %v10345_v12 = vsel %vm8258_vm2, %v4273_v30, %v4277_v10  ;;  %v10359_v30 = vld [vmem:[%s8204_s28 + $0x1b8] sm:$0xff]  ;;  %v4295_v10 = vshll.u32 %v9917_v59, 16  ;;  %v4293_v19 = vrot.slane %v4292_v56, 4  ;;  %13293 = vst [vmem:[#allocation205_spill] sm:$0xff] %v10541_v8 }
 0x107   : > { %13242 = vst [vmem:[#allocation180_spill] sm:$0xff] %v10345_v12  ;;  %v10350_v39 = vpop.permute.xlu0 %2715  ;;  %13246 = vst [vmem:[#allocation133_spill] sm:$0xff] %v10359_v30  ;;  %v4283_v38 = vrot.slane %v4282_v42, 4  ;;  %v13248_v42 = vcombine.low %v13235_v29, %v13236_v20  ;;  %v13250_v1 = vld [vmem:[#allocation81_spill] sm:$0xff]  ;;  %v4316_v29 = vor.u32 %v9956_v53, %v9954_v25  ;;  %v10407_v25 = vld [vmem:[%s8204_s28 + $0x1c0] sm:$0xff]  ;;  %v4319_v53 = vshll.u32 %v9942_v32, 16 }
 0x108   : > { %13244 = vst [vmem:[#allocation182_spill] sm:$0xff] %v10350_v39  ;;  %v13251_v15 = vcombine.high %v13249_v45, %v13250_v1  ;;  %v13256_v20 = vld [vmem:[#allocation53_spill] sm:$0xff]  ;;  %v13270_v9 = vcombine.low %v13249_v45, %v13250_v1  ;;  %v6773_v39 = vld [vmem:[%s8204_s28 + $0xe8] sm:$0x11] }
 0x109   : > { %3947 = vrot.lane.b32.xlu1 %v6792_v22, %s8060_s11  ;;  %1850 = vmatmul.mubr.bf16.gmra.mxu0 %v13247_v35  ;;  %v10377_v35 = vpop.permute.xlu1 %2713  ;;  %v10388_v56 = vsel %vm8258_vm2, %v4283_v38, %v4287_v2  ;;  %v4297_v22 = vrot.slane %v4295_v10, 5  ;;  %v4317_v11 = vrot.slane %v4316_v29, 4  ;;  %v13275_v45 = vld [vmem:[#allocation101_spill] sm:$0xff]  ;;  %v10513_v29 = vld [vmem:[%s8204_s28 + $0x210] sm:$0xff] }
 0x10a   : > { %3953 = vrot.lane.b32.xlu0 %v10323_v18, %s8060_s11  ;;  %1857 = vmatprep.mubr.bf16.mxu0 %v13251_v15  ;;  %13252 = vst [vmem:[#allocation183_spill] sm:$0xff] %v10377_v35  ;;  %13255 = vst [vmem:[#allocation186_spill] sm:$0xff] %v10388_v56  ;;  %v4321_v18 = vrot.slane %v4319_v53, 5 }
 0x10b   : > { %2555 = vmatmul.mubr.bf16.gmra.mxu1 %v13248_v42  ;;  %v13257_v42 = vld [vmem:[#allocation62_spill] sm:$0xff]  ;;  %v10395_v60 = vpop.permute.xlu0 %2719  ;;  %v10411_v38 = vsel %vm8258_vm2, %v4293_v19, %v4297_v22  ;;  %v4302_v10 = vor.u32 %v9958_v13, %v4297_v22  ;;  %13286 = vst [vmem:[#allocation200_spill] sm:$0xff] %v10513_v29 }
 0x10c   : > { %v13258_v15 = vcombine.high %v13256_v20, %v13257_v42  ;;  %13259 = vst [vmem:[#allocation53_spill] sm:$0xff] %v10395_v60  ;;  %13260 = vst [vmem:[#allocation62_spill] sm:$0xff] %v10407_v25  ;;  %v10469_v13 = vsel %vm8258_vm2, %v4317_v11, %v4321_v18  ;;  %v4326_v11 = vor.u32 %v9986_v40, %v4321_v18  ;;  %v10501_v40 = vld [vmem:[%s8204_s28 + $0x1f8] sm:$0xff] }
 0x10d   : > { %3951 = vrot.lane.b32.xlu1 %v10337_v27, %s8060_s11  ;;  %13261 = vst [vmem:[#allocation187_spill] sm:$0xff] %v10411_v38  ;;  %v10423_v27 = vpop.permute.xlu1 %2717  ;;  %v4303_v22 = vrot.slane %v4302_v10, 4  ;;  %13272 = vst [vmem:[#allocation195_spill] sm:$0xff] %v10469_v13  ;;  %v13274_v10 = vld [vmem:[#allocation86_spill] sm:$0xff] }
 0x10e   : > { %2562 = vmatprep.mubr.bf16.mxu1 %v13258_v15  ;;  %v4307_v15 = vrot.slane %v4305_v4, 5  ;;  %3957 = vrot.lane.b32.xlu0 %v10359_v30, %s8060_s11  ;;  %13263 = vst [vmem:[#allocation189_spill] sm:$0xff] %v10423_v27  ;;  %v10427_v4 = vld [vmem:[%s8204_s28 + $0x1d0] sm:$0xff]  ;;  %v4329_v30 = vshll.u32 %v9928_v24, 16  ;;  %v13276_v32 = vcombine.high %v13274_v10, %v13275_v45  ;;  %v4327_v18 = vrot.slane %v4326_v11, 4 }
 0x10f   : > { %13264 = vst [vmem:[#allocation190_spill] sm:$0xff] %v10427_v4  ;;  %v10430_v2 = vpop.permute.xlu0 %2723  ;;  %v1667_v53 = vpop.f32.mrf.mxu0 }
 0x110   : > { %13265 = vst [vmem:[#allocation191_spill] sm:$0xff] %v10430_v2  ;;  %v10446_v59 = vsel %vm8258_vm2, %v4303_v22, %v4307_v15  ;;  %v10461_v15 = vld [vmem:[%s8204_s28 + $0x1e8] sm:$0xff]  ;;  %v2372_v1 = vpop.f32.mrf.mxu1  ;;  %v4349_v2 = vshll.u32 %v6773_v39, 16 }
 0x111   : > { %3955 = vrot.lane.b32.xlu1 %v10381_v26, %s8060_s11  ;;  %13268 = vst [vmem:[#allocation193_spill] sm:$0xff] %v10446_v59  ;;  %1858 = vmatmul.mubr.bf16.gmra.mxu0 %v13270_v9  ;;  %13271 = vst [vmem:[#allocation194_spill] sm:$0xff] %v10461_v15  ;;  %v13273_v9 = vcombine.low %v13256_v20, %v13257_v42  ;;  %v10477_v19 = vpop.permute.xlu1 %2721  ;;  %v10485_v26 = vrot.slane %v4329_v30, 5  ;;  %v10491_v20 = vadd.f32 %v2372_v1, %v1667_v53  ;;  %v13280_v42 = vld [vmem:[#allocation58_spill] sm:$0xff]  ;;  %v13290_v1 = vld [vmem:[#allocation136_spill] sm:$0xff] }
 0x112   : > { %3961 = vrot.lane.b32.xlu0 %v10384_v49, %s8060_s11  ;;  %1865 = vmatprep.mubr.bf16.mxu0 %v13276_v32  ;;  %13277 = vst [vmem:[#allocation196_spill] sm:$0xff] %v10477_v19  ;;  %v10482_v49 = vld [vmem:[%s8204_s28 + $0x208] sm:$0xff]  ;;  %v1669_v32 = vpop.f32.mrf.mxu0  ;;  %v4339_v30 = vshll.u32 %v10011_v47, 16  ;;  %v2374_v55 = vpop.f32.mrf.mxu1 }
 0x113   : > { %2563 = vmatmul.mubr.bf16.gmra.mxu1 %v13273_v9  ;;  %13278 = vst [vmem:[#allocation197_spill] sm:$0xff] %v10482_v49  ;;  %13279 = vst [vmem:[#allocation198_spill] sm:$0xff] %v10491_v20  ;;  %v13281_v9 = vld [vmem:[#allocation68_spill] sm:$0xff]  ;;  %v10497_v22 = vpop.permute.xlu0 %2727  ;;  %v10510_v32 = vld [vmem:[%s8204_s28 + $0x218] sm:$0xff] }
 0x114   : > { %v13282_v63 = vcombine.high %v13280_v42, %v13281_v9  ;;  %13283 = vst [vmem:[#allocation58_spill] sm:$0xff] %v10497_v22  ;;  %13284 = vst [vmem:[#allocation68_spill] sm:$0xff] %v10501_v40  ;;  %v1670_v20 = vpop.f32.mrf.mxu0  ;;  %v2375_v53 = vpop.f32.mrf.mxu1  ;;  %v13299_v58 = vcombine.low %v13280_v42, %v13281_v9  ;;  %v13306_v9 = vld [vmem:[#allocation73_spill] sm:$0xff]  ;;  %v4373_v22 = vshll.u32 %v10021_v3, 16 }
 0x115   : > { %3959 = vrot.lane.b32.xlu1 %v10407_v25, %s8060_s11  ;;  %13285 = vst [vmem:[#allocation199_spill] sm:$0xff] %v10510_v32  ;;  %v10522_v25 = vld [vmem:[%s8204_s28 + $0x230] sm:$0xff]  ;;  %v10526_v11 = vpop.permute.xlu1 %2725  ;;  %v10536_v55 = vadd.f32 %v2375_v53, %v1670_v20  ;;  %v10555_v53 = vld [vmem:[%s8204_s28 + $0x240] sm:$0xff]  ;;  %v10567_v20 = vld [vmem:[%s8204_s28 + $0x238] sm:$0xff] }
 0x116   : > { %2570 = vmatprep.mubr.bf16.mxu1 %v13282_v63  ;;  %3965 = vrot.lane.b32.xlu0 %v10419_v0, %s8060_s11  ;;  %13287 = vst [vmem:[#allocation201_spill] sm:$0xff] %v10522_v25  ;;  %13288 = vst [vmem:[#allocation202_spill] sm:$0xff] %v10526_v11  ;;  %v10532_v0 = vsel %vm8258_vm2, %v4327_v18, %v10485_v26  ;;  %v4336_v63 = vor.u32 %v13290_v1, %v10485_v26  ;;  %v1672_v37 = vpop.f32.mrf.mxu0  ;;  %v4341_v18 = vrot.slane %v4339_v30, 5  ;;  %v2377_v23 = vpop.f32.mrf.mxu1  ;;  %v10570_v1 = vld [vmem:[%s8204_s28 + $0x258] sm:$0xff] }
 0x117   : > { %13289 = vst [vmem:[#allocation203_spill] sm:$0xff] %v10532_v0  ;;  %13291 = vst [vmem:[#allocation136_spill] sm:$0xff] %v10536_v55  ;;  %v10538_v57 = vpop.permute.xlu0 %2731  ;;  %v13295_v23 = vcombine.low %v13274_v10, %v13275_v45  ;;  %v13298_v55 = vld [vmem:[#allocation2_spill] sm:$0xff]  ;;  %v4351_v0 = vrot.slane %v4349_v2, 5 }
 0x118   : > { %13292 = vst [vmem:[#allocation204_spill] sm:$0xff] %v10538_v57  ;;  %13294 = vst [vmem:[#allocation206_spill] sm:$0xff] %v10555_v53  ;;  %v1675_v30 = vpop.f32.mrf.mxu0  ;;  %v13300_v45 = vld [vmem:[#allocation94_spill] sm:$0xff]  ;;  %v4337_v26 = vrot.slane %v4336_v63, 4  ;;  %v4346_v60 = vor.u32 %v10068_v48, %v4341_v18  ;;  %v4383_v48 = vshll.u32 %v10095_v41, 16 }
 0x119   : > { %3963 = vrot.lane.b32.xlu1 %v10427_v4, %s8060_s11  ;;  %1866 = vmatmul.mubr.bf16.gmra.mxu0 %v13295_v23  ;;  %13296 = vst [vmem:[#allocation207_spill] sm:$0xff] %v10567_v20  ;;  %13297 = vst [vmem:[#allocation208_spill] sm:$0xff] %v10570_v1  ;;  %v2883_v4 = vrot.slane %v13298_v55, 4  ;;  %v2380_v23 = vpop.f32.mrf.mxu1  ;;  %v13301_v10 = vld [vmem:[#allocation98_spill] sm:$0xff] }
 0x11a   : > { %3969 = vrot.lane.b32.xlu0 %v10435_v5, %s8060_s11  ;;  %v13302_v37 = vcombine.high %v13300_v45, %v13301_v10  ;;  %v10587_v5 = vpop.permute.xlu1 %2729  ;;  %v10591_v6 = vadd.f32 %v2380_v23, %v1675_v30  ;;  %v1677_v42 = vpop.f32.mrf.mxu0  ;;  %v10604_v23 = vld [vmem:[%s8204_s28 + $0x248] sm:$0xff] }
 0x11b   : > { %2571 = vmatmul.mubr.bf16.gmra.mxu1 %v13299_v58  ;;  %13303 = vst [vmem:[#allocation2_spill] sm:$0xff] %v10587_v5  ;;  %v13305_v58 = vld [vmem:[#allocation64_spill] sm:$0xff]  ;;  %v2382_v27 = vpop.f32.mrf.mxu1  ;;  %13309 = vst [vmem:[#allocation73_spill] sm:$0xff] %v10604_v23  ;;  %v13310_v42 = vld [vmem:[#allocation3_spill] sm:$0xff] }
 0x11c   : > { %1873 = vmatprep.mubr.bf16.mxu0 %v13302_v37  ;;  %13304 = vst [vmem:[#allocation209_spill] sm:$0xff] %v10591_v6  ;;  %v13307_v54 = vcombine.high %v13305_v58, %v13306_v9  ;;  %v10596_v37 = vpop.permute.xlu0 %2735  ;;  %v2884_v35 = vrot.slane %v13310_v42, 4  ;;  %v1678_v63 = vpop.f32.mrf.mxu0  ;;  %v13311_v27 = vld [vmem:[#allocation65_spill] sm:$0xff]  ;;  %v10618_v30 = vld [vmem:[%s8204_s28 + $0x268] sm:$0xff]  ;;  %v13314_v6 = vld [vmem:[#allocation4_spill] sm:$0xff] }
 0x11d   : > { %13308 = vst [vmem:[#allocation64_spill] sm:$0xff] %v10596_v37  ;;  %3967 = vrot.lane.b32.xlu1 %v10461_v15, %s8060_s11  ;;  %v13312_v39 = vrot.slane %v13311_v27, 4  ;;  %13313 = vst [vmem:[#allocation3_spill] sm:$0xff] %v10618_v30  ;;  %v2885_v19 = vrot.slane %v13314_v6, 4  ;;  %v2383_v42 = vpop.f32.mrf.mxu1  ;;  %v10633_v6 = vsel %vm8258_vm2, %v4337_v26, %v4341_v18  ;;  %v13319_v18 = vld [vmem:[#allocation71_spill] sm:$0xff]  ;;  %v10724_v37 = vld [vmem:[%s10638_s25 + $0x10] sm:$0xff] }
 0x11e   : > { %2578 = vmatprep.mubr.bf16.mxu1 %v13307_v54  ;;  %v4363_v54 = vshll.u32 %v10030_v44, 16  ;;  %3973 = vrot.lane.b32.xlu0 %v10482_v49, %s8060_s11  ;;  %v10621_v15 = vpop.permute.xlu1 %2733  ;;  %v10627_v49 = vadd.f32 %v2383_v42, %v1678_v63  ;;  %v10645_v42 = vld [vmem:[%s8204_s28 + $0x260] sm:$0xff] }
 0x11f   : > { %v10615_v34 = vmax.bf16 %v2883_v4, %v13312_v39  ;;  %13315 = vst [vmem:[#allocation65_spill] sm:$0xff] %v10621_v15  ;;  %v1680_v4 = vpop.f32.mrf.mxu0  ;;  %v4347_v39 = vrot.slane %v4346_v60, 4  ;;  %v2385_v55 = vpop.f32.mrf.mxu1  ;;  %13318 = vst [vmem:[#allocation211_spill] sm:$0xff] %v10645_v42  ;;  %v13320_v60 = vrot.slane %v13319_v18, 4  ;;  %v6778_v18 = vld [vmem:[%s8204_s28 + $0x110] sm:$0x11] }
 0x120   : > { %13316 = vst [vmem:[#allocation4_spill] sm:$0xff] %v10627_v49  ;;  %v10629_v27 = vpop.permute.xlu0 %2739  ;;  %v10651_v26 = vrot.slane %v4363_v54, 5  ;;  %v13321_v55 = vcombine.low %v13300_v45, %v13301_v10  ;;  %v13323_v49 = vrot.slane %v13322_v7, 4  ;;  %v13325_v10 = vld [vmem:[#allocation104_spill] sm:$0xff]  ;;  %v10677_v7 = vld [vmem:[%s10638_s25] sm:$0xff]  ;;  %v4385_v54 = vrot.slane %v4383_v48, 5 }
 0x121   : > { %13317 = vst [vmem:[#allocation210_spill] sm:$0xff] %v10629_v27  ;;  %3971 = vrot.lane.b32.xlu1 %v10501_v40, %s8060_s11  ;;  %v10649_v2 = vmax.bf16 %v2884_v35, %v13320_v60  ;;  %v1683_v4 = vpop.f32.mrf.mxu0  ;;  %v2388_v60 = vpop.f32.mrf.mxu1  ;;  %v13326_v45 = vld [vmem:[#allocation28_spill] sm:$0xff]  ;;  %13329 = vst [vmem:[#allocation66_spill] sm:$0xff] %v10677_v7  ;;  %v10680_v35 = vrot.slane %v4373_v22, 5  ;;  %v13337_v22 = vld [vmem:[#allocation147_spill] sm:$0xff] }
 0x122   : > { %1874 = vmatmul.mubr.bf16.gmra.mxu0 %v13321_v55  ;;  %3977 = vrot.lane.b32.xlu0 %v10510_v32, %s8060_s11  ;;  %v10661_v57 = vmax.bf16 %v2885_v19, %v13323_v49  ;;  %v13324_v55 = vcombine.low %v13305_v58, %v13306_v9  ;;  %v13327_v11 = vcombine.high %v13325_v10, %v13326_v45  ;;  %v10674_v63 = vpop.permute.xlu1 %2737  ;;  %v13330_v49 = vld [vmem:[#allocation5_spill] sm:$0xff]  ;;  %v4393_v32 = vshll.u32 %v6778_v18, 16  ;;  %v13332_v58 = vld [vmem:[#allocation70_spill] sm:$0xff]  ;;  %v13333_v9 = vld [vmem:[#allocation79_spill] sm:$0xff] }
 0x123   : > { %13328 = vst [vmem:[#allocation71_spill] sm:$0xff] %v10674_v63  ;;  %v2886_v19 = vrot.slane %v13330_v49, 4  ;;  %v10682_v40 = vadd.f32 %v2388_v60, %v1683_v4  ;;  %v1685_v47 = vpop.f32.mrf.mxu0  ;;  %v13336_v49 = vld [vmem:[#allocation145_spill] sm:$0xff]  ;;  %v2390_v48 = vpop.f32.mrf.mxu1  ;;  %v10700_v4 = vld [vmem:[%s8204_s28 + $0x270] sm:$0xff]  ;;  %v13339_v18 = vld [vmem:[#allocation6_spill] sm:$0xff]  ;;  %v13352_v56 = vcombine.low %v13325_v10, %v13326_v45 }
 0x124   : > { %2579 = vmatmul.mubr.bf16.gmra.mxu1 %v13324_v55  ;;  %1881 = vmatprep.mubr.bf16.mxu0 %v13327_v11  ;;  %v13334_v55 = vcombine.high %v13332_v58, %v13333_v9  ;;  %v10687_v24 = vpop.permute.xlu0 %2743  ;;  %v10691_v11 = vsel %vm8258_vm2, %v4347_v39, %v4351_v0  ;;  %v4360_v46 = vor.u32 %v13337_v22, %v13336_v49  ;;  %v2887_v60 = vrot.slane %v13339_v18, 4  ;;  %v13341_v39 = vld [vmem:[#allocation149_spill] sm:$0xff]  ;;  %v13342_v47 = vld [vmem:[#allocation159_spill] sm:$0xff]  ;;  %v13344_v49 = vld [vmem:[#allocation72_spill] sm:$0xff] }
 0x125   : > { %13331 = vst [vmem:[#allocation5_spill] sm:$0xff] %v10682_v40  ;;  %13335 = vst [vmem:[#allocation70_spill] sm:$0xff] %v10687_v24  ;;  %3975 = vrot.lane.b32.xlu1 %v10513_v29, %s8060_s11  ;;  %v4380_v31 = vor.u32 %v13341_v39, %v10680_v35  ;;  %v1686_v40 = vpop.f32.mrf.mxu0  ;;  %v4390_v29 = vor.u32 %v13342_v47, %v4385_v54  ;;  %v2391_v59 = vpop.f32.mrf.mxu1  ;;  %v13345_v5 = vrot.slane %v13344_v49, 4  ;;  %v13349_v49 = vld [vmem:[#allocation77_spill] sm:$0xff]  ;;  %v10739_v39 = vld [vmem:[%s10638_s25 + $0x8] sm:$0xff] }
 0x126   : > { %2586 = vmatprep.mubr.bf16.mxu1 %v13334_v55  ;;  %13338 = vst [vmem:[#allocation79_spill] sm:$0xff] %v10700_v4  ;;  %v13340_v55 = vld [vmem:[#allocation150_spill] sm:$0xff]  ;;  %3981 = vrot.lane.b32.xlu0 %v10522_v25, %s8060_s11  ;;  %v10713_v18 = vpop.permute.xlu1 %2741  ;;  %13346 = vst [vmem:[#allocation147_spill] sm:$0xff] %v10724_v37  ;;  %v4395_v25 = vrot.slane %v4393_v32, 5  ;;  %v10726_v48 = vadd.f32 %v2391_v59, %v1686_v40  ;;  %v13359_v45 = vld [vmem:[#allocation7_spill] sm:$0xff] }
 0x127   : > { %v4370_v0 = vor.u32 %v13340_v55, %v10651_v26  ;;  %13343 = vst [vmem:[#allocation145_spill] sm:$0xff] %v10713_v18  ;;  %v10721_v22 = vmax.bf16 %v2886_v19, %v13345_v5  ;;  %v1688_v47 = vpop.f32.mrf.mxu0  ;;  %v4361_v55 = vrot.slane %v4360_v46, 4  ;;  %v2393_v38 = vpop.f32.mrf.mxu1  ;;  %v13350_v5 = vrot.slane %v13349_v49, 4  ;;  %13351 = vst [vmem:[#allocation149_spill] sm:$0xff] %v10739_v39  ;;  %v13353_v49 = vld [vmem:[#allocation8_spill] sm:$0xff] }
 0x128   : > { %13347 = vst [vmem:[#allocation6_spill] sm:$0xff] %v10726_v48  ;;  %v10728_v13 = vpop.permute.xlu0 %2747  ;;  %v4381_v40 = vrot.slane %v4380_v31, 4  ;;  %v4391_v32 = vrot.slane %v4390_v29, 4  ;;  %v13354_v31 = vcombine.low %v13332_v58, %v13333_v9  ;;  %v13355_v29 = vld [vmem:[#allocation110_spill] sm:$0xff]  ;;  %v2888_v15 = vrot.slane %v13359_v45, 4  ;;  %v13362_v38 = vld [vmem:[#allocation85_spill] sm:$0xff] }
 0x129   : > { %13348 = vst [vmem:[#allocation150_spill] sm:$0xff] %v10728_v13  ;;  %3979 = vrot.lane.b32.xlu1 %v10541_v8, %s8060_s11  ;;  %v10736_v19 = vmax.bf16 %v2887_v60, %v13350_v5  ;;  %v4371_v59 = vrot.slane %v4370_v0, 4  ;;  %v1691_v47 = vpop.f32.mrf.mxu0  ;;  %v2889_v60 = vrot.slane %v13353_v49, 4  ;;  %v4407_v5 = vshll.u32 %v10112_v33, 16  ;;  %v2396_v51 = vpop.f32.mrf.mxu1  ;;  %v13356_v0 = vld [vmem:[#allocation114_spill] sm:$0xff] }
 0x12a   : > { %1882 = vmatmul.mubr.bf16.gmra.mxu0 %v13352_v56  ;;  %3985 = vrot.lane.b32.xlu0 %v10555_v53, %s8060_s11  ;;  %v13357_v48 = vcombine.high %v13355_v29, %v13356_v0  ;;  %v10757_v46 = vpop.permute.xlu1 %2745  ;;  %v10762_v49 = vsel %vm8258_vm2, %v4381_v40, %v4385_v54  ;;  %v10766_v33 = vsel %vm8258_vm2, %v4391_v32, %v4395_v25  ;;  %v13366_v32 = vld [vmem:[#allocation10_spill] sm:$0xff] }
 0x12b   : > { %13358 = vst [vmem:[#allocation159_spill] sm:$0xff] %v10757_v46  ;;  %v10768_v58 = vadd.f32 %v2396_v51, %v1691_v47  ;;  %v1693_v9 = vpop.f32.mrf.mxu0  ;;  %v10780_v54 = vsel %vm8258_vm2, %v4361_v55, %v10651_v26  ;;  %v2398_v51 = vpop.f32.mrf.mxu1  ;;  %v10789_v40 = vsel %vm8258_vm2, %v4371_v59, %v10680_v35  ;;  %v2891_v47 = vrot.slane %v13366_v32, 4  ;;  %v13372_v35 = vld [vmem:[#allocation9_spill] sm:$0xff]  ;;  %v13429_v46 = vld [vmem:[#allocation20_spill] sm:$0xff] }
 0x12c   : > { %2587 = vmatmul.mubr.bf16.gmra.mxu1 %v13354_v31  ;;  %1889 = vmatprep.mubr.bf16.mxu0 %v13357_v48  ;;  %v13361_v31 = vld [vmem:[#allocation75_spill] sm:$0xff]  ;;  %v10773_v56 = vpop.permute.xlu0 %2751  ;;  %v13370_v51 = vld [vmem:[#allocation82_spill] sm:$0xff]  ;;  %v2890_v59 = vrot.slane %v13372_v35, 4  ;;  %v4409_v10 = vrot.slane %v4407_v5, 5 }
 0x12d   : > { %13360 = vst [vmem:[#allocation72_spill] sm:$0xff] %v10768_v58  ;;  %v13363_v48 = vcombine.high %v13361_v31, %v13362_v38  ;;  %13364 = vst [vmem:[#allocation77_spill] sm:$0xff] %v10773_v56  ;;  %3983 = vrot.lane.b32.xlu1 %v10567_v20, %s8060_s11  ;;  %v13367_v9 = vld [vmem:[#allocation155_spill] sm:$0xff]  ;;  %v13369_v58 = vld [vmem:[#allocation154_spill] sm:$0xff]  ;;  %v1694_v55 = vpop.f32.mrf.mxu0  ;;  %v13371_v25 = vrot.slane %v13370_v51, 4  ;;  %v2399_v32 = vpop.f32.mrf.mxu1  ;;  %v4427_v51 = vshll.u32 %v10166_v21, 16 }
 0x12e   : > { %v4417_v26 = vshll.u32 %v13369_v58, 16  ;;  %3989 = vrot.lane.b32.xlu0 %v10570_v1, %s8060_s11  ;;  %v13374_v58 = vld [vmem:[#allocation78_spill] sm:$0xff] }
 0x12f   : > { %2594 = vmatprep.mubr.bf16.mxu1 %v13363_v48  ;;  %v13368_v48 = vld [vmem:[#allocation157_spill] sm:$0xff]  ;;  %v10799_v53 = vmax.bf16 %v2889_v60, %v13371_v25  ;;  %v10812_v60 = vadd.f32 %v2399_v32, %v1694_v55  ;;  %v1696_v25 = vpop.f32.mrf.mxu0  ;;  %v2401_v8 = vpop.f32.mrf.mxu1  ;;  %v4414_v32 = vor.u32 %v10161_v17, %v4409_v10 }
 0x130   : > { %v4404_v45 = vor.u32 %v13368_v48, %v13367_v9  ;;  %v10805_v9 = vpop.permute.xlu1 %2749  ;;  %v13375_v48 = vrot.slane %v13374_v58, 4  ;;  %v3878_v44 = vpop.permute.xlu0 %3877  ;;  %v4419_v58 = vrot.slane %v4417_v26, 5  ;;  %v13379_v25 = vcombine.low %v13355_v29, %v13356_v0  ;;  %v13380_v8 = vld [vmem:[#allocation84_spill] sm:$0xff]  ;;  %v13393_v0 = vld [vmem:[#allocation11_spill] sm:$0xff] }
 0x131   : > { %13373 = vst [vmem:[#allocation8_spill] sm:$0xff] %v10805_v9  ;;  %13376 = vst [vmem:[#allocation7_spill] sm:$0xff] %v10812_v60  ;;  %3987 = vrot.lane.b32.xlu1 %v10604_v23, %s8060_s11  ;;  %v13381_v35 = vrot.slane %v13380_v8, 4  ;;  %v2404_v17 = vpop.f32.mrf.mxu1  ;;  %v13383_v26 = vcombine.low %v13361_v31, %v13362_v38  ;;  %v13390_v31 = vld [vmem:[#allocation80_spill] sm:$0xff]  ;;  %v2892_v24 = vrot.slane %v13393_v0, 4 }
 0x132   : > { %v10809_v56 = vmax.bf16 %v2888_v15, %v13375_v48  ;;  %v4405_v1 = vrot.slane %v4404_v45, 4  ;;  %v4069_v15 = vmax.bf16 %v3878_v44, %v10615_v34  ;;  %v13377_v45 = vld [vmem:[#allocation88_spill] sm:$0xff]  ;;  %v1699_v48 = vpop.f32.mrf.mxu0  ;;  %1890 = vmatmul.mubr.bf16.gmra.mxu0 %v13379_v25  ;;  %3993 = vrot.lane.b32.xlu0 %v10618_v30, %s8060_s11  ;;  %v13385_v25 = vld [vmem:[#allocation35_spill] sm:$0xff]  ;;  %v6783_v8 = vld [vmem:[%s8204_s28 + $0x138] sm:$0x11] }
 0x133   : > { %v13378_v21 = vrot.slane %v13377_v45, 4  ;;  %v10835_v44 = vmax.bf16 %v2890_v59, %v13381_v35  ;;  %v13382_v34 = vld [vmem:[#allocation12_spill] sm:$0xff]  ;;  %v4429_v45 = vrot.slane %v4427_v51, 5  ;;  %v4415_v35 = vrot.slane %v4414_v32, 4  ;;  %v13388_v51 = vld [vmem:[#allocation45_spill] sm:$0xff]  ;;  %v13394_v32 = vld [vmem:[#allocation138_spill] sm:$0xff] }
 0x134   : > { %2595 = vmatmul.mubr.bf16.gmra.mxu1 %v13383_v26  ;;  %v10844_v20 = vpop.permute.xlu1 %2753  ;;  %v10850_v59 = vsel %vm8258_vm2, %v4405_v1, %v4409_v10  ;;  %v10853_v60 = vadd.f32 %v2404_v17, %v1699_v48  ;;  %v1701_v38 = vpop.f32.mrf.mxu0  ;;  %v13391_v26 = vld [vmem:[#allocation89_spill] sm:$0xff]  ;;  %v5639_v30 = vmax.bf16 %v13394_v32, %v4069_v15  ;;  %v13395_v17 = vld [vmem:[#allocation14_spill] sm:$0xff]  ;;  %v13396_v0 = vld [vmem:[#allocation92_spill] sm:$0xff] }
 0x135   : > { %v10824_v55 = vmax.bf16 %v2891_v47, %v13378_v21  ;;  %v2893_v47 = vrot.slane %v13382_v34, 4  ;;  %v13384_v21 = vld [vmem:[#allocation117_spill] sm:$0xff]  ;;  %13387 = vst [vmem:[#allocation75_spill] sm:$0xff] %v10844_v20  ;;  %v4424_v34 = vor.u32 %v13388_v51, %v4419_v58  ;;  %v13392_v18 = vcombine.high %v13390_v31, %v13391_v26  ;;  %v3882_v20 = vpop.permute.xlu0 %3881  ;;  %v2406_v1 = vpop.f32.mrf.mxu1  ;;  %3991 = vrot.lane.b32.xlu1 %v10645_v42, %s8060_s11 }
 0x136   : > { %v13386_v5 = vcombine.high %v13384_v21, %v13385_v25  ;;  %13389 = vst [vmem:[#allocation85_spill] sm:$0xff] %v10853_v60  ;;  %v4434_v10 = vor.u32 %v10200_v52, %v4429_v45  ;;  %v4071_v48 = vmax.bf16 %v3882_v20, %v10661_v57  ;;  %v2895_v51 = vrot.slane %v13395_v17, 4  ;;  %v1702_v38 = vpop.f32.mrf.mxu0  ;;  %3997 = vrot.lane.b32.xlu0 %v10677_v7, %s8060_s11  ;;  %v10882_v60 = vld [vmem:[%s8204_s28 + $0x100] sm:$0xff]  ;;  %v13400_v7 = vld [vmem:[#allocation16_spill] sm:$0xff]  ;;  %v13402_v57 = vld [vmem:[#allocation91_spill] sm:$0xff] }
 0x137   : > { %2602 = vmatprep.mubr.bf16.mxu1 %v13392_v18  ;;  %v10869_v18 = vsel %vm8258_vm2, %v4415_v35, %v4419_v58  ;;  %v13397_v52 = vrot.slane %v13396_v0, 4  ;;  %v4425_v20 = vrot.slane %v4424_v34, 4  ;;  %v2407_v17 = vpop.f32.mrf.mxu1  ;;  %13398 = vst [vmem:[#allocation10_spill] sm:$0xff] %v10882_v60  ;;  %v13399_v35 = vld [vmem:[#allocation13_spill] sm:$0xff]  ;;  %v2897_v0 = vrot.slane %v13400_v7, 4  ;;  %v13404_v60 = vld [vmem:[#allocation144_spill] sm:$0xff] }
 0x138   : > { %1897 = vmatprep.mubr.bf16.mxu0 %v13386_v5  ;;  %v3880_v5 = vpop.permute.xlu1 %3879  ;;  %v2894_v13 = vrot.slane %v13399_v35, 4  ;;  %v1704_v42 = vpop.f32.mrf.mxu0  ;;  %v13403_v34 = vrot.slane %v13402_v57, 4  ;;  %v4435_v29 = vrot.slane %v4434_v10, 4  ;;  %v5703_v58 = vunpack.c.l.bf16 %v5639_v30  ;;  %v13405_v7 = vld [vmem:[#allocation97_spill] sm:$0xff]  ;;  %v13410_v57 = vld [vmem:[#allocation34_spill] sm:$0xff] }
 0x139   : > { %v10875_v1 = vmax.bf16 %v2893_v47, %v13397_v52  ;;  %v4437_v47 = vshll.u32 %v6783_v8, 16  ;;  %v10888_v52 = vadd.f32 %v2407_v17, %v1702_v38  ;;  %v4070_v15 = vmax.bf16 %v3880_v5, %v10649_v2  ;;  %v3886_v23 = vpop.permute.xlu0 %3885  ;;  %v2409_v3 = vpop.f32.mrf.mxu1  ;;  %3995 = vrot.lane.b32.xlu1 %v10700_v4, %s8060_s11  ;;  %v13411_v17 = vld [vmem:[#allocation126_spill] sm:$0xff] }
 0x13a   : > { %v10893_v63 = vmax.bf16 %v2892_v24, %v13403_v34  ;;  %v5641_v35 = vmax.bf16 %v13404_v60, %v4071_v48  ;;  %v13406_v8 = vrot.slane %v13405_v7, 4  ;;  %v1707_v2 = vpop.f32.mrf.mxu0  ;;  %v13407_v5 = vcombine.low %v13384_v21, %v13385_v25  ;;  %v13408_v24 = vld [vmem:[#allocation38_spill] sm:$0xff]  ;;  %4001 = vrot.lane.b32.xlu0 %v10724_v37, %s8060_s11  ;;  %v13413_v7 = vld [vmem:[#allocation99_spill] sm:$0xff]  ;;  %v13430_v25 = vld [vmem:[#allocation161_spill] sm:$0xff] }
 0x13b   : > { %13401 = vst [vmem:[#allocation155_spill] sm:$0xff] %v10888_v52  ;;  %v5640_v10 = vmax.bf16 %v13408_v24, %v4070_v15  ;;  %v4073_v3 = vmax.bf16 %v3886_v23, %v10736_v19  ;;  %v10912_v30 = vsel %vm8258_vm2, %v4425_v20, %v4429_v45  ;;  %v4439_v48 = vrot.slane %v4437_v47, 5  ;;  %v2412_v38 = vpop.f32.mrf.mxu1  ;;  %v13417_v45 = vld [vmem:[#allocation15_spill] sm:$0xff]  ;;  %v13418_v47 = vld [vmem:[#allocation18_spill] sm:$0xff] }
 0x13c   : > { %v10901_v42 = vmax.bf16 %v2895_v51, %v13406_v8  ;;  %1898 = vmatmul.mubr.bf16.gmra.mxu0 %v13407_v5  ;;  %v13409_v51 = vcombine.low %v13390_v31, %v13391_v26  ;;  %v13412_v34 = vcombine.high %v13410_v57, %v13411_v17  ;;  %v3884_v15 = vpop.permute.xlu1 %3883  ;;  %v13414_v23 = vrot.slane %v13413_v7, 4  ;;  %v13415_v8 = vld [vmem:[#allocation103_spill] sm:$0xff]  ;;  %v1709_v31 = vpop.f32.mrf.mxu0 }
 0x13d   : > { %v13416_v5 = vrot.slane %v13415_v8, 4  ;;  %v2896_v20 = vrot.slane %v13417_v45, 4  ;;  %v2899_v52 = vrot.slane %v13418_v47, 4  ;;  %v10930_v37 = vadd.f32 %v2412_v38, %v1707_v2  ;;  %v13420_v26 = vld [vmem:[#allocation87_spill] sm:$0xff]  ;;  %v3890_v7 = vpop.permute.xlu0 %3889  ;;  %3999 = vrot.lane.b32.xlu1 %v10739_v39, %s8060_s11  ;;  %v13425_v45 = vld [vmem:[#allocation42_spill] sm:$0xff]  ;;  %v13428_v2 = vld [vmem:[#allocation17_spill] sm:$0xff] }
 0x13e   : > { %2603 = vmatmul.mubr.bf16.gmra.mxu1 %v13409_v51  ;;  %1905 = vmatprep.mubr.bf16.mxu0 %v13412_v34  ;;  %v10922_v19 = vmax.bf16 %v2894_v13, %v13414_v23  ;;  %v13421_v51 = vld [vmem:[#allocation93_spill] sm:$0xff]  ;;  %v5704_v34 = vunpack.c.l.bf16 %v5640_v10  ;;  %v4072_v13 = vmax.bf16 %v3884_v15, %v10721_v22  ;;  %v2414_v23 = vpop.f32.mrf.mxu1  ;;  %v5705_v8 = vunpack.c.l.bf16 %v5641_v35  ;;  %v1710_v38 = vpop.f32.mrf.mxu0  ;;  %v13424_v15 = vld [vmem:[#allocation152_spill] sm:$0xff] }
 0x13f   : > { %v10926_v27 = vmax.bf16 %v2897_v0, %v13416_v5  ;;  %13419 = vst [vmem:[#allocation157_spill] sm:$0xff] %v10930_v37  ;;  %v13422_v4 = vcombine.high %v13420_v26, %v13421_v51  ;;  %v10938_v0 = vsel %vm8258_vm2, %v4435_v29, %v4439_v48  ;;  %v4451_v10 = vshll.u32 %v10175_v16, 16  ;;  %v507_v35 = vld [vmem:[%s10638_s25 + $0x18] sm:$0xff]  ;;  %v13426_v23 = vld [vmem:[#allocation106_spill] sm:$0xff] }
 0x140   : > { %13423 = vst [vmem:[#allocation154_spill] sm:$0xff] %v10938_v0  ;;  %v7614_v22 = vpack.i.bf16 %v5704_v34, %v5703_v58  ;;  %v5643_v5 = vmax.bf16 %v13424_v15, %v4073_v3  ;;  %v5642_v29 = vmax.bf16 %v13425_v45, %v4072_v13  ;;  %v4075_v48 = vmax.bf16 %v3890_v7, %v10799_v53  ;;  %v2415_v47 = vpop.f32.mrf.mxu1  ;;  %v3888_v31 = vpop.permute.xlu1 %3887  ;;  %v13431_v58 = vld [vmem:[#allocation164_spill] sm:$0xff] }
 0x141   : > { %2610 = vmatprep.mubr.bf16.mxu1 %v13422_v4  ;;  %v13427_v37 = vrot.slane %v13426_v23, 4  ;;  %v2898_v4 = vrot.slane %v13428_v2, 4  ;;  %v2901_v16 = vrot.slane %v13429_v46, 4  ;;  %v4448_v34 = vor.u32 %v13431_v58, %v13430_v25  ;;  %v1712_v13 = vpop.f32.mrf.mxu0  ;;  %v3894_v7 = vpop.permute.xlu0 %3893  ;;  %v13433_v23 = vld [vmem:[#allocation107_spill] sm:$0xff]  ;;  %4003 = vrot.lane.b32.xlu1 %v507_v35, %s8060_s11 }
 0x142   : > { %v10959_v3 = vadd.f32 %v2415_v47, %v1710_v38  ;;  %v5706_v21 = vunpack.c.l.bf16 %v5642_v29  ;;  %v4074_v53 = vmax.bf16 %v3888_v31, %v10809_v56  ;;  %7615 = vrot.lane.b32.xlu0 %v7614_v22, %s8060_s11  ;;  %v2417_v41 = vpop.f32.mrf.mxu1  ;;  %v4077_v46 = vmax.bf16 %v3894_v7, %v10824_v55  ;;  %v13435_v2 = vld [vmem:[#allocation19_spill] sm:$0xff]  ;;  %v7967_v47 = vld [vmem:[%s8204_s28 + $0x150] sm:$0xff]  ;;  %v13437_v13 = vld [vmem:[#allocation162_spill] sm:$0xff] }
 0x143   : > { %v10953_v39 = vmax.bf16 %v2896_v20, %v13427_v37  ;;  %v13434_v37 = vrot.slane %v13433_v23, 4  ;;  %v2900_v25 = vrot.slane %v13435_v2, 4  ;;  %v4453_v38 = vrot.slane %v4451_v10, 5  ;;  %v1715_v29 = vpop.f32.mrf.mxu0  ;;  %v13438_v23 = vld [vmem:[#allocation158_spill] sm:$0xff]  ;;  %v13441_v7 = vld [vmem:[#allocation111_spill] sm:$0xff] }
 0x144   : > { %13432 = vst [vmem:[#allocation82_spill] sm:$0xff] %v10959_v3  ;;  %v4461_v58 = vshll.u32 %v7967_v47, 16  ;;  %v13436_v56 = vcombine.low %v13410_v57, %v13411_v17  ;;  %v5707_v22 = vunpack.c.l.bf16 %v5643_v5  ;;  %v7619_v31 = vpack.i.bf16 %v5706_v21, %v5705_v8  ;;  %v3892_v35 = vpop.permute.xlu1 %3891  ;;  %v13443_v5 = vld [vmem:[#allocation113_spill] sm:$0xff] }
 0x145   : > { %v10965_v20 = vmax.bf16 %v2899_v52, %v13434_v37  ;;  %v5645_v52 = vmax.bf16 %v13437_v13, %v4075_v48  ;;  %v5644_v41 = vmax.bf16 %v13438_v23, %v4074_v53  ;;  %v2420_v37 = vpop.f32.mrf.mxu1  ;;  %v13439_v55 = vcombine.low %v13420_v26, %v13421_v51  ;;  %v13445_v48 = vld [vmem:[#allocation22_spill] sm:$0xff]  ;;  %v1717_v26 = vpop.f32.mrf.mxu0 }
 0x146   : > { %1906 = vmatmul.mubr.bf16.gmra.mxu0 %v13436_v56  ;;  %v13440_v10 = vcombine.high %v9904_v36, %v10064_v14  ;;  %v13442_v2 = vrot.slane %v13441_v7, 4  ;;  %v13444_v21 = vrot.slane %v13443_v5, 4  ;;  %v2903_v53 = vrot.slane %v13445_v48, 4  ;;  %v13447_v51 = vld [vmem:[#allocation90_spill] sm:$0xff]  ;;  %v3898_v7 = vpop.permute.xlu0 %3897  ;;  %7620 = vrot.lane.b32.xlu1 %v7619_v31, %s8060_s11  ;;  %v13452_v5 = vld [vmem:[#allocation167_spill] sm:$0xff]  ;;  %v13453_v26 = vld [vmem:[#allocation168_spill] sm:$0xff] }
 0x147   : > { %2611 = vmatmul.mubr.bf16.gmra.mxu1 %v13439_v55  ;;  %v4449_v56 = vrot.slane %v4448_v34, 4  ;;  %v10991_v3 = vadd.f32 %v2420_v37, %v1715_v29  ;;  %v13448_v55 = vld [vmem:[#allocation100_spill] sm:$0xff]  ;;  %v10997_v57 = vmax.bf16 %v10234_v62, %v4077_v46  ;;  %v13450_v34 = vld [vmem:[#allocation119_spill] sm:$0xff]  ;;  %v11007_v48 = vrot.slane %v4461_v58, 5 }
 0x148   : > { %1913 = vmatprep.mubr.bf16.mxu0 %v13440_v10  ;;  %v10984_v47 = vmax.bf16 %v2898_v4, %v13442_v2  ;;  %v10988_v8 = vmax.bf16 %v2901_v16, %v13444_v21  ;;  %v13449_v17 = vcombine.high %v13447_v51, %v13448_v55  ;;  %v5708_v10 = vunpack.c.l.bf16 %v5644_v41  ;;  %v2422_v2 = vpop.f32.mrf.mxu1  ;;  %v3896_v9 = vpop.permute.xlu1 %3895  ;;  %v13455_v31 = vld [vmem:[#allocation120_spill] sm:$0xff] }
 0x149   : > { %13446 = vst [vmem:[#allocation9_spill] sm:$0xff] %v10991_v3  ;;  %v4076_v4 = vmax.bf16 %v3892_v35, %v10835_v44  ;;  %v4079_v16 = vmax.bf16 %v3898_v7, %v10875_v1  ;;  %v13451_v29 = vrot.slane %v13450_v34, 4  ;;  %v4458_v21 = vor.u32 %v13452_v5, %v4453_v38  ;;  %v13454_v44 = vld [vmem:[#allocation21_spill] sm:$0xff] }
 0x14a   : > { %2618 = vmatprep.mubr.bf16.mxu1 %v13449_v17  ;;  %v1718_v17 = vpop.f32.mrf.mxu0  ;;  %v5709_v41 = vunpack.c.l.bf16 %v5645_v52  ;;  %v7624_v46 = vpack.i.bf16 %v5708_v10, %v5707_v22  ;;  %v2902_v35 = vrot.slane %v13454_v44, 4  ;;  %v2423_v2 = vpop.f32.mrf.mxu1  ;;  %v13456_v0 = vrot.slane %v13455_v31, 4  ;;  %v13462_v31 = vld [vmem:[#allocation96_spill] sm:$0xff] }
 0x14b   : > { %v11004_v37 = vmax.bf16 %v2900_v25, %v13451_v29  ;;  %v5646_v3 = vmax.bf16 %v13453_v26, %v4076_v4  ;;  %v13457_v25 = vld [vmem:[#allocation24_spill] sm:$0xff]  ;;  %v11018_v58 = vsel %vm8258_vm2, %v4449_v56, %v4453_v38  ;;  %v4459_v34 = vrot.slane %v4458_v21, 4  ;;  %v3902_v5 = vpop.permute.xlu0 %3901  ;;  %v7968_v56 = vld [vmem:[%s8204_s28 + $0x158] sm:$0xff] }
 0x14c   : > { %v11013_v1 = vmax.bf16 %v2903_v53, %v13456_v0  ;;  %v2905_v7 = vrot.slane %v13457_v25, 4  ;;  %v11020_v52 = vadd.f32 %v2423_v2, %v1718_v17  ;;  %v1720_v22 = vpop.f32.mrf.mxu0  ;;  %v5711_v10 = vunpack.c.l.bf16 %v10997_v57  ;;  %7625 = vrot.lane.b32.xlu0 %v7624_v46, %s8060_s11  ;;  %v2425_v0 = vpop.f32.mrf.mxu1  ;;  %v13461_v2 = vld [vmem:[#allocation95_spill] sm:$0xff] }
 0x14d   : > { %v5710_v4 = vunpack.c.l.bf16 %v5646_v3  ;;  %v4078_v29 = vmax.bf16 %v3896_v9, %v10893_v63  ;;  %v5649_v53 = vmax.bf16 %v10282_v50, %v4079_v16  ;;  %v4081_v44 = vmax.bf16 %v3902_v5, %v10901_v42  ;;  %v13464_v22 = vld [vmem:[#allocation33_spill] sm:$0xff]  ;;  %v6788_v42 = vld [vmem:[%s8204_s28 + $0x160] sm:$0x11] }
 0x14e   : > { %13458 = vst [vmem:[#allocation78_spill] sm:$0xff] %v11020_v52  ;;  %v11030_v38 = vsel %vm8258_vm2, %v4459_v34, %v11007_v48  ;;  %v4471_v21 = vshll.u32 %v7968_v56, 16  ;;  %v1723_v57 = vpop.f32.mrf.mxu0  ;;  %v13459_v63 = vcombine.low %v9904_v36, %v10064_v14  ;;  %v2428_v17 = vpop.f32.mrf.mxu1  ;;  %v13460_v46 = vcombine.low %v13447_v51, %v13448_v55  ;;  %v13468_v56 = vld [vmem:[#allocation23_spill] sm:$0xff]  ;;  %v13469_v16 = vld [vmem:[#allocation166_spill] sm:$0xff]  ;;  %v13474_v14 = vld [vmem:[#allocation128_spill] sm:$0xff] }
 0x14f   : > { %v7629_v9 = vpack.i.bf16 %v5710_v4, %v5709_v41  ;;  %v5648_v3 = vmax.bf16 %v10271_v28, %v4078_v29  ;;  %v13463_v25 = vcombine.high %v13461_v2, %v13462_v31  ;;  %v3900_v34 = vpop.permute.xlu1 %3899  ;;  %v13465_v41 = vrot.slane %v13464_v22, 4  ;;  %v13466_v29 = vld [vmem:[#allocation124_spill] sm:$0xff] }
 0x150   : > { %1914 = vmatmul.mubr.bf16.gmra.mxu0 %v13459_v63  ;;  %2619 = vmatmul.mubr.bf16.gmra.mxu1 %v13460_v46  ;;  %v13467_v5 = vrot.slane %v13466_v29, 4  ;;  %v2904_v63 = vrot.slane %v13468_v56, 4  ;;  %v4468_v51 = vor.u32 %v13469_v16, %v11007_v48  ;;  %v11059_v55 = vadd.f32 %v2428_v17, %v1723_v57  ;;  %v1725_v46 = vpop.f32.mrf.mxu0  ;;  %v13473_v57 = vld [vmem:[#allocation25_spill] sm:$0xff] }
 0x151   : > { %3556 = vmatprep.mubr.bf16.mxu0 %v13463_v25  ;;  %v11049_v4 = vmax.bf16 %v2902_v35, %v13465_v41  ;;  %v13471_v25 = vcombine.high %v13394_v32, %v13408_v24  ;;  %v5712_v22 = vunpack.c.l.bf16 %v5648_v3  ;;  %v4080_v35 = vmax.bf16 %v3900_v34, %v10922_v19  ;;  %v3906_v41 = vpop.permute.xlu0 %3905  ;;  %7630 = vrot.lane.b32.xlu1 %v7629_v9, %s8060_s11 }
 0x152   : > { %v11053_v0 = vmax.bf16 %v2905_v7, %v13467_v5  ;;  %13470 = vst [vmem:[#allocation88_spill] sm:$0xff] %v11059_v55  ;;  %v13472_v7 = vld [vmem:[#allocation26_spill] sm:$0xff]  ;;  %v2430_v5 = vpop.f32.mrf.mxu1  ;;  %v5713_v56 = vunpack.c.l.bf16 %v5649_v53  ;;  %v5651_v52 = vmax.bf16 %v10345_v12, %v4081_v44  ;;  %v4083_v48 = vmax.bf16 %v3906_v41, %v10926_v27  ;;  %v1726_v17 = vpop.f32.mrf.mxu0 }
 0x153   : > { %5254 = vmatprep.mubr.bf16.mxu1 %v13471_v25  ;;  %v2907_v29 = vrot.slane %v13472_v7, 4  ;;  %v2906_v16 = vrot.slane %v13473_v57, 4  ;;  %v7634_v46 = vpack.i.bf16 %v5712_v22, %v5711_v10  ;;  %v5650_v25 = vmax.bf16 %v10331_v61, %v4080_v35  ;;  %v3904_v34 = vpop.permute.xlu1 %3903  ;;  %v13476_v7 = vld [vmem:[#allocation29_spill] sm:$0xff]  ;;  %v13477_v5 = vld [vmem:[#allocation27_spill] sm:$0xff] }
 0x154   : > { %v4473_v3 = vrot.slane %v4471_v21, 5  ;;  %v4481_v55 = vshll.u32 %v6788_v42, 16  ;;  %v2431_v19 = vpop.f32.mrf.mxu1  ;;  %v13475_v9 = vrot.slane %v13474_v14, 4  ;;  %v2909_v53 = vrot.slane %v13476_v7, 4  ;;  %v1728_v41 = vpop.f32.mrf.mxu0  ;;  %v13479_v21 = vld [vmem:[#allocation131_spill] sm:$0xff] }
 0x155   : > { %v2908_v44 = vrot.slane %v13477_v5, 4  ;;  %v4469_v12 = vrot.slane %v4468_v51, 4  ;;  %v11077_v27 = vadd.f32 %v2431_v19, %v1726_v17  ;;  %v5714_v57 = vunpack.c.l.bf16 %v5650_v25  ;;  %v3910_v22 = vpop.permute.xlu0 %3909  ;;  %7635 = vrot.lane.b32.xlu0 %v7634_v46, %s8060_s11  ;;  %v13482_v5 = vld [vmem:[#allocation174_spill] sm:$0xff] }
 0x156   : > { %v11073_v36 = vmax.bf16 %v2904_v63, %v13475_v9  ;;  %v4082_v10 = vmax.bf16 %v3904_v34, %v10953_v39  ;;  %v13480_v42 = vrot.slane %v13479_v21, 4  ;;  %v2433_v14 = vpop.f32.mrf.mxu1  ;;  %v13481_v63 = vld [vmem:[#allocation187_spill] sm:$0xff]  ;;  %v4085_v7 = vmax.bf16 %v3910_v22, %v10965_v20  ;;  %v1731_v19 = vpop.f32.mrf.mxu0  ;;  %v13484_v46 = vld [vmem:[#allocation186_spill] sm:$0xff] }
 0x157   : > { %13478 = vst [vmem:[#allocation84_spill] sm:$0xff] %v11077_v27  ;;  %v5653_v9 = vmax.bf16 %v13481_v63, %v4083_v48  ;;  %v4478_v51 = vor.u32 %v13482_v5, %v4473_v3  ;;  %v4483_v17 = vrot.slane %v4481_v55, 5  ;;  %v13483_v25 = vcombine.low %v13461_v2, %v13462_v31  ;;  %v13485_v21 = vld [vmem:[#allocation135_spill] sm:$0xff]  ;;  %v13488_v48 = vld [vmem:[#allocation102_spill] sm:$0xff]  ;;  %v13489_v55 = vld [vmem:[#allocation108_spill] sm:$0xff]  ;;  %v3908_v5 = vpop.permute.xlu1 %3907 }
 0x158   : > { %v11083_v35 = vmax.bf16 %v2907_v29, %v13480_v42  ;;  %v5715_v39 = vunpack.c.l.bf16 %v5651_v52  ;;  %v7639_v34 = vpack.i.bf16 %v5714_v57, %v5713_v56  ;;  %v5652_v41 = vmax.bf16 %v13484_v46, %v4082_v10  ;;  %v2436_v14 = vpop.f32.mrf.mxu1  ;;  %v13491_v2 = vld [vmem:[#allocation137_spill] sm:$0xff]  ;;  %v13493_v56 = vld [vmem:[#allocation140_spill] sm:$0xff] }
 0x159   : > { %3557 = vmatmul.mubr.bf16.vlgmr.msra.gmra.mxu0 %v13483_v25  ;;  %v13486_v29 = vrot.slane %v13485_v21, 4  ;;  %v13487_v20 = vcombine.low %v13394_v32, %v13408_v24  ;;  %v13490_v22 = vcombine.high %v13488_v48, %v13489_v55  ;;  %v13492_v31 = vrot.slane %v13491_v2, 4  ;;  %v1733_v24 = vpop.f32.mrf.mxu0 }
 0x15a   : > { %v13494_v57 = vrot.slane %v13493_v56, 4  ;;  %v4479_v25 = vrot.slane %v4478_v51, 4  ;;  %v11114_v32 = vadd.f32 %v2436_v14, %v1731_v19  ;;  %v13496_v21 = vcombine.high %v13404_v60, %v13425_v45  ;;  %7640 = vrot.lane.b32.xlu1 %v7639_v34, %s8060_s11  ;;  %v2438_v2 = vpop.f32.mrf.mxu1  ;;  %v13499_v56 = vld [vmem:[#allocation193_spill] sm:$0xff] }
 0x15b   : > { %v11094_v42 = vmax.bf16 %v2906_v16, %v13486_v29  ;;  %5255 = vmatmul.mubr.bf16.vlgmr.msra.gmra.mxu1 %v13487_v20  ;;  %3564 = vmatprep.mubr.bf16.mxu0 %v13490_v22  ;;  %v11104_v52 = vmax.bf16 %v2909_v53, %v13492_v31  ;;  %v11112_v16 = vsel %vm8258_vm2, %v4469_v12, %v4473_v3  ;;  %v5716_v29 = vunpack.c.l.bf16 %v5652_v41  ;;  %v3914_v20 = vpop.permute.xlu0 %3913  ;;  %v13498_v3 = vld [vmem:[#allocation195_spill] sm:$0xff]  ;;  %v1734_v31 = vpop.f32.mrf.mxu0 }
 0x15c   : > { %v11108_v10 = vmax.bf16 %v2908_v44, %v13494_v57  ;;  %13495 = vst [vmem:[#allocation12_spill] sm:$0xff] %v11114_v32  ;;  %5262 = vmatprep.mubr.bf16.mxu1 %v13496_v21  ;;  %v4084_v53 = vmax.bf16 %v3908_v5, %v10984_v47  ;;  %v13497_v44 = vld [vmem:[#allocation31_spill] sm:$0xff]  ;;  %v5717_v12 = vunpack.c.l.bf16 %v5653_v9  ;;  %v5655_v51 = vmax.bf16 %v13498_v3, %v4085_v7  ;;  %v2439_v9 = vpop.f32.mrf.mxu1  ;;  %v3912_v57 = vpop.permute.xlu1 %3911  ;;  %v13500_v7 = vld [vmem:[#allocation30_spill] sm:$0xff]  ;;  %v7970_v5 = vld [vmem:[%s8204_s28 + $0x178] sm:$0xff] }
 0x15d   : > { %v2911_v22 = vrot.slane %v13497_v44, 4  ;;  %v4087_v19 = vmax.bf16 %v3914_v20, %v10988_v8  ;;  %v11126_v14 = vsel %vm8258_vm2, %v4479_v25, %v4483_v17  ;;  %v7644_v41 = vpack.i.bf16 %v5716_v29, %v5715_v39  ;;  %v13501_v8 = vld [vmem:[#allocation39_spill] sm:$0xff]  ;;  %v13503_v17 = vld [vmem:[#allocation172_spill] sm:$0xff] }
 0x15e   : > { %v5654_v47 = vmax.bf16 %v13499_v56, %v4084_v53  ;;  %v2910_v24 = vrot.slane %v13500_v7, 4  ;;  %v2913_v21 = vrot.slane %v13501_v8, 4  ;;  %v13502_v20 = vld [vmem:[#allocation171_spill] sm:$0xff]  ;;  %v7969_v44 = vld [vmem:[%s8204_s28 + $0x170] sm:$0xff]  ;;  %v11138_v29 = vadd.f32 %v2439_v9, %v1734_v31  ;;  %v1736_v53 = vpop.f32.mrf.mxu0  ;;  %v2441_v3 = vpop.f32.mrf.mxu1  ;;  %v13505_v8 = vld [vmem:[#allocation142_spill] sm:$0xff] }
 0x15f   : > { %v4492_v25 = vor.u32 %v13503_v17, %v13502_v20  ;;  %v4495_v39 = vshll.u32 %v7969_v44, 16  ;;  %v4086_v34 = vmax.bf16 %v3912_v57, %v11004_v37  ;;  %v3918_v32 = vpop.permute.xlu0 %3917  ;;  %7645 = vrot.lane.b32.xlu0 %v7644_v41, %s8060_s11  ;;  %v4505_v27 = vshll.u32 %v7970_v5, 16  ;;  %v13508_v57 = vld [vmem:[#allocation203_spill] sm:$0xff]  ;;  %v13513_v44 = vld [vmem:[#allocation148_spill] sm:$0xff] }
 0x160   : > { %13504 = vst [vmem:[#allocation45_spill] sm:$0xff] %v11138_v29  ;;  %v5718_v2 = vunpack.c.l.bf16 %v5654_v47  ;;  %v4089_v7 = vmax.bf16 %v3918_v32, %v11013_v1  ;;  %v13506_v56 = vrot.slane %v13505_v8, 4  ;;  %v1739_v31 = vpop.f32.mrf.mxu0  ;;  %v13507_v47 = vcombine.low %v13488_v48, %v13489_v55  ;;  %v2444_v3 = vpop.f32.mrf.mxu1  ;;  %v13510_v32 = vld [vmem:[#allocation105_spill] sm:$0xff]  ;;  %v13515_v55 = vld [vmem:[#allocation32_spill] sm:$0xff] }
 0x161   : > { %v4493_v20 = vrot.slane %v4492_v25, 4  ;;  %v4497_v17 = vrot.slane %v4495_v39, 5  ;;  %v5719_v37 = vunpack.c.l.bf16 %v5655_v51  ;;  %v5657_v41 = vmax.bf16 %v10633_v6, %v4087_v19  ;;  %v3916_v25 = vpop.permute.xlu1 %3915  ;;  %v13516_v51 = vld [vmem:[#allocation175_spill] sm:$0xff] }
 0x162   : > { %v11146_v63 = vmax.bf16 %v2911_v22, %v13506_v56  ;;  %3565 = vmatmul.mubr.bf16.gmra.mxu0 %v13507_v47  ;;  %v7649_v9 = vpack.i.bf16 %v5718_v2, %v5717_v12  ;;  %v5656_v5 = vmax.bf16 %v13508_v57, %v4086_v34  ;;  %v13509_v1 = vcombine.low %v13404_v60, %v13425_v45  ;;  %v13511_v22 = vld [vmem:[#allocation112_spill] sm:$0xff]  ;;  %v1741_v2 = vpop.f32.mrf.mxu0 }
 0x163   : > { %v13512_v56 = vcombine.high %v13510_v32, %v13511_v22  ;;  %v13514_v39 = vrot.slane %v13513_v44, 4  ;;  %v2912_v12 = vrot.slane %v13515_v55, 4  ;;  %v4502_v19 = vor.u32 %v13516_v51, %v4497_v17  ;;  %v3922_v47 = vpop.permute.xlu0 %3921  ;;  %v2446_v44 = vpop.f32.mrf.mxu1  ;;  %v13521_v55 = vld [vmem:[#allocation55_spill] sm:$0xff] }
 0x164   : > { %5263 = vmatmul.mubr.bf16.gmra.mxu1 %v13509_v1  ;;  %v4507_v53 = vrot.slane %v4505_v27, 5  ;;  %v11165_v34 = vadd.f32 %v2444_v3, %v1739_v31  ;;  %v13518_v60 = vcombine.high %v13424_v15, %v13438_v23  ;;  %v5720_v45 = vunpack.c.l.bf16 %v5656_v5  ;;  %7650 = vrot.lane.b32.xlu1 %v7649_v9, %s8060_s11 }
 0x165   : > { %3572 = vmatprep.mubr.bf16.mxu0 %v13512_v56  ;;  %v11161_v48 = vmax.bf16 %v2910_v24, %v13514_v39  ;;  %v4088_v8 = vmax.bf16 %v3916_v25, %v11049_v4  ;;  %v13519_v24 = vld [vmem:[#allocation41_spill] sm:$0xff]  ;;  %v5659_v27 = vmax.bf16 %v10780_v54, %v4089_v7  ;;  %v4091_v31 = vmax.bf16 %v3922_v47, %v11053_v0  ;;  %v1742_v39 = vpop.f32.mrf.mxu0  ;;  %v2447_v51 = vpop.f32.mrf.mxu1  ;;  %v13522_v0 = vld [vmem:[#allocation40_spill] sm:$0xff]  ;;  %v13523_v47 = vld [vmem:[#allocation51_spill] sm:$0xff] }
 0x166   : > { %13517 = vst [vmem:[#allocation80_spill] sm:$0xff] %v11165_v34  ;;  %5270 = vmatprep.mubr.bf16.mxu1 %v13518_v60  ;;  %v13520_v1 = vrot.slane %v13519_v24, 4  ;;  %v11180_v3 = vsel %vm8258_vm2, %v4493_v20, %v4497_v17  ;;  %v4503_v5 = vrot.slane %v4502_v19, 4  ;;  %v5721_v4 = vunpack.c.l.bf16 %v5657_v41  ;;  %v3920_v2 = vpop.permute.xlu1 %3919  ;;  %v7971_v19 = vld [vmem:[%s8204_s28 + $0x180] sm:$0xff] }
 0x167   : > { %v7654_v25 = vpack.i.bf16 %v5720_v45, %v5719_v37  ;;  %v5658_v9 = vmax.bf16 %v10691_v11, %v4088_v8  ;;  %v2914_v60 = vrot.slane %v13522_v0, 4  ;;  %v13524_v20 = vshrl.u32 %v13523_v47, 16  ;;  %v1744_v37 = vpop.f32.mrf.mxu0 }
 0x168   : > { %v11174_v56 = vmax.bf16 %v2913_v21, %v13520_v1  ;;  %v2915_v21 = vrot.slane %v13521_v55, 4  ;;  %v11186_v7 = vsel %vm8258_vm2, %v4503_v5, %v4507_v53  ;;  %v4515_v24 = vshll.u32 %v7971_v19, 16  ;;  %v3926_v1 = vpop.permute.xlu0 %3925  ;;  %v6793_v5 = vld [vmem:[%s8204_s28 + $0x188] sm:$0x11]  ;;  %v2449_v55 = vpop.f32.mrf.mxu1 }
 0x169   : > { %v4511_v17 = vrot.slane %v13524_v20, 4  ;;  %v11192_v41 = vadd.f32 %v2447_v51, %v1742_v39  ;;  %v5722_v45 = vunpack.c.l.bf16 %v5658_v9  ;;  %v4090_v8 = vmax.bf16 %v3920_v2, %v11073_v36  ;;  %7655 = vrot.lane.b32.xlu0 %v7654_v25, %s8060_s11  ;;  %v1747_v51 = vpop.f32.mrf.mxu0 }
 0x16a   : > { %v5723_v0 = vunpack.c.l.bf16 %v5659_v27  ;;  %v5661_v47 = vmax.bf16 %v10762_v49, %v4091_v31  ;;  %v4093_v20 = vmax.bf16 %v3926_v1, %v11083_v35  ;;  %v13526_v36 = vcombine.low %v13510_v32, %v13511_v22  ;;  %v2452_v37 = vpop.f32.mrf.mxu1  ;;  %v13528_v31 = vld [vmem:[#allocation109_spill] sm:$0xff]  ;;  %v13529_v35 = vld [vmem:[#allocation116_spill] sm:$0xff]  ;;  %v3924_v39 = vpop.permute.xlu1 %3923 }
 0x16b   : > { %13525 = vst [vmem:[#allocation89_spill] sm:$0xff] %v11192_v41  ;;  %v7659_v9 = vpack.i.bf16 %v5722_v45, %v5721_v4  ;;  %v5660_v25 = vmax.bf16 %v10789_v40, %v4090_v8  ;;  %v4512_v2 = vor.u32 %v4511_v17, %v4507_v53  ;;  %v4517_v19 = vrot.slane %v4515_v24, 5  ;;  %v13531_v32 = vld [vmem:[#allocation153_spill] sm:$0xff]  ;;  %v13533_v45 = vld [vmem:[#allocation156_spill] sm:$0xff] }
 0x16c   : > { %3573 = vmatmul.mubr.bf16.gmra.mxu0 %v13526_v36  ;;  %v13527_v27 = vcombine.low %v13424_v15, %v13438_v23  ;;  %v13530_v1 = vcombine.high %v13528_v31, %v13529_v35  ;;  %v11214_v55 = vmax.bf16 %v10850_v59, %v4093_v20  ;;  %v13532_v22 = vrot.slane %v13531_v32, 4  ;;  %v1749_v15 = vpop.f32.mrf.mxu0 }
 0x16d   : > { %v13534_v53 = vrot.slane %v13533_v45, 4  ;;  %v4525_v24 = vshll.u32 %v6793_v5, 16  ;;  %v11224_v8 = vadd.f32 %v2452_v37, %v1747_v51  ;;  %v13536_v23 = vcombine.high %v13437_v13, %v13453_v26  ;;  %7660 = vrot.lane.b32.xlu1 %v7659_v9, %s8060_s11  ;;  %v13539_v51 = vld [vmem:[#allocation59_spill] sm:$0xff]  ;;  %v13540_v45 = vld [vmem:[#allocation181_spill] sm:$0xff] }
 0x16e   : > { %5271 = vmatmul.mubr.bf16.gmra.mxu1 %v13527_v27  ;;  %3580 = vmatprep.mubr.bf16.mxu0 %v13530_v1  ;;  %v11218_v4 = vmax.bf16 %v2912_v12, %v13532_v22  ;;  %v5724_v36 = vunpack.c.l.bf16 %v5660_v25  ;;  %v4092_v20 = vmax.bf16 %v3924_v39, %v11094_v42  ;;  %v3930_v27 = vpop.permute.xlu0 %3929  ;;  %v4513_v12 = vrot.slane %v4512_v2, 4  ;;  %v2454_v1 = vpop.f32.mrf.mxu1 }
 0x16f   : > { %v11222_v17 = vmax.bf16 %v2915_v21, %v13534_v53  ;;  %13535 = vst [vmem:[#allocation11_spill] sm:$0xff] %v11224_v8  ;;  %5278 = vmatprep.mubr.bf16.mxu1 %v13536_v23  ;;  %v4095_v32 = vmax.bf16 %v3930_v27, %v11104_v52  ;;  %v13537_v21 = vld [vmem:[#allocation160_spill] sm:$0xff]  ;;  %v2917_v37 = vrot.slane %v13539_v51, 4  ;;  %v4522_v53 = vor.u32 %v13540_v45, %v4517_v19  ;;  %v1750_v15 = vpop.f32.mrf.mxu0  ;;  %v3928_v2 = vpop.permute.xlu1 %3927 }
 0x170   : > { %v13538_v22 = vrot.slane %v13537_v21, 4  ;;  %v5725_v23 = vunpack.c.l.bf16 %v5661_v47  ;;  %v7664_v25 = vpack.i.bf16 %v5724_v36, %v5723_v0  ;;  %v5662_v42 = vmax.bf16 %v10766_v33, %v4092_v20  ;;  %v2455_v44 = vpop.f32.mrf.mxu1  ;;  %v13543_v20 = vld [vmem:[#allocation43_spill] sm:$0xff] }
 0x171   : > { %v4527_v39 = vrot.slane %v4525_v24, 5  ;;  %v5727_v9 = vunpack.c.l.bf16 %v11214_v55  ;;  %v11242_v52 = vsel %vm8258_vm2, %v4513_v12, %v4517_v19  ;;  %v4523_v1 = vrot.slane %v4522_v53, 4  ;;  %v13544_v12 = vld [vmem:[#allocation176_spill] sm:$0xff] }
 0x172   : > { %v11234_v5 = vmax.bf16 %v2914_v60, %v13538_v22  ;;  %v13541_v60 = vld [vmem:[#allocation56_spill] sm:$0xff]  ;;  %v11245_v21 = vadd.f32 %v2455_v44, %v1750_v15  ;;  %v1752_v22 = vpop.f32.mrf.mxu0  ;;  %v5726_v51 = vunpack.c.l.bf16 %v5662_v42  ;;  %v11248_v0 = vmax.bf16 %v10912_v30, %v4095_v32  ;;  %v3934_v24 = vpop.permute.xlu0 %3933  ;;  %7665 = vrot.lane.b32.xlu0 %v7664_v25, %s8060_s11 }
 0x173   : > { %v2916_v27 = vrot.slane %v13541_v60, 4  ;;  %v4094_v47 = vmax.bf16 %v3928_v2, %v11108_v10  ;;  %v2457_v55 = vpop.f32.mrf.mxu1  ;;  %v4097_v36 = vmax.bf16 %v3934_v24, %v11146_v63  ;;  %v11255_v19 = vsel %vm8258_vm2, %v4523_v1, %v4527_v39  ;;  %v13548_v60 = vld [vmem:[#allocation115_spill] sm:$0xff]  ;;  %v13549_v1 = vld [vmem:[#allocation121_spill] sm:$0xff]  ;;  %v13562_v63 = vld [vmem:[#allocation46_spill] sm:$0xff] }
 0x174   : > { %13542 = vst [vmem:[#allocation138_spill] sm:$0xff] %v11245_v21  ;;  %v2919_v44 = vrot.slane %v13543_v20, 4  ;;  %v13545_v45 = vshrl.u32 %v13544_v12, 16  ;;  %v1755_v15 = vpop.f32.mrf.mxu0  ;;  %v13546_v32 = vcombine.low %v13528_v31, %v13529_v35  ;;  %v7669_v10 = vpack.i.bf16 %v5726_v51, %v5725_v23  ;;  %v3932_v35 = vpop.permute.xlu1 %3931  ;;  %v13551_v23 = vld [vmem:[#allocation47_spill] sm:$0xff] }
 0x175   : > { %v5664_v25 = vmax.bf16 %v10869_v18, %v4094_v47  ;;  %v2460_v39 = vpop.f32.mrf.mxu1  ;;  %v13547_v2 = vcombine.low %v13437_v13, %v13453_v26  ;;  %v13550_v22 = vcombine.high %v13548_v60, %v13549_v1  ;;  %v11275_v31 = vmax.bf16 %v11018_v58, %v4097_v36  ;;  %v13553_v24 = vld [vmem:[#allocation163_spill] sm:$0xff] }
 0x176   : > { %v4532_v53 = vrot.slane %v13545_v45, 4  ;;  %3581 = vmatmul.mubr.bf16.gmra.mxu0 %v13546_v32  ;;  %v13552_v51 = vrot.slane %v13551_v23, 4  ;;  %v13554_v55 = vrot.slane %v13553_v24, 4  ;;  %v13555_v45 = vshll.u32 %v13544_v12, 16  ;;  %v1757_v32 = vpop.f32.mrf.mxu0  ;;  %v3938_v23 = vpop.permute.xlu0 %3937  ;;  %7670 = vrot.lane.b32.xlu1 %v7669_v10, %s8060_s11  ;;  %v7973_v21 = vld [vmem:[%s8204_s28 + $0x1a8] sm:$0xff] }
 0x177   : > { %5279 = vmatmul.mubr.bf16.gmra.mxu1 %v13547_v2  ;;  %3588 = vmatprep.mubr.bf16.mxu0 %v13550_v22  ;;  %v11287_v26 = vadd.f32 %v2460_v39, %v1755_v15  ;;  %v13557_v2 = vcombine.high %v10234_v62, %v10271_v28  ;;  %v5728_v36 = vunpack.c.l.bf16 %v5664_v25  ;;  %v4096_v22 = vmax.bf16 %v3932_v35, %v11161_v48  ;;  %v13558_v15 = vld [vmem:[#allocation165_spill] sm:$0xff]  ;;  %v13560_v25 = vld [vmem:[#allocation154_spill] sm:$0xff]  ;;  %v13561_v48 = vld [vmem:[#allocation60_spill] sm:$0xff] }
 0x178   : > { %v11279_v47 = vmax.bf16 %v2917_v37, %v13552_v51  ;;  %v11283_v20 = vmax.bf16 %v2916_v27, %v13554_v55  ;;  %v4535_v13 = vrot.slane %v13555_v45, 5  ;;  %v7972_v37 = vld [vmem:[%s8204_s28 + $0x198] sm:$0xff]  ;;  %v2462_v27 = vpop.f32.mrf.mxu1  ;;  %v5729_v24 = vunpack.c.l.bf16 %v11248_v0  ;;  %v1758_v32 = vpop.f32.mrf.mxu0 }
 0x179   : > { %13556 = vst [vmem:[#allocation14_spill] sm:$0xff] %v11287_v26  ;;  %5286 = vmatprep.mubr.bf16.mxu1 %v13557_v2  ;;  %v4539_v51 = vshll.u32 %v7972_v37, 16  ;;  %v4099_v12 = vmax.bf16 %v3938_v23, %v11174_v56  ;;  %v13559_v39 = vrot.slane %v13558_v15, 4  ;;  %v7674_v2 = vpack.i.bf16 %v5728_v36, %v5727_v9  ;;  %v3936_v56 = vpop.permute.xlu1 %3935  ;;  %v13563_v23 = vld [vmem:[#allocation57_spill] sm:$0xff] }
 0x17a   : > { %v4536_v45 = vor.u32 %v4535_v13, %v4532_v53  ;;  %v5666_v42 = vmax.bf16 %v13560_v25, %v4096_v22  ;;  %v2918_v35 = vrot.slane %v13561_v48, 4  ;;  %v2921_v10 = vrot.slane %v13562_v63, 4  ;;  %v2463_v26 = vpop.f32.mrf.mxu1  ;;  %v1760_v36 = vpop.f32.mrf.mxu0 }
 0x17b   : > { %v11299_v55 = vmax.bf16 %v2919_v44, %v13559_v39  ;;  %v5731_v37 = vunpack.c.l.bf16 %v11275_v31  ;;  %v11306_v0 = vmax.bf16 %v11112_v16, %v4099_v12  ;;  %v13564_v44 = vshll.u32 %v13563_v23, 16  ;;  %v3942_v15 = vpop.permute.xlu0 %3941  ;;  %7675 = vrot.lane.b32.xlu0 %v7674_v2, %s8060_s11 }
 0x17c   : > { %v13565_v9 = vshrl.u32 %v13563_v23, 16  ;;  %v11314_v13 = vadd.f32 %v2463_v26, %v1758_v32  ;;  %v5730_v22 = vunpack.c.l.bf16 %v5666_v42  ;;  %v4098_v63 = vmax.bf16 %v3936_v56, %v11218_v4  ;;  %v2465_v12 = vpop.f32.mrf.mxu1  ;;  %v1763_v23 = vpop.f32.mrf.mxu0  ;;  %v13568_v32 = vld [vmem:[#allocation169_spill] sm:$0xff] }
 0x17d   : > { %v11310_v27 = vrot.slane %v13564_v44, 5  ;;  %v4541_v31 = vrot.slane %v4539_v51, 5  ;;  %v4101_v39 = vmax.bf16 %v3942_v15, %v11222_v17  ;;  %v4537_v48 = vrot.slane %v4536_v45, 4  ;;  %v13570_v51 = vld [vmem:[#allocation44_spill] sm:$0xff]  ;;  %v13577_v15 = vld [vmem:[#allocation179_spill] sm:$0xff] }
 0x17e   : > { %v4555_v53 = vrot.slane %v13565_v9, 4  ;;  %13566 = vst [vmem:[#allocation92_spill] sm:$0xff] %v11314_v13  ;;  %v4559_v8 = vshll.u32 %v7973_v21, 16  ;;  %v13567_v26 = vcombine.low %v13548_v60, %v13549_v1  ;;  %v7679_v42 = vpack.i.bf16 %v5730_v22, %v5729_v24  ;;  %v2468_v17 = vpop.f32.mrf.mxu1  ;;  %v13572_v21 = vld [vmem:[#allocation118_spill] sm:$0xff]  ;;  %v3940_v24 = vpop.permute.xlu1 %3939  ;;  %v13575_v22 = vld [vmem:[#allocation48_spill] sm:$0xff] }
 0x17f   : > { %v5668_v4 = vmax.bf16 %v11030_v38, %v4098_v63  ;;  %v13569_v56 = vrot.slane %v13568_v32, 4  ;;  %v2920_v9 = vrot.slane %v13570_v51, 4  ;;  %v13571_v45 = vcombine.low %v10234_v62, %v10271_v28  ;;  %v1765_v62 = vpop.f32.mrf.mxu0 }
 0x180   : > { %v4556_v44 = vor.u32 %v4555_v53, %v11310_v27  ;;  %3589 = vmatmul.mubr.bf16.gmra.mxu0 %v13567_v26  ;;  %v13573_v53 = vld [vmem:[#allocation123_spill] sm:$0xff]  ;;  %v5733_v60 = vunpack.c.l.bf16 %v11306_v0  ;;  %v11338_v1 = vmax.bf16 %v11180_v3, %v4101_v39  ;;  %v13578_v12 = vshrl.u32 %v13577_v15, 16  ;;  %v3946_v39 = vpop.permute.xlu0 %3945  ;;  %7680 = vrot.lane.b32.xlu1 %v7679_v42, %s8060_s11  ;;  %v13583_v62 = vld [vmem:[#allocation49_spill] sm:$0xff] }
 0x181   : > { %v11327_v2 = vmax.bf16 %v2918_v35, %v13569_v56  ;;  %5287 = vmatmul.mubr.bf16.gmra.mxu1 %v13571_v45  ;;  %v13574_v36 = vcombine.high %v13572_v21, %v13573_v53  ;;  %v13576_v35 = vrot.slane %v13575_v22, 4  ;;  %v11346_v32 = vadd.f32 %v2468_v17, %v1763_v23  ;;  %v2470_v45 = vpop.f32.mrf.mxu1  ;;  %v1766_v22 = vpop.f32.mrf.mxu0 }
 0x182   : > { %v4545_v26 = vrot.slane %v13578_v12, 4  ;;  %v13580_v28 = vcombine.high %v10282_v50, %v10331_v61  ;;  %v5732_v56 = vunpack.c.l.bf16 %v5668_v4  ;;  %v4100_v0 = vmax.bf16 %v3940_v24, %v11234_v5  ;;  %v13581_v24 = vld [vmem:[#allocation170_spill] sm:$0xff]  ;;  %v3944_v12 = vpop.permute.xlu1 %3943 }
 0x183   : > { %3596 = vmatprep.mubr.bf16.mxu0 %v13574_v36  ;;  %v11342_v63 = vmax.bf16 %v2921_v10, %v13576_v35  ;;  %13579 = vst [vmem:[#allocation13_spill] sm:$0xff] %v11346_v32  ;;  %v4557_v51 = vrot.slane %v4556_v44, 4  ;;  %v4103_v10 = vmax.bf16 %v3946_v39, %v11279_v47  ;;  %v11356_v36 = vsel %vm8258_vm2, %v4537_v48, %v4541_v31  ;;  %v2471_v44 = vpop.f32.mrf.mxu1  ;;  %v13584_v48 = vld [vmem:[#allocation133_spill] sm:$0xff] }
 0x184   : > { %5294 = vmatprep.mubr.bf16.mxu1 %v13580_v28  ;;  %v11358_v23 = vrot.slane %v4559_v8, 5  ;;  %v4546_v17 = vor.u32 %v4545_v26, %v4541_v31  ;;  %v7684_v35 = vpack.i.bf16 %v5732_v56, %v5731_v37  ;;  %v5735_v4 = vunpack.c.l.bf16 %v11338_v1  ;;  %v1768_v1 = vpop.f32.mrf.mxu0  ;;  %v3950_v45 = vpop.permute.xlu0 %3949 }
 0x185   : > { %v5670_v5 = vmax.bf16 %v11126_v14, %v4100_v0  ;;  %v13582_v15 = vrot.slane %v13581_v24, 4  ;;  %v2923_v28 = vrot.slane %v13583_v62, 4  ;;  %v13585_v39 = vshrl.u32 %v13584_v48, 16  ;;  %v13591_v62 = vld [vmem:[#allocation127_spill] sm:$0xff]  ;;  %v6798_v1 = vld [vmem:[%s8204_s28 + $0x1b0] sm:$0x11] }
 0x186   : > { %v4547_v47 = vrot.slane %v4546_v17, 4  ;;  %v13586_v31 = vshll.u32 %v13584_v48, 16  ;;  %v11371_v37 = vadd.f32 %v2471_v44, %v1766_v22  ;;  %v4102_v0 = vmax.bf16 %v3944_v12, %v11283_v20  ;;  %7685 = vrot.lane.b32.xlu0 %v7684_v35, %s8060_s11  ;;  %v2473_v17 = vpop.f32.mrf.mxu1 }
 0x187   : > { %v11364_v42 = vmax.bf16 %v2920_v9, %v13582_v15  ;;  %v4576_v8 = vrot.slane %v13585_v39, 4  ;;  %v5734_v56 = vunpack.c.l.bf16 %v5670_v5  ;;  %v11378_v9 = vsel %vm8258_vm2, %v4557_v51, %v11358_v23  ;;  %v1771_v5 = vpop.f32.mrf.mxu0 }
 0x188   : > { %v4579_v26 = vrot.slane %v13586_v31, 5  ;;  %13587 = vst [vmem:[#allocation16_spill] sm:$0xff] %v11371_v37  ;;  %v5673_v24 = vmax.bf16 %v11242_v52, %v4103_v10  ;;  %v4105_v15 = vmax.bf16 %v3950_v45, %v11299_v55  ;;  %v11385_v22 = vsel %vm8258_vm2, %v4547_v47, %v11310_v27  ;;  %v2476_v12 = vpop.f32.mrf.mxu1  ;;  %v13590_v47 = vld [vmem:[#allocation122_spill] sm:$0xff] }
 0x189   : > { %v13588_v35 = vcombine.low %v13572_v21, %v13573_v53  ;;  %v7689_v51 = vpack.i.bf16 %v5734_v56, %v5733_v60  ;;  %v5672_v44 = vmax.bf16 %v11186_v7, %v4102_v0  ;;  %v13589_v27 = vcombine.low %v10282_v50, %v10331_v61  ;;  %v3948_v53 = vpop.permute.xlu1 %3947  ;;  %v13593_v60 = vld [vmem:[#allocation173_spill] sm:$0xff]  ;;  %v7974_v31 = vld [vmem:[%s8204_s28 + $0x1c0] sm:$0xff]  ;;  %v1773_v61 = vpop.f32.mrf.mxu0  ;;  %v13597_v50 = vld [vmem:[#allocation180_spill] sm:$0xff] }
 0x18a   : > { %v4580_v20 = vor.u32 %v4579_v26, %v4576_v8  ;;  %v13592_v48 = vcombine.high %v13590_v47, %v13591_v62  ;;  %v11402_v21 = vmax.bf16 %v11356_v36, %v4105_v15  ;;  %v13594_v39 = vrot.slane %v13593_v60, 4  ;;  %v13595_v56 = vld [vmem:[#allocation69_spill] sm:$0xff] }
 0x18b   : > { %3597 = vmatmul.mubr.bf16.gmra.mxu0 %v13588_v35  ;;  %5295 = vmatmul.mubr.bf16.gmra.mxu1 %v13589_v27  ;;  %v4583_v26 = vshll.u32 %v7974_v31, 16  ;;  %v2922_v0 = vrot.slane %v13595_v56, 4  ;;  %v11411_v45 = vadd.f32 %v2476_v12, %v1771_v5  ;;  %v13598_v17 = vcombine.high %v13597_v50, %v13484_v46  ;;  %v3954_v27 = vpop.permute.xlu0 %3953  ;;  %v1774_v61 = vpop.f32.mrf.mxu0 }
 0x18c   : > { %3604 = vmatprep.mubr.bf16.mxu0 %v13592_v48  ;;  %v11406_v8 = vmax.bf16 %v2923_v28, %v13594_v39  ;;  %v5736_v35 = vunpack.c.l.bf16 %v5672_v44  ;;  %v4104_v15 = vmax.bf16 %v3948_v53, %v11327_v2  ;;  %7690 = vrot.lane.b32.xlu1 %v7689_v51, %s8060_s11  ;;  %v13599_v28 = vld [vmem:[#allocation184_spill] sm:$0xff]  ;;  %v2478_v39 = vpop.f32.mrf.mxu1  ;;  %v5737_v31 = vunpack.c.l.bf16 %v5673_v24 }
 0x18d   : > { %13596 = vst [vmem:[#allocation91_spill] sm:$0xff] %v11411_v45  ;;  %5302 = vmatprep.mubr.bf16.mxu1 %v13598_v17  ;;  %v13600_v48 = vshrl.u32 %v13599_v28, 16  ;;  %v5739_v56 = vunpack.c.l.bf16 %v11402_v21  ;;  %v4107_v5 = vmax.bf16 %v3954_v27, %v11342_v63  ;;  %v4581_v12 = vrot.slane %v4580_v20, 4  ;;  %v3952_v28 = vpop.permute.xlu1 %3951  ;;  %v13601_v39 = vld [vmem:[#allocation177_spill] sm:$0xff]  ;;  %v13603_v21 = vld [vmem:[#allocation54_spill] sm:$0xff]  ;;  %v1776_v20 = vpop.f32.mrf.mxu0 }
 0x18e   : > { %v7694_v10 = vpack.i.bf16 %v5736_v35, %v5735_v4  ;;  %v5674_v17 = vmax.bf16 %v11255_v19, %v4104_v15  ;;  %v4569_v2 = vshll.u32 %v6798_v1, 16  ;;  %v2479_v53 = vpop.f32.mrf.mxu1  ;;  %v13602_v24 = vrot.slane %v13601_v39, 4  ;;  %v13613_v20 = vld [vmem:[#allocation36_spill] sm:$0xff] }
 0x18f   : > { %v4565_v60 = vrot.slane %v13600_v48, 4  ;;  %v11425_v51 = vmax.bf16 %v11378_v9, %v4107_v5  ;;  %v4585_v48 = vrot.slane %v4583_v26, 5  ;;  %v2925_v45 = vrot.slane %v13603_v21, 4  ;;  %v3958_v15 = vpop.permute.xlu0 %3957  ;;  %v13612_v21 = vld [vmem:[#allocation125_spill] sm:$0xff] }
 0x190   : > { %v3050_v55 = vmax.bf16 %v2922_v0, %v13602_v24  ;;  %v11430_v63 = vadd.f32 %v2479_v53, %v1774_v61  ;;  %v5738_v4 = vunpack.c.l.bf16 %v5674_v17  ;;  %v4106_v35 = vmax.bf16 %v3952_v28, %v11364_v42  ;;  %7695 = vrot.lane.b32.xlu0 %v7694_v10, %s8060_s11  ;;  %v2481_v1 = vpop.f32.mrf.mxu1  ;;  %v1779_v53 = vpop.f32.mrf.mxu0 }
 0x191   : > { %v4566_v44 = vor.u32 %v4565_v60, %v11358_v23  ;;  %v11436_v26 = vsel %vm8258_vm2, %v4581_v12, %v4585_v48  ;;  %v4109_v0 = vmax.bf16 %v3958_v15, %v11406_v8  ;;  %v4571_v27 = vrot.slane %v4569_v2, 5  ;;  %v13605_v60 = vld [vmem:[#allocation185_spill] sm:$0xff]  ;;  %v13616_v1 = vld [vmem:[#allocation62_spill] sm:$0xff] }
 0x192   : > { %13604 = vst [vmem:[#allocation144_spill] sm:$0xff] %v11430_v63  ;;  %v13606_v5 = vshll.u32 %v13605_v60, 16  ;;  %v13607_v42 = vcombine.low %v13590_v47, %v13591_v62  ;;  %v7699_v17 = vpack.i.bf16 %v5738_v4, %v5737_v31  ;;  %v5676_v10 = vmax.bf16 %v11385_v22, %v4106_v35  ;;  %v2484_v8 = vpop.f32.mrf.mxu1  ;;  %v3956_v62 = vpop.permute.xlu1 %3955  ;;  %v7975_v31 = vld [vmem:[%s8204_s28 + $0x1d0] sm:$0xff]  ;;  %v13615_v4 = vld [vmem:[#allocation50_spill] sm:$0xff]  ;;  %v13646_v63 = vld [vmem:[#allocation67_spill] sm:$0xff] }
 0x193   : > { %v4567_v23 = vrot.slane %v4566_v44, 4  ;;  %v13608_v44 = vld [vmem:[#allocation52_spill] sm:$0xff]  ;;  %v13610_v12 = vshrl.u32 %v13605_v60, 16  ;;  %v13611_v2 = vcombine.low %v13597_v50, %v13484_v46  ;;  %v13614_v15 = vcombine.high %v13612_v21, %v13613_v20  ;;  %v1781_v46 = vpop.f32.mrf.mxu0  ;;  %v13619_v50 = vld [vmem:[#allocation187_spill] sm:$0xff] }
 0x194   : > { %v4595_v61 = vrot.slane %v13606_v5, 5  ;;  %3605 = vmatmul.mubr.bf16.gmra.mxu0 %v13607_v42  ;;  %v13609_v28 = vrot.slane %v13608_v44, 4  ;;  %v2924_v35 = vrot.slane %v13615_v4, 4  ;;  %v13617_v60 = vshrl.u32 %v13616_v1, 16  ;;  %v13620_v44 = vld [vmem:[#allocation193_spill] sm:$0xff]  ;;  %7700 = vrot.lane.b32.xlu1 %v7699_v17, %s8060_s11  ;;  %v13622_v46 = vld [vmem:[#allocation178_spill] sm:$0xff] }
 0x195   : > { %v4599_v24 = vrot.slane %v13610_v12, 4  ;;  %5303 = vmatmul.mubr.bf16.gmra.mxu1 %v13611_v2  ;;  %3612 = vmatprep.mubr.bf16.mxu0 %v13614_v15  ;;  %v11459_v47 = vsel %vm8258_vm2, %v4567_v23, %v4571_v27  ;;  %v11465_v42 = vadd.f32 %v2484_v8, %v1779_v53  ;;  %v5740_v12 = vunpack.c.l.bf16 %v5676_v10  ;;  %v2486_v2 = vpop.f32.mrf.mxu1  ;;  %v1782_v4 = vpop.f32.mrf.mxu0 }
 0x196   : > { %v11447_v39 = vmax.bf16 %v2925_v45, %v13609_v28  ;;  %v4603_v45 = vshll.u32 %v7975_v31, 16  ;;  %v4589_v5 = vrot.slane %v13617_v60, 4  ;;  %v13621_v28 = vcombine.high %v13619_v50, %v13620_v44  ;;  %v3962_v10 = vpop.permute.xlu0 %3961  ;;  %v3960_v15 = vpop.permute.xlu1 %3959 }
 0x197   : > { %13618 = vst [vmem:[#allocation97_spill] sm:$0xff] %v11465_v42  ;;  %v4108_v27 = vmax.bf16 %v3956_v62, %v3050_v55  ;;  %v5741_v31 = vunpack.c.l.bf16 %v11425_v51  ;;  %v5679_v53 = vmax.bf16 %v11436_v26, %v4109_v0  ;;  %v4600_v8 = vor.u32 %v4599_v24, %v4595_v61  ;;  %v2487_v62 = vpop.f32.mrf.mxu1 }
 0x198   : > { %5310 = vmatprep.mubr.bf16.mxu1 %v13621_v28  ;;  %v7704_v1 = vpack.i.bf16 %v5740_v12, %v5739_v56  ;;  %v13623_v28 = vrot.slane %v13622_v46, 4  ;;  %v4590_v55 = vor.u32 %v4589_v5, %v4585_v48  ;;  %v4605_v2 = vrot.slane %v4603_v45, 5  ;;  %v1784_v56 = vpop.f32.mrf.mxu0  ;;  %v13626_v45 = vld [vmem:[#allocation61_spill] sm:$0xff]  ;;  %v13627_v5 = vld [vmem:[#allocation188_spill] sm:$0xff] }
 0x199   : > { %v5678_v60 = vmax.bf16 %v11459_v47, %v4108_v27  ;;  %v4601_v17 = vrot.slane %v4600_v8, 4  ;;  %v4111_v42 = vmax.bf16 %v3962_v10, %v11447_v39  ;;  %v11483_v0 = vadd.f32 %v2487_v62, %v1782_v4 }
 0x19a   : > { %v3052_v23 = vmax.bf16 %v2924_v35, %v13623_v28  ;;  %v4591_v12 = vrot.slane %v4590_v55, 4  ;;  %7705 = vrot.lane.b32.xlu0 %v7704_v1, %s8060_s11  ;;  %v2489_v35 = vpop.f32.mrf.mxu1  ;;  %v2927_v39 = vrot.slane %v13626_v45, 4  ;;  %v13628_v8 = vshrl.u32 %v13627_v5, 16  ;;  %v1787_v28 = vpop.f32.mrf.mxu0  ;;  %v7976_v55 = vld [vmem:[%s8204_s28 + $0x1e8] sm:$0xff]  ;;  %v13634_v45 = vld [vmem:[#allocation134_spill] sm:$0xff] }
 0x19b   : > { %13624 = vst [vmem:[#allocation38_spill] sm:$0xff] %v11483_v0  ;;  %v5742_v24 = vunpack.c.l.bf16 %v5678_v60  ;;  %v11488_v48 = vsel %vm8258_vm2, %v4601_v17, %v4605_v2  ;;  %v13629_v4 = vshll.u32 %v13627_v5, 16  ;;  %v4627_v62 = vshll.u32 %v7976_v55, 16  ;;  %v13633_v35 = vld [vmem:[#allocation129_spill] sm:$0xff] }
 0x19c   : > { %v4110_v27 = vmax.bf16 %v3960_v15, %v3052_v23  ;;  %13625 = vst [vmem:[#allocation99_spill] sm:$0xff] %v11488_v48  ;;  %v4620_v10 = vrot.slane %v13628_v8, 4  ;;  %v13630_v23 = vcombine.low %v13612_v21, %v13613_v20  ;;  %v5743_v15 = vunpack.c.l.bf16 %v5679_v53  ;;  %v2492_v17 = vpop.f32.mrf.mxu1 }
 0x19d   : > { %v4623_v46 = vrot.slane %v13629_v4, 5  ;;  %v7709_v1 = vpack.i.bf16 %v5742_v24, %v5741_v31  ;;  %v11500_v60 = vsel %vm8258_vm2, %v4591_v12, %v4595_v61  ;;  %v13632_v56 = vcombine.low %v13619_v50, %v13620_v44  ;;  %v13636_v31 = vld [vmem:[#allocation182_spill] sm:$0xff]  ;;  %v6803_v24 = vld [vmem:[%s8204_s28 + $0x1d8] sm:$0x11]  ;;  %v13638_v12 = vld [vmem:[#allocation76_spill] sm:$0xff] }
 0x19e   : > { %3613 = vmatmul.mubr.bf16.gmra.mxu0 %v13630_v23  ;;  %13631 = vst [vmem:[#allocation103_spill] sm:$0xff] %v11500_v60  ;;  %v13635_v5 = vcombine.high %v13633_v35, %v13634_v45  ;;  %v5680_v20 = vmax.bf16 %v11500_v60, %v4110_v27  ;;  %v13637_v53 = vrot.slane %v13636_v31, 4  ;;  %v2926_v8 = vrot.slane %v13638_v12, 4  ;;  %v1789_v23 = vpop.f32.mrf.mxu0  ;;  %v13640_v50 = vld [vmem:[#allocation195_spill] sm:$0xff]  ;;  %v3966_v27 = vpop.permute.xlu0 %3965 }
 0x19f   : > { %5311 = vmatmul.mubr.bf16.gmra.mxu1 %v13632_v56  ;;  %v11516_v4 = vadd.f32 %v2492_v17, %v1787_v28  ;;  %v13641_v44 = vcombine.high %v13640_v50, %v13508_v57  ;;  %v11522_v55 = vmax.bf16 %v11488_v48, %v4111_v42  ;;  %v4624_v56 = vor.u32 %v4623_v46, %v4620_v10  ;;  %v13642_v12 = vld [vmem:[#allocation183_spill] sm:$0xff]  ;;  %v13644_v23 = vld [vmem:[#allocation190_spill] sm:$0xff]  ;;  %v3964_v42 = vpop.permute.xlu1 %3963  ;;  %v13647_v46 = vld [vmem:[#allocation192_spill] sm:$0xff] }
 0x1a0   : > { %3620 = vmatprep.mubr.bf16.mxu0 %v13635_v5  ;;  %v3055_v61 = vmax.bf16 %v2927_v39, %v13637_v53  ;;  %v11524_v5 = vrot.slane %v4627_v62, 5  ;;  %7710 = vrot.lane.b32.xlu1 %v7709_v1, %s8060_s11  ;;  %v2494_v39 = vpop.f32.mrf.mxu1  ;;  %v5744_v31 = vunpack.c.l.bf16 %v5680_v20  ;;  %v13643_v28 = vrot.slane %v13642_v12, 4 }
 0x1a1   : > { %13639 = vst [vmem:[#allocation15_spill] sm:$0xff] %v11516_v4  ;;  %5318 = vmatprep.mubr.bf16.mxu1 %v13641_v44  ;;  %v13645_v21 = vshrl.u32 %v13644_v23, 16  ;;  %v1790_v4 = vpop.f32.mrf.mxu0  ;;  %v4625_v44 = vrot.slane %v4624_v56, 4  ;;  %v4613_v0 = vshll.u32 %v6803_v24, 16  ;;  %v2929_v10 = vrot.slane %v13646_v63, 4  ;;  %v13651_v56 = vld [vmem:[#allocation53_spill] sm:$0xff] }
 0x1a2   : > { %v4113_v53 = vmax.bf16 %v3966_v27, %v3055_v61  ;;  %v3054_v17 = vmax.bf16 %v2926_v8, %v13643_v28  ;;  %v13648_v62 = vshll.u32 %v13647_v46, 16  ;;  %v2495_v1 = vpop.f32.mrf.mxu1  ;;  %v7714_v20 = vpack.i.bf16 %v5744_v31, %v5743_v15  ;;  %v11550_v31 = vld [vmem:[%s8204_s28 + $0x1f8] sm:$0xff] }
 0x1a3   : > { %v4609_v51 = vrot.slane %v13645_v21, 4  ;;  %v13649_v8 = vshrl.u32 %v13647_v46, 16  ;;  %v11538_v12 = vadd.f32 %v2495_v1, %v1790_v4  ;;  %v1792_v21 = vpop.f32.mrf.mxu0  ;;  %v11543_v24 = vsel %vm8258_vm2, %v4625_v44, %v11524_v5  ;;  %13654 = vst [vmem:[#allocation87_spill] sm:$0xff] %v11550_v31  ;;  %v13656_v46 = vld [vmem:[#allocation63_spill] sm:$0xff] }
 0x1a4   : > { %v11534_v37 = vrot.slane %v13648_v62, 5  ;;  %v4112_v27 = vmax.bf16 %v3964_v42, %v3054_v17  ;;  %v4615_v63 = vrot.slane %v4613_v0, 5  ;;  %v13652_v28 = vrot.slane %v13651_v56, 4  ;;  %v13653_v62 = vld [vmem:[#allocation77_spill] sm:$0xff]  ;;  %v2497_v15 = vpop.f32.mrf.mxu1  ;;  %7715 = vrot.lane.b32.xlu0 %v7714_v20, %s8060_s11  ;;  %v13660_v56 = vld [vmem:[#allocation132_spill] sm:$0xff] }
 0x1a5   : > { %v4610_v61 = vor.u32 %v4609_v51, %v4605_v2  ;;  %v4643_v39 = vrot.slane %v13649_v8, 4  ;;  %13650 = vst [vmem:[#allocation18_spill] sm:$0xff] %v11538_v12  ;;  %v4647_v4 = vshll.u32 %v11550_v31, 16  ;;  %v1795_v17 = vpop.f32.mrf.mxu0  ;;  %v13655_v44 = vcombine.low %v13633_v35, %v13634_v45 }
 0x1a6   : > { %v3057_v23 = vmax.bf16 %v2929_v10, %v13652_v28  ;;  %v5745_v0 = vunpack.c.l.bf16 %v11522_v55  ;;  %v11559_v42 = vmax.bf16 %v11543_v24, %v4113_v53  ;;  %v3970_v10 = vpop.permute.xlu0 %3969  ;;  %v2928_v1 = vrot.slane %v13656_v46, 4  ;;  %v2500_v21 = vpop.f32.mrf.mxu1  ;;  %v13661_v28 = vld [vmem:[#allocation37_spill] sm:$0xff] }
 0x1a7   : > { %v4611_v2 = vrot.slane %v4610_v61, 4  ;;  %v4644_v51 = vor.u32 %v4643_v39, %v11534_v37  ;;  %3621 = vmatmul.mubr.bf16.gmra.mxu0 %v13655_v44  ;;  %v13657_v61 = vld [vmem:[#allocation194_spill] sm:$0xff]  ;;  %v13659_v20 = vcombine.low %v13640_v50, %v13508_v57  ;;  %v13662_v35 = vcombine.high %v13660_v56, %v13661_v28  ;;  %v1797_v46 = vpop.f32.mrf.mxu0 }
 0x1a8   : > { %v13658_v8 = vshrl.u32 %v13657_v61, 16  ;;  %v11574_v53 = vrot.slane %v4647_v4, 5  ;;  %v4115_v15 = vmax.bf16 %v3970_v10, %v3057_v23  ;;  %v11576_v44 = vadd.f32 %v2500_v21, %v1795_v17  ;;  %v3968_v10 = vpop.permute.xlu1 %3967  ;;  %v11599_v46 = vld [vmem:[%s8204_s28 + $0x120] sm:$0xff] }
 0x1a9   : > { %5319 = vmatmul.mubr.bf16.gmra.mxu1 %v13659_v20  ;;  %3628 = vmatprep.mubr.bf16.mxu0 %v13662_v35  ;;  %v11572_v45 = vsel %vm8258_vm2, %v4611_v2, %v4615_v63  ;;  %v4645_v55 = vrot.slane %v4644_v51, 4  ;;  %v13665_v57 = vcombine.high %v10633_v6, %v10691_v11  ;;  %v13666_v63 = vld [vmem:[#allocation189_spill] sm:$0xff]  ;;  %v2502_v20 = vpop.f32.mrf.mxu1  ;;  %v1798_v35 = vpop.f32.mrf.mxu0 }
 0x1aa   : > { %v4633_v39 = vrot.slane %v13658_v8, 4  ;;  %13663 = vst [vmem:[#allocation93_spill] sm:$0xff] %v11572_v45  ;;  %13664 = vst [vmem:[#allocation152_spill] sm:$0xff] %v11576_v44  ;;  %v5682_v61 = vmax.bf16 %v11572_v45, %v4112_v27  ;;  %v13667_v2 = vrot.slane %v13666_v63, 4  ;;  %v13668_v8 = vld [vmem:[#allocation8_spill] sm:$0xff]  ;;  %v11596_v27 = vld [vmem:[%s8204_s28 + $0x118] sm:$0xff] }
 0x1ab   : > { %5326 = vmatprep.mubr.bf16.mxu1 %v13665_v57  ;;  %v11590_v23 = vsel %vm8258_vm2, %v4645_v55, %v11574_v53  ;;  %v2503_v20 = vpop.f32.mrf.mxu1  ;;  %v11609_v44 = vld [vmem:[%s8204_s28 + $0x210] sm:$0xff]  ;;  %v1800_v41 = vpop.f32.mrf.mxu0 }
 0x1ac   : > { %v3056_v51 = vmax.bf16 %v2928_v1, %v13667_v2  ;;  %v4634_v17 = vor.u32 %v4633_v39, %v11524_v5  ;;  %v5746_v57 = vunpack.c.l.bf16 %v5682_v61  ;;  %v13669_v2 = vld [vmem:[#allocation74_spill] sm:$0xff]  ;;  %v13670_v5 = vld [vmem:[#allocation197_spill] sm:$0xff]  ;;  %13673 = vst [vmem:[#allocation42_spill] sm:$0xff] %v11609_v44  ;;  %v4671_v12 = vshll.u32 %v11609_v44, 16 }
 0x1ad   : > { %v2931_v55 = vrot.slane %v13669_v2, 4  ;;  %v13671_v39 = vshrl.u32 %v13670_v5, 16  ;;  %v13672_v21 = vshll.u32 %v13670_v5, 16  ;;  %v11612_v13 = vadd.f32 %v2503_v20, %v1798_v35  ;;  %v2505_v2 = vpop.f32.mrf.mxu1  ;;  %v13677_v35 = vld [vmem:[#allocation83_spill] sm:$0xff]  ;;  %v1803_v41 = vpop.f32.mrf.mxu0  ;;  %v13720_v44 = vld [vmem:[#allocation2_spill] sm:$0xff] }
 0x1ae   : > { %v4114_v63 = vmax.bf16 %v3968_v10, %v3056_v51  ;;  %v4635_v50 = vrot.slane %v4634_v17, 4  ;;  %v5747_v61 = vunpack.c.l.bf16 %v11559_v42  ;;  %v7719_v51 = vpack.i.bf16 %v5746_v57, %v5745_v0  ;;  %v6808_v17 = vld [vmem:[%s8204_s28 + $0x200] sm:$0x11] }
 0x1af   : > { %v4664_v4 = vrot.slane %v13671_v39, 4  ;;  %v4667_v32 = vrot.slane %v13672_v21, 5  ;;  %13674 = vst [vmem:[#allocation106_spill] sm:$0xff] %v11612_v13  ;;  %v11616_v10 = vmax.bf16 %v11590_v23, %v4115_v15  ;;  %v13675_v21 = vld [vmem:[#allocation191_spill] sm:$0xff]  ;;  %v2930_v20 = vrot.slane %v13677_v35, 4  ;;  %v13685_v35 = vld [vmem:[#allocation196_spill] sm:$0xff] }
 0x1b0   : > { %v11622_v5 = vsel %vm8258_vm2, %v4635_v50, %v11534_v37  ;;  %v13676_v39 = vrot.slane %v13675_v21, 4  ;;  %v13678_v0 = vcombine.low %v13660_v56, %v13661_v28  ;;  %v11633_v57 = vrot.slane %v4671_v12, 5  ;;  %v13679_v37 = vld [vmem:[#allocation68_spill] sm:$0xff]  ;;  %7720 = vrot.lane.b32.xlu1 %v7719_v51, %s8060_s11  ;;  %v13683_v56 = vld [vmem:[#allocation143_spill] sm:$0xff]  ;;  %v13687_v42 = vld [vmem:[#allocation86_spill] sm:$0xff]  ;;  %v1805_v51 = vpop.f32.mrf.mxu0 }
 0x1b1   : > { %v4668_v34 = vor.u32 %v4667_v32, %v4664_v4  ;;  %v5684_v15 = vmax.bf16 %v11622_v5, %v4114_v63  ;;  %v13680_v50 = vshrl.u32 %v13679_v37, 16  ;;  %v2508_v32 = vpop.f32.mrf.mxu1  ;;  %v13681_v4 = vcombine.low %v10633_v6, %v10691_v11 }
 0x1b2   : > { %v3059_v1 = vmax.bf16 %v2931_v55, %v13676_v39  ;;  %3629 = vmatmul.mubr.bf16.gmra.mxu0 %v13678_v0  ;;  %v13682_v55 = vld [vmem:[#allocation139_spill] sm:$0xff]  ;;  %v3974_v39 = vpop.permute.xlu0 %3973  ;;  %v13686_v63 = vrot.slane %v13685_v35, 4  ;;  %v4657_v0 = vshll.u32 %v6808_v17, 16  ;;  %v2933_v37 = vrot.slane %v13687_v42, 4 }
 0x1b3   : > { %v4653_v2 = vrot.slane %v13680_v50, 4  ;;  %5327 = vmatmul.mubr.bf16.gmra.mxu1 %v13681_v4  ;;  %v13684_v28 = vcombine.high %v13682_v55, %v13683_v56  ;;  %v4669_v21 = vrot.slane %v4668_v34, 4  ;;  %v11647_v50 = vadd.f32 %v2508_v32, %v1803_v41  ;;  %v3972_v4 = vpop.permute.xlu1 %3971  ;;  %v13690_v34 = vld [vmem:[#allocation199_spill] sm:$0xff]  ;;  %v2510_v35 = vpop.f32.mrf.mxu1 }
 0x1b4   : > { %v3058_v12 = vmax.bf16 %v2930_v20, %v13686_v63  ;;  %v13689_v13 = vcombine.high %v10780_v54, %v10789_v40  ;;  %v5748_v6 = vunpack.c.l.bf16 %v5684_v15  ;;  %v4117_v20 = vmax.bf16 %v3974_v39, %v3059_v1  ;;  %v1806_v32 = vpop.f32.mrf.mxu0  ;;  %v11666_v35 = vld [vmem:[%s8204_s28 + $0x220] sm:$0xff]  ;;  %v13694_v39 = vld [vmem:[#allocation81_spill] sm:$0xff] }
 0x1b5   : > { %3636 = vmatprep.mubr.bf16.mxu0 %v13684_v28  ;;  %13688 = vst [vmem:[#allocation17_spill] sm:$0xff] %v11647_v50  ;;  %v4654_v11 = vor.u32 %v4653_v2, %v11574_v53  ;;  %v13691_v28 = vshll.u32 %v13690_v34, 16  ;;  %v4659_v41 = vrot.slane %v4657_v0, 5  ;;  %v13692_v53 = vshrl.u32 %v13690_v34, 16  ;;  %v2511_v51 = vpop.f32.mrf.mxu1  ;;  %13693 = vst [vmem:[#allocation20_spill] sm:$0xff] %v11666_v35  ;;  %v13695_v0 = vld [vmem:[#allocation200_spill] sm:$0xff] }
 0x1b6   : > { %5334 = vmatprep.mubr.bf16.mxu1 %v13689_v13  ;;  %v4116_v42 = vmax.bf16 %v3972_v4, %v3058_v12  ;;  %v7724_v63 = vpack.i.bf16 %v5748_v6, %v5747_v61  ;;  %v11660_v13 = vsel %vm8258_vm2, %v4669_v21, %v11633_v57  ;;  %v4691_v1 = vshll.u32 %v11666_v35, 16  ;;  %v13698_v34 = vld [vmem:[#allocation58_spill] sm:$0xff] }
 0x1b7   : > { %v4683_v29 = vrot.slane %v13691_v28, 5  ;;  %v4655_v15 = vrot.slane %v4654_v11, 4  ;;  %v4687_v2 = vrot.slane %v13692_v53, 4  ;;  %v5749_v28 = vunpack.c.l.bf16 %v11616_v10  ;;  %v1808_v11 = vpop.f32.mrf.mxu0  ;;  %v2513_v50 = vpop.f32.mrf.mxu1 }
 0x1b8   : > { %v2932_v12 = vrot.slane %v13694_v39, 4  ;;  %v13696_v61 = vshrl.u32 %v13695_v0, 16  ;;  %v11672_v21 = vadd.f32 %v2511_v51, %v1806_v32  ;;  %v13699_v10 = vrot.slane %v13698_v34, 4  ;;  %7725 = vrot.lane.b32.xlu0 %v7724_v63, %s8060_s11  ;;  %v3978_v51 = vpop.permute.xlu0 %3977  ;;  %v11696_v50 = vld [vmem:[%s8204_s28 + $0x130] sm:$0xff] }
 0x1b9   : > { %v11676_v4 = vsel %vm8258_vm2, %v4655_v15, %v4659_v41  ;;  %v4688_v17 = vor.u32 %v4687_v2, %v4683_v29  ;;  %v11682_v39 = vmax.bf16 %v11660_v13, %v4117_v20  ;;  %v1811_v15 = vpop.f32.mrf.mxu0  ;;  %v11693_v2 = vld [vmem:[%s8204_s28 + $0x128] sm:$0xff]  ;;  %v4693_v0 = vrot.slane %v4691_v1, 5 }
 0x1ba   : > { %v4677_v6 = vrot.slane %v13696_v61, 4  ;;  %13697 = vst [vmem:[#allocation161_spill] sm:$0xff] %v11672_v21  ;;  %v3061_v53 = vmax.bf16 %v2933_v37, %v13699_v10  ;;  %v5686_v32 = vmax.bf16 %v11676_v4, %v4116_v42  ;;  %v13700_v61 = vld [vmem:[#allocation202_spill] sm:$0xff]  ;;  %v13702_v37 = vcombine.low %v13682_v55, %v13683_v56  ;;  %v3976_v42 = vpop.permute.xlu1 %3975  ;;  %v13704_v55 = vld [vmem:[#allocation141_spill] sm:$0xff]  ;;  %v13705_v56 = vld [vmem:[#allocation151_spill] sm:$0xff] }
 0x1bb   : > { %v13701_v11 = vrot.slane %v13700_v61, 4  ;;  %v4689_v63 = vrot.slane %v4688_v17, 4  ;;  %v13703_v61 = vcombine.low %v10780_v54, %v10789_v40  ;;  %v13707_v17 = vld [vmem:[#allocation94_spill] sm:$0xff]  ;;  %v13709_v10 = vcombine.high %v10762_v49, %v10766_v33 }
 0x1bc   : > { %3637 = vmatmul.mubr.bf16.gmra.mxu0 %v13702_v37  ;;  %v4678_v34 = vor.u32 %v4677_v6, %v11633_v57  ;;  %v5750_v37 = vunpack.c.l.bf16 %v5686_v32  ;;  %v2935_v21 = vrot.slane %v13707_v17, 4  ;;  %v1813_v6 = vpop.f32.mrf.mxu0  ;;  %v4119_v54 = vmax.bf16 %v3978_v51, %v3061_v53  ;;  %v11729_v53 = vld [vmem:[%s8204_s28 + $0x238] sm:$0xff]  ;;  %v6813_v51 = vld [vmem:[%s8204_s28 + $0x228] sm:$0x11] }
 0x1bd   : > { %v3060_v41 = vmax.bf16 %v2932_v12, %v13701_v11  ;;  %v2516_v12 = vpop.f32.mrf.mxu1  ;;  %5335 = vmatmul.mubr.bf16.gmra.mxu1 %v13703_v61  ;;  %v13706_v11 = vcombine.high %v13704_v55, %v13705_v56  ;;  %v13710_v61 = vld [vmem:[#allocation201_spill] sm:$0xff]  ;;  %v5751_v1 = vunpack.c.l.bf16 %v11682_v39  ;;  %13713 = vst [vmem:[#allocation107_spill] sm:$0xff] %v11729_v53  ;;  %v13721_v31 = vrot.slane %v13720_v44, 4 }
 0x1be   : > { %v11710_v57 = vadd.f32 %v2516_v12, %v1811_v15  ;;  %5342 = vmatprep.mubr.bf16.mxu1 %v13709_v10  ;;  %v4679_v40 = vrot.slane %v4678_v34, 4  ;;  %v13711_v35 = vshrl.u32 %v13710_v61, 16  ;;  %v7729_v32 = vpack.i.bf16 %v5750_v37, %v5749_v28  ;;  %v1814_v12 = vpop.f32.mrf.mxu0  ;;  %v13714_v34 = vld [vmem:[#allocation101_spill] sm:$0xff] }
 0x1bf   : > { %3644 = vmatprep.mubr.bf16.mxu0 %v13706_v11  ;;  %v4118_v20 = vmax.bf16 %v3976_v42, %v3060_v41  ;;  %v2518_v11 = vpop.f32.mrf.mxu1  ;;  %v11720_v41 = vsel %vm8258_vm2, %v4689_v63, %v4693_v0  ;;  %v13712_v15 = vshll.u32 %v13710_v61, 16  ;;  %v2934_v39 = vrot.slane %v13714_v34, 4  ;;  %v13715_v28 = vld [vmem:[#allocation205_spill] sm:$0xff] }
 0x1c0   : > { %13708 = vst [vmem:[#allocation164_spill] sm:$0xff] %v11710_v57  ;;  %v4708_v55 = vrot.slane %v13711_v35, 4  ;;  %v11726_v10 = vsel %vm8258_vm2, %v4679_v40, %v4683_v29  ;;  %v4715_v35 = vshll.u32 %v11729_v53, 16  ;;  %v13716_v37 = vshrl.u32 %v13715_v28, 16  ;;  %v13717_v11 = vld [vmem:[#allocation204_spill] sm:$0xff]  ;;  %7730 = vrot.lane.b32.xlu1 %v7729_v32, %s8060_s11  ;;  %v1816_v53 = vpop.f32.mrf.mxu0 }
 0x1c1   : > { %v4711_v42 = vrot.slane %v13712_v15, 5  ;;  %v2519_v63 = vpop.f32.mrf.mxu1  ;;  %v5688_v61 = vmax.bf16 %v11726_v10, %v4118_v20  ;;  %v13718_v15 = vrot.slane %v13717_v11, 4  ;;  %v11745_v34 = vmax.bf16 %v11720_v41, %v4119_v54  ;;  %v13724_v53 = vld [vmem:[#allocation104_spill] sm:$0xff] }
 0x1c2   : > { %v4697_v17 = vrot.slane %v13716_v37, 4  ;;  %v11742_v57 = vadd.f32 %v2519_v63, %v1814_v12  ;;  %v4717_v28 = vrot.slane %v4715_v35, 5  ;;  %v3982_v37 = vpop.permute.xlu0 %3981  ;;  %v3062_v45 = vmax.bf16 %v2934_v39, %v13721_v31  ;;  %v13725_v63 = vld [vmem:[#allocation206_spill] sm:$0xff] }
 0x1c3   : > { %v3063_v29 = vmax.bf16 %v2935_v21, %v13718_v15  ;;  %v4712_v40 = vor.u32 %v4711_v42, %v4708_v55  ;;  %v2521_v6 = vpop.f32.mrf.mxu1  ;;  %v5752_v48 = vunpack.c.l.bf16 %v5688_v61  ;;  %v4701_v11 = vshll.u32 %v6813_v51, 16  ;;  %v3980_v21 = vpop.permute.xlu1 %3979  ;;  %v13722_v42 = vld [vmem:[#allocation10_spill] sm:$0xff] }
 0x1c4   : > { %13719 = vst [vmem:[#allocation19_spill] sm:$0xff] %v11742_v57  ;;  %v4698_v60 = vor.u32 %v4697_v17, %v4693_v0  ;;  %v1819_v55 = vpop.f32.mrf.mxu0  ;;  %v13723_v32 = vcombine.low %v13722_v42, %v13705_v56  ;;  %v4120_v12 = vmax.bf16 %v3980_v21, %v3062_v45  ;;  %v2937_v54 = vrot.slane %v13724_v53, 4  ;;  %v13758_v57 = vld [vmem:[#allocation117_spill] sm:$0xff] }
 0x1c5   : > { %v4713_v20 = vrot.slane %v4712_v40, 4  ;;  %v13726_v35 = vshll.u32 %v13725_v63, 16  ;;  %v13727_v44 = vshrl.u32 %v13725_v63, 16  ;;  %v2524_v39 = vpop.f32.mrf.mxu1  ;;  %v13728_v0 = vcombine.low %v10762_v49, %v10766_v33  ;;  %v13732_v49 = vld [vmem:[#allocation64_spill] sm:$0xff] }
 0x1c6   : > { %3645 = vmatmul.mubr.bf16.gmra.mxu0 %v13723_v32  ;;  %v13729_v51 = vcombine.high %v11596_v27, %v11599_v46  ;;  %v7734_v56 = vpack.i.bf16 %v5752_v48, %v5751_v1  ;;  %v4121_v45 = vmax.bf16 %v3982_v37, %v3063_v29  ;;  %v4699_v17 = vrot.slane %v4698_v60, 4  ;;  %v1821_v40 = vpop.f32.mrf.mxu0  ;;  %v11779_v60 = vld [vmem:[%s8204_s28 + $0x248] sm:$0xff]  ;;  %v13735_v29 = vld [vmem:[#allocation98_spill] sm:$0xff] }
 0x1c7   : > { %v4727_v15 = vrot.slane %v13726_v35, 5  ;;  %v4731_v31 = vrot.slane %v13727_v44, 4  ;;  %5343 = vmatmul.mubr.bf16.gmra.mxu1 %v13728_v0  ;;  %v4703_v6 = vrot.slane %v4701_v11, 5  ;;  %v11763_v61 = vadd.f32 %v2524_v39, %v1819_v55  ;;  %v2526_v63 = vpop.f32.mrf.mxu1  ;;  %13734 = vst [vmem:[#allocation158_spill] sm:$0xff] %v11779_v60  ;;  %v13736_v11 = vld [vmem:[#allocation207_spill] sm:$0xff]  ;;  %v13738_v40 = vld [vmem:[#allocation65_spill] sm:$0xff] }
 0x1c8   : > { %3652 = vmatprep.mubr.bf16.mxu0 %v13729_v51  ;;  %v13731_v21 = vcombine.high %v10850_v59, %v10869_v18  ;;  %v11770_v42 = vsel %vm8258_vm2, %v4713_v20, %v4717_v28  ;;  %v13733_v33 = vrot.slane %v13732_v49, 4  ;;  %v4735_v1 = vshll.u32 %v11779_v60, 16  ;;  %7735 = vrot.lane.b32.xlu0 %v7734_v56, %s8060_s11  ;;  %v1822_v20 = vpop.f32.mrf.mxu0  ;;  %v11803_v44 = vld [vmem:[%s8204_s28 + $0x148] sm:$0xff] }
 0x1c9   : > { %13730 = vst [vmem:[#allocation162_spill] sm:$0xff] %v11763_v61  ;;  %v4732_v53 = vor.u32 %v4731_v31, %v4727_v15  ;;  %v11776_v48 = vsel %vm8258_vm2, %v4699_v17, %v4703_v6  ;;  %v2936_v37 = vrot.slane %v13735_v29, 4  ;;  %v13737_v55 = vshrl.u32 %v13736_v11, 16  ;;  %v2527_v0 = vpop.f32.mrf.mxu1  ;;  %v3986_v6 = vpop.permute.xlu0 %3985 }
 0x1ca   : > { %5350 = vmatprep.mubr.bf16.mxu1 %v13731_v21  ;;  %v3065_v32 = vmax.bf16 %v2937_v54, %v13733_v33  ;;  %v5753_v54 = vunpack.c.l.bf16 %v11745_v34  ;;  %v5690_v31 = vmax.bf16 %v11776_v48, %v4120_v12  ;;  %v5691_v17 = vmax.bf16 %v11770_v42, %v4121_v45  ;;  %v1824_v33 = vpop.f32.mrf.mxu0  ;;  %v3984_v11 = vpop.permute.xlu1 %3983 }
 0x1cb   : > { %v4721_v35 = vrot.slane %v13737_v55, 4  ;;  %v4733_v39 = vrot.slane %v4732_v53, 4  ;;  %v13739_v56 = vrot.slane %v13738_v40, 4  ;;  %v11795_v34 = vadd.f32 %v2527_v0, %v1822_v20  ;;  %v2529_v53 = vpop.f32.mrf.mxu1  ;;  %v11800_v55 = vld [vmem:[%s8204_s28 + $0x140] sm:$0xff]  ;;  %v13743_v33 = vld [vmem:[#allocation208_spill] sm:$0xff] }
 0x1cc   : > { %v5754_v63 = vunpack.c.l.bf16 %v5690_v31  ;;  %v4737_v29 = vrot.slane %v4735_v1, 5  ;;  %v7077_v45 = vcombine.high %v11800_v55, %v11803_v44  ;;  %v1827_v20 = vpop.f32.mrf.mxu0  ;;  %v13741_v1 = vcombine.low %v11596_v27, %v11599_v46  ;;  %v13742_v40 = vld [vmem:[#allocation110_spill] sm:$0xff] }
 0x1cd   : > { %v3064_v21 = vmax.bf16 %v2936_v37, %v13739_v56  ;;  %v4722_v49 = vor.u32 %v4721_v35, %v4717_v28  ;;  %13740 = vst [vmem:[#allocation111_spill] sm:$0xff] %v11795_v34  ;;  %v4123_v37 = vmax.bf16 %v3986_v6, %v3065_v32  ;;  %v2939_v56 = vrot.slane %v13742_v40, 4  ;;  %v2532_v51 = vpop.f32.mrf.mxu1  ;;  %v13756_v34 = vld [vmem:[#allocation73_spill] sm:$0xff] }
 0x1ce   : > { %3653 = vmatmul.mubr.bf16.gmra.mxu0 %v13741_v1  ;;  %v7739_v31 = vpack.i.bf16 %v5754_v63, %v5753_v54  ;;  %v11812_v0 = vsel %vm8258_vm2, %v4733_v39, %v4737_v29  ;;  %v13744_v53 = vshrl.u32 %v13743_v33, 16  ;;  %v13745_v32 = vcombine.low %v10850_v59, %v10869_v18  ;;  %v11830_v39 = vld [vmem:[%s8204_s28 + $0x260] sm:$0xff]  ;;  %v13749_v63 = vld [vmem:[#allocation28_spill] sm:$0xff]  ;;  %v1829_v18 = vpop.f32.mrf.mxu0 }
 0x1cf   : > { %v4723_v28 = vrot.slane %v4722_v49, 4  ;;  %v4122_v35 = vmax.bf16 %v3984_v11, %v3064_v21  ;;  %v13746_v6 = vcombine.high %v11693_v2, %v11696_v50  ;;  %v13747_v46 = vshll.u32 %v13743_v33, 16  ;;  %13748 = vst [vmem:[#allocation113_spill] sm:$0xff] %v11830_v39  ;;  %v6818_v49 = vld [vmem:[%s8204_s28 + $0x250] sm:$0x11]  ;;  %v2534_v33 = vpop.f32.mrf.mxu1 }
 0x1d0   : > { %v4752_v12 = vrot.slane %v13744_v53, 4  ;;  %5351 = vmatmul.mubr.bf16.gmra.mxu1 %v13745_v32  ;;  %v4759_v21 = vshll.u32 %v11830_v39, 16  ;;  %v2938_v11 = vrot.slane %v13749_v63, 4  ;;  %v11835_v59 = vadd.f32 %v2532_v51, %v1827_v20  ;;  %7740 = vrot.lane.b32.xlu1 %v7739_v31, %s8060_s11  ;;  %v13752_v32 = vld [vmem:[#allocation210_spill] sm:$0xff] }
 0x1d1   : > { %3660 = vmatprep.mubr.bf16.mxu0 %v13746_v6  ;;  %v11825_v27 = vsel %vm8258_vm2, %v4723_v28, %v4727_v15  ;;  %v4755_v54 = vrot.slane %v13747_v46, 5  ;;  %v13751_v1 = vcombine.high %v10912_v30, %v13560_v25  ;;  %v5755_v40 = vunpack.c.l.bf16 %v5691_v17  ;;  %v13754_v46 = vld [vmem:[#allocation71_spill] sm:$0xff]  ;;  %v2535_v33 = vpop.f32.mrf.mxu1 }
 0x1d2   : > { %13750 = vst [vmem:[#allocation22_spill] sm:$0xff] %v11835_v59  ;;  %v5692_v28 = vmax.bf16 %v11825_v27, %v4122_v35  ;;  %v11845_v53 = vmax.bf16 %v11812_v0, %v4123_v37  ;;  %v13753_v51 = vrot.slane %v13752_v32, 4  ;;  %v13755_v63 = vrot.slane %v13754_v46, 4  ;;  %v3990_v59 = vpop.permute.xlu0 %3989  ;;  %v3988_v32 = vpop.permute.xlu1 %3987 }
 0x1d3   : > { %5358 = vmatprep.mubr.bf16.mxu1 %v13751_v1  ;;  %v4756_v6 = vor.u32 %v4755_v54, %v4752_v12  ;;  %v1830_v1 = vpop.f32.mrf.mxu0  ;;  %v13757_v15 = vshrl.u32 %v13756_v34, 16  ;;  %v4745_v35 = vshll.u32 %v6818_v49, 16  ;;  %v2941_v31 = vrot.slane %v13758_v57, 4  ;;  %v2537_v34 = vpop.f32.mrf.mxu1 }
 0x1d4   : > { %v3067_v20 = vmax.bf16 %v2939_v56, %v13753_v51  ;;  %v3066_v18 = vmax.bf16 %v2938_v11, %v13755_v63  ;;  %v5756_v17 = vunpack.c.l.bf16 %v5692_v28  ;;  %v4761_v37 = vrot.slane %v4759_v21, 5  ;;  %v13759_v56 = vld [vmem:[#allocation3_spill] sm:$0xff]  ;;  %v13761_v21 = vld [vmem:[#allocation70_spill] sm:$0xff] }
 0x1d5   : > { %v4741_v61 = vrot.slane %v13757_v15, 4  ;;  %v4757_v39 = vrot.slane %v4756_v6, 4  ;;  %v13760_v12 = vshll.u32 %v13759_v56, 16  ;;  %v11856_v51 = vadd.f32 %v2535_v33, %v1830_v1  ;;  %v1832_v11 = vpop.f32.mrf.mxu0 }
 0x1d6   : > { %v4125_v60 = vmax.bf16 %v3990_v59, %v3067_v20  ;;  %v7744_v28 = vpack.i.bf16 %v5756_v17, %v5755_v40  ;;  %v4747_v63 = vrot.slane %v4745_v35, 5  ;;  %v4124_v57 = vmax.bf16 %v3988_v32, %v3066_v18  ;;  %v11872_v40 = vld [vmem:[%s8204_s28 + $0x270] sm:$0xff]  ;;  %v13765_v17 = vld [vmem:[#allocation114_spill] sm:$0xff]  ;;  %v13766_v35 = vld [vmem:[#allocation211_spill] sm:$0xff] }
 0x1d7   : > { %v4771_v54 = vrot.slane %v13760_v12, 5  ;;  %v4742_v46 = vor.u32 %v4741_v61, %v4737_v29  ;;  %v11860_v49 = vsel %vm8258_vm2, %v4757_v39, %v4761_v37  ;;  %v13762_v59 = vrot.slane %v13761_v21, 4  ;;  %v1835_v1 = vpop.f32.mrf.mxu0  ;;  %v11888_v12 = vld [vmem:[%s8204_s28 + $0x158] sm:$0xff] }
 0x1d8   : > { %v13763_v20 = vshrl.u32 %v13759_v56, 16  ;;  %v13764_v61 = vcombine.low %v11693_v2, %v11696_v50  ;;  %v4779_v39 = vshll.u32 %v11872_v40, 16  ;;  %v2940_v18 = vrot.slane %v13765_v17, 4  ;;  %7745 = vrot.lane.b32.xlu0 %v7744_v28, %s8060_s11  ;;  %v11885_v50 = vld [vmem:[%s8204_s28 + $0x150] sm:$0xff] }
 0x1d9   : > { %v11864_v15 = vmax.bf16 %v2941_v31, %v13762_v59  ;;  %v4743_v29 = vrot.slane %v4742_v46, 4  ;;  %v13767_v33 = vshrl.u32 %v13766_v35, 16  ;;  %v2540_v31 = vpop.f32.mrf.mxu1  ;;  %v13768_v56 = vcombine.low %v10912_v30, %v13560_v25  ;;  %v1837_v21 = vpop.f32.mrf.mxu0 }
 0x1da   : > { %v4775_v6 = vrot.slane %v13763_v20, 4  ;;  %3661 = vmatmul.mubr.bf16.gmra.mxu0 %v13764_v61  ;;  %v7076_v2 = vcombine.low %v11800_v55, %v11803_v44  ;;  %v7079_v11 = vcombine.high %v11885_v50, %v11888_v12  ;;  %v5757_v46 = vunpack.c.l.bf16 %v11845_v53  ;;  %v3994_v55 = vpop.permute.xlu0 %3993  ;;  %v3992_v35 = vpop.permute.xlu1 %3991  ;;  %v13783_v53 = vld [vmem:[#allocation79_spill] sm:$0xff] }
 0x1db   : > { %v4765_v32 = vrot.slane %v13767_v33, 4  ;;  %5359 = vmatmul.mubr.bf16.gmra.mxu1 %v13768_v56  ;;  %3668 = vmatprep.mubr.bf16.mxu0 %v7077_v45  ;;  %v11893_v28 = vadd.f32 %v2540_v31, %v1835_v1  ;;  %v13769_v30 = vcombine.high %v11018_v58, %v11030_v38  ;;  %v5695_v25 = vmax.bf16 %v11860_v49, %v4125_v60  ;;  %v13770_v45 = vld [vmem:[#allocation145_spill] sm:$0xff]  ;;  %v2542_v61 = vpop.f32.mrf.mxu1  ;;  %v1838_v33 = vpop.f32.mrf.mxu0 }
 0x1dc   : > { %v4776_v34 = vor.u32 %v4775_v6, %v4771_v54  ;;  %v11901_v44 = vsel %vm8258_vm2, %v4743_v29, %v4747_v63  ;;  %v13771_v59 = vrot.slane %v13770_v45, 4  ;;  %v4781_v31 = vrot.slane %v4779_v39, 5 }
 0x1dd   : > { %5366 = vmatprep.mubr.bf16.mxu1 %v13769_v30  ;;  %v5694_v6 = vmax.bf16 %v11901_v44, %v4124_v57  ;;  %v4766_v17 = vor.u32 %v4765_v32, %v4761_v37  ;;  %v4127_v60 = vmax.bf16 %v3994_v55, %v11864_v15  ;;  %v13772_v30 = vld [vmem:[#allocation34_spill] sm:$0xff]  ;;  %v1840_v32 = vpop.f32.mrf.mxu0  ;;  %v7078_v15 = vcombine.low %v11885_v50, %v11888_v12 }
 0x1de   : > { %v3068_v20 = vmax.bf16 %v2940_v18, %v13771_v59  ;;  %v4777_v1 = vrot.slane %v4776_v34, 4  ;;  %v2543_v18 = vpop.f32.mrf.mxu1  ;;  %v2943_v45 = vrot.slane %v13772_v30, 4  ;;  %v13773_v59 = vld [vmem:[#allocation66_spill] sm:$0xff]  ;;  %v13777_v30 = vld [vmem:[#allocation35_spill] sm:$0xff] }
 0x1df   : > { %v5758_v56 = vunpack.c.l.bf16 %v5694_v6  ;;  %v4767_v21 = vrot.slane %v4766_v17, 4  ;;  %v13774_v57 = vshrl.u32 %v13773_v59, 16  ;;  %v11914_v37 = vadd.f32 %v2543_v18, %v1838_v33  ;;  %v6823_v18 = vld [vmem:[%s8204_s28 + $0x278] sm:$0x11]  ;;  %v1843_v12 = vpop.f32.mrf.mxu0  ;;  %v13779_v32 = vld [vmem:[#allocation150_spill] sm:$0xff] }
 0x1e0   : > { %v4126_v63 = vmax.bf16 %v3992_v35, %v3068_v20  ;;  %v11920_v39 = vsel %vm8258_vm2, %v4777_v1, %v4781_v31  ;;  %v13776_v55 = vshll.u32 %v13773_v59, 16  ;;  %v2545_v61 = vpop.f32.mrf.mxu1  ;;  %v11929_v35 = vld [vmem:[%s10638_s25 + $0x8] sm:$0xff]  ;;  %v2942_v50 = vrot.slane %v13777_v30, 4 }
 0x1e1   : > { %v4796_v34 = vrot.slane %v13774_v57, 4  ;;  %13775 = vst [vmem:[#allocation90_spill] sm:$0xff] %v11914_v37  ;;  %v7749_v6 = vpack.i.bf16 %v5758_v56, %v5757_v46  ;;  %v11926_v17 = vsel %vm8258_vm2, %v4767_v21, %v4771_v54  ;;  %v4803_v33 = vshll.u32 %v11929_v35, 16 }
 0x1e2   : > { %v4799_v20 = vrot.slane %v13776_v55, 5  ;;  %3669 = vmatmul.mubr.bf16.gmra.mxu0 %v7076_v2  ;;  %v5759_v1 = vunpack.c.l.bf16 %v5695_v25  ;;  %v5696_v57 = vmax.bf16 %v11926_v17, %v4126_v63  ;;  %v2548_v56 = vpop.f32.mrf.mxu1  ;;  %v13778_v54 = vcombine.low %v11018_v58, %v11030_v38  ;;  %v13781_v2 = vld [vmem:[#allocation159_spill] sm:$0xff] }
 0x1e3   : > { %3676 = vmatprep.mubr.bf16.mxu0 %v7079_v11  ;;  %v11941_v21 = vmax.bf16 %v11920_v39, %v4127_v60  ;;  %v13780_v55 = vrot.slane %v13779_v32, 4  ;;  %v13782_v25 = vrot.slane %v13781_v2, 4  ;;  %v13784_v59 = vshrl.u32 %v13783_v53, 16  ;;  %7750 = vrot.lane.b32.xlu1 %v7749_v6, %s8060_s11  ;;  %v3998_v2 = vpop.permute.xlu0 %3997  ;;  %v11963_v6 = vld [vmem:[%s8204_s28 + $0x168] sm:$0xff] }
 0x1e4   : > { %v4800_v46 = vor.u32 %v4799_v20, %v4796_v34  ;;  %5367 = vmatmul.mubr.bf16.gmra.mxu1 %v13778_v54  ;;  %v11949_v63 = vadd.f32 %v2548_v56, %v1843_v12  ;;  %v1845_v34 = vpop.f32.mrf.mxu0  ;;  %v13786_v58 = vcombine.high %v11112_v16, %v11126_v14  ;;  %v5760_v38 = vunpack.c.l.bf16 %v5696_v57  ;;  %v3996_v20 = vpop.permute.xlu1 %3995  ;;  %v13789_v57 = vld [vmem:[#allocation130_spill] sm:$0xff] }
 0x1e5   : > { %v3071_v61 = vmax.bf16 %v2943_v45, %v13780_v55  ;;  %v3070_v30 = vmax.bf16 %v2942_v50, %v13782_v25  ;;  %v4785_v29 = vrot.slane %v13784_v59, 4  ;;  %v4789_v60 = vshll.u32 %v6823_v18, 16  ;;  %v2550_v45 = vpop.f32.mrf.mxu1  ;;  %v13787_v59 = vld [vmem:[#allocation147_spill] sm:$0xff] }
 0x1e6   : > { %13785 = vst [vmem:[#allocation100_spill] sm:$0xff] %v11949_v63  ;;  %5374 = vmatprep.mubr.bf16.mxu1 %v13786_v58  ;;  %v4801_v11 = vrot.slane %v4800_v46, 4  ;;  %v4805_v50 = vrot.slane %v4803_v33, 5  ;;  %v13788_v12 = vshll.u32 %v13787_v59, 16  ;;  %v1846_v32 = vpop.f32.mrf.mxu0  ;;  %v7754_v55 = vpack.i.bf16 %v5760_v38, %v5759_v1  ;;  %v11966_v33 = vld [vmem:[%s8204_s28 + $0x170] sm:$0xff]  ;;  %v13792_v45 = vld [vmem:[#allocation126_spill] sm:$0xff] }
 0x1e7   : > { %v4786_v54 = vor.u32 %v4785_v29, %v4781_v31  ;;  %v4128_v53 = vmax.bf16 %v3996_v20, %v3070_v30  ;;  %v4791_v25 = vrot.slane %v4789_v60, 5  ;;  %v2945_v46 = vrot.slane %v13789_v57, 4  ;;  %v2551_v58 = vpop.f32.mrf.mxu1  ;;  %v11982_v63 = vld [vmem:[%s10638_s25 + $0x18] sm:$0xff] }
 0x1e8   : > { %v11957_v56 = vrot.slane %v13788_v12, 5  ;;  %v13790_v18 = vshrl.u32 %v13787_v59, 16  ;;  %v7081_v31 = vcombine.high %v11963_v6, %v11966_v33  ;;  %v11972_v29 = vsel %vm8258_vm2, %v4801_v11, %v4805_v50  ;;  %v1848_v60 = vpop.f32.mrf.mxu0  ;;  %v13793_v12 = vld [vmem:[#allocation149_spill] sm:$0xff]  ;;  %7755 = vrot.lane.b32.xlu0 %v7754_v55, %s8060_s11 }
 0x1e9   : > { %v4129_v1 = vmax.bf16 %v3998_v2, %v3071_v61  ;;  %v4787_v30 = vrot.slane %v4786_v54, 4  ;;  %v11974_v38 = vadd.f32 %v2551_v58, %v1846_v32  ;;  %v2944_v59 = vrot.slane %v13792_v45, 4  ;;  %v2553_v11 = vpop.f32.mrf.mxu1 }
 0x1ea   : > { %v4819_v34 = vrot.slane %v13790_v18, 4  ;;  %v13794_v57 = vshrl.u32 %v13793_v12, 16  ;;  %v4827_v37 = vshrl.u32 %v11982_v63, 16  ;;  %v5761_v61 = vunpack.c.l.bf16 %v11941_v21  ;;  %v1851_v2 = vpop.f32.mrf.mxu0  ;;  %3677 = vmatmul.mubr.bf16.gmra.mxu0 %v7078_v15 }
 0x1eb   : > { %13791 = vst [vmem:[#allocation119_spill] sm:$0xff] %v11974_v38  ;;  %v11988_v54 = vsel %vm8258_vm2, %v4787_v30, %v4791_v25  ;;  %v4823_v32 = vshll.u32 %v11982_v63, 16  ;;  %v13795_v58 = vrot.slane %v13653_v62, 4  ;;  %v13796_v45 = vrot.slane %v13668_v8, 4  ;;  %v2556_v12 = vpop.f32.mrf.mxu1  ;;  %3684 = vmatprep.mubr.bf16.mxu0 %v7081_v31  ;;  %v13801_v62 = vld [vmem:[#allocation146_spill] sm:$0xff] }
 0x1ec   : > { %v4820_v20 = vor.u32 %v4819_v34, %v11957_v56  ;;  %v4809_v18 = vrot.slane %v13794_v57, 4  ;;  %v5698_v55 = vmax.bf16 %v11988_v54, %v4128_v53  ;;  %v13797_v25 = vcombine.low %v11112_v16, %v11126_v14  ;;  %v4000_v53 = vpop.permute.xlu1 %3999  ;;  %v4002_v34 = vpop.permute.xlu0 %4001 }
 0x1ed   : > { %v3073_v60 = vmax.bf16 %v2945_v46, %v13795_v58  ;;  %v3072_v21 = vmax.bf16 %v2944_v59, %v13796_v45  ;;  %v5699_v15 = vmax.bf16 %v11972_v29, %v4129_v1  ;;  %v13798_v46 = vld [vmem:[#allocation75_spill] sm:$0xff]  ;;  %v12005_v11 = vadd.f32 %v2556_v12, %v1851_v2  ;;  %v1853_v59 = vpop.f32.mrf.mxu0  ;;  %v508_v58 = vld [vmem:[%s10638_s25 + $0x20] sm:$0x11]  ;;  %v2558_v45 = vpop.f32.mrf.mxu1  ;;  %v7996_v1 = vld [vmem:[%s8204_s28 + $0x178] sm:$0xff] }
 0x1ee   : > { %5375 = vmatmul.mubr.bf16.gmra.mxu1 %v13797_v25  ;;  %v4821_v30 = vrot.slane %v4820_v20, 4  ;;  %v4810_v57 = vor.u32 %v4809_v18, %v4805_v50  ;;  %v2818_v8 = vrot.slane %v13798_v46, 4  ;;  %v13800_v16 = vcombine.high %v11180_v3, %v11186_v7  ;;  %v7997_v20 = vld [vmem:[%s8204_s28 + $0x180] sm:$0xff] }
 0x1ef   : > { %13799 = vst [vmem:[#allocation167_spill] sm:$0xff] %v12005_v11  ;;  %v5762_v14 = vunpack.c.l.bf16 %v5698_v55  ;;  %v4130_v31 = vmax.bf16 %v4000_v53, %v3072_v21  ;;  %v7080_v50 = vcombine.low %v11963_v6, %v11966_v33  ;;  %v7083_v18 = vcombine.high %v7996_v1, %v7997_v20  ;;  %v1854_v2 = vpop.f32.mrf.mxu0 }
 0x1f0   : > { %5382 = vmatprep.mubr.bf16.mxu1 %v13800_v16  ;;  %v4825_v25 = vrot.slane %v4823_v32, 5  ;;  %v4811_v46 = vrot.slane %v4810_v57, 4  ;;  %v4131_v59 = vmax.bf16 %v4002_v34, %v3073_v60  ;;  %v2946_v11 = vrot.slane %v13801_v62, 4  ;;  %v2559_v16 = vpop.f32.mrf.mxu1  ;;  %v4004_v53 = vpop.permute.xlu1 %4003 }
 0x1f1   : > { %v7759_v12 = vpack.i.bf16 %v5762_v14, %v5761_v61  ;;  %v4829_v38 = vrot.slane %v4827_v37, 4  ;;  %v5763_v55 = vunpack.c.l.bf16 %v5699_v15  ;;  %v4833_v33 = vshll.u32 %v508_v58, 16  ;;  %v1856_v57 = vpop.f32.mrf.mxu0 }
 0x1f2   : > { %v12018_v21 = vsel %vm8258_vm2, %v4821_v30, %v4825_v25  ;;  %v12023_v6 = vsel %vm8258_vm2, %v4811_v46, %v11957_v56  ;;  %v12025_v32 = vadd.f32 %v2559_v16, %v1854_v2  ;;  %v3074_v34 = vmax.bf16 %v2946_v11, %v2818_v8  ;;  %v2561_v60 = vpop.f32.mrf.mxu1  ;;  %3685 = vmatmul.mubr.bf16.gmra.mxu0 %v7080_v50 }
 0x1f3   : > { %v7220_v61 = vcombine.low %v11972_v29, %v12023_v6  ;;  %v5700_v37 = vmax.bf16 %v12023_v6, %v4130_v31  ;;  %7760 = vrot.lane.b32.xlu1 %v7759_v12, %s8060_s11  ;;  %v4830_v15 = vor.u32 %v4829_v38, %v4825_v25  ;;  %v4835_v30 = vrot.slane %v4833_v33, 5  ;;  %v1859_v62 = vpop.f32.mrf.mxu0  ;;  %3692 = vmatprep.mubr.bf16.mxu0 %v7083_v18 }
 0x1f4   : > { %v5701_v56 = vmax.bf16 %v12018_v21, %v4131_v59  ;;  %v4132_v58 = vmax.bf16 %v4004_v53, %v3074_v34  ;;  %v7211_v45 = vcombine.high %v11720_v41, %v11776_v48  ;;  %v2564_v46 = vpop.f32.mrf.mxu1  ;;  %v13802_v31 = vcombine.low %v11180_v3, %v11186_v7  ;;  %v7999_v34 = vld [vmem:[%s8204_s28 + $0x198] sm:$0xff] }
 0x1f5   : > { %v5764_v14 = vunpack.c.l.bf16 %v5700_v37  ;;  %v4831_v8 = vrot.slane %v4830_v15, 4  ;;  %v7213_v38 = vcombine.high %v11770_v42, %v11825_v27  ;;  %v12039_v11 = vadd.f32 %v2564_v46, %v1859_v62  ;;  %v1861_v50 = vpop.f32.mrf.mxu0 }
 0x1f6   : > { %5383 = vmatmul.mubr.bf16.gmra.mxu1 %v13802_v31  ;;  %v13803_v25 = vcombine.high %v11242_v52, %v11255_v19  ;;  %v2566_v12 = vpop.f32.mrf.mxu1  ;;  %v7215_v7 = vcombine.high %v11812_v0, %v11901_v44  ;;  %v7082_v59 = vcombine.low %v7996_v1, %v7997_v20  ;;  %v5765_v16 = vunpack.c.l.bf16 %v5701_v56 }
 0x1f7   : > { %v7764_v2 = vpack.i.bf16 %v5764_v14, %v5763_v55  ;;  %v12046_v3 = vsel %vm8258_vm2, %v4831_v8, %v4835_v30  ;;  %v1862_v18 = vpop.f32.mrf.mxu0  ;;  %v7998_v55 = vld [vmem:[%s8204_s28 + $0x190] sm:$0xff]  ;;  %v7217_v53 = vcombine.high %v11860_v49, %v11926_v17  ;;  %v7219_v56 = vcombine.high %v11920_v39, %v11988_v54 }
 0x1f8   : > { %5390 = vmatprep.mubr.bf16.mxu1 %v13803_v25  ;;  %v5702_v57 = vmax.bf16 %v12046_v3, %v4132_v58  ;;  %v2567_v37 = vpop.f32.mrf.mxu1  ;;  %v7085_v60 = vcombine.high %v7998_v55, %v7999_v34  ;;  %v13804_v58 = vcombine.low %v11242_v52, %v11255_v19  ;;  %v13805_v8 = vcombine.high %v11356_v36, %v11385_v22 }
 0x1f9   : > { %7765 = vrot.lane.b32.xlu0 %v7764_v2, %s8060_s11  ;;  %v12056_v43 = vadd.f32 %v2567_v37, %v1862_v18  ;;  %v1864_v15 = vpop.f32.mrf.mxu0  ;;  %v7221_v50 = vcombine.high %v11972_v29, %v12023_v6  ;;  %v7084_v52 = vcombine.low %v7998_v55, %v7999_v34  ;;  %v8000_v18 = vld [vmem:[%s8204_s28 + $0x1a0] sm:$0xff]  ;;  %v13807_v34 = vcombine.high %v11378_v9, %v11459_v47 }
 0x1fa   : > { %v5766_v30 = vunpack.c.l.bf16 %v5702_v57  ;;  %v2569_v1 = vpop.f32.mrf.mxu1  ;;  %3693 = vmatmul.mubr.bf16.gmra.mxu0 %v7082_v59  ;;  %v8001_v59 = vld [vmem:[%s8204_s28 + $0x1a8] sm:$0xff] }
 0x1fb   : > { %v1867_v20 = vpop.f32.mrf.mxu0  ;;  %3700 = vmatprep.mubr.bf16.mxu0 %v7085_v60  ;;  %v13806_v1 = vcombine.low %v11356_v36, %v11385_v22 }
 0x1fc   : > { %v7769_v62 = vpack.i.bf16 %v5766_v30, %v5765_v16  ;;  %v2572_v14 = vpop.f32.mrf.mxu1  ;;  %v7087_v16 = vcombine.high %v8000_v18, %v8001_v59 }
 0x1fd   : > { %v12065_v46 = vadd.f32 %v2572_v14, %v1867_v20  ;;  %v1869_v31 = vpop.f32.mrf.mxu0 }
 0x1fe   : > { %5391 = vmatmul.mubr.bf16.gmra.mxu1 %v13804_v58  ;;  %7770 = vrot.lane.b32.xlu1 %v7769_v62, %s8060_s11  ;;  %v2574_v25 = vpop.f32.mrf.mxu1  ;;  %v7086_v58 = vcombine.low %v8000_v18, %v8001_v59  ;;  %v13809_v59 = vld [vmem:[#allocation103_spill] sm:$0xff] }
 0x1ff   : > { %5398 = vmatprep.mubr.bf16.mxu1 %v13805_v8  ;;  %v1870_v12 = vpop.f32.mrf.mxu0  ;;  %v8002_v8 = vld [vmem:[%s8204_s28 + $0x1b8] sm:$0xff]  ;;  %v8003_v25 = vld [vmem:[%s8204_s28 + $0x1c0] sm:$0xff] }
 0x200   : > { %v2575_v19 = vpop.f32.mrf.mxu1 }
 0x201   : > { %v12077_v57 = vadd.f32 %v2575_v19, %v1870_v12  ;;  %v1872_v37 = vpop.f32.mrf.mxu0  ;;  %v7089_v12 = vcombine.high %v8002_v8, %v8003_v25 }
 0x202   : > { %v2577_v60 = vpop.f32.mrf.mxu1  ;;  %3701 = vmatmul.mubr.bf16.gmra.mxu0 %v7084_v52  ;;  %v13808_v37 = vcombine.low %v11378_v9, %v11459_v47 }
 0x203   : > { %v1875_v15 = vpop.f32.mrf.mxu0  ;;  %3708 = vmatprep.mubr.bf16.mxu0 %v7087_v16 }
 0x204   : > { %v2580_v30 = vpop.f32.mrf.mxu1 }
 0x205   : > { %v12082_v20 = vadd.f32 %v2580_v30, %v1875_v15  ;;  %v1877_v55 = vpop.f32.mrf.mxu0  ;;  %v13810_v15 = vcombine.high %v11436_v26, %v13809_v59 }
 0x206   : > { %5399 = vmatmul.mubr.bf16.gmra.mxu1 %v13806_v1  ;;  %v2582_v62 = vpop.f32.mrf.mxu1  ;;  %v7088_v55 = vcombine.low %v8002_v8, %v8003_v25  ;;  %v13812_v25 = vld [vmem:[#allocation99_spill] sm:$0xff] }
 0x207   : > { %5406 = vmatprep.mubr.bf16.mxu1 %v13807_v34  ;;  %v1878_v14 = vpop.f32.mrf.mxu0  ;;  %v8004_v62 = vld [vmem:[%s8204_s28 + $0x1c8] sm:$0xff] }
 0x208   : > { %v2583_v31 = vpop.f32.mrf.mxu1 }
 0x209   : > { %v12089_v52 = vadd.f32 %v2583_v31, %v1878_v14  ;;  %v1880_v36 = vpop.f32.mrf.mxu0  ;;  %v8005_v14 = vld [vmem:[%s8204_s28 + $0x1d0] sm:$0xff] }
 0x20a   : > { %v2585_v22 = vpop.f32.mrf.mxu1  ;;  %3709 = vmatmul.mubr.bf16.gmra.mxu0 %v7086_v58  ;;  %v7091_v58 = vcombine.high %v8004_v62, %v8005_v14 }
 0x20b   : > { %v1883_v19 = vpop.f32.mrf.mxu0  ;;  %3716 = vmatprep.mubr.bf16.mxu0 %v7089_v12  ;;  %v13811_v22 = vcombine.low %v11436_v26, %v13809_v59 }
 0x20c   : > { %v2588_v16 = vpop.f32.mrf.mxu1 }
 0x20d   : > { %v12094_v60 = vadd.f32 %v2588_v16, %v1883_v19  ;;  %v1885_v18 = vpop.f32.mrf.mxu0  ;;  %v13813_v16 = vld [vmem:[#allocation93_spill] sm:$0xff] }
 0x20e   : > { %5407 = vmatmul.mubr.bf16.gmra.mxu1 %v13808_v37  ;;  %v2590_v30 = vpop.f32.mrf.mxu1  ;;  %v13814_v37 = vcombine.high %v13812_v25, %v13813_v16 }
 0x20f   : > { %5414 = vmatprep.mubr.bf16.mxu1 %v13810_v15  ;;  %v1886_v1 = vpop.f32.mrf.mxu0  ;;  %v7090_v30 = vcombine.low %v8004_v62, %v8005_v14  ;;  %v13816_v14 = vcombine.high %v11543_v24, %v11622_v5 }
 0x210   : > { %v2591_v34 = vpop.f32.mrf.mxu1 }
 0x211   : > { %v12101_v31 = vadd.f32 %v2591_v34, %v1886_v1  ;;  %v1888_v9 = vpop.f32.mrf.mxu0  ;;  %v8006_v34 = vld [vmem:[%s8204_s28 + $0x1e0] sm:$0xff] }
 0x212   : > { %v2593_v47 = vpop.f32.mrf.mxu1  ;;  %3717 = vmatmul.mubr.bf16.gmra.mxu0 %v7088_v55  ;;  %v8007_v9 = vld [vmem:[%s8204_s28 + $0x1e8] sm:$0xff] }
 0x213   : > { %v1891_v12 = vpop.f32.mrf.mxu0  ;;  %3724 = vmatprep.mubr.bf16.mxu0 %v7091_v58  ;;  %v7093_v55 = vcombine.high %v8006_v34, %v8007_v9 }
 0x214   : > { %v2596_v36 = vpop.f32.mrf.mxu1 }
 0x215   : > { %v12106_v19 = vadd.f32 %v2596_v36, %v1891_v12  ;;  %v1893_v8 = vpop.f32.mrf.mxu0  ;;  %v13815_v36 = vcombine.low %v13812_v25, %v13813_v16 }
 0x216   : > { %5415 = vmatmul.mubr.bf16.gmra.mxu1 %v13811_v22  ;;  %v2598_v18 = vpop.f32.mrf.mxu1 }
 0x217   : > { %5422 = vmatprep.mubr.bf16.mxu1 %v13814_v37  ;;  %v1894_v15 = vpop.f32.mrf.mxu0  ;;  %v7092_v18 = vcombine.low %v8006_v34, %v8007_v9  ;;  %v13819_v9 = vcombine.high %v11590_v23, %v11676_v4 }
 0x218   : > { %v2599_v1 = vpop.f32.mrf.mxu1 }
 0x219   : > { %v12113_v47 = vadd.f32 %v2599_v1, %v1894_v15  ;;  %v1896_v26 = vpop.f32.mrf.mxu0  ;;  %v8008_v1 = vld [vmem:[%s8204_s28 + $0x1f0] sm:$0xff] }
 0x21a   : > { %v2601_v59 = vpop.f32.mrf.mxu1  ;;  %3725 = vmatmul.mubr.bf16.gmra.mxu0 %v7090_v30  ;;  %v13817_v26 = vld [vmem:[#allocation87_spill] sm:$0xff] }
 0x21b   : > { %v1899_v58 = vpop.f32.mrf.mxu0  ;;  %3732 = vmatprep.mubr.bf16.mxu0 %v7093_v55  ;;  %v7095_v30 = vcombine.high %v8008_v1, %v13817_v26 }
 0x21c   : > { %v2604_v12 = vpop.f32.mrf.mxu1 }
 0x21d   : > { %v12118_v22 = vadd.f32 %v2604_v12, %v1899_v58  ;;  %v1901_v62 = vpop.f32.mrf.mxu0  ;;  %v13818_v12 = vcombine.low %v11543_v24, %v11622_v5 }
 0x21e   : > { %5423 = vmatmul.mubr.bf16.gmra.mxu1 %v13815_v36  ;;  %v2606_v8 = vpop.f32.mrf.mxu1 }
 0x21f   : > { %5430 = vmatprep.mubr.bf16.mxu1 %v13816_v14  ;;  %v1902_v37 = vpop.f32.mrf.mxu0  ;;  %v7094_v8 = vcombine.low %v8008_v1, %v13817_v26  ;;  %v13822_v26 = vcombine.high %v11660_v13, %v11726_v10 }
 0x220   : > { %v2607_v15 = vpop.f32.mrf.mxu1 }
 0x221   : > { %v12125_v59 = vadd.f32 %v2607_v15, %v1902_v37  ;;  %v1904_v25 = vpop.f32.mrf.mxu0  ;;  %v8009_v15 = vld [vmem:[%s8204_s28 + $0x208] sm:$0xff] }
 0x222   : > { %v2609_v16 = vpop.f32.mrf.mxu1  ;;  %3733 = vmatmul.mubr.bf16.gmra.mxu0 %v7092_v18  ;;  %v13820_v18 = vld [vmem:[#allocation42_spill] sm:$0xff] }
 0x223   : > { %v1907_v55 = vpop.f32.mrf.mxu0  ;;  %3740 = vmatprep.mubr.bf16.mxu0 %v7095_v30  ;;  %v7097_v25 = vcombine.high %v8009_v15, %v13820_v18 }
 0x224   : > { %v2612_v58 = vpop.f32.mrf.mxu1 }
 0x225   : > { %v12130_v36 = vadd.f32 %v2612_v58, %v1907_v55  ;;  %v1909_v34 = vpop.f32.mrf.mxu0  ;;  %v13821_v58 = vcombine.low %v11590_v23, %v11676_v4  ;;  %v7616_v4 = vpop.permute.xlu0 %7615 }
 0x226   : > { %5431 = vmatmul.mubr.bf16.gmra.mxu1 %v13818_v12  ;;  %v2614_v62 = vpop.f32.mrf.mxu1 }
 0x227   : > { %5438 = vmatprep.mubr.bf16.mxu1 %v13819_v9  ;;  %v1910_v14 = vpop.f32.mrf.mxu0  ;;  %v7096_v62 = vcombine.low %v8009_v15, %v13820_v18  ;;  %v7617_v15 = vunpack.i.l.bf16 %v7616_v4 }
 0x228   : > { %v2615_v37 = vpop.f32.mrf.mxu1 }
 0x229   : > { %v12138_v16 = vadd.f32 %v2615_v37, %v1910_v14  ;;  %v1912_v24 = vpop.f32.mrf.mxu0  ;;  %v13823_v37 = vld [vmem:[#allocation20_spill] sm:$0xff] }
 0x22a   : > { %v2617_v5 = vpop.f32.mrf.mxu1  ;;  %3741 = vmatmul.mubr.bf16.gmra.mxu0 %v7094_v8  ;;  %v8010_v8 = vld [vmem:[%s8204_s28 + $0x218] sm:$0xff] }
 0x22b   : > { %v1915_v30 = vpop.f32.mrf.mxu0  ;;  %3748 = vmatprep.mubr.bf16.mxu0 %v7097_v25  ;;  %v7099_v24 = vcombine.high %v8010_v8, %v13823_v37 }
 0x22c   : > { %v2620_v55 = vpop.f32.mrf.mxu1 }
 0x22d   : > { %v12143_v12 = vadd.f32 %v2620_v55, %v1915_v30  ;;  %v1917_v1 = vpop.f32.mrf.mxu0  ;;  %v13824_v55 = vld [vmem:[#allocation198_spill] sm:$0xff] }
 0x22e   : > { %5439 = vmatmul.mubr.bf16.gmra.mxu1 %v13821_v58  ;;  %v2622_v34 = vpop.f32.mrf.mxu1 }
 0x22f   : > { %5446 = vmatprep.mubr.bf16.mxu1 %v13822_v26  ;;  %v1918_v9 = vpop.f32.mrf.mxu0  ;;  %v13825_v26 = vcombine.low %v11660_v13, %v11726_v10  ;;  %v7098_v10 = vcombine.low %v8010_v8, %v13823_v37 }
 0x230   : > { %v2623_v14 = vpop.f32.mrf.mxu1 }
 0x231   : > { %v12151_v5 = vadd.f32 %v2623_v14, %v1918_v9  ;;  %v1920_v23 = vpop.f32.mrf.mxu0  ;;  %v7618_v14 = vunpack.i.h.bf16 %v7616_v4  ;;  %v7621_v4 = vpop.permute.xlu1 %7620 }
 0x232   : > { %v2625_v25 = vpop.f32.mrf.mxu1  ;;  %3749 = vmatmul.mubr.bf16.gmra.mxu0 %v7096_v62  ;;  %v12165_v62 = vld [vmem:[%s12551_s3] ss:$0 sm:$0xff]  ;;  %v13826_v23 = vld [vmem:[#allocation136_spill] sm:$0xff] }
 0x233   : > { %v3558_v30 = vpop.f32.mrf.mxu0  ;;  %3756 = vmatprep.mubr.bf16.mxu0 %v7099_v24 }
 0x234   : > { %v3813_v58 = vadd.f32 %v3558_v30, %v13824_v55  ;;  %v5256_v1 = vpop.f32.mrf.mxu1  ;;  %v8011_v55 = vld [vmem:[%s8204_s28 + $0x230] sm:$0xff] }
 0x235   : > { %v3560_v18 = vpop.f32.mrf.mxu0 }
 0x236   : > { %5447 = vmatmul.mubr.bf16.gmra.mxu1 %v13825_v26  ;;  %v5511_v34 = vadd.f32 %v5256_v1, %v3813_v58  ;;  %v5258_v9 = vpop.f32.mrf.mxu1  ;;  %v13827_v26 = vld [vmem:[#allocation107_spill] sm:$0xff]  ;;  %v12177_v1 = vld [vmem:[%s12552_s4] ss:$0 sm:$0xff] }
 0x237   : > { %5454 = vmatprep.mubr.bf16.mxu1 %v7211_v45  ;;  %v3561_v13 = vpop.f32.mrf.mxu0  ;;  %v7101_v18 = vcombine.high %v8011_v55, %v13827_v26  ;;  %v13828_v9 = vld [vmem:[#allocation209_spill] sm:$0xff] }
 0x238   : > { %v6024_v24 = vsel %vm6023_vm3, %v5511_v34, %v7617_v15  ;;  %v3814_v25 = vadd.f32 %v3561_v13, %v13826_v23  ;;  %v5259_v30 = vpop.f32.mrf.mxu1 }
 0x239   : > { %v6095_v45 = vmul.f32 %v12165_v62, %v6024_v24  ;;  %v3563_v58 = vpop.f32.mrf.mxu0  ;;  %v13829_v24 = vcombine.low %v11720_v41, %v11776_v48  ;;  %v7100_v41 = vcombine.low %v8011_v55, %v13827_v26  ;;  %v7623_v55 = vunpack.i.h.bf16 %v7621_v4 }
 0x23a   : > { %v5512_v8 = vadd.f32 %v5259_v30, %v3814_v25  ;;  %v5261_v37 = vpop.f32.mrf.mxu1  ;;  %3757 = vmatmul.mubr.bf16.gmra.mxu0 %v7098_v10  ;;  %v7622_v10 = vunpack.i.l.bf16 %v7621_v4 }
 0x23b   : > { %v3566_v15 = vpop.f32.mrf.mxu0  ;;  %3764 = vmatprep.mubr.bf16.mxu0 %v7101_v18  ;;  %v6166_v58 = vadd.f32 %v12177_v1, %v6095_v45  ;;  %v13830_v18 = vld [vmem:[#allocation4_spill] sm:$0xff] }
 0x23c   : > { %v6025_v34 = vsel %vm6023_vm3, %v5512_v8, %v7618_v14  ;;  %v3815_v13 = vadd.f32 %v3566_v15, %v13828_v9  ;;  %v5264_v23 = vpop.f32.mrf.mxu1 }
 0x23d   : > { %v6096_v25 = vmul.f32 %v12165_v62, %v6025_v34  ;;  %v3568_v30 = vpop.f32.mrf.mxu0  ;;  %v8012_v34 = vld [vmem:[%s8204_s28 + $0x240] sm:$0xff]  ;;  %v6230_v33 = vmax.f32 %v6166_v58, 0.0  ;;  %v13832_v58 = vld [vmem:[#allocation5_spill] sm:$0xff] }
 0x23e   : > { %5455 = vmatmul.mubr.bf16.gmra.mxu1 %v13829_v24  ;;  %v5513_v14 = vadd.f32 %v5264_v23, %v3815_v13  ;;  %v5266_v8 = vpop.f32.mrf.mxu1  ;;  %v13831_v24 = vld [vmem:[#allocation158_spill] sm:$0xff] }
 0x23f   : > { %5462 = vmatprep.mubr.bf16.mxu1 %v7213_v38  ;;  %v6167_v37 = vadd.f32 %v12177_v1, %v6096_v25  ;;  %v3569_v15 = vpop.f32.mrf.mxu0  ;;  %v7103_v30 = vcombine.high %v8012_v34, %v13831_v24 }
 0x240   : > { %v6026_v48 = vsel %vm6023_vm3, %v5513_v14, %v7622_v10  ;;  %v3816_v45 = vadd.f32 %v3569_v15, %v13830_v18  ;;  %v5267_v9 = vpop.f32.mrf.mxu1  ;;  %v7626_v10 = vpop.permute.xlu0 %7625 }
 0x241   : > { %v6231_v2 = vmax.f32 %v6167_v37, 0.0  ;;  %v6097_v38 = vmul.f32 %v12165_v62, %v6026_v48  ;;  %v3571_v13 = vpop.f32.mrf.mxu0  ;;  %v13833_v48 = vcombine.low %v11770_v42, %v11825_v27  ;;  %v7102_v42 = vcombine.low %v8012_v34, %v13831_v24 }
 0x242   : > { %v5514_v26 = vadd.f32 %v5267_v9, %v3816_v45  ;;  %v5269_v23 = vpop.f32.mrf.mxu1  ;;  %3765 = vmatmul.mubr.bf16.gmra.mxu0 %v7100_v41 }
 0x243   : > { %v7381_v25 = vpack.c.bf16 %v6231_v2, %v6230_v33  ;;  %v3574_v14 = vpop.f32.mrf.mxu0  ;;  %3772 = vmatprep.mubr.bf16.mxu0 %v7103_v30  ;;  %v6168_v4 = vadd.f32 %v12177_v1, %v6097_v38  ;;  %v7627_v2 = vunpack.i.l.bf16 %v7626_v10  ;;  %v13834_v30 = vld [vmem:[#allocation6_spill] sm:$0xff]  ;;  %v13835_v23 = vld [vmem:[#allocation113_spill] sm:$0xff] }
 0x244   : > { %v6027_v8 = vsel %vm6023_vm3, %v5514_v26, %v7623_v55  ;;  %v3817_v37 = vadd.f32 %v3574_v14, %v13832_v58  ;;  %v5272_v15 = vpop.f32.mrf.mxu1  ;;  %v8013_v26 = vld [vmem:[%s8204_s28 + $0x258] sm:$0xff] }
 0x245   : > { %7382 = vst [vmem:[%s12199_s10] sm:$0xff] %v7381_v25   ;;  %v6098_v18 = vmul.f32 %v12165_v62, %v6027_v8  ;;  %v3576_v33 = vpop.f32.mrf.mxu0  ;;  %v7105_v25 = vcombine.high %v8013_v26, %v13835_v23  ;;  %v6232_v14 = vmax.f32 %v6168_v4, 0.0  ;;  %v13837_v4 = vcombine.low %v11812_v0, %v11901_v44 }
 0x246   : > { %5463 = vmatmul.mubr.bf16.gmra.mxu1 %v13833_v48  ;;  %v5515_v41 = vadd.f32 %v5272_v15, %v3817_v37  ;;  %v5274_v45 = vpop.f32.mrf.mxu1  ;;  %v7628_v37 = vunpack.i.h.bf16 %v7626_v10  ;;  %v7631_v33 = vpop.permute.xlu1 %7630  ;;  %v7104_v0 = vcombine.low %v8013_v26, %v13835_v23 }
 0x247   : > { %5470 = vmatprep.mubr.bf16.mxu1 %v7215_v7  ;;  %v6169_v9 = vadd.f32 %v12177_v1, %v6098_v18  ;;  %v3577_v13 = vpop.f32.mrf.mxu0 }
 0x248   : > { %v6028_v27 = vsel %vm6023_vm3, %v5515_v41, %v7627_v2  ;;  %v3818_v55 = vadd.f32 %v3577_v13, %v13834_v30  ;;  %v5275_v38 = vpop.f32.mrf.mxu1  ;;  %v13836_v2 = vld [vmem:[#allocation72_spill] sm:$0xff] }
 0x249   : > { %v6233_v8 = vmax.f32 %v6169_v9, 0.0  ;;  %v6099_v7 = vmul.f32 %v12165_v62, %v6028_v27  ;;  %v3579_v58 = vpop.f32.mrf.mxu0 }
 0x24a   : > { %v5516_v15 = vadd.f32 %v5275_v38, %v3818_v55  ;;  %v5277_v48 = vpop.f32.mrf.mxu1  ;;  %3773 = vmatmul.mubr.bf16.gmra.mxu0 %v7102_v42  ;;  %v7632_v42 = vunpack.i.l.bf16 %v7631_v33 }
 0x24b   : > { %v7386_v18 = vpack.c.bf16 %v6233_v8, %v6232_v14  ;;  %v3582_v34 = vpop.f32.mrf.mxu0  ;;  %3780 = vmatprep.mubr.bf16.mxu0 %v7105_v25  ;;  %v6170_v10 = vadd.f32 %v12177_v1, %v6099_v7  ;;  %v13838_v25 = vld [vmem:[#allocation7_spill] sm:$0xff] }
 0x24c   : > { %v6029_v24 = vsel %vm6023_vm3, %v5516_v15, %v7628_v37  ;;  %v3819_v41 = vadd.f32 %v3582_v34, %v13836_v2  ;;  %v5280_v45 = vpop.f32.mrf.mxu1  ;;  %v8014_v7 = vld [vmem:[%s8204_s28 + $0x268] sm:$0xff] }
 0x24d   : > { %7538 = vst [vmem:[%s12199_s10 + $0x8] sm:$0xff] %v7386_v18   ;;  %v6100_v9 = vmul.f32 %v12165_v62, %v6029_v24  ;;  %v3584_v13 = vpop.f32.mrf.mxu0  ;;  %v7107_v58 = vcombine.high %v8014_v7, %v11872_v40  ;;  %v6234_v37 = vmax.f32 %v6170_v10, 0.0  ;;  %v7633_v18 = vunpack.i.h.bf16 %v7631_v33 }
 0x24e   : > { %5471 = vmatmul.mubr.bf16.gmra.mxu1 %v13837_v4  ;;  %v5517_v27 = vadd.f32 %v5280_v45, %v3819_v41  ;;  %v5282_v30 = vpop.f32.mrf.mxu1  ;;  %v7636_v41 = vpop.permute.xlu0 %7635  ;;  %v13839_v45 = vld [vmem:[#allocation85_spill] sm:$0xff]  ;;  %v13840_v10 = vcombine.low %v11860_v49, %v11926_v17  ;;  %v7106_v49 = vcombine.low %v8014_v7, %v11872_v40 }
 0x24f   : > { %5478 = vmatprep.mubr.bf16.mxu1 %v7217_v53  ;;  %v6171_v55 = vadd.f32 %v12177_v1, %v6100_v9  ;;  %v3585_v38 = vpop.f32.mrf.mxu0 }
 0x250   : > { %v6030_v44 = vsel %vm6023_vm3, %v5517_v27, %v7632_v42  ;;  %v3820_v14 = vadd.f32 %v3585_v38, %v13838_v25  ;;  %v5283_v8 = vpop.f32.mrf.mxu1  ;;  %v7637_v27 = vunpack.i.l.bf16 %v7636_v41 }
 0x251   : > { %v6235_v15 = vmax.f32 %v6171_v55, 0.0  ;;  %v6101_v53 = vmul.f32 %v12165_v62, %v6030_v44  ;;  %v3587_v48 = vpop.f32.mrf.mxu0  ;;  %v13841_v44 = vld [vmem:[#allocation155_spill] sm:$0xff] }
 0x252   : > { %v5518_v34 = vadd.f32 %v5283_v8, %v3820_v14  ;;  %v5285_v24 = vpop.f32.mrf.mxu1  ;;  %3781 = vmatmul.mubr.bf16.gmra.mxu0 %v7104_v0  ;;  %v8015_v8 = vld [vmem:[%s10638_s25] sm:$0xff]  ;;  %v7638_v48 = vunpack.i.h.bf16 %v7636_v41 }
 0x253   : > { %v7391_v2 = vpack.c.bf16 %v6235_v15, %v6234_v37  ;;  %v3590_v26 = vpop.f32.mrf.mxu0  ;;  %3788 = vmatprep.mubr.bf16.mxu0 %v7107_v58  ;;  %v6172_v33 = vadd.f32 %v12177_v1, %v6101_v53  ;;  %v7109_v58 = vcombine.high %v8015_v8, %v11929_v35  ;;  %v7641_v24 = vpop.permute.xlu1 %7640 }
 0x254   : > { %v6031_v23 = vsel %vm6023_vm3, %v5518_v34, %v7633_v18  ;;  %v3821_v4 = vadd.f32 %v3590_v26, %v13839_v45  ;;  %v5288_v9 = vpop.f32.mrf.mxu1  ;;  %v13842_v26 = vld [vmem:[#allocation157_spill] sm:$0xff] }
 0x255   : > { %7539 = vst [vmem:[%s12199_s10 + $0x10] sm:$0xff] %v7391_v2   ;;  %v6102_v13 = vmul.f32 %v12165_v62, %v6031_v23  ;;  %v3592_v42 = vpop.f32.mrf.mxu0  ;;  %v6236_v37 = vmax.f32 %v6172_v33, 0.0  ;;  %v7642_v33 = vunpack.i.l.bf16 %v7641_v24 }
 0x256   : > { %5479 = vmatmul.mubr.bf16.gmra.mxu1 %v13840_v10  ;;  %v5519_v30 = vadd.f32 %v5288_v9, %v3821_v4  ;;  %v5290_v55 = vpop.f32.mrf.mxu1  ;;  %v13843_v4 = vcombine.low %v11920_v39, %v11988_v54  ;;  %v7108_v39 = vcombine.low %v8015_v8, %v11929_v35 }
 0x257   : > { %5486 = vmatprep.mubr.bf16.mxu1 %v7219_v56  ;;  %v6173_v38 = vadd.f32 %v12177_v1, %v6102_v13  ;;  %v3593_v0 = vpop.f32.mrf.mxu0  ;;  %v13844_v55 = vld [vmem:[#allocation82_spill] sm:$0xff] }
 0x258   : > { %v6032_v17 = vsel %vm6023_vm3, %v5519_v30, %v7637_v27  ;;  %v3822_v25 = vadd.f32 %v3593_v0, %v13841_v44  ;;  %v5291_v14 = vpop.f32.mrf.mxu1 }
 0x259   : > { %v6237_v15 = vmax.f32 %v6173_v38, 0.0  ;;  %v6103_v56 = vmul.f32 %v12165_v62, %v6032_v17  ;;  %v3595_v53 = vpop.f32.mrf.mxu0 }
 0x25a   : > { %v5520_v18 = vadd.f32 %v5291_v14, %v3822_v25  ;;  %v5293_v34 = vpop.f32.mrf.mxu1  ;;  %3789 = vmatmul.mubr.bf16.gmra.mxu0 %v7106_v49  ;;  %v8016_v49 = vld [vmem:[%s10638_s25 + $0x10] sm:$0xff] }
 0x25b   : > { %v7396_v2 = vpack.c.bf16 %v6237_v15, %v6236_v37  ;;  %v3598_v40 = vpop.f32.mrf.mxu0  ;;  %3796 = vmatprep.mubr.bf16.mxu0 %v7109_v58  ;;  %v6174_v41 = vadd.f32 %v12177_v1, %v6103_v56  ;;  %v7111_v17 = vcombine.high %v8016_v49, %v11982_v63  ;;  %v7643_v58 = vunpack.i.h.bf16 %v7641_v24  ;;  %v7646_v56 = vpop.permute.xlu0 %7645 }
 0x25c   : > { %v6033_v7 = vsel %vm6023_vm3, %v5520_v18, %v7638_v48  ;;  %v3823_v23 = vadd.f32 %v3598_v40, %v13842_v26  ;;  %v5296_v45 = vpop.f32.mrf.mxu1  ;;  %v13845_v48 = vld [vmem:[#allocation9_spill] sm:$0xff]  ;;  %v7647_v26 = vunpack.i.l.bf16 %v7646_v56  ;;  %v7110_v29 = vcombine.low %v8016_v49, %v11982_v63  ;;  %v13848_v49 = vld [vmem:[#allocation88_spill] sm:$0xff] }
 0x25d   : > { %7540 = vst [vmem:[%s12199_s10 + $0x18] sm:$0xff] %v7396_v2   ;;  %v6104_v9 = vmul.f32 %v12165_v62, %v6033_v7  ;;  %v3600_v10 = vpop.f32.mrf.mxu0  ;;  %v6238_v44 = vmax.f32 %v6174_v41, 0.0  ;;  %v13846_v7 = vcombine.high %v12018_v21, %v12046_v3 }
 0x25e   : > { %5487 = vmatmul.mubr.bf16.gmra.mxu1 %v13843_v4  ;;  %v5521_v13 = vadd.f32 %v5296_v45, %v3823_v23  ;;  %v5298_v42 = vpop.f32.mrf.mxu1 }
 0x25f   : > { %5494 = vmatprep.mubr.bf16.mxu1 %v7221_v50  ;;  %v6175_v27 = vadd.f32 %v12177_v1, %v6104_v9  ;;  %v3601_v30 = vpop.f32.mrf.mxu0 }
 0x260   : > { %v6034_v54 = vsel %vm6023_vm3, %v5521_v13, %v7642_v33  ;;  %v3824_v38 = vadd.f32 %v3601_v30, %v13844_v55  ;;  %v5299_v0 = vpop.f32.mrf.mxu1  ;;  %v7648_v30 = vunpack.i.h.bf16 %v7646_v56  ;;  %v7651_v55 = vpop.permute.xlu1 %7650 }
 0x261   : > { %v6239_v25 = vmax.f32 %v6175_v27, 0.0  ;;  %v6105_v50 = vmul.f32 %v12165_v62, %v6034_v54  ;;  %v3603_v14 = vpop.f32.mrf.mxu0 }
 0x262   : > { %v5522_v37 = vadd.f32 %v5299_v0, %v3824_v38  ;;  %v5301_v15 = vpop.f32.mrf.mxu1  ;;  %3797 = vmatmul.mubr.bf16.gmra.mxu0 %v7108_v39 }
 0x263   : > { %v7401_v53 = vpack.c.bf16 %v6239_v25, %v6238_v44  ;;  %v3606_v35 = vpop.f32.mrf.mxu0  ;;  %3804 = vmatprep.mubr.bf16.mxu0 %v7111_v17  ;;  %v6176_v2 = vadd.f32 %v12177_v1, %v6105_v50  ;;  %v13849_v25 = vcombine.low %v12018_v21, %v12046_v3 }
 0x264   : > { %v6035_v8 = vsel %vm6023_vm3, %v5522_v37, %v7643_v58  ;;  %v3825_v18 = vadd.f32 %v3606_v35, %v13845_v48  ;;  %v5304_v34 = vpop.f32.mrf.mxu1  ;;  %v7652_v37 = vunpack.i.l.bf16 %v7651_v55  ;;  %v13850_v48 = vld [vmem:[#allocation84_spill] sm:$0xff] }
 0x265   : > { %7541 = vst [vmem:[%s12199_s10 + $0x20] sm:$0xff] %v7401_v53   ;;  %v6106_v24 = vmul.f32 %v12165_v62, %v6035_v8  ;;  %v3608_v40 = vpop.f32.mrf.mxu0  ;;  %v6240_v33 = vmax.f32 %v6176_v2, 0.0 }
 0x266   : > { %5495 = vmatmul.mubr.bf16.gmra.mxu1 %v7220_v61  ;;  %v5523_v23 = vadd.f32 %v5304_v34, %v3825_v18  ;;  %v5306_v45 = vpop.f32.mrf.mxu1  ;;  %v13847_v61 = vld [vmem:[#allocation78_spill] sm:$0xff]  ;;  %v7653_v40 = vunpack.i.h.bf16 %v7651_v55  ;;  %v13852_v55 = vld [vmem:[#allocation45_spill] sm:$0xff] }
 0x267   : > { %5502 = vmatprep.mubr.bf16.mxu1 %v13846_v7  ;;  %v6177_v4 = vadd.f32 %v12177_v1, %v6106_v24  ;;  %v3609_v41 = vpop.f32.mrf.mxu0 }
 0x268   : > { %v6036_v6 = vsel %vm6023_vm3, %v5523_v23, %v7647_v26  ;;  %v3826_v9 = vadd.f32 %v3609_v41, %v13847_v61  ;;  %v5307_v10 = vpop.f32.mrf.mxu1  ;;  %v7656_v23 = vpop.permute.xlu0 %7655 }
 0x269   : > { %v6241_v13 = vmax.f32 %v6177_v4, 0.0  ;;  %v6107_v42 = vmul.f32 %v12165_v62, %v6036_v6  ;;  %v3611_v27 = vpop.f32.mrf.mxu0 }
 0x26a   : > { %v5524_v39 = vadd.f32 %v5307_v10, %v3826_v9  ;;  %v5309_v54 = vpop.f32.mrf.mxu1  ;;  %3805 = vmatmul.mubr.bf16.gmra.mxu0 %v7110_v29  ;;  %v13851_v29 = vld [vmem:[#allocation12_spill] sm:$0xff] }
 0x26b   : > { %v7406_v38 = vpack.c.bf16 %v6241_v13, %v6240_v33  ;;  %v3614_v0 = vpop.f32.mrf.mxu0  ;;  %v6178_v50 = vadd.f32 %v12177_v1, %v6107_v42  ;;  %v7657_v13 = vunpack.i.l.bf16 %v7656_v23 }
 0x26c   : > { %v6037_v63 = vsel %vm6023_vm3, %v5524_v39, %v7648_v30  ;;  %v3827_v17 = vadd.f32 %v3614_v0, %v13848_v49  ;;  %v5312_v44 = vpop.f32.mrf.mxu1 }
 0x26d   : > { %7542 = vst [vmem:[%s12199_s10 + $0x28] sm:$0xff] %v7406_v38   ;;  %v6108_v14 = vmul.f32 %v12165_v62, %v6037_v63  ;;  %v3616_v58 = vpop.f32.mrf.mxu0  ;;  %v6242_v21 = vmax.f32 %v6178_v50, 0.0 }
 0x26e   : > { %5503 = vmatmul.mubr.bf16.gmra.mxu1 %v13849_v25  ;;  %v5525_v15 = vadd.f32 %v5312_v44, %v3827_v17  ;;  %v5314_v56 = vpop.f32.mrf.mxu1  ;;  %v7658_v25 = vunpack.i.h.bf16 %v7656_v23  ;;  %v7661_v58 = vpop.permute.xlu1 %7660 }
 0x26f   : > { %v6179_v53 = vadd.f32 %v12177_v1, %v6108_v14  ;;  %v3617_v35 = vpop.f32.mrf.mxu0 }
 0x270   : > { %v6038_v8 = vsel %vm6023_vm3, %v5525_v15, %v7652_v37  ;;  %v3828_v18 = vadd.f32 %v3617_v35, %v13850_v48  ;;  %v5315_v34 = vpop.f32.mrf.mxu1 }
 0x271   : > { %v6243_v3 = vmax.f32 %v6179_v53, 0.0  ;;  %v6109_v2 = vmul.f32 %v12165_v62, %v6038_v8  ;;  %v3619_v24 = vpop.f32.mrf.mxu0  ;;  %v13853_v53 = vld [vmem:[#allocation80_spill] sm:$0xff] }
 0x272   : > { %v5526_v7 = vadd.f32 %v5315_v34, %v3828_v18  ;;  %v5317_v26 = vpop.f32.mrf.mxu1 }
 0x273   : > { %v7411_v45 = vpack.c.bf16 %v6243_v3, %v6242_v21  ;;  %v3622_v4 = vpop.f32.mrf.mxu0  ;;  %v6180_v9 = vadd.f32 %v12177_v1, %v6109_v2  ;;  %v7662_v21 = vunpack.i.l.bf16 %v7661_v58  ;;  %v13854_v26 = vld [vmem:[#allocation89_spill] sm:$0xff] }
 0x274   : > { %v6039_v41 = vsel %vm6023_vm3, %v5526_v7, %v7653_v40  ;;  %v3829_v6 = vadd.f32 %v3622_v4, %v13851_v29  ;;  %v5320_v61 = vpop.f32.mrf.mxu1 }
 0x275   : > { %7543 = vst [vmem:[%s12199_s10 + $0x30] sm:$0xff] %v7411_v45   ;;  %v6110_v10 = vmul.f32 %v12165_v62, %v6039_v41  ;;  %v3624_v33 = vpop.f32.mrf.mxu0  ;;  %v6244_v63 = vmax.f32 %v6180_v9, 0.0 }
 0x276   : > { %v5527_v42 = vadd.f32 %v5320_v61, %v3829_v6  ;;  %v5322_v27 = vpop.f32.mrf.mxu1  ;;  %v7663_v61 = vunpack.i.h.bf16 %v7661_v58  ;;  %v7666_v33 = vpop.permute.xlu0 %7665 }
 0x277   : > { %v6181_v30 = vadd.f32 %v12177_v1, %v6110_v10  ;;  %v3625_v39 = vpop.f32.mrf.mxu0 }
 0x278   : > { %v6040_v54 = vsel %vm6023_vm3, %v5527_v42, %v7657_v13  ;;  %v3830_v38 = vadd.f32 %v3625_v39, %v13852_v55  ;;  %v5323_v0 = vpop.f32.mrf.mxu1 }
 0x279   : > { %v6245_v49 = vmax.f32 %v6181_v30, 0.0  ;;  %v6111_v17 = vmul.f32 %v12165_v62, %v6040_v54  ;;  %v3627_v44 = vpop.f32.mrf.mxu0  ;;  %v13855_v30 = vld [vmem:[#allocation11_spill] sm:$0xff] }
 0x27a   : > { %v5528_v50 = vadd.f32 %v5323_v0, %v3830_v38  ;;  %v5325_v14 = vpop.f32.mrf.mxu1 }
 0x27b   : > { %v7416_v37 = vpack.c.bf16 %v6245_v49, %v6244_v63  ;;  %v3630_v15 = vpop.f32.mrf.mxu0  ;;  %v6182_v48 = vadd.f32 %v12177_v1, %v6111_v17  ;;  %v7667_v63 = vunpack.i.l.bf16 %v7666_v33  ;;  %v13856_v14 = vld [vmem:[#allocation138_spill] sm:$0xff] }
 0x27c   : > { %v6041_v56 = vsel %vm6023_vm3, %v5528_v50, %v7658_v25  ;;  %v3831_v35 = vadd.f32 %v3630_v15, %v13853_v53  ;;  %v5328_v8 = vpop.f32.mrf.mxu1 }
 0x27d   : > { %7544 = vst [vmem:[%s12199_s10 + $0x38] sm:$0xff] %v7416_v37   ;;  %v6112_v18 = vmul.f32 %v12165_v62, %v6041_v56  ;;  %v3632_v34 = vpop.f32.mrf.mxu0  ;;  %v6246_v4 = vmax.f32 %v6182_v48, 0.0 }
 0x27e   : > { %v5529_v3 = vadd.f32 %v5328_v8, %v3831_v35  ;;  %v5330_v2 = vpop.f32.mrf.mxu1  ;;  %v7668_v8 = vunpack.i.h.bf16 %v7666_v33  ;;  %v7671_v34 = vpop.permute.xlu1 %7670 }
 0x27f   : > { %v6183_v24 = vadd.f32 %v12177_v1, %v6112_v18  ;;  %v3633_v40 = vpop.f32.mrf.mxu0 }
 0x280   : > { %v6042_v7 = vsel %vm6023_vm3, %v5529_v3, %v7662_v21  ;;  %v3832_v23 = vadd.f32 %v3633_v40, %v13854_v26  ;;  %v5331_v45 = vpop.f32.mrf.mxu1 }
 0x281   : > { %v6247_v41 = vmax.f32 %v6183_v24, 0.0  ;;  %v6113_v29 = vmul.f32 %v12165_v62, %v6042_v7  ;;  %v3635_v6 = vpop.f32.mrf.mxu0  ;;  %v13857_v24 = vld [vmem:[#allocation14_spill] sm:$0xff] }
 0x282   : > { %v5530_v9 = vadd.f32 %v5331_v45, %v3832_v23  ;;  %v5333_v10 = vpop.f32.mrf.mxu1 }
 0x283   : > { %v7421_v13 = vpack.c.bf16 %v6247_v41, %v6246_v4  ;;  %v3638_v42 = vpop.f32.mrf.mxu0  ;;  %v6184_v55 = vadd.f32 %v12177_v1, %v6113_v29  ;;  %v7672_v4 = vunpack.i.l.bf16 %v7671_v34  ;;  %v13858_v10 = vld [vmem:[#allocation92_spill] sm:$0xff] }
 0x284   : > { %v6043_v27 = vsel %vm6023_vm3, %v5530_v9, %v7663_v61  ;;  %v3833_v39 = vadd.f32 %v3638_v42, %v13855_v30  ;;  %v5336_v54 = vpop.f32.mrf.mxu1 }
 0x285   : > { %7545 = vst [vmem:[%s12199_s10 + $0x40] sm:$0xff] %v7421_v13   ;;  %v6114_v38 = vmul.f32 %v12165_v62, %v6043_v27  ;;  %v3640_v0 = vpop.f32.mrf.mxu0  ;;  %v6248_v15 = vmax.f32 %v6184_v55, 0.0 }
 0x286   : > { %v5531_v49 = vadd.f32 %v5336_v54, %v3833_v39  ;;  %v5338_v17 = vpop.f32.mrf.mxu1  ;;  %v7673_v54 = vunpack.i.h.bf16 %v7671_v34  ;;  %v7676_v0 = vpop.permute.xlu0 %7675 }
 0x287   : > { %v6185_v44 = vadd.f32 %v12177_v1, %v6114_v38  ;;  %v3641_v25 = vpop.f32.mrf.mxu0 }
 0x288   : > { %v6044_v50 = vsel %vm6023_vm3, %v5531_v49, %v7667_v63  ;;  %v3834_v58 = vadd.f32 %v3641_v25, %v13856_v14  ;;  %v5339_v37 = vpop.f32.mrf.mxu1 }
 0x289   : > { %v6249_v56 = vmax.f32 %v6185_v44, 0.0  ;;  %v6115_v53 = vmul.f32 %v12165_v62, %v6044_v50  ;;  %v3643_v35 = vpop.f32.mrf.mxu0  ;;  %v13859_v44 = vld [vmem:[#allocation13_spill] sm:$0xff] }
 0x28a   : > { %v5532_v48 = vadd.f32 %v5339_v37, %v3834_v58  ;;  %v5341_v18 = vpop.f32.mrf.mxu1 }
 0x28b   : > { %v7426_v21 = vpack.c.bf16 %v6249_v56, %v6248_v15  ;;  %v3646_v3 = vpop.f32.mrf.mxu0  ;;  %v6186_v26 = vadd.f32 %v12177_v1, %v6115_v53  ;;  %v7677_v15 = vunpack.i.l.bf16 %v7676_v0  ;;  %v13860_v18 = vld [vmem:[#allocation16_spill] sm:$0xff] }
 0x28c   : > { %v6045_v2 = vsel %vm6023_vm3, %v5532_v48, %v7668_v8  ;;  %v3835_v40 = vadd.f32 %v3646_v3, %v13857_v24  ;;  %v5344_v7 = vpop.f32.mrf.mxu1 }
 0x28d   : > { %7546 = vst [vmem:[%s12199_s10 + $0x48] sm:$0xff] %v7426_v21   ;;  %v6116_v23 = vmul.f32 %v12165_v62, %v6045_v2  ;;  %v3648_v45 = vpop.f32.mrf.mxu0  ;;  %v6250_v42 = vmax.f32 %v6186_v26, 0.0 }
 0x28e   : > { %v5533_v41 = vadd.f32 %v5344_v7, %v3835_v40  ;;  %v5346_v29 = vpop.f32.mrf.mxu1  ;;  %v7678_v7 = vunpack.i.h.bf16 %v7676_v0  ;;  %v7681_v45 = vpop.permute.xlu1 %7680 }
 0x28f   : > { %v6187_v6 = vadd.f32 %v12177_v1, %v6116_v23  ;;  %v3649_v61 = vpop.f32.mrf.mxu0 }
 0x290   : > { %v6046_v9 = vsel %vm6023_vm3, %v5533_v41, %v7672_v4  ;;  %v3836_v33 = vadd.f32 %v3649_v61, %v13858_v10  ;;  %v5347_v13 = vpop.f32.mrf.mxu1 }
 0x291   : > { %v6251_v27 = vmax.f32 %v6187_v6, 0.0  ;;  %v6117_v30 = vmul.f32 %v12165_v62, %v6046_v9  ;;  %v3651_v39 = vpop.f32.mrf.mxu0  ;;  %v13861_v6 = vld [vmem:[#allocation91_spill] sm:$0xff] }
 0x292   : > { %v5534_v55 = vadd.f32 %v5347_v13, %v3836_v33  ;;  %v5349_v38 = vpop.f32.mrf.mxu1 }
 0x293   : > { %v7431_v63 = vpack.c.bf16 %v6251_v27, %v6250_v42  ;;  %v3654_v49 = vpop.f32.mrf.mxu0  ;;  %v6188_v14 = vadd.f32 %v12177_v1, %v6117_v30  ;;  %v7682_v42 = vunpack.i.l.bf16 %v7681_v45  ;;  %v13862_v38 = vld [vmem:[#allocation144_spill] sm:$0xff] }
 0x294   : > { %v6047_v17 = vsel %vm6023_vm3, %v5534_v55, %v7673_v54  ;;  %v3837_v25 = vadd.f32 %v3654_v49, %v13859_v44  ;;  %v5352_v50 = vpop.f32.mrf.mxu1 }
 0x295   : > { %7547 = vst [vmem:[%s12199_s10 + $0x50] sm:$0xff] %v7431_v63   ;;  %v6118_v58 = vmul.f32 %v12165_v62, %v6047_v17  ;;  %v3656_v37 = vpop.f32.mrf.mxu0  ;;  %v6252_v3 = vmax.f32 %v6188_v14, 0.0 }
 0x296   : > { %v5535_v56 = vadd.f32 %v5352_v50, %v3837_v25  ;;  %v5354_v53 = vpop.f32.mrf.mxu1  ;;  %v7683_v50 = vunpack.i.h.bf16 %v7681_v45  ;;  %v7686_v37 = vpop.permute.xlu0 %7685 }
 0x297   : > { %v6189_v35 = vadd.f32 %v12177_v1, %v6118_v58  ;;  %v3657_v8 = vpop.f32.mrf.mxu0 }
 0x298   : > { %v6048_v48 = vsel %vm6023_vm3, %v5535_v56, %v7677_v15  ;;  %v3838_v34 = vadd.f32 %v3657_v8, %v13860_v18  ;;  %v5355_v21 = vpop.f32.mrf.mxu1 }
 0x299   : > { %v6253_v2 = vmax.f32 %v6189_v35, 0.0  ;;  %v6119_v24 = vmul.f32 %v12165_v62, %v6048_v48  ;;  %v3659_v40 = vpop.f32.mrf.mxu0  ;;  %v13863_v35 = vld [vmem:[#allocation97_spill] sm:$0xff] }
 0x29a   : > { %v5536_v26 = vadd.f32 %v5355_v21, %v3838_v34  ;;  %v5357_v23 = vpop.f32.mrf.mxu1 }
 0x29b   : > { %v7436_v4 = vpack.c.bf16 %v6253_v2, %v6252_v3  ;;  %v3662_v41 = vpop.f32.mrf.mxu0  ;;  %v6190_v10 = vadd.f32 %v12177_v1, %v6119_v24  ;;  %v7687_v3 = vunpack.i.l.bf16 %v7686_v37  ;;  %v13864_v23 = vld [vmem:[#allocation38_spill] sm:$0xff] }
 0x29c   : > { %v6049_v29 = vsel %vm6023_vm3, %v5536_v26, %v7678_v7  ;;  %v3839_v61 = vadd.f32 %v3662_v41, %v13861_v6  ;;  %v5360_v9 = vpop.f32.mrf.mxu1 }
 0x29d   : > { %7548 = vst [vmem:[%s12199_s10 + $0x58] sm:$0xff] %v7436_v4   ;;  %v6120_v33 = vmul.f32 %v12165_v62, %v6049_v29  ;;  %v3664_v13 = vpop.f32.mrf.mxu0  ;;  %v6254_v49 = vmax.f32 %v6190_v10, 0.0 }
 0x29e   : > { %v5537_v27 = vadd.f32 %v5360_v9, %v3839_v61  ;;  %v5362_v30 = vpop.f32.mrf.mxu1  ;;  %v7688_v9 = vunpack.i.h.bf16 %v7686_v37  ;;  %v7691_v13 = vpop.permute.xlu1 %7690 }
 0x29f   : > { %v6191_v39 = vadd.f32 %v12177_v1, %v6120_v33  ;;  %v3665_v54 = vpop.f32.mrf.mxu0 }
 0x2a0   : > { %v6050_v55 = vsel %vm6023_vm3, %v5537_v27, %v7682_v42  ;;  %v3840_v0 = vadd.f32 %v3665_v54, %v13862_v38  ;;  %v5363_v63 = vpop.f32.mrf.mxu1 }
 0x2a1   : > { %v6255_v17 = vmax.f32 %v6191_v39, 0.0  ;;  %v6121_v44 = vmul.f32 %v12165_v62, %v6050_v55  ;;  %v3667_v25 = vpop.f32.mrf.mxu0  ;;  %v13865_v39 = vld [vmem:[#allocation15_spill] sm:$0xff] }
 0x2a2   : > { %v5538_v14 = vadd.f32 %v5363_v63, %v3840_v0  ;;  %v5365_v58 = vpop.f32.mrf.mxu1 }
 0x2a3   : > { %v7441_v15 = vpack.c.bf16 %v6255_v17, %v6254_v49  ;;  %v3670_v56 = vpop.f32.mrf.mxu0  ;;  %v6192_v18 = vadd.f32 %v12177_v1, %v6121_v44  ;;  %v7692_v49 = vunpack.i.l.bf16 %v7691_v13  ;;  %v13866_v58 = vld [vmem:[#allocation18_spill] sm:$0xff] }
 0x2a4   : > { %v6051_v53 = vsel %vm6023_vm3, %v5538_v14, %v7683_v50  ;;  %v3841_v8 = vadd.f32 %v3670_v56, %v13863_v35  ;;  %v5368_v48 = vpop.f32.mrf.mxu1 }
 0x2a5   : > { %7549 = vst [vmem:[%s12199_s10 + $0x60] sm:$0xff] %v7441_v15   ;;  %v6122_v34 = vmul.f32 %v12165_v62, %v6051_v53  ;;  %v3672_v21 = vpop.f32.mrf.mxu0  ;;  %v6256_v41 = vmax.f32 %v6192_v18, 0.0 }
 0x2a6   : > { %v5539_v2 = vadd.f32 %v5368_v48, %v3841_v8  ;;  %v5370_v24 = vpop.f32.mrf.mxu1  ;;  %v7693_v48 = vunpack.i.h.bf16 %v7691_v13  ;;  %v7696_v21 = vpop.permute.xlu0 %7695 }
 0x2a7   : > { %v6193_v40 = vadd.f32 %v12177_v1, %v6122_v34  ;;  %v3673_v7 = vpop.f32.mrf.mxu0 }
 0x2a8   : > { %v6052_v26 = vsel %vm6023_vm3, %v5539_v2, %v7687_v3  ;;  %v3842_v45 = vadd.f32 %v3673_v7, %v13864_v23  ;;  %v5371_v4 = vpop.f32.mrf.mxu1 }
 0x2a9   : > { %v6257_v29 = vmax.f32 %v6193_v40, 0.0  ;;  %v6123_v6 = vmul.f32 %v12165_v62, %v6052_v26  ;;  %v3675_v61 = vpop.f32.mrf.mxu0  ;;  %v13867_v40 = vld [vmem:[#allocation152_spill] sm:$0xff] }
 0x2aa   : > { %v5540_v10 = vadd.f32 %v5371_v4, %v3842_v45  ;;  %v5373_v33 = vpop.f32.mrf.mxu1 }
 0x2ab   : > { %v7446_v42 = vpack.c.bf16 %v6257_v29, %v6256_v41  ;;  %v3678_v27 = vpop.f32.mrf.mxu0  ;;  %v6194_v38 = vadd.f32 %v12177_v1, %v6123_v6  ;;  %v7697_v41 = vunpack.i.l.bf16 %v7696_v21  ;;  %v13868_v33 = vld [vmem:[#allocation106_spill] sm:$0xff] }
 0x2ac   : > { %v6053_v30 = vsel %vm6023_vm3, %v5540_v10, %v7688_v9  ;;  %v3843_v54 = vadd.f32 %v3678_v27, %v13865_v39 }
 0x2ad   : > { %7550 = vst [vmem:[%s12199_s10 + $0x68] sm:$0xff] %v7446_v42   ;;  %v6124_v0 = vmul.f32 %v12165_v62, %v6053_v30  ;;  %v3680_v63 = vpop.f32.mrf.mxu0  ;;  %v6258_v56 = vmax.f32 %v6194_v38, 0.0 }
 0x2ae   : > { %v5376_v55 = vpop.f32.mrf.mxu1  ;;  %v7701_v63 = vpop.permute.xlu1 %7700 }
 0x2af   : > { %v5541_v17 = vadd.f32 %v5376_v55, %v3843_v54  ;;  %v6195_v25 = vadd.f32 %v12177_v1, %v6124_v0  ;;  %v3681_v50 = vpop.f32.mrf.mxu0  ;;  %v7698_v55 = vunpack.i.h.bf16 %v7696_v21 }
 0x2b0   : > { %v5378_v44 = vpop.f32.mrf.mxu1  ;;  %v3844_v37 = vadd.f32 %v3681_v50, %v13866_v58 }
 0x2b1   : > { %v6054_v14 = vsel %vm6023_vm3, %v5541_v17, %v7692_v49  ;;  %v6259_v53 = vmax.f32 %v6195_v25, 0.0  ;;  %v3683_v8 = vpop.f32.mrf.mxu0  ;;  %v13869_v25 = vld [vmem:[#allocation17_spill] sm:$0xff] }
 0x2b2   : > { %v5379_v15 = vpop.f32.mrf.mxu1  ;;  %v6125_v35 = vmul.f32 %v12165_v62, %v6054_v14 }
 0x2b3   : > { %v5542_v18 = vadd.f32 %v5379_v15, %v3844_v37  ;;  %v7451_v3 = vpack.c.bf16 %v6259_v53, %v6258_v56  ;;  %v3686_v2 = vpop.f32.mrf.mxu0  ;;  %v7702_v56 = vunpack.i.l.bf16 %v7701_v63 }
 0x2b4   : > { %v5381_v34 = vpop.f32.mrf.mxu1  ;;  %v3845_v7 = vadd.f32 %v3686_v2, %v13867_v40  ;;  %v6196_v23 = vadd.f32 %v12177_v1, %v6125_v35 }
 0x2b5   : > { %v6055_v24 = vsel %vm6023_vm3, %v5542_v18, %v7693_v48  ;;  %7551 = vst [vmem:[%s12199_s10 + $0x70] sm:$0xff] %v7451_v3   ;;  %v3688_v4 = vpop.f32.mrf.mxu0  ;;  %v13870_v34 = vld [vmem:[#allocation161_spill] sm:$0xff] }
 0x2b6   : > { %v5384_v26 = vpop.f32.mrf.mxu1  ;;  %v6126_v45 = vmul.f32 %v12165_v62, %v6055_v24  ;;  %v6260_v27 = vmax.f32 %v6196_v23, 0.0  ;;  %v7706_v4 = vpop.permute.xlu0 %7705 }
 0x2b7   : > { %v5543_v29 = vadd.f32 %v5384_v26, %v3845_v7  ;;  %v3689_v9 = vpop.f32.mrf.mxu0  ;;  %v7703_v26 = vunpack.i.h.bf16 %v7701_v63 }
 0x2b8   : > { %v5386_v6 = vpop.f32.mrf.mxu1  ;;  %v6197_v61 = vadd.f32 %v12177_v1, %v6126_v45  ;;  %v3846_v13 = vadd.f32 %v3689_v9, %v13868_v33 }
 0x2b9   : > { %v6056_v10 = vsel %vm6023_vm3, %v5543_v29, %v7697_v41  ;;  %v3691_v54 = vpop.f32.mrf.mxu0 }
 0x2ba   : > { %v5387_v42 = vpop.f32.mrf.mxu1  ;;  %v6261_v30 = vmax.f32 %v6197_v61, 0.0  ;;  %v6127_v39 = vmul.f32 %v12165_v62, %v6056_v10  ;;  %v13871_v61 = vld [vmem:[#allocation164_spill] sm:$0xff] }
 0x2bb   : > { %v5544_v38 = vadd.f32 %v5387_v42, %v3846_v13  ;;  %v3694_v17 = vpop.f32.mrf.mxu0 }
 0x2bc   : > { %v5389_v0 = vpop.f32.mrf.mxu1  ;;  %v7456_v49 = vpack.c.bf16 %v6261_v30, %v6260_v27  ;;  %v3847_v50 = vadd.f32 %v3694_v17, %v13869_v25  ;;  %v6198_v58 = vadd.f32 %v12177_v1, %v6127_v39  ;;  %v7707_v27 = vunpack.i.l.bf16 %v7706_v4 }
 0x2bd   : > { %v6057_v44 = vsel %vm6023_vm3, %v5544_v38, %v7698_v55  ;;  %v3696_v15 = vpop.f32.mrf.mxu0  ;;  %v13872_v0 = vld [vmem:[#allocation19_spill] sm:$0xff] }
 0x2be   : > { %v5392_v14 = vpop.f32.mrf.mxu1  ;;  %7552 = vst [vmem:[%s12199_s10 + $0x78] sm:$0xff] %v7456_v49   ;;  %v6128_v37 = vmul.f32 %v12165_v62, %v6057_v44  ;;  %v6262_v2 = vmax.f32 %v6198_v58, 0.0  ;;  %v7711_v15 = vpop.permute.xlu1 %7710 }
 0x2bf   : > { %v5545_v53 = vadd.f32 %v5392_v14, %v3847_v50  ;;  %v3697_v48 = vpop.f32.mrf.mxu0  ;;  %v7708_v14 = vunpack.i.h.bf16 %v7706_v4 }
 0x2c0   : > { %v5394_v35 = vpop.f32.mrf.mxu1  ;;  %v6199_v8 = vadd.f32 %v12177_v1, %v6128_v37  ;;  %v3848_v21 = vadd.f32 %v3697_v48, %v13870_v34 }
 0x2c1   : > { %v6058_v18 = vsel %vm6023_vm3, %v5545_v53, %v7702_v56  ;;  %v3699_v7 = vpop.f32.mrf.mxu0 }
 0x2c2   : > { %v5395_v3 = vpop.f32.mrf.mxu1  ;;  %v6263_v24 = vmax.f32 %v6199_v8, 0.0  ;;  %v6129_v40 = vmul.f32 %v12165_v62, %v6058_v18  ;;  %v13873_v8 = vld [vmem:[#allocation162_spill] sm:$0xff] }
 0x2c3   : > { %v5546_v23 = vadd.f32 %v5395_v3, %v3848_v21  ;;  %v3702_v29 = vpop.f32.mrf.mxu0 }
 0x2c4   : > { %v5397_v45 = vpop.f32.mrf.mxu1  ;;  %v7461_v41 = vpack.c.bf16 %v6263_v24, %v6262_v2  ;;  %v3849_v9 = vadd.f32 %v3702_v29, %v13871_v61  ;;  %v6200_v33 = vadd.f32 %v12177_v1, %v6129_v40  ;;  %v7712_v2 = vunpack.i.l.bf16 %v7711_v15  ;;  %v12411_v61 = vld [vmem:[%s12551_s3] ss:$0 sm:$0xff] }
 0x2c5   : > { %v6059_v6 = vsel %vm6023_vm3, %v5546_v23, %v7703_v26  ;;  %v3704_v42 = vpop.f32.mrf.mxu0  ;;  %v13874_v45 = vld [vmem:[#allocation111_spill] sm:$0xff] }
 0x2c6   : > { %v5400_v10 = vpop.f32.mrf.mxu1  ;;  %7553 = vst [vmem:[%s12199_s10 + $0x80] sm:$0xff] %v7461_v41   ;;  %v6130_v13 = vmul.f32 %v12165_v62, %v6059_v6  ;;  %v6264_v17 = vmax.f32 %v6200_v33, 0.0 }
 0x2c7   : > { %v5547_v30 = vadd.f32 %v5400_v10, %v3849_v9  ;;  %v3705_v55 = vpop.f32.mrf.mxu0  ;;  %v7713_v10 = vunpack.i.h.bf16 %v7711_v15 }
 0x2c8   : > { %v5402_v39 = vpop.f32.mrf.mxu1  ;;  %v6201_v54 = vadd.f32 %v12177_v1, %v6130_v13  ;;  %v3850_v63 = vadd.f32 %v3705_v55, %v13872_v0  ;;  %v7716_v13 = vpop.permute.xlu0 %7715 }
 0x2c9   : > { %v6060_v38 = vsel %vm6023_vm3, %v5547_v30, %v7707_v27  ;;  %v3707_v50 = vpop.f32.mrf.mxu0  ;;  %v13875_v39 = vld [vmem:[#allocation22_spill] sm:$0xff] }
 0x2ca   : > { %v5403_v49 = vpop.f32.mrf.mxu1  ;;  %v6265_v44 = vmax.f32 %v6201_v54, 0.0  ;;  %v6131_v25 = vmul.f32 %v12165_v62, %v6060_v38  ;;  %v12420_v38 = vld [vmem:[%s12552_s4] ss:$0 sm:$0xff] }
 0x2cb   : > { %v5548_v58 = vadd.f32 %v5403_v49, %v3850_v63  ;;  %v3710_v53 = vpop.f32.mrf.mxu0 }
 0x2cc   : > { %v5405_v37 = vpop.f32.mrf.mxu1  ;;  %v7466_v56 = vpack.c.bf16 %v6265_v44, %v6264_v17  ;;  %v3851_v48 = vadd.f32 %v3710_v53, %v13873_v8  ;;  %v6202_v34 = vadd.f32 %v12177_v1, %v6131_v25  ;;  %v7717_v17 = vunpack.i.l.bf16 %v7716_v13 }
 0x2cd   : > { %v6061_v35 = vsel %vm6023_vm3, %v5548_v58, %v7708_v14  ;;  %v3712_v3 = vpop.f32.mrf.mxu0 }
 0x2ce   : > { %v5408_v18 = vpop.f32.mrf.mxu1  ;;  %7554 = vst [vmem:[%s12199_s10 + $0x88] sm:$0xff] %v7466_v56   ;;  %v6132_v21 = vmul.f32 %v12165_v62, %v6061_v35  ;;  %v6266_v29 = vmax.f32 %v6202_v34, 0.0 }
 0x2cf   : > { %v5549_v24 = vadd.f32 %v5408_v18, %v3851_v48  ;;  %v3713_v26 = vpop.f32.mrf.mxu0  ;;  %v7718_v48 = vunpack.i.h.bf16 %v7716_v13 }
 0x2d0   : > { %v5410_v40 = vpop.f32.mrf.mxu1  ;;  %v6203_v7 = vadd.f32 %v12177_v1, %v6132_v21  ;;  %v3852_v4 = vadd.f32 %v3713_v26, %v13874_v45  ;;  %v7721_v21 = vpop.permute.xlu1 %7720 }
 0x2d1   : > { %v6062_v23 = vsel %vm6023_vm3, %v5549_v24, %v7712_v2  ;;  %v3715_v9 = vpop.f32.mrf.mxu0  ;;  %v7722_v45 = vunpack.i.l.bf16 %v7721_v21 }
 0x2d2   : > { %v5411_v41 = vpop.f32.mrf.mxu1  ;;  %v6267_v6 = vmax.f32 %v6203_v7, 0.0  ;;  %v6133_v62 = vmul.f32 %v12411_v61, %v6062_v23  ;;  %v13876_v9 = vld [vmem:[#allocation90_spill] sm:$0xff] }
 0x2d3   : > { %v5550_v33 = vadd.f32 %v5411_v41, %v3852_v4  ;;  %v3718_v27 = vpop.f32.mrf.mxu0 }
 0x2d4   : > { %v5413_v1 = vpop.f32.mrf.mxu1  ;;  %v7471_v42 = vpack.c.bf16 %v6267_v6, %v6266_v29  ;;  %v3853_v54 = vadd.f32 %v3718_v27, %v13875_v39  ;;  %v6204_v0 = vadd.f32 %v12420_v38, %v6133_v62  ;;  %v7723_v27 = vunpack.i.h.bf16 %v7721_v21 }
 0x2d5   : > { %v6063_v30 = vsel %vm6023_vm3, %v5550_v33, %v7713_v10  ;;  %v3720_v49 = vpop.f32.mrf.mxu0 }
 0x2d6   : > { %v5416_v55 = vpop.f32.mrf.mxu1  ;;  %7555 = vst [vmem:[%s12199_s10 + $0x90] sm:$0xff] %v7471_v42   ;;  %v6134_v63 = vmul.f32 %v12411_v61, %v6063_v30  ;;  %v6268_v56 = vmax.f32 %v6204_v0, 0.0  ;;  %v13877_v49 = vld [vmem:[#allocation100_spill] sm:$0xff] }
 0x2d7   : > { %v5551_v44 = vadd.f32 %v5416_v55, %v3853_v54  ;;  %v3721_v14 = vpop.f32.mrf.mxu0  ;;  %v7726_v54 = vpop.permute.xlu0 %7725 }
 0x2d8   : > { %v5418_v25 = vpop.f32.mrf.mxu1  ;;  %v6205_v50 = vadd.f32 %v12420_v38, %v6134_v63  ;;  %v3854_v37 = vadd.f32 %v3721_v14, %v11856_v51 }
 0x2d9   : > { %v6064_v58 = vsel %vm6023_vm3, %v5551_v44, %v7717_v17  ;;  %v3723_v8 = vpop.f32.mrf.mxu0 }
 0x2da   : > { %v5419_v15 = vpop.f32.mrf.mxu1  ;;  %v6269_v53 = vmax.f32 %v6205_v50, 0.0  ;;  %v6135_v35 = vmul.f32 %v12411_v61, %v6064_v58  ;;  %v7727_v58 = vunpack.i.l.bf16 %v7726_v54  ;;  %v13878_v8 = vld [vmem:[#allocation119_spill] sm:$0xff] }
 0x2db   : > { %v5552_v18 = vadd.f32 %v5419_v15, %v3854_v37  ;;  %v3726_v2 = vpop.f32.mrf.mxu0 }
 0x2dc   : > { %v5421_v34 = vpop.f32.mrf.mxu1  ;;  %v7476_v3 = vpack.c.bf16 %v6269_v53, %v6268_v56  ;;  %v3855_v40 = vadd.f32 %v3726_v2, %v11893_v28  ;;  %v6206_v51 = vadd.f32 %v12420_v38, %v6135_v35 }
 0x2dd   : > { %v6065_v24 = vsel %vm6023_vm3, %v5552_v18, %v7718_v48  ;;  %v3728_v23 = vpop.f32.mrf.mxu0 }
 0x2de   : > { %v5424_v7 = vpop.f32.mrf.mxu1  ;;  %7556 = vst [vmem:[%s12199_s10 + $0x98] sm:$0xff] %v7476_v3   ;;  %v6136_v26 = vmul.f32 %v12411_v61, %v6065_v24  ;;  %v6270_v28 = vmax.f32 %v6206_v51, 0.0  ;;  %v7728_v24 = vunpack.i.h.bf16 %v7726_v54  ;;  %v7731_v51 = vpop.permute.xlu1 %7730 }
 0x2df   : > { %v5553_v4 = vadd.f32 %v5424_v7, %v3855_v40  ;;  %v3729_v6 = vpop.f32.mrf.mxu0 }
 0x2e0   : > { %v5426_v41 = vpop.f32.mrf.mxu1  ;;  %v6207_v29 = vadd.f32 %v12420_v38, %v6136_v26  ;;  %v3856_v10 = vadd.f32 %v3729_v6, %v13876_v9 }
 0x2e1   : > { %v6066_v62 = vsel %vm6023_vm3, %v5553_v4, %v7722_v45  ;;  %v3731_v42 = vpop.f32.mrf.mxu0  ;;  %v13879_v4 = vld [vmem:[#allocation167_spill] sm:$0xff] }
 0x2e2   : > { %v5427_v33 = vpop.f32.mrf.mxu1  ;;  %v6271_v1 = vmax.f32 %v6207_v29, 0.0  ;;  %v6137_v13 = vmul.f32 %v12411_v61, %v6066_v62 }
 0x2e3   : > { %v5554_v30 = vadd.f32 %v5427_v33, %v3856_v10  ;;  %v3734_v0 = vpop.f32.mrf.mxu0  ;;  %v7732_v10 = vunpack.i.l.bf16 %v7731_v51 }
 0x2e4   : > { %v5429_v39 = vpop.f32.mrf.mxu1  ;;  %v7481_v55 = vpack.c.bf16 %v6271_v1, %v6270_v28  ;;  %v3857_v17 = vadd.f32 %v3734_v0, %v13877_v49  ;;  %v6208_v25 = vadd.f32 %v12420_v38, %v6137_v13 }
 0x2e5   : > { %v6067_v63 = vsel %vm6023_vm3, %v5554_v30, %v7723_v27  ;;  %v3736_v14 = vpop.f32.mrf.mxu0 }
 0x2e6   : > { %v5432_v44 = vpop.f32.mrf.mxu1  ;;  %7557 = vst [vmem:[%s12199_s10 + $0xa0] sm:$0xff] %v7481_v55   ;;  %v6138_v50 = vmul.f32 %v12411_v61, %v6067_v63  ;;  %v6272_v34 = vmax.f32 %v6208_v25, 0.0  ;;  %v7733_v63 = vunpack.i.h.bf16 %v7731_v51 }
 0x2e7   : > { %v5555_v37 = vadd.f32 %v5432_v44, %v3857_v17  ;;  %v3737_v53 = vpop.f32.mrf.mxu0  ;;  %v7736_v44 = vpop.permute.xlu0 %7735 }
 0x2e8   : > { %v5434_v15 = vpop.f32.mrf.mxu1  ;;  %v6209_v56 = vadd.f32 %v12420_v38, %v6138_v50  ;;  %v3858_v48 = vadd.f32 %v3737_v53, %v13878_v8  ;;  %v7737_v53 = vunpack.i.l.bf16 %v7736_v44 }
 0x2e9   : > { %v6068_v35 = vsel %vm6023_vm3, %v5555_v37, %v7727_v58  ;;  %v3739_v2 = vpop.f32.mrf.mxu0 }
 0x2ea   : > { %v5435_v18 = vpop.f32.mrf.mxu1  ;;  %v6273_v21 = vmax.f32 %v6209_v56, 0.0  ;;  %v6139_v3 = vmul.f32 %v12411_v61, %v6068_v35 }
 0x2eb   : > { %v5556_v40 = vadd.f32 %v5435_v18, %v3858_v48  ;;  %v3742_v23 = vpop.f32.mrf.mxu0 }
 0x2ec   : > { %v5437_v7 = vpop.f32.mrf.mxu1  ;;  %v7486_v26 = vpack.c.bf16 %v6273_v21, %v6272_v34  ;;  %v3859_v41 = vadd.f32 %v3742_v23, %v13879_v4  ;;  %v6210_v6 = vadd.f32 %v12420_v38, %v6139_v3  ;;  %v7741_v23 = vpop.permute.xlu1 %7740 }
 0x2ed   : > { %v6069_v45 = vsel %vm6023_vm3, %v5556_v40, %v7728_v24  ;;  %v3744_v9 = vpop.f32.mrf.mxu0  ;;  %v7738_v7 = vunpack.i.h.bf16 %v7736_v44 }
 0x2ee   : > { %v5440_v29 = vpop.f32.mrf.mxu1  ;;  %7558 = vst [vmem:[%s12199_s10 + $0xa8] sm:$0xff] %v7486_v26   ;;  %v6140_v62 = vmul.f32 %v12411_v61, %v6069_v45  ;;  %v6274_v39 = vmax.f32 %v6210_v6, 0.0 }
 0x2ef   : > { %v5557_v33 = vadd.f32 %v5440_v29, %v3859_v41  ;;  %v3745_v13 = vpop.f32.mrf.mxu0 }
 0x2f0   : > { %v5442_v28 = vpop.f32.mrf.mxu1  ;;  %v6211_v1 = vadd.f32 %v12420_v38, %v6140_v62  ;;  %v3860_v27 = vadd.f32 %v3745_v13, %v12025_v32 }
 0x2f1   : > { %v6070_v42 = vsel %vm6023_vm3, %v5557_v33, %v7732_v10  ;;  %v3747_v0 = vpop.f32.mrf.mxu0  ;;  %v7742_v10 = vunpack.i.l.bf16 %v7741_v23 }
 0x2f2   : > { %v5443_v30 = vpop.f32.mrf.mxu1  ;;  %v6275_v54 = vmax.f32 %v6211_v1, 0.0  ;;  %v6141_v55 = vmul.f32 %v12411_v61, %v6070_v42  ;;  %v7743_v0 = vunpack.i.h.bf16 %v7741_v23 }
 0x2f3   : > { %v5558_v49 = vadd.f32 %v5443_v30, %v3860_v27  ;;  %v3750_v50 = vpop.f32.mrf.mxu0 }
 0x2f4   : > { %v5445_v17 = vpop.f32.mrf.mxu1  ;;  %v7491_v25 = vpack.c.bf16 %v6275_v54, %v6274_v39  ;;  %v3861_v58 = vadd.f32 %v3750_v50, %v12039_v11  ;;  %v6212_v32 = vadd.f32 %v12420_v38, %v6141_v55 }
 0x2f5   : > { %v6071_v14 = vsel %vm6023_vm3, %v5558_v49, %v7733_v63  ;;  %v3752_v56 = vpop.f32.mrf.mxu0  ;;  %v7746_v17 = vpop.permute.xlu0 %7745 }
 0x2f6   : > { %v5448_v37 = vpop.f32.mrf.mxu1  ;;  %7559 = vst [vmem:[%s12199_s10 + $0xb0] sm:$0xff] %v7491_v25   ;;  %v6142_v15 = vmul.f32 %v12411_v61, %v6071_v14  ;;  %v6276_v11 = vmax.f32 %v6212_v32, 0.0 }
 0x2f7   : > { %v5559_v35 = vadd.f32 %v5448_v37, %v3861_v58  ;;  %v3753_v18 = vpop.f32.mrf.mxu0 }
 0x2f8   : > { %v5450_v8 = vpop.f32.mrf.mxu1  ;;  %v6213_v48 = vadd.f32 %v12420_v38, %v6142_v15  ;;  %v3862_v21 = vadd.f32 %v3753_v18, %v12056_v43  ;;  %v7747_v15 = vunpack.i.l.bf16 %v7746_v17 }
 0x2f9   : > { %v6072_v34 = vsel %vm6023_vm3, %v5559_v35, %v7737_v53  ;;  %v3755_v40 = vpop.f32.mrf.mxu0 }
 0x2fa   : > { %v5451_v3 = vpop.f32.mrf.mxu1  ;;  %v6277_v2 = vmax.f32 %v6213_v48, 0.0  ;;  %v6143_v24 = vmul.f32 %v12411_v61, %v6072_v34 }
 0x2fb   : > { %v5560_v51 = vadd.f32 %v5451_v3, %v3862_v21  ;;  %v3758_v4 = vpop.f32.mrf.mxu0 }
 0x2fc   : > { %v5453_v26 = vpop.f32.mrf.mxu1  ;;  %v7496_v45 = vpack.c.bf16 %v6277_v2, %v6276_v11  ;;  %v3863_v29 = vadd.f32 %v3758_v4, %v12065_v46  ;;  %v6214_v43 = vadd.f32 %v12420_v38, %v6143_v24  ;;  %v7748_v2 = vunpack.i.h.bf16 %v7746_v17 }
 0x2fd   : > { %v6073_v41 = vsel %vm6023_vm3, %v5560_v51, %v7738_v7  ;;  %v3760_v9 = vpop.f32.mrf.mxu0  ;;  %v7751_v7 = vpop.permute.xlu1 %7750 }
 0x2fe   : > { %v5456_v6 = vpop.f32.mrf.mxu1  ;;  %7560 = vst [vmem:[%s12199_s10 + $0xb8] sm:$0xff] %v7496_v45   ;;  %v6144_v62 = vmul.f32 %v12411_v61, %v6073_v41  ;;  %v6278_v46 = vmax.f32 %v6214_v43, 0.0 }
 0x2ff   : > { %v5561_v33 = vadd.f32 %v5456_v6, %v3863_v29  ;;  %v3761_v13 = vpop.f32.mrf.mxu0  ;;  %v7752_v6 = vunpack.i.l.bf16 %v7751_v7 }
 0x300   : > { %v5458_v28 = vpop.f32.mrf.mxu1  ;;  %v6215_v1 = vadd.f32 %v12420_v38, %v6144_v62  ;;  %v3864_v27 = vadd.f32 %v3761_v13, %v12077_v57 }
 0x301   : > { %v6074_v42 = vsel %vm6023_vm3, %v5561_v33, %v7742_v10  ;;  %v3763_v55 = vpop.f32.mrf.mxu0 }
 0x302   : > { %v5459_v30 = vpop.f32.mrf.mxu1  ;;  %v6279_v39 = vmax.f32 %v6215_v1, 0.0  ;;  %v6145_v54 = vmul.f32 %v12411_v61, %v6074_v42 }
 0x303   : > { %v5562_v63 = vadd.f32 %v5459_v30, %v3864_v27  ;;  %v3766_v25 = vpop.f32.mrf.mxu0  ;;  %v7753_v30 = vunpack.i.h.bf16 %v7751_v7 }
 0x304   : > { %v5461_v49 = vpop.f32.mrf.mxu1  ;;  %v7501_v44 = vpack.c.bf16 %v6279_v39, %v6278_v46  ;;  %v3865_v14 = vadd.f32 %v3766_v25, %v12082_v20  ;;  %v6216_v57 = vadd.f32 %v12420_v38, %v6145_v54  ;;  %v7756_v54 = vpop.permute.xlu0 %7755 }
 0x305   : > { %v6075_v50 = vsel %vm6023_vm3, %v5562_v63, %v7743_v0  ;;  %v3768_v32 = vpop.f32.mrf.mxu0 }
 0x306   : > { %v5464_v58 = vpop.f32.mrf.mxu1  ;;  %7561 = vst [vmem:[%s12199_s10 + $0xc0] sm:$0xff] %v7501_v44   ;;  %v6146_v37 = vmul.f32 %v12411_v61, %v6075_v50  ;;  %v6280_v20 = vmax.f32 %v6216_v57, 0.0  ;;  %v7757_v50 = vunpack.i.l.bf16 %v7756_v54 }
 0x307   : > { %v5563_v56 = vadd.f32 %v5464_v58, %v3865_v14  ;;  %v3769_v8 = vpop.f32.mrf.mxu0 }
 0x308   : > { %v5466_v53 = vpop.f32.mrf.mxu1  ;;  %v6217_v35 = vadd.f32 %v12420_v38, %v6146_v37  ;;  %v3866_v18 = vadd.f32 %v3769_v8, %v12089_v52 }
 0x309   : > { %v6076_v48 = vsel %vm6023_vm3, %v5563_v56, %v7747_v15  ;;  %v3771_v11 = vpop.f32.mrf.mxu0 }
 0x30a   : > { %v5467_v34 = vpop.f32.mrf.mxu1  ;;  %v6281_v21 = vmax.f32 %v6217_v35, 0.0  ;;  %v6147_v3 = vmul.f32 %v12411_v61, %v6076_v48  ;;  %v7758_v48 = vunpack.i.h.bf16 %v7756_v54 }
 0x30b   : > { %v5564_v24 = vadd.f32 %v5467_v34, %v3866_v18  ;;  %v3774_v26 = vpop.f32.mrf.mxu0 }
 0x30c   : > { %v5469_v40 = vpop.f32.mrf.mxu1  ;;  %v7506_v51 = vpack.c.bf16 %v6281_v21, %v6280_v20  ;;  %v3867_v45 = vadd.f32 %v3774_v26, %v12094_v60  ;;  %v6218_v52 = vadd.f32 %v12420_v38, %v6147_v3  ;;  %v7761_v20 = vpop.permute.xlu1 %7760 }
 0x30d   : > { %v6077_v23 = vsel %vm6023_vm3, %v5564_v24, %v7748_v2  ;;  %v3776_v29 = vpop.f32.mrf.mxu0 }
 0x30e   : > { %v5472_v4 = vpop.f32.mrf.mxu1  ;;  %7562 = vst [vmem:[%s12199_s10 + $0xc8] sm:$0xff] %v7506_v51   ;;  %v6148_v41 = vmul.f32 %v12411_v61, %v6077_v23  ;;  %v6282_v60 = vmax.f32 %v6218_v52, 0.0  ;;  %v7762_v51 = vunpack.i.l.bf16 %v7761_v20 }
 0x30f   : > { %v5565_v43 = vadd.f32 %v5472_v4, %v3867_v45  ;;  %v3777_v10 = vpop.f32.mrf.mxu0 }
 0x310   : > { %v5474_v62 = vpop.f32.mrf.mxu1  ;;  %v6219_v9 = vadd.f32 %v12420_v38, %v6148_v41  ;;  %v3868_v28 = vadd.f32 %v3777_v10, %v12101_v31 }
 0x311   : > { %v6078_v33 = vsel %vm6023_vm3, %v5565_v43, %v7752_v6  ;;  %v3779_v27 = vpop.f32.mrf.mxu0 }
 0x312   : > { %v5475_v1 = vpop.f32.mrf.mxu1  ;;  %v6283_v13 = vmax.f32 %v6219_v9, 0.0  ;;  %v6149_v42 = vmul.f32 %v12411_v61, %v6078_v33  ;;  %v7763_v9 = vunpack.i.h.bf16 %v7761_v20 }
 0x313   : > { %v5566_v46 = vadd.f32 %v5475_v1, %v3868_v28  ;;  %v3782_v0 = vpop.f32.mrf.mxu0  ;;  %v7766_v28 = vpop.permute.xlu0 %7765 }
 0x314   : > { %v5477_v39 = vpop.f32.mrf.mxu1  ;;  %v7511_v55 = vpack.c.bf16 %v6283_v13, %v6282_v60  ;;  %v3869_v49 = vadd.f32 %v3782_v0, %v12106_v19  ;;  %v6220_v31 = vadd.f32 %v12420_v38, %v6149_v42 }
 0x315   : > { %v6079_v63 = vsel %vm6023_vm3, %v5566_v46, %v7753_v30  ;;  %v3784_v25 = vpop.f32.mrf.mxu0  ;;  %v7767_v39 = vunpack.i.l.bf16 %v7766_v28 }
 0x316   : > { %v5480_v17 = vpop.f32.mrf.mxu1  ;;  %7563 = vst [vmem:[%s12199_s10 + $0xd0] sm:$0xff] %v7511_v55   ;;  %v6150_v44 = vmul.f32 %v12411_v61, %v6079_v63  ;;  %v6284_v19 = vmax.f32 %v6220_v31, 0.0 }
 0x317   : > { %v5567_v14 = vadd.f32 %v5480_v17, %v3869_v49  ;;  %v3785_v37 = vpop.f32.mrf.mxu0 }
 0x318   : > { %v5482_v58 = vpop.f32.mrf.mxu1  ;;  %v6221_v57 = vadd.f32 %v12420_v38, %v6150_v44  ;;  %v3870_v15 = vadd.f32 %v3785_v37, %v12113_v47  ;;  %v7771_v37 = vpop.permute.xlu1 %7770 }
 0x319   : > { %v6080_v32 = vsel %vm6023_vm3, %v5567_v14, %v7757_v50  ;;  %v3787_v8 = vpop.f32.mrf.mxu0  ;;  %v7768_v14 = vunpack.i.h.bf16 %v7766_v28 }
 0x31a   : > { %v5483_v56 = vpop.f32.mrf.mxu1  ;;  %v6285_v53 = vmax.f32 %v6221_v57, 0.0  ;;  %v6151_v35 = vmul.f32 %v12411_v61, %v6080_v32 }
 0x31b   : > { %v5568_v18 = vadd.f32 %v5483_v56, %v3870_v15  ;;  %v3790_v3 = vpop.f32.mrf.mxu0 }
 0x31c   : > { %v5485_v34 = vpop.f32.mrf.mxu1  ;;  %v7516_v21 = vpack.c.bf16 %v6285_v53, %v6284_v19  ;;  %v3871_v2 = vadd.f32 %v3790_v3, %v12118_v22  ;;  %v6222_v47 = vadd.f32 %v12420_v38, %v6151_v35 }
 0x31d   : > { %v6081_v11 = vsel %vm6023_vm3, %v5568_v18, %v7758_v48  ;;  %v3792_v7 = vpop.f32.mrf.mxu0  ;;  %v7772_v48 = vunpack.i.l.bf16 %v7771_v37 }
 0x31e   : > { %v5488_v24 = vpop.f32.mrf.mxu1  ;;  %7564 = vst [vmem:[%s12199_s10 + $0xd8] sm:$0xff] %v7516_v21   ;;  %v6152_v40 = vmul.f32 %v12411_v61, %v6081_v11  ;;  %v6286_v22 = vmax.f32 %v6222_v47, 0.0  ;;  %v7773_v7 = vunpack.i.h.bf16 %v7771_v37 }
 0x31f   : > { %v5569_v26 = vadd.f32 %v5488_v24, %v3871_v2  ;;  %v3793_v4 = vpop.f32.mrf.mxu0 }
 0x320   : > { %v5490_v23 = vpop.f32.mrf.mxu1  ;;  %v6223_v45 = vadd.f32 %v12420_v38, %v6152_v40  ;;  %v3872_v41 = vadd.f32 %v3793_v4, %v12125_v59 }
 0x321   : > { %v6082_v52 = vsel %vm6023_vm3, %v5569_v26, %v7762_v51  ;;  %v3795_v62 = vpop.f32.mrf.mxu0 }
 0x322   : > { %v5491_v29 = vpop.f32.mrf.mxu1  ;;  %v6287_v6 = vmax.f32 %v6223_v45, 0.0  ;;  %v6153_v43 = vmul.f32 %v12411_v61, %v6082_v52 }
 0x323   : > { %v5570_v10 = vadd.f32 %v5491_v29, %v3872_v41  ;;  %v3798_v60 = vpop.f32.mrf.mxu0 }
 0x324   : > { %v5493_v33 = vpop.f32.mrf.mxu1  ;;  %v7521_v1 = vpack.c.bf16 %v6287_v6, %v6286_v22  ;;  %v3873_v42 = vadd.f32 %v3798_v60, %v12130_v36  ;;  %v6224_v59 = vadd.f32 %v12420_v38, %v6153_v43 }
 0x325   : > { %v6083_v13 = vsel %vm6023_vm3, %v5570_v10, %v7763_v9  ;;  %v3800_v46 = vpop.f32.mrf.mxu0 }
 0x326   : > { %v5496_v27 = vpop.f32.mrf.mxu1  ;;  %7565 = vst [vmem:[%s12199_s10 + $0xe0] sm:$0xff] %v7521_v1   ;;  %v6154_v30 = vmul.f32 %v12411_v61, %v6083_v13  ;;  %v6288_v36 = vmax.f32 %v6224_v59, 0.0 }
 0x327   : > { %v5571_v54 = vadd.f32 %v5496_v27, %v3873_v42  ;;  %v3801_v63 = vpop.f32.mrf.mxu0 }
 0x328   : > { %v5498_v55 = vpop.f32.mrf.mxu1  ;;  %v6225_v0 = vadd.f32 %v12420_v38, %v6154_v30  ;;  %v3874_v17 = vadd.f32 %v3801_v63, %v12138_v16 }
 0x329   : > { %v6084_v49 = vsel %vm6023_vm3, %v5571_v54, %v7767_v39  ;;  %v3803_v50 = vpop.f32.mrf.mxu0 }
 0x32a   : > { %v5499_v31 = vpop.f32.mrf.mxu1  ;;  %v6289_v44 = vmax.f32 %v6225_v0, 0.0  ;;  %v6155_v25 = vmul.f32 %v12411_v61, %v6084_v49 }
 0x32b   : > { %v5572_v58 = vadd.f32 %v5499_v31, %v3874_v17  ;;  %v3806_v15 = vpop.f32.mrf.mxu0 }
 0x32c   : > { %v5501_v57 = vpop.f32.mrf.mxu1  ;;  %v7526_v32 = vpack.c.bf16 %v6289_v44, %v6288_v36  ;;  %v3875_v19 = vadd.f32 %v3806_v15, %v12143_v12  ;;  %v6226_v16 = vadd.f32 %v12420_v38, %v6155_v25 }
 0x32d   : > { %v6085_v56 = vsel %vm6023_vm3, %v5572_v58, %v7768_v14  ;;  %v3808_v8 = vpop.f32.mrf.mxu0 }
 0x32e   : > { %v5504_v53 = vpop.f32.mrf.mxu1  ;;  %7566 = vst [vmem:[%s12199_s10 + $0xe8] sm:$0xff] %v7526_v32   ;;  %v6156_v35 = vmul.f32 %v12411_v61, %v6085_v56  ;;  %v6290_v12 = vmax.f32 %v6226_v16, 0.0 }
 0x32f   : > { %v5573_v18 = vadd.f32 %v5504_v53, %v3875_v19  ;;  %v3809_v21 = vpop.f32.mrf.mxu0 }
 0x330   : > { %v5506_v34 = vpop.f32.mrf.mxu1  ;;  %v6227_v20 = vadd.f32 %v12420_v38, %v6156_v35  ;;  %v3876_v11 = vadd.f32 %v3809_v21, %v12151_v5 }
 0x331   : > { %v6086_v3 = vsel %vm6023_vm3, %v5573_v18, %v7772_v48  ;;  %v3811_v40 = vpop.f32.mrf.mxu0 }
 0x332   : > { %v5507_v2 = vpop.f32.mrf.mxu1  ;;  %v6291_v24 = vmax.f32 %v6227_v20, 0.0  ;;  %v6157_v47 = vmul.f32 %v12411_v61, %v6086_v3 }
 0x333   : > { %v5574_v51 = vadd.f32 %v5507_v2, %v3876_v11 }
 0x334   : > { %v5509_v26 = vpop.f32.mrf.mxu1  ;;  %v7531_v23 = vpack.c.bf16 %v6291_v24, %v6290_v12  ;;  %v6228_v4 = vadd.f32 %v12420_v38, %v6157_v47 }
 0x335   : > { %v6087_v45 = vsel %vm6023_vm3, %v5574_v51, %v7773_v7 }
 0x336   : > { %7567 = vst [vmem:[%s12199_s10 + $0xf0] sm:$0xff] %v7531_v23   ;;  %v6158_v52 = vmul.f32 %v12411_v61, %v6087_v45  ;;  %v6292_v41 = vmax.f32 %v6228_v4, 0.0 }
 0x338   : > { %v6229_v5 = vadd.f32 %v12420_v38, %v6158_v52 }
 0x33a   : > { %v6293_v29 = vmax.f32 %v6229_v5, 0.0 }
 0x33c   : > { %v7536_v22 = vpack.c.bf16 %v6293_v29, %v6292_v41 }
 0x33e   : > { %7568 = vst [vmem:[%s12199_s10 + $0xf8] sm:$0xff] %v7536_v22  }
 0x33f PF: > { %s15_s22 = sadd.s32 1, %s8057_s22   ;;  %s13880_s18 = smov %s8049_s20 }
 0x340   : > { %p12_p9 = scmp.ge.s32.totalorder %s15_s22, 6   ;;  %s13881_s19 = smov %s8053_s21 }
 0x341   : > { %s13882_s20 = smov %s13885_s23  ;;  %s13883_s21 = smov %s13889_s24 }
 0x342   :  { %14 = sbr.rel (!%p12_p9) target bundleno = 3 (0x3), region = 77 }

</bundles_post_ra>
